<compile_context>
chip_gen: v5e
topology: v5e:2x2
jax: 0.10.0
libtpu: 0.0.40
codegen_flags: <defaults>
</compile_context>

<pallas_src>
import functools
import math

import jax
import jax.numpy as jnp
from jax.experimental import pallas as pl
from jax.experimental.pallas import tpu as pltpu

NUM_CLASSES = 1
BN_EPS = 1e-5
# (planes, num_blocks, stride) per layer — static topology (ResNet-18).
LAYERS_CFG = ((64, 2, 1), (128, 2, 2), (256, 2, 2), (512, 2, 2))


def _round_up(x, m):
    return ((x + m - 1) // m) * m


def _pick_tk(k_pad, cap=512):
    """Largest multiple of 128 that divides k_pad and is <= cap."""
    best = 128
    d = 256
    while d <= min(cap, k_pad):
        if k_pad % d == 0:
            best = d
        d += 128
    return best


def _pick_tm(m):
    """M tile: as large as reasonable while keeping tiles VMEM-friendly."""
    if m >= 4096:
        return 512, _round_up(m, 512)
    if m >= 1024:
        return 256, _round_up(m, 256)
    m_pad = _round_up(m, 8)
    return m_pad, m_pad


# ----------------------------------------------------------------------------
# Pallas kernels
# ----------------------------------------------------------------------------
def _conv_bn_kernel(x_ref, w_ref, b_ref, o_ref, acc_ref, *, relu):
    # K-tiled matmul: acc += X_tile @ W_tile ; epilogue: + bias (+ ReLU).
    k = pl.program_id(2)

    @pl.when(k == 0)
    def _():
        acc_ref[...] = jnp.zeros_like(acc_ref)

    acc_ref[...] += jnp.dot(x_ref[...], w_ref[...],
                            preferred_element_type=jnp.float32)

    @pl.when(k == pl.num_programs(2) - 1)
    def _():
        y = acc_ref[...] + b_ref[...]
        if relu:
            y = jnp.maximum(y, 0.0)
        o_ref[...] = y.astype(o_ref.dtype)


def _conv_bn_res_kernel(x_ref, w_ref, b_ref, r_ref, o_ref, acc_ref, *, relu):
    # Same as above, plus a fused residual add (end of a BasicBlock).
    k = pl.program_id(2)

    @pl.when(k == 0)
    def _():
        acc_ref[...] = jnp.zeros_like(acc_ref)

    acc_ref[...] += jnp.dot(x_ref[...], w_ref[...],
                            preferred_element_type=jnp.float32)

    @pl.when(k == pl.num_programs(2) - 1)
    def _():
        y = acc_ref[...] + b_ref[...] + r_ref[...].astype(jnp.float32)
        if relu:
            y = jnp.maximum(y, 0.0)
        o_ref[...] = y.astype(o_ref.dtype)


def _max9_kernel(w0, w1, w2, w3, w4, w5, w6, w7, w8, o_ref):
    # Elementwise max over the 9 shifted window views (MaxPool 3x3).
    m = jnp.maximum(w0[...], w1[...])
    m = jnp.maximum(m, w2[...])
    m = jnp.maximum(m, w3[...])
    m = jnp.maximum(m, w4[...])
    m = jnp.maximum(m, w5[...])
    m = jnp.maximum(m, w6[...])
    m = jnp.maximum(m, w7[...])
    m = jnp.maximum(m, w8[...])
    o_ref[...] = m


def _avgpool_fc_kernel(x_ref, w_ref, b_ref, feats_ref, logits_ref, *, inv_hw):
    # Global average pool over the spatial axis + final Linear layer.
    x = x_ref[...].astype(jnp.float32)                       # [bn, HW, C]
    feats = jnp.sum(x, axis=1) * inv_hw                      # [bn, C]
    feats_ref[...] = feats.astype(feats_ref.dtype)
    logits = jnp.dot(feats, w_ref[...], preferred_element_type=jnp.float32)
    logits_ref[...] = (logits + b_ref[...]).astype(logits_ref.dtype)


# ----------------------------------------------------------------------------
# Glue: im2col, conv+bn wrapper, maxpool, avgpool+fc
# ----------------------------------------------------------------------------
def im2col(x, kh, kw, stride, pad):
    """x: [N,H,W,C] NHWC (bf16) -> patches [N*Ho*Wo, kh*kw*C]."""
    N, H, W, C = x.shape
    Ho = (H + 2 * pad - kh) // stride + 1
    Wo = (W + 2 * pad - kw) // stride + 1
    if kh == 1 and kw == 1 and pad == 0 and stride == 1:
        return x.reshape(N * H * W, C), H, W
    xp = jnp.pad(x, ((0, 0), (pad, pad), (pad, pad), (0, 0)))
    cols = []
    for i in range(kh):
        for j in range(kw):
            p = jax.lax.slice(
                xp,
                (0, i, j, 0),
                (N, i + (Ho - 1) * stride + 1, j + (Wo - 1) * stride + 1, C),
                (1, stride, stride, 1))
            cols.append(p)                                    # [N,Ho,Wo,C]
    patches = jnp.stack(cols, axis=3)                         # [N,Ho,Wo,kh*kw,C]
    return patches.reshape(N * Ho * Wo, kh * kw * C), Ho, Wo


def conv_bn(x, w, bn, *, stride, pad, relu, residual=None):
    """Fused Conv2d (no bias) + BatchNorm (+ residual) (+ ReLU).

    x: [N,H,W,Cin] NHWC bf16;  w: [kh,kw,Cin,Cout] HWIO f32;
    residual: [N,Ho,Wo,Cout] bf16.  Returns bf16 [N,Ho,Wo,Cout].
    """
    kh, kw, cin, cout = w.shape
    N = x.shape[0]
    patches, Ho, Wo = im2col(x, kh, kw, stride, pad)          # bf16 [M, K]
    M, K = patches.shape

    # Fold BN (running-stat / inference semantics) into the weights + a bias.
    scale = bn['gamma'] * jax.lax.rsqrt(bn['var'] + BN_EPS)            # [cout]
    bias = (bn['beta'] - bn['mean'] * scale).reshape(1, cout)
    bias = bias.astype(jnp.float32)
    wmat = (w.reshape(K, cout) * scale[None, :]).astype(jnp.bfloat16)

    # Tile selection + zero padding so every grid axis divides exactly.
    K_pad = _round_up(K, 128)
    tk = _pick_tk(K_pad)
    tm, M_pad = _pick_tm(M)
    tn = min(cout, 256)

    if K_pad != K:
        wmat = jnp.pad(wmat, ((0, K_pad - K), (0, 0)))
    if M_pad != M or K_pad != K:
        patches = jnp.pad(patches, ((0, M_pad - M), (0, K_pad - K)))

    grid = (M_pad // tm, cout // tn, K_pad // tk)

    in_specs = [
        pl.BlockSpec((tm, tk), lambda i, j, k: (i, k)),
        pl.BlockSpec((tk, tn), lambda i, j, k: (k, j)),
        pl.BlockSpec((1, tn), lambda i, j, k: (0, j)),
    ]
    operands = [patches, wmat, bias]

    if residual is None:
        kernel = functools.partial(_conv_bn_kernel, relu=relu)
    else:
        kernel = functools.partial(_conv_bn_res_kernel, relu=relu)
        res = residual.reshape(M, cout).astype(jnp.bfloat16)
        if M_pad != M:
            res = jnp.pad(res, ((0, M_pad - M), (0, 0)))
        in_specs.append(pl.BlockSpec((tm, tn), lambda i, j, k: (i, j)))
        operands.append(res)

    out = pl.pallas_call(
        kernel,
        out_shape=jax.ShapeDtypeStruct((M_pad, cout), jnp.bfloat16),
        grid_spec=pltpu.PrefetchScalarGridSpec(
            num_scalar_prefetch=0,
            grid=grid,
            in_specs=in_specs,
            out_specs=pl.BlockSpec((tm, tn), lambda i, j, k: (i, j)),
            scratch_shapes=[pltpu.VMEM((tm, tn), jnp.float32)],
        ),
        compiler_params=pltpu.CompilerParams(
            dimension_semantics=("parallel", "parallel", "arbitrary")),
    )(*operands)

    if M_pad != M:
        out = out[:M]
    return out.reshape(N, Ho, Wo, cout)


def maxpool_3x3_s2_p1(x):
    """x: [N,H,W,C] bf16 -> [N,Ho,Wo,C]; MaxPool2d(kernel=3, stride=2, pad=1)."""
    N, H, W, C = x.shape
    k, s, pad = 3, 2, 1
    Ho = (H + 2 * pad - k) // s + 1
    Wo = (W + 2 * pad - k) // s + 1
    xp = jnp.pad(x, ((0, 0), (pad, pad), (pad, pad), (0, 0)),
                 constant_values=-jnp.inf)
    wins = []
    for i in range(k):
        for j in range(k):
            p = jax.lax.slice(
                xp,
                (0, i, j, 0),
                (N, i + (Ho - 1) * s + 1, j + (Wo - 1) * s + 1, C),
                (1, s, s, 1))
            # Lane-dense 2D view: rows = N*Ho, lanes = Wo*C (>=128).
            wins.append(p.reshape(N * Ho, Wo * C))

    R, L = N * Ho, Wo * C
    TR = 64 if R >= 64 else _round_up(R, 8)
    R_pad = _round_up(R, TR)
    if R_pad != R:
        wins = [jnp.pad(wv, ((0, R_pad - R), (0, 0))) for wv in wins]

    spec = pl.BlockSpec((TR, L), lambda i: (i, 0))
    out = pl.pallas_call(
        _max9_kernel,
        out_shape=jax.ShapeDtypeStruct((R_pad, L), x.dtype),
        grid_spec=pltpu.PrefetchScalarGridSpec(
            num_scalar_prefetch=0,
            grid=(R_pad // TR,),
            in_specs=[spec] * 9,
            out_specs=spec,
        ),
        compiler_params=pltpu.CompilerParams(
            dimension_semantics=("parallel",)),
    )(*wins)
    if R_pad != R:
        out = out[:R]
    return out.reshape(N, Ho, Wo, C)


def avgpool_fc(x, fc_w, fc_b):
    """x: [N,H,W,C] bf16 -> (feats [N,C] f32, logits [N,num_classes] f32)."""
    N, H, W, C = x.shape
    HW = H * W
    nc = fc_w.shape[1]
    xr = x.reshape(N, HW, C)

    BT = 8  # batch tile
    N_pad = _round_up(N, BT)
    if N_pad != N:
        xr = jnp.pad(xr, ((0, N_pad - N), (0, 0), (0, 0)))

    feats, logits = pl.pallas_call(
        functools.partial(_avgpool_fc_kernel, inv_hw=1.0 / HW),
        out_shape=(jax.ShapeDtypeStruct((N_pad, C), jnp.float32),
                   jax.ShapeDtypeStruct((N_pad, nc), jnp.float32)),
        grid_spec=pltpu.PrefetchScalarGridSpec(
            num_scalar_prefetch=0,
            grid=(N_pad // BT,),
            in_specs=[pl.BlockSpec((BT, HW, C), lambda i: (i, 0, 0)),
                      pl.BlockSpec((C, nc), lambda i: (0, 0)),
                      pl.BlockSpec((1, nc), lambda i: (0, 0))],
            out_specs=[pl.BlockSpec((BT, C), lambda i: (i, 0)),
                       pl.BlockSpec((BT, nc), lambda i: (i, 0))],
        ),
        compiler_params=pltpu.CompilerParams(
            dimension_semantics=("parallel",)),
    )(xr, fc_w.astype(jnp.float32), fc_b.reshape(1, nc).astype(jnp.float32))
    return feats[:N], logits[:N]


# ----------------------------------------------------------------------------
# Parameters (deterministic synthetic init matching the PyTorch __init__).
# NOTE: params hold arrays only; strides/topology come from LAYERS_CFG so the
# whole forward can be jax.jit-ed with concrete control flow.
# ----------------------------------------------------------------------------
def init_params(key, layers_cfg=LAYERS_CFG, num_classes=NUM_CLASSES):
    keys = iter(jax.random.split(key, 128))

    def conv_w(kh, kw, cin, cout):
        # kaiming_normal_(mode='fan_out', nonlinearity='relu')
        std = math.sqrt(2.0 / (cout * kh * kw))
        return jax.random.normal(next(keys), (kh, kw, cin, cout), jnp.float32) * std

    def bn(c):
        return dict(gamma=jnp.ones((c,), jnp.float32),
                    beta=jnp.zeros((c,), jnp.float32),
                    mean=jnp.zeros((c,), jnp.float32),
                    var=jnp.ones((c,), jnp.float32))

    params = dict(conv1=conv_w(7, 7, 3, 64), bn1=bn(64))

    inplanes = 64
    layers = []
    for planes, blocks, stride in layers_cfg:
        blk_list = []
        for bi in range(blocks):
            s = stride if bi == 0 else 1
            blk = dict(
                conv1=conv_w(3, 3, inplanes, planes), bn1=bn(planes),
                conv2=conv_w(3, 3, planes, planes), bn2=bn(planes),
            )
            if s != 1 or inplanes != planes:  # BasicBlock.expansion == 1
                blk['ds_conv'] = conv_w(1, 1, inplanes, planes)
                blk['ds_bn'] = bn(planes)
            blk_list.append(blk)
            inplanes = planes
        layers.append(blk_list)
    params['layers'] = layers

    # nn.Linear: normal(0, 0.01) weight, zero bias. Stored as [in, out].
    params['fc_w'] = jax.random.normal(next(keys), (512, num_classes),
                                       jnp.float32) * 0.01
    params['fc_b'] = jnp.zeros((num_classes,), jnp.float32)
    return params


# ----------------------------------------------------------------------------
# Forward pass
# ----------------------------------------------------------------------------
def basic_block(x, blk, stride):
    out = conv_bn(x, blk['conv1'], blk['bn1'], stride=stride, pad=1, relu=True)
    if 'ds_conv' in blk:
        identity = conv_bn(x, blk['ds_conv'], blk['ds_bn'], stride=stride,
                           pad=0, relu=False)
    else:
        identity = x
    # conv2 + bn2 + residual add + relu fused in one Pallas kernel.
    out = conv_bn(out, blk['conv2'], blk['bn2'], stride=1, pad=1, relu=True,
                  residual=identity)
    return out


@jax.jit
def resnet_forward(x5, params):
    """x5: [batch, num_levels, grid, 3, crop, crop] (PyTorch NCHW per patch).

    Returns (logits [batch*num_levels, grid, num_classes],
             feats  [batch*num_levels, grid, 512]).
    """
    B, L, G, C, H, W = x5.shape
    x = x5.reshape(B * L * G, C, H, W).transpose(0, 2, 3, 1)   # -> NHWC
    x = x.astype(jnp.bfloat16)

    x = conv_bn(x, params['conv1'], params['bn1'], stride=2, pad=3, relu=True)
    x = maxpool_3x3_s2_p1(x)
    for li, layer in enumerate(params['layers']):
        layer_stride = LAYERS_CFG[li][2]
        for bi, blk in enumerate(layer):
            s = layer_stride if bi == 0 else 1
            x = basic_block(x, blk, s)

    feats, logits = avgpool_fc(x, params['fc_w'], params['fc_b'])

    feats = feats.reshape(B * L, G, -1)
    logits = logits.reshape(B * L, G, -1)
    # TODO(synk): self.crf(feats, logits) skipped — CRF class not provided.
    return logits, feats


# ----------------------------------------------------------------------------
if __name__ == "__main__":
    key = jax.random.PRNGKey(0)
    pkey, xkey = jax.random.split(key)

    params = init_params(pkey)

    # Small shapes consistent with the forward contract:
    # [batch=1, num_levels=1, grid=2, 3, crop=32, crop=32]
    x = jax.random.normal(xkey, (1, 1, 2, 3, 32, 32), jnp.float32)

    logits, feats = resnet_forward(x, params)
    jax.block_until_ready((logits, feats))

    assert logits.shape == (1, 2, NUM_CLASSES), logits.shape
    assert feats.shape == (1, 2, 512), feats.shape
    assert bool(jnp.all(jnp.isfinite(logits))) and bool(jnp.all(jnp.isfinite(feats)))
    print("KERNEL_OK")
</pallas_src>

<mosaic_0001>
module attributes {stable_mosaic.version = 11 : i64} {
  func.func @_conv_bn_kernel(%arg0: i32, %arg1: i32, %arg2: i32, %arg3: memref<512x256xbf16, #tpu.memory_space<vmem>>, %arg4: memref<256x64xbf16, #tpu.memory_space<vmem>>, %arg5: memref<1x64xf32, #tpu.memory_space<vmem>>, %arg6: memref<512x64xbf16, #tpu.memory_space<vmem>>, %arg7: memref<512x64xf32, #tpu.memory_space<vmem>>) attributes {dimension_semantics = [#tpu.dimension_semantics<parallel>, #tpu.dimension_semantics<parallel>, #tpu.dimension_semantics<arbitrary>], iteration_bounds = array<i64: 1, 1, 1>, scalar_prefetch = 0 : i64, scratch_operands = 1 : i64, tpu.core_type = #tpu.core_type<tc>, window_params = [{transform_indices = @transform_0, window_bounds = array<i64: 512, 256>}, {transform_indices = @transform_1, window_bounds = array<i64: 256, 64>}, {transform_indices = @transform_2, window_bounds = array<i64: 1, 64>}, {transform_indices = @transform_3, window_bounds = array<i64: 512, 64>}]} {
    %c0_i32 = arith.constant 0 : i32
    %0 = arith.cmpi eq, %arg2, %c0_i32 : i32
    %1 = arith.extui %0 : i1 to i32
    %c0_i32_0 = arith.constant 0 : i32
    %2 = arith.cmpi ne, %1, %c0_i32_0 : i32
    scf.if %2 {
      %cst_10 = arith.constant 0.000000e+00 : f32
      %12 = vector.broadcast %cst_10 : f32 to vector<512x64xf32>
      %c0_11 = arith.constant 0 : index
      %c0_12 = arith.constant 0 : index
      %13 = vector.load %arg7[%c0_11, %c0_12] : memref<512x64xf32, #tpu.memory_space<vmem>>, vector<512x64xf32>
      tpu.vector_store %arg7[%c0_11, %c0_12], %12 {strides = array<i32>} : memref<512x64xf32, #tpu.memory_space<vmem>>, vector<512x64xf32>,
    } else {
    }
    %c0 = arith.constant 0 : index
    %c0_1 = arith.constant 0 : index
    %3 = vector.load %arg7[%c0, %c0_1] : memref<512x64xf32, #tpu.memory_space<vmem>>, vector<512x64xf32>
    %c0_2 = arith.constant 0 : index
    %c0_3 = arith.constant 0 : index
    %4 = vector.load %arg3[%c0_2, %c0_3] : memref<512x256xbf16, #tpu.memory_space<vmem>>, vector<512x256xbf16>
    %c0_4 = arith.constant 0 : index
    %c0_5 = arith.constant 0 : index
    %5 = vector.load %arg4[%c0_4, %c0_5] : memref<256x64xbf16, #tpu.memory_space<vmem>>, vector<256x64xbf16>
    %cst = arith.constant dense<0.000000e+00> : vector<512x64xf32>
    %6 = tpu.matmul %4, %5, %cst {dimension_numbers = #tpu.dot_dimension_numbers<[1], [0], [0], [1], [0, 0, 1, 1], [], []>} : vector<512x256xbf16>, vector<256x64xbf16>, vector<512x64xf32> -> vector<512x64xf32>
    %7 = arith.addf %3, %6 : vector<512x64xf32>
    %c0_6 = arith.constant 0 : index
    %c0_7 = arith.constant 0 : index
    %8 = vector.load %arg7[%c0_6, %c0_7] : memref<512x64xf32, #tpu.memory_space<vmem>>, vector<512x64xf32>
    tpu.vector_store %arg7[%c0_6, %c0_7], %7 {strides = array<i32>} : memref<512x64xf32, #tpu.memory_space<vmem>>, vector<512x64xf32>,
    %c0_i32_8 = arith.constant 0 : i32
    %9 = arith.cmpi eq, %arg2, %c0_i32_8 : i32
    %10 = arith.extui %9 : i1 to i32
    %c0_i32_9 = arith.constant 0 : i32
    %11 = arith.cmpi ne, %10, %c0_i32_9 : i32
    scf.if %11 {
      %c0_10 = arith.constant 0 : index
      %c0_11 = arith.constant 0 : index
      %12 = vector.load %arg7[%c0_10, %c0_11] : memref<512x64xf32, #tpu.memory_space<vmem>>, vector<512x64xf32>
      %c0_12 = arith.constant 0 : index
      %c0_13 = arith.constant 0 : index
      %13 = vector.load %arg5[%c0_12, %c0_13] : memref<1x64xf32, #tpu.memory_space<vmem>>, vector<1x64xf32>
      %14 = vector.broadcast %13 : vector<1x64xf32> to vector<512x64xf32>
      %15 = arith.addf %12, %14 : vector<512x64xf32>
      %cst_14 = arith.constant 0.000000e+00 : f32
      %16 = vector.broadcast %cst_14 : f32 to vector<512x64xf32>
      %17 = arith.maximumf %15, %16 : vector<512x64xf32>
      %18 = arith.truncf %17 : vector<512x64xf32> to vector<512x64xbf16>
      %c0_15 = arith.constant 0 : index
      %c0_16 = arith.constant 0 : index
      %19 = vector.load %arg6[%c0_15, %c0_16] : memref<512x64xbf16, #tpu.memory_space<vmem>>, vector<512x64xbf16>
      tpu.vector_store %arg6[%c0_15, %c0_16], %18 {strides = array<i32>} : memref<512x64xbf16, #tpu.memory_space<vmem>>, vector<512x64xbf16>,
    } else {
    }
    return
  }
  func.func @transform_0(%arg0: i32, %arg1: i32, %arg2: i32) -> (i32, i32) {
    %c0_i32 = arith.constant 0 : i32
    return %arg0, %arg2 : i32, i32
  }
  func.func @transform_1(%arg0: i32, %arg1: i32, %arg2: i32) -> (i32, i32) {
    %c0_i32 = arith.constant 0 : i32
    return %arg2, %arg1 : i32, i32
  }
  func.func @transform_2(%arg0: i32, %arg1: i32, %arg2: i32) -> (i32, i32) {
    %c0_i32 = arith.constant 0 : i32
    %c0_i32_0 = arith.constant 0 : i32
    return %c0_i32, %arg1 : i32, i32
  }
  func.func @transform_3(%arg0: i32, %arg1: i32, %arg2: i32) -> (i32, i32) {
    %c0_i32 = arith.constant 0 : i32
    return %arg0, %arg1 : i32, i32
  }
}

module attributes {stable_mosaic.version = 11 : i64} {
  func.func @_max9_kernel(%arg0: i32, %arg1: memref<16x512xbf16, #tpu.memory_space<vmem>>, %arg2: memref<16x512xbf16, #tpu.memory_space<vmem>>, %arg3: memref<16x512xbf16, #tpu.memory_space<vmem>>, %arg4: memref<16x512xbf16, #tpu.memory_space<vmem>>, %arg5: memref<16x512xbf16, #tpu.memory_space<vmem>>, %arg6: memref<16x512xbf16, #tpu.memory_space<vmem>>, %arg7: memref<16x512xbf16, #tpu.memory_space<vmem>>, %arg8: memref<16x512xbf16, #tpu.memory_space<vmem>>, %arg9: memref<16x512xbf16, #tpu.memory_space<vmem>>, %arg10: memref<16x512xbf16, #tpu.memory_space<vmem>>) attributes {dimension_semantics = [#tpu.dimension_semantics<parallel>], iteration_bounds = array<i64: 1>, scalar_prefetch = 0 : i64, scratch_operands = 0 : i64, tpu.core_type = #tpu.core_type<tc>, window_params = [{transform_indices = @transform_0, window_bounds = array<i64: 16, 512>}, {transform_indices = @transform_1, window_bounds = array<i64: 16, 512>}, {transform_indices = @transform_2, window_bounds = array<i64: 16, 512>}, {transform_indices = @transform_3, window_bounds = array<i64: 16, 512>}, {transform_indices = @transform_4, window_bounds = array<i64: 16, 512>}, {transform_indices = @transform_5, window_bounds = array<i64: 16, 512>}, {transform_indices = @transform_6, window_bounds = array<i64: 16, 512>}, {transform_indices = @transform_7, window_bounds = array<i64: 16, 512>}, {transform_indices = @transform_8, window_bounds = array<i64: 16, 512>}, {transform_indices = @transform_9, window_bounds = array<i64: 16, 512>}]} {
    %c0 = arith.constant 0 : index
    %c0_0 = arith.constant 0 : index
    %0 = vector.load %arg1[%c0, %c0_0] : memref<16x512xbf16, #tpu.memory_space<vmem>>, vector<16x512xbf16>
    %c0_1 = arith.constant 0 : index
    %c0_2 = arith.constant 0 : index
    %1 = vector.load %arg2[%c0_1, %c0_2] : memref<16x512xbf16, #tpu.memory_space<vmem>>, vector<16x512xbf16>
    %2 = arith.maximumf %0, %1 : vector<16x512xbf16>
    %c0_3 = arith.constant 0 : index
    %c0_4 = arith.constant 0 : index
    %3 = vector.load %arg3[%c0_3, %c0_4] : memref<16x512xbf16, #tpu.memory_space<vmem>>, vector<16x512xbf16>
    %4 = arith.maximumf %2, %3 : vector<16x512xbf16>
    %c0_5 = arith.constant 0 : index
    %c0_6 = arith.constant 0 : index
    %5 = vector.load %arg4[%c0_5, %c0_6] : memref<16x512xbf16, #tpu.memory_space<vmem>>, vector<16x512xbf16>
    %6 = arith.maximumf %4, %5 : vector<16x512xbf16>
    %c0_7 = arith.constant 0 : index
    %c0_8 = arith.constant 0 : index
    %7 = vector.load %arg5[%c0_7, %c0_8] : memref<16x512xbf16, #tpu.memory_space<vmem>>, vector<16x512xbf16>
    %8 = arith.maximumf %6, %7 : vector<16x512xbf16>
    %c0_9 = arith.constant 0 : index
    %c0_10 = arith.constant 0 : index
    %9 = vector.load %arg6[%c0_9, %c0_10] : memref<16x512xbf16, #tpu.memory_space<vmem>>, vector<16x512xbf16>
    %10 = arith.maximumf %8, %9 : vector<16x512xbf16>
    %c0_11 = arith.constant 0 : index
    %c0_12 = arith.constant 0 : index
    %11 = vector.load %arg7[%c0_11, %c0_12] : memref<16x512xbf16, #tpu.memory_space<vmem>>, vector<16x512xbf16>
    %12 = arith.maximumf %10, %11 : vector<16x512xbf16>
    %c0_13 = arith.constant 0 : index
    %c0_14 = arith.constant 0 : index
    %13 = vector.load %arg8[%c0_13, %c0_14] : memref<16x512xbf16, #tpu.memory_space<vmem>>, vector<16x512xbf16>
    %14 = arith.maximumf %12, %13 : vector<16x512xbf16>
    %c0_15 = arith.constant 0 : index
    %c0_16 = arith.constant 0 : index
    %15 = vector.load %arg9[%c0_15, %c0_16] : memref<16x512xbf16, #tpu.memory_space<vmem>>, vector<16x512xbf16>
    %16 = arith.maximumf %14, %15 : vector<16x512xbf16>
    %c0_17 = arith.constant 0 : index
    %c0_18 = arith.constant 0 : index
    %17 = vector.load %arg10[%c0_17, %c0_18] : memref<16x512xbf16, #tpu.memory_space<vmem>>, vector<16x512xbf16>
    tpu.vector_store %arg10[%c0_17, %c0_18], %16 {strides = array<i32>} : memref<16x512xbf16, #tpu.memory_space<vmem>>, vector<16x512xbf16>,
    return
  }
  func.func @transform_0(%arg0: i32) -> (i32, i32) {
    %c0_i32 = arith.constant 0 : i32
    %c0_i32_0 = arith.constant 0 : i32
    return %arg0, %c0_i32 : i32, i32
  }
  func.func @transform_1(%arg0: i32) -> (i32, i32) {
    %c0_i32 = arith.constant 0 : i32
    %c0_i32_0 = arith.constant 0 : i32
    return %arg0, %c0_i32 : i32, i32
  }
  func.func @transform_2(%arg0: i32) -> (i32, i32) {
    %c0_i32 = arith.constant 0 : i32
    %c0_i32_0 = arith.constant 0 : i32
    return %arg0, %c0_i32 : i32, i32
  }
  func.func @transform_3(%arg0: i32) -> (i32, i32) {
    %c0_i32 = arith.constant 0 : i32
    %c0_i32_0 = arith.constant 0 : i32
    return %arg0, %c0_i32 : i32, i32
  }
  func.func @transform_4(%arg0: i32) -> (i32, i32) {
    %c0_i32 = arith.constant 0 : i32
    %c0_i32_0 = arith.constant 0 : i32
    return %arg0, %c0_i32 : i32, i32
  }
  func.func @transform_5(%arg0: i32) -> (i32, i32) {
    %c0_i32 = arith.constant 0 : i32
    %c0_i32_0 = arith.constant 0 : i32
    return %arg0, %c0_i32 : i32, i32
  }
  func.func @transform_6(%arg0: i32) -> (i32, i32) {
    %c0_i32 = arith.constant 0 : i32
    %c0_i32_0 = arith.constant 0 : i32
    return %arg0, %c0_i32 : i32, i32
  }
  func.func @transform_7(%arg0: i32) -> (i32, i32) {
    %c0_i32 = arith.constant 0 : i32
    %c0_i32_0 = arith.constant 0 : i32
    return %arg0, %c0_i32 : i32, i32
  }
  func.func @transform_8(%arg0: i32) -> (i32, i32) {
    %c0_i32 = arith.constant 0 : i32
    %c0_i32_0 = arith.constant 0 : i32
    return %arg0, %c0_i32 : i32, i32
  }
  func.func @transform_9(%arg0: i32) -> (i32, i32) {
    %c0_i32 = arith.constant 0 : i32
    %c0_i32_0 = arith.constant 0 : i32
    return %arg0, %c0_i32 : i32, i32
  }
}

module attributes {stable_mosaic.version = 11 : i64} {
  func.func @_conv_bn_kernel(%arg0: i32, %arg1: i32, %arg2: i32, %arg3: memref<128x128xbf16, #tpu.memory_space<vmem>>, %arg4: memref<128x64xbf16, #tpu.memory_space<vmem>>, %arg5: memref<1x64xf32, #tpu.memory_space<vmem>>, %arg6: memref<128x64xbf16, #tpu.memory_space<vmem>>, %arg7: memref<128x64xf32, #tpu.memory_space<vmem>>) attributes {dimension_semantics = [#tpu.dimension_semantics<parallel>, #tpu.dimension_semantics<parallel>, #tpu.dimension_semantics<arbitrary>], iteration_bounds = array<i64: 1, 1, 5>, scalar_prefetch = 0 : i64, scratch_operands = 1 : i64, tpu.core_type = #tpu.core_type<tc>, window_params = [{transform_indices = @transform_0, window_bounds = array<i64: 128, 128>}, {transform_indices = @transform_1, window_bounds = array<i64: 128, 64>}, {transform_indices = @transform_2, window_bounds = array<i64: 1, 64>}, {transform_indices = @transform_3, window_bounds = array<i64: 128, 64>}]} {
    %c0_i32 = arith.constant 0 : i32
    %0 = arith.cmpi eq, %arg2, %c0_i32 : i32
    %1 = arith.extui %0 : i1 to i32
    %c0_i32_0 = arith.constant 0 : i32
    %2 = arith.cmpi ne, %1, %c0_i32_0 : i32
    scf.if %2 {
      %cst_9 = arith.constant 0.000000e+00 : f32
      %12 = vector.broadcast %cst_9 : f32 to vector<128x64xf32>
      %c0_10 = arith.constant 0 : index
      %c0_11 = arith.constant 0 : index
      %13 = vector.load %arg7[%c0_10, %c0_11] : memref<128x64xf32, #tpu.memory_space<vmem>>, vector<128x64xf32>
      tpu.vector_store %arg7[%c0_10, %c0_11], %12 {strides = array<i32>} : memref<128x64xf32, #tpu.memory_space<vmem>>, vector<128x64xf32>,
    } else {
    }
    %c0 = arith.constant 0 : index
    %c0_1 = arith.constant 0 : index
    %3 = vector.load %arg7[%c0, %c0_1] : memref<128x64xf32, #tpu.memory_space<vmem>>, vector<128x64xf32>
    %c0_2 = arith.constant 0 : index
    %c0_3 = arith.constant 0 : index
    %4 = vector.load %arg3[%c0_2, %c0_3] : memref<128x128xbf16, #tpu.memory_space<vmem>>, vector<128x128xbf16>
    %c0_4 = arith.constant 0 : index
    %c0_5 = arith.constant 0 : index
    %5 = vector.load %arg4[%c0_4, %c0_5] : memref<128x64xbf16, #tpu.memory_space<vmem>>, vector<128x64xbf16>
    %cst = arith.constant dense<0.000000e+00> : vector<128x64xf32>
    %6 = tpu.matmul %4, %5, %cst {dimension_numbers = #tpu.dot_dimension_numbers<[1], [0], [0], [1], [0, 0, 1, 1], [], []>} : vector<128x128xbf16>, vector<128x64xbf16>, vector<128x64xf32> -> vector<128x64xf32>
    %7 = arith.addf %3, %6 : vector<128x64xf32>
    %c0_6 = arith.constant 0 : index
    %c0_7 = arith.constant 0 : index
    %8 = vector.load %arg7[%c0_6, %c0_7] : memref<128x64xf32, #tpu.memory_space<vmem>>, vector<128x64xf32>
    tpu.vector_store %arg7[%c0_6, %c0_7], %7 {strides = array<i32>} : memref<128x64xf32, #tpu.memory_space<vmem>>, vector<128x64xf32>,
    %c4_i32 = arith.constant 4 : i32
    %9 = arith.cmpi eq, %arg2, %c4_i32 : i32
    %10 = arith.extui %9 : i1 to i32
    %c0_i32_8 = arith.constant 0 : i32
    %11 = arith.cmpi ne, %10, %c0_i32_8 : i32
    scf.if %11 {
      %c0_9 = arith.constant 0 : index
      %c0_10 = arith.constant 0 : index
      %12 = vector.load %arg7[%c0_9, %c0_10] : memref<128x64xf32, #tpu.memory_space<vmem>>, vector<128x64xf32>
      %c0_11 = arith.constant 0 : index
      %c0_12 = arith.constant 0 : index
      %13 = vector.load %arg5[%c0_11, %c0_12] : memref<1x64xf32, #tpu.memory_space<vmem>>, vector<1x64xf32>
      %14 = vector.broadcast %13 : vector<1x64xf32> to vector<128x64xf32>
      %15 = arith.addf %12, %14 : vector<128x64xf32>
      %cst_13 = arith.constant 0.000000e+00 : f32
      %16 = vector.broadcast %cst_13 : f32 to vector<128x64xf32>
      %17 = arith.maximumf %15, %16 : vector<128x64xf32>
      %18 = arith.truncf %17 : vector<128x64xf32> to vector<128x64xbf16>
      %c0_14 = arith.constant 0 : index
      %c0_15 = arith.constant 0 : index
      %19 = vector.load %arg6[%c0_14, %c0_15] : memref<128x64xbf16, #tpu.memory_space<vmem>>, vector<128x64xbf16>
      tpu.vector_store %arg6[%c0_14, %c0_15], %18 {strides = array<i32>} : memref<128x64xbf16, #tpu.memory_space<vmem>>, vector<128x64xbf16>,
    } else {
    }
    return
  }
  func.func @transform_0(%arg0: i32, %arg1: i32, %arg2: i32) -> (i32, i32) {
    %c0_i32 = arith.constant 0 : i32
    return %arg0, %arg2 : i32, i32
  }
  func.func @transform_1(%arg0: i32, %arg1: i32, %arg2: i32) -> (i32, i32) {
    %c0_i32 = arith.constant 0 : i32
    return %arg2, %arg1 : i32, i32
  }
  func.func @transform_2(%arg0: i32, %arg1: i32, %arg2: i32) -> (i32, i32) {
    %c0_i32 = arith.constant 0 : i32
    %c0_i32_0 = arith.constant 0 : i32
    return %c0_i32, %arg1 : i32, i32
  }
  func.func @transform_3(%arg0: i32, %arg1: i32, %arg2: i32) -> (i32, i32) {
    %c0_i32 = arith.constant 0 : i32
    return %arg0, %arg1 : i32, i32
  }
}

module attributes {stable_mosaic.version = 11 : i64} {
  func.func @_conv_bn_res_kernel(%arg0: i32, %arg1: i32, %arg2: i32, %arg3: memref<128x128xbf16, #tpu.memory_space<vmem>>, %arg4: memref<128x64xbf16, #tpu.memory_space<vmem>>, %arg5: memref<1x64xf32, #tpu.memory_space<vmem>>, %arg6: memref<128x64xbf16, #tpu.memory_space<vmem>>, %arg7: memref<128x64xbf16, #tpu.memory_space<vmem>>, %arg8: memref<128x64xf32, #tpu.memory_space<vmem>>) attributes {dimension_semantics = [#tpu.dimension_semantics<parallel>, #tpu.dimension_semantics<parallel>, #tpu.dimension_semantics<arbitrary>], iteration_bounds = array<i64: 1, 1, 5>, scalar_prefetch = 0 : i64, scratch_operands = 1 : i64, tpu.core_type = #tpu.core_type<tc>, window_params = [{transform_indices = @transform_0, window_bounds = array<i64: 128, 128>}, {transform_indices = @transform_1, window_bounds = array<i64: 128, 64>}, {transform_indices = @transform_2, window_bounds = array<i64: 1, 64>}, {transform_indices = @transform_3, window_bounds = array<i64: 128, 64>}, {transform_indices = @transform_4, window_bounds = array<i64: 128, 64>}]} {
    %c0_i32 = arith.constant 0 : i32
    %0 = arith.cmpi eq, %arg2, %c0_i32 : i32
    %1 = arith.extui %0 : i1 to i32
    %c0_i32_0 = arith.constant 0 : i32
    %2 = arith.cmpi ne, %1, %c0_i32_0 : i32
    scf.if %2 {
      %cst_9 = arith.constant 0.000000e+00 : f32
      %12 = vector.broadcast %cst_9 : f32 to vector<128x64xf32>
      %c0_10 = arith.constant 0 : index
      %c0_11 = arith.constant 0 : index
      %13 = vector.load %arg8[%c0_10, %c0_11] : memref<128x64xf32, #tpu.memory_space<vmem>>, vector<128x64xf32>
      tpu.vector_store %arg8[%c0_10, %c0_11], %12 {strides = array<i32>} : memref<128x64xf32, #tpu.memory_space<vmem>>, vector<128x64xf32>,
    } else {
    }
    %c0 = arith.constant 0 : index
    %c0_1 = arith.constant 0 : index
    %3 = vector.load %arg8[%c0, %c0_1] : memref<128x64xf32, #tpu.memory_space<vmem>>, vector<128x64xf32>
    %c0_2 = arith.constant 0 : index
    %c0_3 = arith.constant 0 : index
    %4 = vector.load %arg3[%c0_2, %c0_3] : memref<128x128xbf16, #tpu.memory_space<vmem>>, vector<128x128xbf16>
    %c0_4 = arith.constant 0 : index
    %c0_5 = arith.constant 0 : index
    %5 = vector.load %arg4[%c0_4, %c0_5] : memref<128x64xbf16, #tpu.memory_space<vmem>>, vector<128x64xbf16>
    %cst = arith.constant dense<0.000000e+00> : vector<128x64xf32>
    %6 = tpu.matmul %4, %5, %cst {dimension_numbers = #tpu.dot_dimension_numbers<[1], [0], [0], [1], [0, 0, 1, 1], [], []>} : vector<128x128xbf16>, vector<128x64xbf16>, vector<128x64xf32> -> vector<128x64xf32>
    %7 = arith.addf %3, %6 : vector<128x64xf32>
    %c0_6 = arith.constant 0 : index
    %c0_7 = arith.constant 0 : index
    %8 = vector.load %arg8[%c0_6, %c0_7] : memref<128x64xf32, #tpu.memory_space<vmem>>, vector<128x64xf32>
    tpu.vector_store %arg8[%c0_6, %c0_7], %7 {strides = array<i32>} : memref<128x64xf32, #tpu.memory_space<vmem>>, vector<128x64xf32>,
    %c4_i32 = arith.constant 4 : i32
    %9 = arith.cmpi eq, %arg2, %c4_i32 : i32
    %10 = arith.extui %9 : i1 to i32
    %c0_i32_8 = arith.constant 0 : i32
    %11 = arith.cmpi ne, %10, %c0_i32_8 : i32
    scf.if %11 {
      %c0_9 = arith.constant 0 : index
      %c0_10 = arith.constant 0 : index
      %12 = vector.load %arg8[%c0_9, %c0_10] : memref<128x64xf32, #tpu.memory_space<vmem>>, vector<128x64xf32>
      %c0_11 = arith.constant 0 : index
      %c0_12 = arith.constant 0 : index
      %13 = vector.load %arg5[%c0_11, %c0_12] : memref<1x64xf32, #tpu.memory_space<vmem>>, vector<1x64xf32>
      %14 = vector.broadcast %13 : vector<1x64xf32> to vector<128x64xf32>
      %15 = arith.addf %12, %14 : vector<128x64xf32>
      %c0_13 = arith.constant 0 : index
      %c0_14 = arith.constant 0 : index
      %16 = vector.load %arg6[%c0_13, %c0_14] : memref<128x64xbf16, #tpu.memory_space<vmem>>, vector<128x64xbf16>
      %17 = arith.extf %16 : vector<128x64xbf16> to vector<128x64xf32>
      %18 = arith.addf %15, %17 : vector<128x64xf32>
      %cst_15 = arith.constant 0.000000e+00 : f32
      %19 = vector.broadcast %cst_15 : f32 to vector<128x64xf32>
      %20 = arith.maximumf %18, %19 : vector<128x64xf32>
      %21 = arith.truncf %20 : vector<128x64xf32> to vector<128x64xbf16>
      %c0_16 = arith.constant 0 : index
      %c0_17 = arith.constant 0 : index
      %22 = vector.load %arg7[%c0_16, %c0_17] : memref<128x64xbf16, #tpu.memory_space<vmem>>, vector<128x64xbf16>
      tpu.vector_store %arg7[%c0_16, %c0_17], %21 {strides = array<i32>} : memref<128x64xbf16, #tpu.memory_space<vmem>>, vector<128x64xbf16>,
    } else {
    }
    return
  }
  func.func @transform_0(%arg0: i32, %arg1: i32, %arg2: i32) -> (i32, i32) {
    %c0_i32 = arith.constant 0 : i32
    return %arg0, %arg2 : i32, i32
  }
  func.func @transform_1(%arg0: i32, %arg1: i32, %arg2: i32) -> (i32, i32) {
    %c0_i32 = arith.constant 0 : i32
    return %arg2, %arg1 : i32, i32
  }
  func.func @transform_2(%arg0: i32, %arg1: i32, %arg2: i32) -> (i32, i32) {
    %c0_i32 = arith.constant 0 : i32
    %c0_i32_0 = arith.constant 0 : i32
    return %c0_i32, %arg1 : i32, i32
  }
  func.func @transform_3(%arg0: i32, %arg1: i32, %arg2: i32) -> (i32, i32) {
    %c0_i32 = arith.constant 0 : i32
    return %arg0, %arg1 : i32, i32
  }
  func.func @transform_4(%arg0: i32, %arg1: i32, %arg2: i32) -> (i32, i32) {
    %c0_i32 = arith.constant 0 : i32
    return %arg0, %arg1 : i32, i32
  }
}

module attributes {stable_mosaic.version = 11 : i64} {
  func.func @_conv_bn_kernel(%arg0: i32, %arg1: i32, %arg2: i32, %arg3: memref<32x128xbf16, #tpu.memory_space<vmem>>, %arg4: memref<128x128xbf16, #tpu.memory_space<vmem>>, %arg5: memref<1x128xf32, #tpu.memory_space<vmem>>, %arg6: memref<32x128xbf16, #tpu.memory_space<vmem>>, %arg7: memref<32x128xf32, #tpu.memory_space<vmem>>) attributes {dimension_semantics = [#tpu.dimension_semantics<parallel>, #tpu.dimension_semantics<parallel>, #tpu.dimension_semantics<arbitrary>], iteration_bounds = array<i64: 1, 1, 5>, scalar_prefetch = 0 : i64, scratch_operands = 1 : i64, tpu.core_type = #tpu.core_type<tc>, window_params = [{transform_indices = @transform_0, window_bounds = array<i64: 32, 128>}, {transform_indices = @transform_1, window_bounds = array<i64: 128, 128>}, {transform_indices = @transform_2, window_bounds = array<i64: 1, 128>}, {transform_indices = @transform_3, window_bounds = array<i64: 32, 128>}]} {
    %c0_i32 = arith.constant 0 : i32
    %0 = arith.cmpi eq, %arg2, %c0_i32 : i32
    %1 = arith.extui %0 : i1 to i32
    %c0_i32_0 = arith.constant 0 : i32
    %2 = arith.cmpi ne, %1, %c0_i32_0 : i32
    scf.if %2 {
      %cst_9 = arith.constant 0.000000e+00 : f32
      %12 = vector.broadcast %cst_9 : f32 to vector<32x128xf32>
      %c0_10 = arith.constant 0 : index
      %c0_11 = arith.constant 0 : index
      %13 = vector.load %arg7[%c0_10, %c0_11] : memref<32x128xf32, #tpu.memory_space<vmem>>, vector<32x128xf32>
      tpu.vector_store %arg7[%c0_10, %c0_11], %12 {strides = array<i32>} : memref<32x128xf32, #tpu.memory_space<vmem>>, vector<32x128xf32>,
    } else {
    }
    %c0 = arith.constant 0 : index
    %c0_1 = arith.constant 0 : index
    %3 = vector.load %arg7[%c0, %c0_1] : memref<32x128xf32, #tpu.memory_space<vmem>>, vector<32x128xf32>
    %c0_2 = arith.constant 0 : index
    %c0_3 = arith.constant 0 : index
    %4 = vector.load %arg3[%c0_2, %c0_3] : memref<32x128xbf16, #tpu.memory_space<vmem>>, vector<32x128xbf16>
    %c0_4 = arith.constant 0 : index
    %c0_5 = arith.constant 0 : index
    %5 = vector.load %arg4[%c0_4, %c0_5] : memref<128x128xbf16, #tpu.memory_space<vmem>>, vector<128x128xbf16>
    %cst = arith.constant dense<0.000000e+00> : vector<32x128xf32>
    %6 = tpu.matmul %4, %5, %cst {dimension_numbers = #tpu.dot_dimension_numbers<[1], [0], [0], [1], [0, 0, 1, 1], [], []>} : vector<32x128xbf16>, vector<128x128xbf16>, vector<32x128xf32> -> vector<32x128xf32>
    %7 = arith.addf %3, %6 : vector<32x128xf32>
    %c0_6 = arith.constant 0 : index
    %c0_7 = arith.constant 0 : index
    %8 = vector.load %arg7[%c0_6, %c0_7] : memref<32x128xf32, #tpu.memory_space<vmem>>, vector<32x128xf32>
    tpu.vector_store %arg7[%c0_6, %c0_7], %7 {strides = array<i32>} : memref<32x128xf32, #tpu.memory_space<vmem>>, vector<32x128xf32>,
    %c4_i32 = arith.constant 4 : i32
    %9 = arith.cmpi eq, %arg2, %c4_i32 : i32
    %10 = arith.extui %9 : i1 to i32
    %c0_i32_8 = arith.constant 0 : i32
    %11 = arith.cmpi ne, %10, %c0_i32_8 : i32
    scf.if %11 {
      %c0_9 = arith.constant 0 : index
      %c0_10 = arith.constant 0 : index
      %12 = vector.load %arg7[%c0_9, %c0_10] : memref<32x128xf32, #tpu.memory_space<vmem>>, vector<32x128xf32>
      %c0_11 = arith.constant 0 : index
      %c0_12 = arith.constant 0 : index
      %13 = vector.load %arg5[%c0_11, %c0_12] : memref<1x128xf32, #tpu.memory_space<vmem>>, vector<1x128xf32>
      %14 = vector.broadcast %13 : vector<1x128xf32> to vector<32x128xf32>
      %15 = arith.addf %12, %14 : vector<32x128xf32>
      %cst_13 = arith.constant 0.000000e+00 : f32
      %16 = vector.broadcast %cst_13 : f32 to vector<32x128xf32>
      %17 = arith.maximumf %15, %16 : vector<32x128xf32>
      %18 = arith.truncf %17 : vector<32x128xf32> to vector<32x128xbf16>
      %c0_14 = arith.constant 0 : index
      %c0_15 = arith.constant 0 : index
      %19 = vector.load %arg6[%c0_14, %c0_15] : memref<32x128xbf16, #tpu.memory_space<vmem>>, vector<32x128xbf16>
      tpu.vector_store %arg6[%c0_14, %c0_15], %18 {strides = array<i32>} : memref<32x128xbf16, #tpu.memory_space<vmem>>, vector<32x128xbf16>,
    } else {
    }
    return
  }
  func.func @transform_0(%arg0: i32, %arg1: i32, %arg2: i32) -> (i32, i32) {
    %c0_i32 = arith.constant 0 : i32
    return %arg0, %arg2 : i32, i32
  }
  func.func @transform_1(%arg0: i32, %arg1: i32, %arg2: i32) -> (i32, i32) {
    %c0_i32 = arith.constant 0 : i32
    return %arg2, %arg1 : i32, i32
  }
  func.func @transform_2(%arg0: i32, %arg1: i32, %arg2: i32) -> (i32, i32) {
    %c0_i32 = arith.constant 0 : i32
    %c0_i32_0 = arith.constant 0 : i32
    return %c0_i32, %arg1 : i32, i32
  }
  func.func @transform_3(%arg0: i32, %arg1: i32, %arg2: i32) -> (i32, i32) {
    %c0_i32 = arith.constant 0 : i32
    return %arg0, %arg1 : i32, i32
  }
}

module attributes {stable_mosaic.version = 11 : i64} {
  func.func @_conv_bn_res_kernel(%arg0: i32, %arg1: i32, %arg2: i32, %arg3: memref<32x384xbf16, #tpu.memory_space<vmem>>, %arg4: memref<384x128xbf16, #tpu.memory_space<vmem>>, %arg5: memref<1x128xf32, #tpu.memory_space<vmem>>, %arg6: memref<32x128xbf16, #tpu.memory_space<vmem>>, %arg7: memref<32x128xbf16, #tpu.memory_space<vmem>>, %arg8: memref<32x128xf32, #tpu.memory_space<vmem>>) attributes {dimension_semantics = [#tpu.dimension_semantics<parallel>, #tpu.dimension_semantics<parallel>, #tpu.dimension_semantics<arbitrary>], iteration_bounds = array<i64: 1, 1, 3>, scalar_prefetch = 0 : i64, scratch_operands = 1 : i64, tpu.core_type = #tpu.core_type<tc>, window_params = [{transform_indices = @transform_0, window_bounds = array<i64: 32, 384>}, {transform_indices = @transform_1, window_bounds = array<i64: 384, 128>}, {transform_indices = @transform_2, window_bounds = array<i64: 1, 128>}, {transform_indices = @transform_3, window_bounds = array<i64: 32, 128>}, {transform_indices = @transform_4, window_bounds = array<i64: 32, 128>}]} {
    %c0_i32 = arith.constant 0 : i32
    %0 = arith.cmpi eq, %arg2, %c0_i32 : i32
    %1 = arith.extui %0 : i1 to i32
    %c0_i32_0 = arith.constant 0 : i32
    %2 = arith.cmpi ne, %1, %c0_i32_0 : i32
    scf.if %2 {
      %cst_9 = arith.constant 0.000000e+00 : f32
      %12 = vector.broadcast %cst_9 : f32 to vector<32x128xf32>
      %c0_10 = arith.constant 0 : index
      %c0_11 = arith.constant 0 : index
      %13 = vector.load %arg8[%c0_10, %c0_11] : memref<32x128xf32, #tpu.memory_space<vmem>>, vector<32x128xf32>
      tpu.vector_store %arg8[%c0_10, %c0_11], %12 {strides = array<i32>} : memref<32x128xf32, #tpu.memory_space<vmem>>, vector<32x128xf32>,
    } else {
    }
    %c0 = arith.constant 0 : index
    %c0_1 = arith.constant 0 : index
    %3 = vector.load %arg8[%c0, %c0_1] : memref<32x128xf32, #tpu.memory_space<vmem>>, vector<32x128xf32>
    %c0_2 = arith.constant 0 : index
    %c0_3 = arith.constant 0 : index
    %4 = vector.load %arg3[%c0_2, %c0_3] : memref<32x384xbf16, #tpu.memory_space<vmem>>, vector<32x384xbf16>
    %c0_4 = arith.constant 0 : index
    %c0_5 = arith.constant 0 : index
    %5 = vector.load %arg4[%c0_4, %c0_5] : memref<384x128xbf16, #tpu.memory_space<vmem>>, vector<384x128xbf16>
    %cst = arith.constant dense<0.000000e+00> : vector<32x128xf32>
    %6 = tpu.matmul %4, %5, %cst {dimension_numbers = #tpu.dot_dimension_numbers<[1], [0], [0], [1], [0, 0, 1, 1], [], []>} : vector<32x384xbf16>, vector<384x128xbf16>, vector<32x128xf32> -> vector<32x128xf32>
    %7 = arith.addf %3, %6 : vector<32x128xf32>
    %c0_6 = arith.constant 0 : index
    %c0_7 = arith.constant 0 : index
    %8 = vector.load %arg8[%c0_6, %c0_7] : memref<32x128xf32, #tpu.memory_space<vmem>>, vector<32x128xf32>
    tpu.vector_store %arg8[%c0_6, %c0_7], %7 {strides = array<i32>} : memref<32x128xf32, #tpu.memory_space<vmem>>, vector<32x128xf32>,
    %c2_i32 = arith.constant 2 : i32
    %9 = arith.cmpi eq, %arg2, %c2_i32 : i32
    %10 = arith.extui %9 : i1 to i32
    %c0_i32_8 = arith.constant 0 : i32
    %11 = arith.cmpi ne, %10, %c0_i32_8 : i32
    scf.if %11 {
      %c0_9 = arith.constant 0 : index
      %c0_10 = arith.constant 0 : index
      %12 = vector.load %arg8[%c0_9, %c0_10] : memref<32x128xf32, #tpu.memory_space<vmem>>, vector<32x128xf32>
      %c0_11 = arith.constant 0 : index
      %c0_12 = arith.constant 0 : index
      %13 = vector.load %arg5[%c0_11, %c0_12] : memref<1x128xf32, #tpu.memory_space<vmem>>, vector<1x128xf32>
      %14 = vector.broadcast %13 : vector<1x128xf32> to vector<32x128xf32>
      %15 = arith.addf %12, %14 : vector<32x128xf32>
      %c0_13 = arith.constant 0 : index
      %c0_14 = arith.constant 0 : index
      %16 = vector.load %arg6[%c0_13, %c0_14] : memref<32x128xbf16, #tpu.memory_space<vmem>>, vector<32x128xbf16>
      %17 = arith.extf %16 : vector<32x128xbf16> to vector<32x128xf32>
      %18 = arith.addf %15, %17 : vector<32x128xf32>
      %cst_15 = arith.constant 0.000000e+00 : f32
      %19 = vector.broadcast %cst_15 : f32 to vector<32x128xf32>
      %20 = arith.maximumf %18, %19 : vector<32x128xf32>
      %21 = arith.truncf %20 : vector<32x128xf32> to vector<32x128xbf16>
      %c0_16 = arith.constant 0 : index
      %c0_17 = arith.constant 0 : index
      %22 = vector.load %arg7[%c0_16, %c0_17] : memref<32x128xbf16, #tpu.memory_space<vmem>>, vector<32x128xbf16>
      tpu.vector_store %arg7[%c0_16, %c0_17], %21 {strides = array<i32>} : memref<32x128xbf16, #tpu.memory_space<vmem>>, vector<32x128xbf16>,
    } else {
    }
    return
  }
  func.func @transform_0(%arg0: i32, %arg1: i32, %arg2: i32) -> (i32, i32) {
    %c0_i32 = arith.constant 0 : i32
    return %arg0, %arg2 : i32, i32
  }
  func.func @transform_1(%arg0: i32, %arg1: i32, %arg2: i32) -> (i32, i32) {
    %c0_i32 = arith.constant 0 : i32
    return %arg2, %arg1 : i32, i32
  }
  func.func @transform_2(%arg0: i32, %arg1: i32, %arg2: i32) -> (i32, i32) {
    %c0_i32 = arith.constant 0 : i32
    %c0_i32_0 = arith.constant 0 : i32
    return %c0_i32, %arg1 : i32, i32
  }
  func.func @transform_3(%arg0: i32, %arg1: i32, %arg2: i32) -> (i32, i32) {
    %c0_i32 = arith.constant 0 : i32
    return %arg0, %arg1 : i32, i32
  }
  func.func @transform_4(%arg0: i32, %arg1: i32, %arg2: i32) -> (i32, i32) {
    %c0_i32 = arith.constant 0 : i32
    return %arg0, %arg1 : i32, i32
  }
}

module attributes {stable_mosaic.version = 11 : i64} {
  func.func @_conv_bn_kernel(%arg0: i32, %arg1: i32, %arg2: i32, %arg3: memref<32x128xbf16, #tpu.memory_space<vmem>>, %arg4: memref<128x128xbf16, #tpu.memory_space<vmem>>, %arg5: memref<1x128xf32, #tpu.memory_space<vmem>>, %arg6: memref<32x128xbf16, #tpu.memory_space<vmem>>, %arg7: memref<32x128xf32, #tpu.memory_space<vmem>>) attributes {dimension_semantics = [#tpu.dimension_semantics<parallel>, #tpu.dimension_semantics<parallel>, #tpu.dimension_semantics<arbitrary>], iteration_bounds = array<i64: 1, 1, 1>, scalar_prefetch = 0 : i64, scratch_operands = 1 : i64, tpu.core_type = #tpu.core_type<tc>, window_params = [{transform_indices = @transform_0, window_bounds = array<i64: 32, 128>}, {transform_indices = @transform_1, window_bounds = array<i64: 128, 128>}, {transform_indices = @transform_2, window_bounds = array<i64: 1, 128>}, {transform_indices = @transform_3, window_bounds = array<i64: 32, 128>}]} {
    %c0_i32 = arith.constant 0 : i32
    %0 = arith.cmpi eq, %arg2, %c0_i32 : i32
    %1 = arith.extui %0 : i1 to i32
    %c0_i32_0 = arith.constant 0 : i32
    %2 = arith.cmpi ne, %1, %c0_i32_0 : i32
    scf.if %2 {
      %cst_10 = arith.constant 0.000000e+00 : f32
      %12 = vector.broadcast %cst_10 : f32 to vector<32x128xf32>
      %c0_11 = arith.constant 0 : index
      %c0_12 = arith.constant 0 : index
      %13 = vector.load %arg7[%c0_11, %c0_12] : memref<32x128xf32, #tpu.memory_space<vmem>>, vector<32x128xf32>
      tpu.vector_store %arg7[%c0_11, %c0_12], %12 {strides = array<i32>} : memref<32x128xf32, #tpu.memory_space<vmem>>, vector<32x128xf32>,
    } else {
    }
    %c0 = arith.constant 0 : index
    %c0_1 = arith.constant 0 : index
    %3 = vector.load %arg7[%c0, %c0_1] : memref<32x128xf32, #tpu.memory_space<vmem>>, vector<32x128xf32>
    %c0_2 = arith.constant 0 : index
    %c0_3 = arith.constant 0 : index
    %4 = vector.load %arg3[%c0_2, %c0_3] : memref<32x128xbf16, #tpu.memory_space<vmem>>, vector<32x128xbf16>
    %c0_4 = arith.constant 0 : index
    %c0_5 = arith.constant 0 : index
    %5 = vector.load %arg4[%c0_4, %c0_5] : memref<128x128xbf16, #tpu.memory_space<vmem>>, vector<128x128xbf16>
    %cst = arith.constant dense<0.000000e+00> : vector<32x128xf32>
    %6 = tpu.matmul %4, %5, %cst {dimension_numbers = #tpu.dot_dimension_numbers<[1], [0], [0], [1], [0, 0, 1, 1], [], []>} : vector<32x128xbf16>, vector<128x128xbf16>, vector<32x128xf32> -> vector<32x128xf32>
    %7 = arith.addf %3, %6 : vector<32x128xf32>
    %c0_6 = arith.constant 0 : index
    %c0_7 = arith.constant 0 : index
    %8 = vector.load %arg7[%c0_6, %c0_7] : memref<32x128xf32, #tpu.memory_space<vmem>>, vector<32x128xf32>
    tpu.vector_store %arg7[%c0_6, %c0_7], %7 {strides = array<i32>} : memref<32x128xf32, #tpu.memory_space<vmem>>, vector<32x128xf32>,
    %c0_i32_8 = arith.constant 0 : i32
    %9 = arith.cmpi eq, %arg2, %c0_i32_8 : i32
    %10 = arith.extui %9 : i1 to i32
    %c0_i32_9 = arith.constant 0 : i32
    %11 = arith.cmpi ne, %10, %c0_i32_9 : i32
    scf.if %11 {
      %c0_10 = arith.constant 0 : index
      %c0_11 = arith.constant 0 : index
      %12 = vector.load %arg7[%c0_10, %c0_11] : memref<32x128xf32, #tpu.memory_space<vmem>>, vector<32x128xf32>
      %c0_12 = arith.constant 0 : index
      %c0_13 = arith.constant 0 : index
      %13 = vector.load %arg5[%c0_12, %c0_13] : memref<1x128xf32, #tpu.memory_space<vmem>>, vector<1x128xf32>
      %14 = vector.broadcast %13 : vector<1x128xf32> to vector<32x128xf32>
      %15 = arith.addf %12, %14 : vector<32x128xf32>
      %16 = arith.truncf %15 : vector<32x128xf32> to vector<32x128xbf16>
      %c0_14 = arith.constant 0 : index
      %c0_15 = arith.constant 0 : index
      %17 = vector.load %arg6[%c0_14, %c0_15] : memref<32x128xbf16, #tpu.memory_space<vmem>>, vector<32x128xbf16>
      tpu.vector_store %arg6[%c0_14, %c0_15], %16 {strides = array<i32>} : memref<32x128xbf16, #tpu.memory_space<vmem>>, vector<32x128xbf16>,
    } else {
    }
    return
  }
  func.func @transform_0(%arg0: i32, %arg1: i32, %arg2: i32) -> (i32, i32) {
    %c0_i32 = arith.constant 0 : i32
    return %arg0, %arg2 : i32, i32
  }
  func.func @transform_1(%arg0: i32, %arg1: i32, %arg2: i32) -> (i32, i32) {
    %c0_i32 = arith.constant 0 : i32
    return %arg2, %arg1 : i32, i32
  }
  func.func @transform_2(%arg0: i32, %arg1: i32, %arg2: i32) -> (i32, i32) {
    %c0_i32 = arith.constant 0 : i32
    %c0_i32_0 = arith.constant 0 : i32
    return %c0_i32, %arg1 : i32, i32
  }
  func.func @transform_3(%arg0: i32, %arg1: i32, %arg2: i32) -> (i32, i32) {
    %c0_i32 = arith.constant 0 : i32
    return %arg0, %arg1 : i32, i32
  }
}

module attributes {stable_mosaic.version = 11 : i64} {
  func.func @_conv_bn_kernel(%arg0: i32, %arg1: i32, %arg2: i32, %arg3: memref<32x384xbf16, #tpu.memory_space<vmem>>, %arg4: memref<384x128xbf16, #tpu.memory_space<vmem>>, %arg5: memref<1x128xf32, #tpu.memory_space<vmem>>, %arg6: memref<32x128xbf16, #tpu.memory_space<vmem>>, %arg7: memref<32x128xf32, #tpu.memory_space<vmem>>) attributes {dimension_semantics = [#tpu.dimension_semantics<parallel>, #tpu.dimension_semantics<parallel>, #tpu.dimension_semantics<arbitrary>], iteration_bounds = array<i64: 1, 1, 3>, scalar_prefetch = 0 : i64, scratch_operands = 1 : i64, tpu.core_type = #tpu.core_type<tc>, window_params = [{transform_indices = @transform_0, window_bounds = array<i64: 32, 384>}, {transform_indices = @transform_1, window_bounds = array<i64: 384, 128>}, {transform_indices = @transform_2, window_bounds = array<i64: 1, 128>}, {transform_indices = @transform_3, window_bounds = array<i64: 32, 128>}]} {
    %c0_i32 = arith.constant 0 : i32
    %0 = arith.cmpi eq, %arg2, %c0_i32 : i32
    %1 = arith.extui %0 : i1 to i32
    %c0_i32_0 = arith.constant 0 : i32
    %2 = arith.cmpi ne, %1, %c0_i32_0 : i32
    scf.if %2 {
      %cst_9 = arith.constant 0.000000e+00 : f32
      %12 = vector.broadcast %cst_9 : f32 to vector<32x128xf32>
      %c0_10 = arith.constant 0 : index
      %c0_11 = arith.constant 0 : index
      %13 = vector.load %arg7[%c0_10, %c0_11] : memref<32x128xf32, #tpu.memory_space<vmem>>, vector<32x128xf32>
      tpu.vector_store %arg7[%c0_10, %c0_11], %12 {strides = array<i32>} : memref<32x128xf32, #tpu.memory_space<vmem>>, vector<32x128xf32>,
    } else {
    }
    %c0 = arith.constant 0 : index
    %c0_1 = arith.constant 0 : index
    %3 = vector.load %arg7[%c0, %c0_1] : memref<32x128xf32, #tpu.memory_space<vmem>>, vector<32x128xf32>
    %c0_2 = arith.constant 0 : index
    %c0_3 = arith.constant 0 : index
    %4 = vector.load %arg3[%c0_2, %c0_3] : memref<32x384xbf16, #tpu.memory_space<vmem>>, vector<32x384xbf16>
    %c0_4 = arith.constant 0 : index
    %c0_5 = arith.constant 0 : index
    %5 = vector.load %arg4[%c0_4, %c0_5] : memref<384x128xbf16, #tpu.memory_space<vmem>>, vector<384x128xbf16>
    %cst = arith.constant dense<0.000000e+00> : vector<32x128xf32>
    %6 = tpu.matmul %4, %5, %cst {dimension_numbers = #tpu.dot_dimension_numbers<[1], [0], [0], [1], [0, 0, 1, 1], [], []>} : vector<32x384xbf16>, vector<384x128xbf16>, vector<32x128xf32> -> vector<32x128xf32>
    %7 = arith.addf %3, %6 : vector<32x128xf32>
    %c0_6 = arith.constant 0 : index
    %c0_7 = arith.constant 0 : index
    %8 = vector.load %arg7[%c0_6, %c0_7] : memref<32x128xf32, #tpu.memory_space<vmem>>, vector<32x128xf32>
    tpu.vector_store %arg7[%c0_6, %c0_7], %7 {strides = array<i32>} : memref<32x128xf32, #tpu.memory_space<vmem>>, vector<32x128xf32>,
    %c2_i32 = arith.constant 2 : i32
    %9 = arith.cmpi eq, %arg2, %c2_i32 : i32
    %10 = arith.extui %9 : i1 to i32
    %c0_i32_8 = arith.constant 0 : i32
    %11 = arith.cmpi ne, %10, %c0_i32_8 : i32
    scf.if %11 {
      %c0_9 = arith.constant 0 : index
      %c0_10 = arith.constant 0 : index
      %12 = vector.load %arg7[%c0_9, %c0_10] : memref<32x128xf32, #tpu.memory_space<vmem>>, vector<32x128xf32>
      %c0_11 = arith.constant 0 : index
      %c0_12 = arith.constant 0 : index
      %13 = vector.load %arg5[%c0_11, %c0_12] : memref<1x128xf32, #tpu.memory_space<vmem>>, vector<1x128xf32>
      %14 = vector.broadcast %13 : vector<1x128xf32> to vector<32x128xf32>
      %15 = arith.addf %12, %14 : vector<32x128xf32>
      %cst_13 = arith.constant 0.000000e+00 : f32
      %16 = vector.broadcast %cst_13 : f32 to vector<32x128xf32>
      %17 = arith.maximumf %15, %16 : vector<32x128xf32>
      %18 = arith.truncf %17 : vector<32x128xf32> to vector<32x128xbf16>
      %c0_14 = arith.constant 0 : index
      %c0_15 = arith.constant 0 : index
      %19 = vector.load %arg6[%c0_14, %c0_15] : memref<32x128xbf16, #tpu.memory_space<vmem>>, vector<32x128xbf16>
      tpu.vector_store %arg6[%c0_14, %c0_15], %18 {strides = array<i32>} : memref<32x128xbf16, #tpu.memory_space<vmem>>, vector<32x128xbf16>,
    } else {
    }
    return
  }
  func.func @transform_0(%arg0: i32, %arg1: i32, %arg2: i32) -> (i32, i32) {
    %c0_i32 = arith.constant 0 : i32
    return %arg0, %arg2 : i32, i32
  }
  func.func @transform_1(%arg0: i32, %arg1: i32, %arg2: i32) -> (i32, i32) {
    %c0_i32 = arith.constant 0 : i32
    return %arg2, %arg1 : i32, i32
  }
  func.func @transform_2(%arg0: i32, %arg1: i32, %arg2: i32) -> (i32, i32) {
    %c0_i32 = arith.constant 0 : i32
    %c0_i32_0 = arith.constant 0 : i32
    return %c0_i32, %arg1 : i32, i32
  }
  func.func @transform_3(%arg0: i32, %arg1: i32, %arg2: i32) -> (i32, i32) {
    %c0_i32 = arith.constant 0 : i32
    return %arg0, %arg1 : i32, i32
  }
}

module attributes {stable_mosaic.version = 11 : i64} {
  func.func @_conv_bn_kernel(%arg0: i32, %arg1: i32, %arg2: i32, %arg3: memref<8x384xbf16, #tpu.memory_space<vmem>>, %arg4: memref<384x256xbf16, #tpu.memory_space<vmem>>, %arg5: memref<1x256xf32, #tpu.memory_space<vmem>>, %arg6: memref<8x256xbf16, #tpu.memory_space<vmem>>, %arg7: memref<8x256xf32, #tpu.memory_space<vmem>>) attributes {dimension_semantics = [#tpu.dimension_semantics<parallel>, #tpu.dimension_semantics<parallel>, #tpu.dimension_semantics<arbitrary>], iteration_bounds = array<i64: 1, 1, 3>, scalar_prefetch = 0 : i64, scratch_operands = 1 : i64, tpu.core_type = #tpu.core_type<tc>, window_params = [{transform_indices = @transform_0, window_bounds = array<i64: 8, 384>}, {transform_indices = @transform_1, window_bounds = array<i64: 384, 256>}, {transform_indices = @transform_2, window_bounds = array<i64: 1, 256>}, {transform_indices = @transform_3, window_bounds = array<i64: 8, 256>}]} {
    %c0_i32 = arith.constant 0 : i32
    %0 = arith.cmpi eq, %arg2, %c0_i32 : i32
    %1 = arith.extui %0 : i1 to i32
    %c0_i32_0 = arith.constant 0 : i32
    %2 = arith.cmpi ne, %1, %c0_i32_0 : i32
    scf.if %2 {
      %cst_9 = arith.constant 0.000000e+00 : f32
      %12 = vector.broadcast %cst_9 : f32 to vector<8x256xf32>
      %c0_10 = arith.constant 0 : index
      %c0_11 = arith.constant 0 : index
      %13 = vector.load %arg7[%c0_10, %c0_11] : memref<8x256xf32, #tpu.memory_space<vmem>>, vector<8x256xf32>
      tpu.vector_store %arg7[%c0_10, %c0_11], %12 {strides = array<i32>} : memref<8x256xf32, #tpu.memory_space<vmem>>, vector<8x256xf32>,
    } else {
    }
    %c0 = arith.constant 0 : index
    %c0_1 = arith.constant 0 : index
    %3 = vector.load %arg7[%c0, %c0_1] : memref<8x256xf32, #tpu.memory_space<vmem>>, vector<8x256xf32>
    %c0_2 = arith.constant 0 : index
    %c0_3 = arith.constant 0 : index
    %4 = vector.load %arg3[%c0_2, %c0_3] : memref<8x384xbf16, #tpu.memory_space<vmem>>, vector<8x384xbf16>
    %c0_4 = arith.constant 0 : index
    %c0_5 = arith.constant 0 : index
    %5 = vector.load %arg4[%c0_4, %c0_5] : memref<384x256xbf16, #tpu.memory_space<vmem>>, vector<384x256xbf16>
    %cst = arith.constant dense<0.000000e+00> : vector<8x256xf32>
    %6 = tpu.matmul %4, %5, %cst {dimension_numbers = #tpu.dot_dimension_numbers<[1], [0], [0], [1], [0, 0, 1, 1], [], []>} : vector<8x384xbf16>, vector<384x256xbf16>, vector<8x256xf32> -> vector<8x256xf32>
    %7 = arith.addf %3, %6 : vector<8x256xf32>
    %c0_6 = arith.constant 0 : index
    %c0_7 = arith.constant 0 : index
    %8 = vector.load %arg7[%c0_6, %c0_7] : memref<8x256xf32, #tpu.memory_space<vmem>>, vector<8x256xf32>
    tpu.vector_store %arg7[%c0_6, %c0_7], %7 {strides = array<i32>} : memref<8x256xf32, #tpu.memory_space<vmem>>, vector<8x256xf32>,
    %c2_i32 = arith.constant 2 : i32
    %9 = arith.cmpi eq, %arg2, %c2_i32 : i32
    %10 = arith.extui %9 : i1 to i32
    %c0_i32_8 = arith.constant 0 : i32
    %11 = arith.cmpi ne, %10, %c0_i32_8 : i32
    scf.if %11 {
      %c0_9 = arith.constant 0 : index
      %c0_10 = arith.constant 0 : index
      %12 = vector.load %arg7[%c0_9, %c0_10] : memref<8x256xf32, #tpu.memory_space<vmem>>, vector<8x256xf32>
      %c0_11 = arith.constant 0 : index
      %c0_12 = arith.constant 0 : index
      %13 = vector.load %arg5[%c0_11, %c0_12] : memref<1x256xf32, #tpu.memory_space<vmem>>, vector<1x256xf32>
      %14 = vector.broadcast %13 : vector<1x256xf32> to vector<8x256xf32>
      %15 = arith.addf %12, %14 : vector<8x256xf32>
      %cst_13 = arith.constant 0.000000e+00 : f32
      %16 = vector.broadcast %cst_13 : f32 to vector<8x256xf32>
      %17 = arith.maximumf %15, %16 : vector<8x256xf32>
      %18 = arith.truncf %17 : vector<8x256xf32> to vector<8x256xbf16>
      %c0_14 = arith.constant 0 : index
      %c0_15 = arith.constant 0 : index
      %19 = vector.load %arg6[%c0_14, %c0_15] : memref<8x256xbf16, #tpu.memory_space<vmem>>, vector<8x256xbf16>
      tpu.vector_store %arg6[%c0_14, %c0_15], %18 {strides = array<i32>} : memref<8x256xbf16, #tpu.memory_space<vmem>>, vector<8x256xbf16>,
    } else {
    }
    return
  }
  func.func @transform_0(%arg0: i32, %arg1: i32, %arg2: i32) -> (i32, i32) {
    %c0_i32 = arith.constant 0 : i32
    return %arg0, %arg2 : i32, i32
  }
  func.func @transform_1(%arg0: i32, %arg1: i32, %arg2: i32) -> (i32, i32) {
    %c0_i32 = arith.constant 0 : i32
    return %arg2, %arg1 : i32, i32
  }
  func.func @transform_2(%arg0: i32, %arg1: i32, %arg2: i32) -> (i32, i32) {
    %c0_i32 = arith.constant 0 : i32
    %c0_i32_0 = arith.constant 0 : i32
    return %c0_i32, %arg1 : i32, i32
  }
  func.func @transform_3(%arg0: i32, %arg1: i32, %arg2: i32) -> (i32, i32) {
    %c0_i32 = arith.constant 0 : i32
    return %arg0, %arg1 : i32, i32
  }
}

module attributes {stable_mosaic.version = 11 : i64} {
  func.func @_conv_bn_kernel(%arg0: i32, %arg1: i32, %arg2: i32, %arg3: memref<8x128xbf16, #tpu.memory_space<vmem>>, %arg4: memref<128x256xbf16, #tpu.memory_space<vmem>>, %arg5: memref<1x256xf32, #tpu.memory_space<vmem>>, %arg6: memref<8x256xbf16, #tpu.memory_space<vmem>>, %arg7: memref<8x256xf32, #tpu.memory_space<vmem>>) attributes {dimension_semantics = [#tpu.dimension_semantics<parallel>, #tpu.dimension_semantics<parallel>, #tpu.dimension_semantics<arbitrary>], iteration_bounds = array<i64: 1, 1, 1>, scalar_prefetch = 0 : i64, scratch_operands = 1 : i64, tpu.core_type = #tpu.core_type<tc>, window_params = [{transform_indices = @transform_0, window_bounds = array<i64: 8, 128>}, {transform_indices = @transform_1, window_bounds = array<i64: 128, 256>}, {transform_indices = @transform_2, window_bounds = array<i64: 1, 256>}, {transform_indices = @transform_3, window_bounds = array<i64: 8, 256>}]} {
    %c0_i32 = arith.constant 0 : i32
    %0 = arith.cmpi eq, %arg2, %c0_i32 : i32
    %1 = arith.extui %0 : i1 to i32
    %c0_i32_0 = arith.constant 0 : i32
    %2 = arith.cmpi ne, %1, %c0_i32_0 : i32
    scf.if %2 {
      %cst_10 = arith.constant 0.000000e+00 : f32
      %12 = vector.broadcast %cst_10 : f32 to vector<8x256xf32>
      %c0_11 = arith.constant 0 : index
      %c0_12 = arith.constant 0 : index
      %13 = vector.load %arg7[%c0_11, %c0_12] : memref<8x256xf32, #tpu.memory_space<vmem>>, vector<8x256xf32>
      tpu.vector_store %arg7[%c0_11, %c0_12], %12 {strides = array<i32>} : memref<8x256xf32, #tpu.memory_space<vmem>>, vector<8x256xf32>,
    } else {
    }
    %c0 = arith.constant 0 : index
    %c0_1 = arith.constant 0 : index
    %3 = vector.load %arg7[%c0, %c0_1] : memref<8x256xf32, #tpu.memory_space<vmem>>, vector<8x256xf32>
    %c0_2 = arith.constant 0 : index
    %c0_3 = arith.constant 0 : index
    %4 = vector.load %arg3[%c0_2, %c0_3] : memref<8x128xbf16, #tpu.memory_space<vmem>>, vector<8x128xbf16>
    %c0_4 = arith.constant 0 : index
    %c0_5 = arith.constant 0 : index
    %5 = vector.load %arg4[%c0_4, %c0_5] : memref<128x256xbf16, #tpu.memory_space<vmem>>, vector<128x256xbf16>
    %cst = arith.constant dense<0.000000e+00> : vector<8x256xf32>
    %6 = tpu.matmul %4, %5, %cst {dimension_numbers = #tpu.dot_dimension_numbers<[1], [0], [0], [1], [0, 0, 1, 1], [], []>} : vector<8x128xbf16>, vector<128x256xbf16>, vector<8x256xf32> -> vector<8x256xf32>
    %7 = arith.addf %3, %6 : vector<8x256xf32>
    %c0_6 = arith.constant 0 : index
    %c0_7 = arith.constant 0 : index
    %8 = vector.load %arg7[%c0_6, %c0_7] : memref<8x256xf32, #tpu.memory_space<vmem>>, vector<8x256xf32>
    tpu.vector_store %arg7[%c0_6, %c0_7], %7 {strides = array<i32>} : memref<8x256xf32, #tpu.memory_space<vmem>>, vector<8x256xf32>,
    %c0_i32_8 = arith.constant 0 : i32
    %9 = arith.cmpi eq, %arg2, %c0_i32_8 : i32
    %10 = arith.extui %9 : i1 to i32
    %c0_i32_9 = arith.constant 0 : i32
    %11 = arith.cmpi ne, %10, %c0_i32_9 : i32
    scf.if %11 {
      %c0_10 = arith.constant 0 : index
      %c0_11 = arith.constant 0 : index
      %12 = vector.load %arg7[%c0_10, %c0_11] : memref<8x256xf32, #tpu.memory_space<vmem>>, vector<8x256xf32>
      %c0_12 = arith.constant 0 : index
      %c0_13 = arith.constant 0 : index
      %13 = vector.load %arg5[%c0_12, %c0_13] : memref<1x256xf32, #tpu.memory_space<vmem>>, vector<1x256xf32>
      %14 = vector.broadcast %13 : vector<1x256xf32> to vector<8x256xf32>
      %15 = arith.addf %12, %14 : vector<8x256xf32>
      %16 = arith.truncf %15 : vector<8x256xf32> to vector<8x256xbf16>
      %c0_14 = arith.constant 0 : index
      %c0_15 = arith.constant 0 : index
      %17 = vector.load %arg6[%c0_14, %c0_15] : memref<8x256xbf16, #tpu.memory_space<vmem>>, vector<8x256xbf16>
      tpu.vector_store %arg6[%c0_14, %c0_15], %16 {strides = array<i32>} : memref<8x256xbf16, #tpu.memory_space<vmem>>, vector<8x256xbf16>,
    } else {
    }
    return
  }
  func.func @transform_0(%arg0: i32, %arg1: i32, %arg2: i32) -> (i32, i32) {
    %c0_i32 = arith.constant 0 : i32
    return %arg0, %arg2 : i32, i32
  }
  func.func @transform_1(%arg0: i32, %arg1: i32, %arg2: i32) -> (i32, i32) {
    %c0_i32 = arith.constant 0 : i32
    return %arg2, %arg1 : i32, i32
  }
  func.func @transform_2(%arg0: i32, %arg1: i32, %arg2: i32) -> (i32, i32) {
    %c0_i32 = arith.constant 0 : i32
    %c0_i32_0 = arith.constant 0 : i32
    return %c0_i32, %arg1 : i32, i32
  }
  func.func @transform_3(%arg0: i32, %arg1: i32, %arg2: i32) -> (i32, i32) {
    %c0_i32 = arith.constant 0 : i32
    return %arg0, %arg1 : i32, i32
  }
}

module attributes {stable_mosaic.version = 11 : i64} {
  func.func @_conv_bn_res_kernel(%arg0: i32, %arg1: i32, %arg2: i32, %arg3: memref<8x384xbf16, #tpu.memory_space<vmem>>, %arg4: memref<384x256xbf16, #tpu.memory_space<vmem>>, %arg5: memref<1x256xf32, #tpu.memory_space<vmem>>, %arg6: memref<8x256xbf16, #tpu.memory_space<vmem>>, %arg7: memref<8x256xbf16, #tpu.memory_space<vmem>>, %arg8: memref<8x256xf32, #tpu.memory_space<vmem>>) attributes {dimension_semantics = [#tpu.dimension_semantics<parallel>, #tpu.dimension_semantics<parallel>, #tpu.dimension_semantics<arbitrary>], iteration_bounds = array<i64: 1, 1, 6>, scalar_prefetch = 0 : i64, scratch_operands = 1 : i64, tpu.core_type = #tpu.core_type<tc>, window_params = [{transform_indices = @transform_0, window_bounds = array<i64: 8, 384>}, {transform_indices = @transform_1, window_bounds = array<i64: 384, 256>}, {transform_indices = @transform_2, window_bounds = array<i64: 1, 256>}, {transform_indices = @transform_3, window_bounds = array<i64: 8, 256>}, {transform_indices = @transform_4, window_bounds = array<i64: 8, 256>}]} {
    %c0_i32 = arith.constant 0 : i32
    %0 = arith.cmpi eq, %arg2, %c0_i32 : i32
    %1 = arith.extui %0 : i1 to i32
    %c0_i32_0 = arith.constant 0 : i32
    %2 = arith.cmpi ne, %1, %c0_i32_0 : i32
    scf.if %2 {
      %cst_9 = arith.constant 0.000000e+00 : f32
      %12 = vector.broadcast %cst_9 : f32 to vector<8x256xf32>
      %c0_10 = arith.constant 0 : index
      %c0_11 = arith.constant 0 : index
      %13 = vector.load %arg8[%c0_10, %c0_11] : memref<8x256xf32, #tpu.memory_space<vmem>>, vector<8x256xf32>
      tpu.vector_store %arg8[%c0_10, %c0_11], %12 {strides = array<i32>} : memref<8x256xf32, #tpu.memory_space<vmem>>, vector<8x256xf32>,
    } else {
    }
    %c0 = arith.constant 0 : index
    %c0_1 = arith.constant 0 : index
    %3 = vector.load %arg8[%c0, %c0_1] : memref<8x256xf32, #tpu.memory_space<vmem>>, vector<8x256xf32>
    %c0_2 = arith.constant 0 : index
    %c0_3 = arith.constant 0 : index
    %4 = vector.load %arg3[%c0_2, %c0_3] : memref<8x384xbf16, #tpu.memory_space<vmem>>, vector<8x384xbf16>
    %c0_4 = arith.constant 0 : index
    %c0_5 = arith.constant 0 : index
    %5 = vector.load %arg4[%c0_4, %c0_5] : memref<384x256xbf16, #tpu.memory_space<vmem>>, vector<384x256xbf16>
    %cst = arith.constant dense<0.000000e+00> : vector<8x256xf32>
    %6 = tpu.matmul %4, %5, %cst {dimension_numbers = #tpu.dot_dimension_numbers<[1], [0], [0], [1], [0, 0, 1, 1], [], []>} : vector<8x384xbf16>, vector<384x256xbf16>, vector<8x256xf32> -> vector<8x256xf32>
    %7 = arith.addf %3, %6 : vector<8x256xf32>
    %c0_6 = arith.constant 0 : index
    %c0_7 = arith.constant 0 : index
    %8 = vector.load %arg8[%c0_6, %c0_7] : memref<8x256xf32, #tpu.memory_space<vmem>>, vector<8x256xf32>
    tpu.vector_store %arg8[%c0_6, %c0_7], %7 {strides = array<i32>} : memref<8x256xf32, #tpu.memory_space<vmem>>, vector<8x256xf32>,
    %c5_i32 = arith.constant 5 : i32
    %9 = arith.cmpi eq, %arg2, %c5_i32 : i32
    %10 = arith.extui %9 : i1 to i32
    %c0_i32_8 = arith.constant 0 : i32
    %11 = arith.cmpi ne, %10, %c0_i32_8 : i32
    scf.if %11 {
      %c0_9 = arith.constant 0 : index
      %c0_10 = arith.constant 0 : index
      %12 = vector.load %arg8[%c0_9, %c0_10] : memref<8x256xf32, #tpu.memory_space<vmem>>, vector<8x256xf32>
      %c0_11 = arith.constant 0 : index
      %c0_12 = arith.constant 0 : index
      %13 = vector.load %arg5[%c0_11, %c0_12] : memref<1x256xf32, #tpu.memory_space<vmem>>, vector<1x256xf32>
      %14 = vector.broadcast %13 : vector<1x256xf32> to vector<8x256xf32>
      %15 = arith.addf %12, %14 : vector<8x256xf32>
      %c0_13 = arith.constant 0 : index
      %c0_14 = arith.constant 0 : index
      %16 = vector.load %arg6[%c0_13, %c0_14] : memref<8x256xbf16, #tpu.memory_space<vmem>>, vector<8x256xbf16>
      %17 = arith.extf %16 : vector<8x256xbf16> to vector<8x256xf32>
      %18 = arith.addf %15, %17 : vector<8x256xf32>
      %cst_15 = arith.constant 0.000000e+00 : f32
      %19 = vector.broadcast %cst_15 : f32 to vector<8x256xf32>
      %20 = arith.maximumf %18, %19 : vector<8x256xf32>
      %21 = arith.truncf %20 : vector<8x256xf32> to vector<8x256xbf16>
      %c0_16 = arith.constant 0 : index
      %c0_17 = arith.constant 0 : index
      %22 = vector.load %arg7[%c0_16, %c0_17] : memref<8x256xbf16, #tpu.memory_space<vmem>>, vector<8x256xbf16>
      tpu.vector_store %arg7[%c0_16, %c0_17], %21 {strides = array<i32>} : memref<8x256xbf16, #tpu.memory_space<vmem>>, vector<8x256xbf16>,
    } else {
    }
    return
  }
  func.func @transform_0(%arg0: i32, %arg1: i32, %arg2: i32) -> (i32, i32) {
    %c0_i32 = arith.constant 0 : i32
    return %arg0, %arg2 : i32, i32
  }
  func.func @transform_1(%arg0: i32, %arg1: i32, %arg2: i32) -> (i32, i32) {
    %c0_i32 = arith.constant 0 : i32
    return %arg2, %arg1 : i32, i32
  }
  func.func @transform_2(%arg0: i32, %arg1: i32, %arg2: i32) -> (i32, i32) {
    %c0_i32 = arith.constant 0 : i32
    %c0_i32_0 = arith.constant 0 : i32
    return %c0_i32, %arg1 : i32, i32
  }
  func.func @transform_3(%arg0: i32, %arg1: i32, %arg2: i32) -> (i32, i32) {
    %c0_i32 = arith.constant 0 : i32
    return %arg0, %arg1 : i32, i32
  }
  func.func @transform_4(%arg0: i32, %arg1: i32, %arg2: i32) -> (i32, i32) {
    %c0_i32 = arith.constant 0 : i32
    return %arg0, %arg1 : i32, i32
  }
}

module attributes {stable_mosaic.version = 11 : i64} {
  func.func @_conv_bn_kernel(%arg0: i32, %arg1: i32, %arg2: i32, %arg3: memref<8x384xbf16, #tpu.memory_space<vmem>>, %arg4: memref<384x256xbf16, #tpu.memory_space<vmem>>, %arg5: memref<1x256xf32, #tpu.memory_space<vmem>>, %arg6: memref<8x256xbf16, #tpu.memory_space<vmem>>, %arg7: memref<8x256xf32, #tpu.memory_space<vmem>>) attributes {dimension_semantics = [#tpu.dimension_semantics<parallel>, #tpu.dimension_semantics<parallel>, #tpu.dimension_semantics<arbitrary>], iteration_bounds = array<i64: 1, 1, 6>, scalar_prefetch = 0 : i64, scratch_operands = 1 : i64, tpu.core_type = #tpu.core_type<tc>, window_params = [{transform_indices = @transform_0, window_bounds = array<i64: 8, 384>}, {transform_indices = @transform_1, window_bounds = array<i64: 384, 256>}, {transform_indices = @transform_2, window_bounds = array<i64: 1, 256>}, {transform_indices = @transform_3, window_bounds = array<i64: 8, 256>}]} {
    %c0_i32 = arith.constant 0 : i32
    %0 = arith.cmpi eq, %arg2, %c0_i32 : i32
    %1 = arith.extui %0 : i1 to i32
    %c0_i32_0 = arith.constant 0 : i32
    %2 = arith.cmpi ne, %1, %c0_i32_0 : i32
    scf.if %2 {
      %cst_9 = arith.constant 0.000000e+00 : f32
      %12 = vector.broadcast %cst_9 : f32 to vector<8x256xf32>
      %c0_10 = arith.constant 0 : index
      %c0_11 = arith.constant 0 : index
      %13 = vector.load %arg7[%c0_10, %c0_11] : memref<8x256xf32, #tpu.memory_space<vmem>>, vector<8x256xf32>
      tpu.vector_store %arg7[%c0_10, %c0_11], %12 {strides = array<i32>} : memref<8x256xf32, #tpu.memory_space<vmem>>, vector<8x256xf32>,
    } else {
    }
    %c0 = arith.constant 0 : index
    %c0_1 = arith.constant 0 : index
    %3 = vector.load %arg7[%c0, %c0_1] : memref<8x256xf32, #tpu.memory_space<vmem>>, vector<8x256xf32>
    %c0_2 = arith.constant 0 : index
    %c0_3 = arith.constant 0 : index
    %4 = vector.load %arg3[%c0_2, %c0_3] : memref<8x384xbf16, #tpu.memory_space<vmem>>, vector<8x384xbf16>
    %c0_4 = arith.constant 0 : index
    %c0_5 = arith.constant 0 : index
    %5 = vector.load %arg4[%c0_4, %c0_5] : memref<384x256xbf16, #tpu.memory_space<vmem>>, vector<384x256xbf16>
    %cst = arith.constant dense<0.000000e+00> : vector<8x256xf32>
    %6 = tpu.matmul %4, %5, %cst {dimension_numbers = #tpu.dot_dimension_numbers<[1], [0], [0], [1], [0, 0, 1, 1], [], []>} : vector<8x384xbf16>, vector<384x256xbf16>, vector<8x256xf32> -> vector<8x256xf32>
    %7 = arith.addf %3, %6 : vector<8x256xf32>
    %c0_6 = arith.constant 0 : index
    %c0_7 = arith.constant 0 : index
    %8 = vector.load %arg7[%c0_6, %c0_7] : memref<8x256xf32, #tpu.memory_space<vmem>>, vector<8x256xf32>
    tpu.vector_store %arg7[%c0_6, %c0_7], %7 {strides = array<i32>} : memref<8x256xf32, #tpu.memory_space<vmem>>, vector<8x256xf32>,
    %c5_i32 = arith.constant 5 : i32
    %9 = arith.cmpi eq, %arg2, %c5_i32 : i32
    %10 = arith.extui %9 : i1 to i32
    %c0_i32_8 = arith.constant 0 : i32
    %11 = arith.cmpi ne, %10, %c0_i32_8 : i32
    scf.if %11 {
      %c0_9 = arith.constant 0 : index
      %c0_10 = arith.constant 0 : index
      %12 = vector.load %arg7[%c0_9, %c0_10] : memref<8x256xf32, #tpu.memory_space<vmem>>, vector<8x256xf32>
      %c0_11 = arith.constant 0 : index
      %c0_12 = arith.constant 0 : index
      %13 = vector.load %arg5[%c0_11, %c0_12] : memref<1x256xf32, #tpu.memory_space<vmem>>, vector<1x256xf32>
      %14 = vector.broadcast %13 : vector<1x256xf32> to vector<8x256xf32>
      %15 = arith.addf %12, %14 : vector<8x256xf32>
      %cst_13 = arith.constant 0.000000e+00 : f32
      %16 = vector.broadcast %cst_13 : f32 to vector<8x256xf32>
      %17 = arith.maximumf %15, %16 : vector<8x256xf32>
      %18 = arith.truncf %17 : vector<8x256xf32> to vector<8x256xbf16>
      %c0_14 = arith.constant 0 : index
      %c0_15 = arith.constant 0 : index
      %19 = vector.load %arg6[%c0_14, %c0_15] : memref<8x256xbf16, #tpu.memory_space<vmem>>, vector<8x256xbf16>
      tpu.vector_store %arg6[%c0_14, %c0_15], %18 {strides = array<i32>} : memref<8x256xbf16, #tpu.memory_space<vmem>>, vector<8x256xbf16>,
    } else {
    }
    return
  }
  func.func @transform_0(%arg0: i32, %arg1: i32, %arg2: i32) -> (i32, i32) {
    %c0_i32 = arith.constant 0 : i32
    return %arg0, %arg2 : i32, i32
  }
  func.func @transform_1(%arg0: i32, %arg1: i32, %arg2: i32) -> (i32, i32) {
    %c0_i32 = arith.constant 0 : i32
    return %arg2, %arg1 : i32, i32
  }
  func.func @transform_2(%arg0: i32, %arg1: i32, %arg2: i32) -> (i32, i32) {
    %c0_i32 = arith.constant 0 : i32
    %c0_i32_0 = arith.constant 0 : i32
    return %c0_i32, %arg1 : i32, i32
  }
  func.func @transform_3(%arg0: i32, %arg1: i32, %arg2: i32) -> (i32, i32) {
    %c0_i32 = arith.constant 0 : i32
    return %arg0, %arg1 : i32, i32
  }
}

module attributes {stable_mosaic.version = 11 : i64} {
  func.func @_conv_bn_kernel(%arg0: i32, %arg1: i32, %arg2: i32, %arg3: memref<8x384xbf16, #tpu.memory_space<vmem>>, %arg4: memref<384x256xbf16, #tpu.memory_space<vmem>>, %arg5: memref<1x256xf32, #tpu.memory_space<vmem>>, %arg6: memref<8x256xbf16, #tpu.memory_space<vmem>>, %arg7: memref<8x256xf32, #tpu.memory_space<vmem>>) attributes {dimension_semantics = [#tpu.dimension_semantics<parallel>, #tpu.dimension_semantics<parallel>, #tpu.dimension_semantics<arbitrary>], iteration_bounds = array<i64: 1, 2, 6>, scalar_prefetch = 0 : i64, scratch_operands = 1 : i64, tpu.core_type = #tpu.core_type<tc>, window_params = [{transform_indices = @transform_0, window_bounds = array<i64: 8, 384>}, {transform_indices = @transform_1, window_bounds = array<i64: 384, 256>}, {transform_indices = @transform_2, window_bounds = array<i64: 1, 256>}, {transform_indices = @transform_3, window_bounds = array<i64: 8, 256>}]} {
    %c0_i32 = arith.constant 0 : i32
    %0 = arith.cmpi eq, %arg2, %c0_i32 : i32
    %1 = arith.extui %0 : i1 to i32
    %c0_i32_0 = arith.constant 0 : i32
    %2 = arith.cmpi ne, %1, %c0_i32_0 : i32
    scf.if %2 {
      %cst_9 = arith.constant 0.000000e+00 : f32
      %12 = vector.broadcast %cst_9 : f32 to vector<8x256xf32>
      %c0_10 = arith.constant 0 : index
      %c0_11 = arith.constant 0 : index
      %13 = vector.load %arg7[%c0_10, %c0_11] : memref<8x256xf32, #tpu.memory_space<vmem>>, vector<8x256xf32>
      tpu.vector_store %arg7[%c0_10, %c0_11], %12 {strides = array<i32>} : memref<8x256xf32, #tpu.memory_space<vmem>>, vector<8x256xf32>,
    } else {
    }
    %c0 = arith.constant 0 : index
    %c0_1 = arith.constant 0 : index
    %3 = vector.load %arg7[%c0, %c0_1] : memref<8x256xf32, #tpu.memory_space<vmem>>, vector<8x256xf32>
    %c0_2 = arith.constant 0 : index
    %c0_3 = arith.constant 0 : index
    %4 = vector.load %arg3[%c0_2, %c0_3] : memref<8x384xbf16, #tpu.memory_space<vmem>>, vector<8x384xbf16>
    %c0_4 = arith.constant 0 : index
    %c0_5 = arith.constant 0 : index
    %5 = vector.load %arg4[%c0_4, %c0_5] : memref<384x256xbf16, #tpu.memory_space<vmem>>, vector<384x256xbf16>
    %cst = arith.constant dense<0.000000e+00> : vector<8x256xf32>
    %6 = tpu.matmul %4, %5, %cst {dimension_numbers = #tpu.dot_dimension_numbers<[1], [0], [0], [1], [0, 0, 1, 1], [], []>} : vector<8x384xbf16>, vector<384x256xbf16>, vector<8x256xf32> -> vector<8x256xf32>
    %7 = arith.addf %3, %6 : vector<8x256xf32>
    %c0_6 = arith.constant 0 : index
    %c0_7 = arith.constant 0 : index
    %8 = vector.load %arg7[%c0_6, %c0_7] : memref<8x256xf32, #tpu.memory_space<vmem>>, vector<8x256xf32>
    tpu.vector_store %arg7[%c0_6, %c0_7], %7 {strides = array<i32>} : memref<8x256xf32, #tpu.memory_space<vmem>>, vector<8x256xf32>,
    %c5_i32 = arith.constant 5 : i32
    %9 = arith.cmpi eq, %arg2, %c5_i32 : i32
    %10 = arith.extui %9 : i1 to i32
    %c0_i32_8 = arith.constant 0 : i32
    %11 = arith.cmpi ne, %10, %c0_i32_8 : i32
    scf.if %11 {
      %c0_9 = arith.constant 0 : index
      %c0_10 = arith.constant 0 : index
      %12 = vector.load %arg7[%c0_9, %c0_10] : memref<8x256xf32, #tpu.memory_space<vmem>>, vector<8x256xf32>
      %c0_11 = arith.constant 0 : index
      %c0_12 = arith.constant 0 : index
      %13 = vector.load %arg5[%c0_11, %c0_12] : memref<1x256xf32, #tpu.memory_space<vmem>>, vector<1x256xf32>
      %14 = vector.broadcast %13 : vector<1x256xf32> to vector<8x256xf32>
      %15 = arith.addf %12, %14 : vector<8x256xf32>
      %cst_13 = arith.constant 0.000000e+00 : f32
      %16 = vector.broadcast %cst_13 : f32 to vector<8x256xf32>
      %17 = arith.maximumf %15, %16 : vector<8x256xf32>
      %18 = arith.truncf %17 : vector<8x256xf32> to vector<8x256xbf16>
      %c0_14 = arith.constant 0 : index
      %c0_15 = arith.constant 0 : index
      %19 = vector.load %arg6[%c0_14, %c0_15] : memref<8x256xbf16, #tpu.memory_space<vmem>>, vector<8x256xbf16>
      tpu.vector_store %arg6[%c0_14, %c0_15], %18 {strides = array<i32>} : memref<8x256xbf16, #tpu.memory_space<vmem>>, vector<8x256xbf16>,
    } else {
    }
    return
  }
  func.func @transform_0(%arg0: i32, %arg1: i32, %arg2: i32) -> (i32, i32) {
    %c0_i32 = arith.constant 0 : i32
    return %arg0, %arg2 : i32, i32
  }
  func.func @transform_1(%arg0: i32, %arg1: i32, %arg2: i32) -> (i32, i32) {
    %c0_i32 = arith.constant 0 : i32
    return %arg2, %arg1 : i32, i32
  }
  func.func @transform_2(%arg0: i32, %arg1: i32, %arg2: i32) -> (i32, i32) {
    %c0_i32 = arith.constant 0 : i32
    %c0_i32_0 = arith.constant 0 : i32
    return %c0_i32, %arg1 : i32, i32
  }
  func.func @transform_3(%arg0: i32, %arg1: i32, %arg2: i32) -> (i32, i32) {
    %c0_i32 = arith.constant 0 : i32
    return %arg0, %arg1 : i32, i32
  }
}

module attributes {stable_mosaic.version = 11 : i64} {
  func.func @_conv_bn_kernel(%arg0: i32, %arg1: i32, %arg2: i32, %arg3: memref<8x256xbf16, #tpu.memory_space<vmem>>, %arg4: memref<256x256xbf16, #tpu.memory_space<vmem>>, %arg5: memref<1x256xf32, #tpu.memory_space<vmem>>, %arg6: memref<8x256xbf16, #tpu.memory_space<vmem>>, %arg7: memref<8x256xf32, #tpu.memory_space<vmem>>) attributes {dimension_semantics = [#tpu.dimension_semantics<parallel>, #tpu.dimension_semantics<parallel>, #tpu.dimension_semantics<arbitrary>], iteration_bounds = array<i64: 1, 2, 1>, scalar_prefetch = 0 : i64, scratch_operands = 1 : i64, tpu.core_type = #tpu.core_type<tc>, window_params = [{transform_indices = @transform_0, window_bounds = array<i64: 8, 256>}, {transform_indices = @transform_1, window_bounds = array<i64: 256, 256>}, {transform_indices = @transform_2, window_bounds = array<i64: 1, 256>}, {transform_indices = @transform_3, window_bounds = array<i64: 8, 256>}]} {
    %c0_i32 = arith.constant 0 : i32
    %0 = arith.cmpi eq, %arg2, %c0_i32 : i32
    %1 = arith.extui %0 : i1 to i32
    %c0_i32_0 = arith.constant 0 : i32
    %2 = arith.cmpi ne, %1, %c0_i32_0 : i32
    scf.if %2 {
      %cst_10 = arith.constant 0.000000e+00 : f32
      %12 = vector.broadcast %cst_10 : f32 to vector<8x256xf32>
      %c0_11 = arith.constant 0 : index
      %c0_12 = arith.constant 0 : index
      %13 = vector.load %arg7[%c0_11, %c0_12] : memref<8x256xf32, #tpu.memory_space<vmem>>, vector<8x256xf32>
      tpu.vector_store %arg7[%c0_11, %c0_12], %12 {strides = array<i32>} : memref<8x256xf32, #tpu.memory_space<vmem>>, vector<8x256xf32>,
    } else {
    }
    %c0 = arith.constant 0 : index
    %c0_1 = arith.constant 0 : index
    %3 = vector.load %arg7[%c0, %c0_1] : memref<8x256xf32, #tpu.memory_space<vmem>>, vector<8x256xf32>
    %c0_2 = arith.constant 0 : index
    %c0_3 = arith.constant 0 : index
    %4 = vector.load %arg3[%c0_2, %c0_3] : memref<8x256xbf16, #tpu.memory_space<vmem>>, vector<8x256xbf16>
    %c0_4 = arith.constant 0 : index
    %c0_5 = arith.constant 0 : index
    %5 = vector.load %arg4[%c0_4, %c0_5] : memref<256x256xbf16, #tpu.memory_space<vmem>>, vector<256x256xbf16>
    %cst = arith.constant dense<0.000000e+00> : vector<8x256xf32>
    %6 = tpu.matmul %4, %5, %cst {dimension_numbers = #tpu.dot_dimension_numbers<[1], [0], [0], [1], [0, 0, 1, 1], [], []>} : vector<8x256xbf16>, vector<256x256xbf16>, vector<8x256xf32> -> vector<8x256xf32>
    %7 = arith.addf %3, %6 : vector<8x256xf32>
    %c0_6 = arith.constant 0 : index
    %c0_7 = arith.constant 0 : index
    %8 = vector.load %arg7[%c0_6, %c0_7] : memref<8x256xf32, #tpu.memory_space<vmem>>, vector<8x256xf32>
    tpu.vector_store %arg7[%c0_6, %c0_7], %7 {strides = array<i32>} : memref<8x256xf32, #tpu.memory_space<vmem>>, vector<8x256xf32>,
    %c0_i32_8 = arith.constant 0 : i32
    %9 = arith.cmpi eq, %arg2, %c0_i32_8 : i32
    %10 = arith.extui %9 : i1 to i32
    %c0_i32_9 = arith.constant 0 : i32
    %11 = arith.cmpi ne, %10, %c0_i32_9 : i32
    scf.if %11 {
      %c0_10 = arith.constant 0 : index
      %c0_11 = arith.constant 0 : index
      %12 = vector.load %arg7[%c0_10, %c0_11] : memref<8x256xf32, #tpu.memory_space<vmem>>, vector<8x256xf32>
      %c0_12 = arith.constant 0 : index
      %c0_13 = arith.constant 0 : index
      %13 = vector.load %arg5[%c0_12, %c0_13] : memref<1x256xf32, #tpu.memory_space<vmem>>, vector<1x256xf32>
      %14 = vector.broadcast %13 : vector<1x256xf32> to vector<8x256xf32>
      %15 = arith.addf %12, %14 : vector<8x256xf32>
      %16 = arith.truncf %15 : vector<8x256xf32> to vector<8x256xbf16>
      %c0_14 = arith.constant 0 : index
      %c0_15 = arith.constant 0 : index
      %17 = vector.load %arg6[%c0_14, %c0_15] : memref<8x256xbf16, #tpu.memory_space<vmem>>, vector<8x256xbf16>
      tpu.vector_store %arg6[%c0_14, %c0_15], %16 {strides = array<i32>} : memref<8x256xbf16, #tpu.memory_space<vmem>>, vector<8x256xbf16>,
    } else {
    }
    return
  }
  func.func @transform_0(%arg0: i32, %arg1: i32, %arg2: i32) -> (i32, i32) {
    %c0_i32 = arith.constant 0 : i32
    return %arg0, %arg2 : i32, i32
  }
  func.func @transform_1(%arg0: i32, %arg1: i32, %arg2: i32) -> (i32, i32) {
    %c0_i32 = arith.constant 0 : i32
    return %arg2, %arg1 : i32, i32
  }
  func.func @transform_2(%arg0: i32, %arg1: i32, %arg2: i32) -> (i32, i32) {
    %c0_i32 = arith.constant 0 : i32
    %c0_i32_0 = arith.constant 0 : i32
    return %c0_i32, %arg1 : i32, i32
  }
  func.func @transform_3(%arg0: i32, %arg1: i32, %arg2: i32) -> (i32, i32) {
    %c0_i32 = arith.constant 0 : i32
    return %arg0, %arg1 : i32, i32
  }
}

module attributes {stable_mosaic.version = 11 : i64} {
  func.func @_conv_bn_res_kernel(%arg0: i32, %arg1: i32, %arg2: i32, %arg3: memref<8x512xbf16, #tpu.memory_space<vmem>>, %arg4: memref<512x256xbf16, #tpu.memory_space<vmem>>, %arg5: memref<1x256xf32, #tpu.memory_space<vmem>>, %arg6: memref<8x256xbf16, #tpu.memory_space<vmem>>, %arg7: memref<8x256xbf16, #tpu.memory_space<vmem>>, %arg8: memref<8x256xf32, #tpu.memory_space<vmem>>) attributes {dimension_semantics = [#tpu.dimension_semantics<parallel>, #tpu.dimension_semantics<parallel>, #tpu.dimension_semantics<arbitrary>], iteration_bounds = array<i64: 1, 2, 9>, scalar_prefetch = 0 : i64, scratch_operands = 1 : i64, tpu.core_type = #tpu.core_type<tc>, window_params = [{transform_indices = @transform_0, window_bounds = array<i64: 8, 512>}, {transform_indices = @transform_1, window_bounds = array<i64: 512, 256>}, {transform_indices = @transform_2, window_bounds = array<i64: 1, 256>}, {transform_indices = @transform_3, window_bounds = array<i64: 8, 256>}, {transform_indices = @transform_4, window_bounds = array<i64: 8, 256>}]} {
    %c0_i32 = arith.constant 0 : i32
    %0 = arith.cmpi eq, %arg2, %c0_i32 : i32
    %1 = arith.extui %0 : i1 to i32
    %c0_i32_0 = arith.constant 0 : i32
    %2 = arith.cmpi ne, %1, %c0_i32_0 : i32
    scf.if %2 {
      %cst_9 = arith.constant 0.000000e+00 : f32
      %12 = vector.broadcast %cst_9 : f32 to vector<8x256xf32>
      %c0_10 = arith.constant 0 : index
      %c0_11 = arith.constant 0 : index
      %13 = vector.load %arg8[%c0_10, %c0_11] : memref<8x256xf32, #tpu.memory_space<vmem>>, vector<8x256xf32>
      tpu.vector_store %arg8[%c0_10, %c0_11], %12 {strides = array<i32>} : memref<8x256xf32, #tpu.memory_space<vmem>>, vector<8x256xf32>,
    } else {
    }
    %c0 = arith.constant 0 : index
    %c0_1 = arith.constant 0 : index
    %3 = vector.load %arg8[%c0, %c0_1] : memref<8x256xf32, #tpu.memory_space<vmem>>, vector<8x256xf32>
    %c0_2 = arith.constant 0 : index
    %c0_3 = arith.constant 0 : index
    %4 = vector.load %arg3[%c0_2, %c0_3] : memref<8x512xbf16, #tpu.memory_space<vmem>>, vector<8x512xbf16>
    %c0_4 = arith.constant 0 : index
    %c0_5 = arith.constant 0 : index
    %5 = vector.load %arg4[%c0_4, %c0_5] : memref<512x256xbf16, #tpu.memory_space<vmem>>, vector<512x256xbf16>
    %cst = arith.constant dense<0.000000e+00> : vector<8x256xf32>
    %6 = tpu.matmul %4, %5, %cst {dimension_numbers = #tpu.dot_dimension_numbers<[1], [0], [0], [1], [0, 0, 1, 1], [], []>} : vector<8x512xbf16>, vector<512x256xbf16>, vector<8x256xf32> -> vector<8x256xf32>
    %7 = arith.addf %3, %6 : vector<8x256xf32>
    %c0_6 = arith.constant 0 : index
    %c0_7 = arith.constant 0 : index
    %8 = vector.load %arg8[%c0_6, %c0_7] : memref<8x256xf32, #tpu.memory_space<vmem>>, vector<8x256xf32>
    tpu.vector_store %arg8[%c0_6, %c0_7], %7 {strides = array<i32>} : memref<8x256xf32, #tpu.memory_space<vmem>>, vector<8x256xf32>,
    %c8_i32 = arith.constant 8 : i32
    %9 = arith.cmpi eq, %arg2, %c8_i32 : i32
    %10 = arith.extui %9 : i1 to i32
    %c0_i32_8 = arith.constant 0 : i32
    %11 = arith.cmpi ne, %10, %c0_i32_8 : i32
    scf.if %11 {
      %c0_9 = arith.constant 0 : index
      %c0_10 = arith.constant 0 : index
      %12 = vector.load %arg8[%c0_9, %c0_10] : memref<8x256xf32, #tpu.memory_space<vmem>>, vector<8x256xf32>
      %c0_11 = arith.constant 0 : index
      %c0_12 = arith.constant 0 : index
      %13 = vector.load %arg5[%c0_11, %c0_12] : memref<1x256xf32, #tpu.memory_space<vmem>>, vector<1x256xf32>
      %14 = vector.broadcast %13 : vector<1x256xf32> to vector<8x256xf32>
      %15 = arith.addf %12, %14 : vector<8x256xf32>
      %c0_13 = arith.constant 0 : index
      %c0_14 = arith.constant 0 : index
      %16 = vector.load %arg6[%c0_13, %c0_14] : memref<8x256xbf16, #tpu.memory_space<vmem>>, vector<8x256xbf16>
      %17 = arith.extf %16 : vector<8x256xbf16> to vector<8x256xf32>
      %18 = arith.addf %15, %17 : vector<8x256xf32>
      %cst_15 = arith.constant 0.000000e+00 : f32
      %19 = vector.broadcast %cst_15 : f32 to vector<8x256xf32>
      %20 = arith.maximumf %18, %19 : vector<8x256xf32>
      %21 = arith.truncf %20 : vector<8x256xf32> to vector<8x256xbf16>
      %c0_16 = arith.constant 0 : index
      %c0_17 = arith.constant 0 : index
      %22 = vector.load %arg7[%c0_16, %c0_17] : memref<8x256xbf16, #tpu.memory_space<vmem>>, vector<8x256xbf16>
      tpu.vector_store %arg7[%c0_16, %c0_17], %21 {strides = array<i32>} : memref<8x256xbf16, #tpu.memory_space<vmem>>, vector<8x256xbf16>,
    } else {
    }
    return
  }
  func.func @transform_0(%arg0: i32, %arg1: i32, %arg2: i32) -> (i32, i32) {
    %c0_i32 = arith.constant 0 : i32
    return %arg0, %arg2 : i32, i32
  }
  func.func @transform_1(%arg0: i32, %arg1: i32, %arg2: i32) -> (i32, i32) {
    %c0_i32 = arith.constant 0 : i32
    return %arg2, %arg1 : i32, i32
  }
  func.func @transform_2(%arg0: i32, %arg1: i32, %arg2: i32) -> (i32, i32) {
    %c0_i32 = arith.constant 0 : i32
    %c0_i32_0 = arith.constant 0 : i32
    return %c0_i32, %arg1 : i32, i32
  }
  func.func @transform_3(%arg0: i32, %arg1: i32, %arg2: i32) -> (i32, i32) {
    %c0_i32 = arith.constant 0 : i32
    return %arg0, %arg1 : i32, i32
  }
  func.func @transform_4(%arg0: i32, %arg1: i32, %arg2: i32) -> (i32, i32) {
    %c0_i32 = arith.constant 0 : i32
    return %arg0, %arg1 : i32, i32
  }
}

module attributes {stable_mosaic.version = 11 : i64} {
  func.func @_conv_bn_kernel(%arg0: i32, %arg1: i32, %arg2: i32, %arg3: memref<8x512xbf16, #tpu.memory_space<vmem>>, %arg4: memref<512x256xbf16, #tpu.memory_space<vmem>>, %arg5: memref<1x256xf32, #tpu.memory_space<vmem>>, %arg6: memref<8x256xbf16, #tpu.memory_space<vmem>>, %arg7: memref<8x256xf32, #tpu.memory_space<vmem>>) attributes {dimension_semantics = [#tpu.dimension_semantics<parallel>, #tpu.dimension_semantics<parallel>, #tpu.dimension_semantics<arbitrary>], iteration_bounds = array<i64: 1, 2, 9>, scalar_prefetch = 0 : i64, scratch_operands = 1 : i64, tpu.core_type = #tpu.core_type<tc>, window_params = [{transform_indices = @transform_0, window_bounds = array<i64: 8, 512>}, {transform_indices = @transform_1, window_bounds = array<i64: 512, 256>}, {transform_indices = @transform_2, window_bounds = array<i64: 1, 256>}, {transform_indices = @transform_3, window_bounds = array<i64: 8, 256>}]} {
    %c0_i32 = arith.constant 0 : i32
    %0 = arith.cmpi eq, %arg2, %c0_i32 : i32
    %1 = arith.extui %0 : i1 to i32
    %c0_i32_0 = arith.constant 0 : i32
    %2 = arith.cmpi ne, %1, %c0_i32_0 : i32
    scf.if %2 {
      %cst_9 = arith.constant 0.000000e+00 : f32
      %12 = vector.broadcast %cst_9 : f32 to vector<8x256xf32>
      %c0_10 = arith.constant 0 : index
      %c0_11 = arith.constant 0 : index
      %13 = vector.load %arg7[%c0_10, %c0_11] : memref<8x256xf32, #tpu.memory_space<vmem>>, vector<8x256xf32>
      tpu.vector_store %arg7[%c0_10, %c0_11], %12 {strides = array<i32>} : memref<8x256xf32, #tpu.memory_space<vmem>>, vector<8x256xf32>,
    } else {
    }
    %c0 = arith.constant 0 : index
    %c0_1 = arith.constant 0 : index
    %3 = vector.load %arg7[%c0, %c0_1] : memref<8x256xf32, #tpu.memory_space<vmem>>, vector<8x256xf32>
    %c0_2 = arith.constant 0 : index
    %c0_3 = arith.constant 0 : index
    %4 = vector.load %arg3[%c0_2, %c0_3] : memref<8x512xbf16, #tpu.memory_space<vmem>>, vector<8x512xbf16>
    %c0_4 = arith.constant 0 : index
    %c0_5 = arith.constant 0 : index
    %5 = vector.load %arg4[%c0_4, %c0_5] : memref<512x256xbf16, #tpu.memory_space<vmem>>, vector<512x256xbf16>
    %cst = arith.constant dense<0.000000e+00> : vector<8x256xf32>
    %6 = tpu.matmul %4, %5, %cst {dimension_numbers = #tpu.dot_dimension_numbers<[1], [0], [0], [1], [0, 0, 1, 1], [], []>} : vector<8x512xbf16>, vector<512x256xbf16>, vector<8x256xf32> -> vector<8x256xf32>
    %7 = arith.addf %3, %6 : vector<8x256xf32>
    %c0_6 = arith.constant 0 : index
    %c0_7 = arith.constant 0 : index
    %8 = vector.load %arg7[%c0_6, %c0_7] : memref<8x256xf32, #tpu.memory_space<vmem>>, vector<8x256xf32>
    tpu.vector_store %arg7[%c0_6, %c0_7], %7 {strides = array<i32>} : memref<8x256xf32, #tpu.memory_space<vmem>>, vector<8x256xf32>,
    %c8_i32 = arith.constant 8 : i32
    %9 = arith.cmpi eq, %arg2, %c8_i32 : i32
    %10 = arith.extui %9 : i1 to i32
    %c0_i32_8 = arith.constant 0 : i32
    %11 = arith.cmpi ne, %10, %c0_i32_8 : i32
    scf.if %11 {
      %c0_9 = arith.constant 0 : index
      %c0_10 = arith.constant 0 : index
      %12 = vector.load %arg7[%c0_9, %c0_10] : memref<8x256xf32, #tpu.memory_space<vmem>>, vector<8x256xf32>
      %c0_11 = arith.constant 0 : index
      %c0_12 = arith.constant 0 : index
      %13 = vector.load %arg5[%c0_11, %c0_12] : memref<1x256xf32, #tpu.memory_space<vmem>>, vector<1x256xf32>
      %14 = vector.broadcast %13 : vector<1x256xf32> to vector<8x256xf32>
      %15 = arith.addf %12, %14 : vector<8x256xf32>
      %cst_13 = arith.constant 0.000000e+00 : f32
      %16 = vector.broadcast %cst_13 : f32 to vector<8x256xf32>
      %17 = arith.maximumf %15, %16 : vector<8x256xf32>
      %18 = arith.truncf %17 : vector<8x256xf32> to vector<8x256xbf16>
      %c0_14 = arith.constant 0 : index
      %c0_15 = arith.constant 0 : index
      %19 = vector.load %arg6[%c0_14, %c0_15] : memref<8x256xbf16, #tpu.memory_space<vmem>>, vector<8x256xbf16>
      tpu.vector_store %arg6[%c0_14, %c0_15], %18 {strides = array<i32>} : memref<8x256xbf16, #tpu.memory_space<vmem>>, vector<8x256xbf16>,
    } else {
    }
    return
  }
  func.func @transform_0(%arg0: i32, %arg1: i32, %arg2: i32) -> (i32, i32) {
    %c0_i32 = arith.constant 0 : i32
    return %arg0, %arg2 : i32, i32
  }
  func.func @transform_1(%arg0: i32, %arg1: i32, %arg2: i32) -> (i32, i32) {
    %c0_i32 = arith.constant 0 : i32
    return %arg2, %arg1 : i32, i32
  }
  func.func @transform_2(%arg0: i32, %arg1: i32, %arg2: i32) -> (i32, i32) {
    %c0_i32 = arith.constant 0 : i32
    %c0_i32_0 = arith.constant 0 : i32
    return %c0_i32, %arg1 : i32, i32
  }
  func.func @transform_3(%arg0: i32, %arg1: i32, %arg2: i32) -> (i32, i32) {
    %c0_i32 = arith.constant 0 : i32
    return %arg0, %arg1 : i32, i32
  }
}

module attributes {stable_mosaic.version = 11 : i64} {
  func.func @_avgpool_fc_kernel(%arg0: i32, %arg1: memref<8x1x512xbf16, #tpu.memory_space<vmem>>, %arg2: memref<512x1xf32, #tpu.memory_space<vmem>>, %arg3: memref<1x1xf32, #tpu.memory_space<vmem>>, %arg4: memref<8x512xf32, #tpu.memory_space<vmem>>, %arg5: memref<8x1xf32, #tpu.memory_space<vmem>>) attributes {dimension_semantics = [#tpu.dimension_semantics<parallel>], iteration_bounds = array<i64: 1>, scalar_prefetch = 0 : i64, scratch_operands = 0 : i64, tpu.core_type = #tpu.core_type<tc>, window_params = [{transform_indices = @transform_0, window_bounds = array<i64: 8, 1, 512>}, {pipeline_mode = #tpu.pipeline_mode<synchronous>, transform_indices = @transform_1, window_bounds = array<i64: 512, 1>}, {pipeline_mode = #tpu.pipeline_mode<synchronous>, transform_indices = @transform_2, window_bounds = array<i64: 1, 1>}, {transform_indices = @transform_3, window_bounds = array<i64: 8, 512>}, {transform_indices = @transform_4, window_bounds = array<i64: 8, 1>}]} {
    %c0 = arith.constant 0 : index
    %c0_0 = arith.constant 0 : index
    %c0_1 = arith.constant 0 : index
    %0 = vector.load %arg1[%c0, %c0_0, %c0_1] : memref<8x1x512xbf16, #tpu.memory_space<vmem>>, vector<8x1x512xbf16>
    %1 = arith.extf %0 : vector<8x1x512xbf16> to vector<8x1x512xf32>
    %cst = arith.constant dense<0.000000e+00> : vector<8x512xf32>
    %2 = vector.multi_reduction <add>, %1, %cst [1] : vector<8x1x512xf32> to vector<8x512xf32>
    %cst_2 = arith.constant 1.000000e+00 : f32
    %3 = vector.broadcast %cst_2 : f32 to vector<8x512xf32>
    %4 = arith.mulf %2, %3 : vector<8x512xf32>
    %c0_3 = arith.constant 0 : index
    %c0_4 = arith.constant 0 : index
    %5 = vector.load %arg4[%c0_3, %c0_4] : memref<8x512xf32, #tpu.memory_space<vmem>>, vector<8x512xf32>
    tpu.vector_store %arg4[%c0_3, %c0_4], %4 {strides = array<i32>} : memref<8x512xf32, #tpu.memory_space<vmem>>, vector<8x512xf32>,
    %c0_5 = arith.constant 0 : index
    %c0_6 = arith.constant 0 : index
    %6 = vector.load %arg2[%c0_5, %c0_6] : memref<512x1xf32, #tpu.memory_space<vmem>>, vector<512x1xf32>
    %cst_7 = arith.constant dense<0.000000e+00> : vector<8x1xf32>
    %7 = tpu.matmul %4, %6, %cst_7 {dimension_numbers = #tpu.dot_dimension_numbers<[1], [0], [0], [1], [0, 0, 1, 1], [], []>} : vector<8x512xf32>, vector<512x1xf32>, vector<8x1xf32> -> vector<8x1xf32>
    %c0_8 = arith.constant 0 : index
    %c0_9 = arith.constant 0 : index
    %8 = vector.load %arg3[%c0_8, %c0_9] : memref<1x1xf32, #tpu.memory_space<vmem>>, vector<1x1xf32>
    %9 = vector.broadcast %8 : vector<1x1xf32> to vector<8x1xf32>
    %10 = arith.addf %7, %9 : vector<8x1xf32>
    %c0_10 = arith.constant 0 : index
    %c0_11 = arith.constant 0 : index
    %11 = vector.load %arg5[%c0_10, %c0_11] : memref<8x1xf32, #tpu.memory_space<vmem>>, vector<8x1xf32>
    tpu.vector_store %arg5[%c0_10, %c0_11], %10 {strides = array<i32>} : memref<8x1xf32, #tpu.memory_space<vmem>>, vector<8x1xf32>,
    return
  }
  func.func @transform_0(%arg0: i32) -> (i32, i32, i32) {
    %c0_i32 = arith.constant 0 : i32
    %c0_i32_0 = arith.constant 0 : i32
    %c0_i32_1 = arith.constant 0 : i32
    return %arg0, %c0_i32, %c0_i32_0 : i32, i32, i32
  }
  func.func @transform_1(%arg0: i32) -> (i32, i32) {
    %c0_i32 = arith.constant 0 : i32
    %c0_i32_0 = arith.constant 0 : i32
    %c0_i32_1 = arith.constant 0 : i32
    return %c0_i32, %c0_i32_0 : i32, i32
  }
  func.func @transform_2(%arg0: i32) -> (i32, i32) {
    %c0_i32 = arith.constant 0 : i32
    %c0_i32_0 = arith.constant 0 : i32
    %c0_i32_1 = arith.constant 0 : i32
    return %c0_i32, %c0_i32_0 : i32, i32
  }
  func.func @transform_3(%arg0: i32) -> (i32, i32) {
    %c0_i32 = arith.constant 0 : i32
    %c0_i32_0 = arith.constant 0 : i32
    return %arg0, %c0_i32 : i32, i32
  }
  func.func @transform_4(%arg0: i32) -> (i32, i32) {
    %c0_i32 = arith.constant 0 : i32
    %c0_i32_0 = arith.constant 0 : i32
    return %arg0, %c0_i32 : i32, i32
  }
}

</mosaic_0001>

<bundles_post_ra>
// kernel: resnet_forward.22
= control target key start
LH: loop header
LB: loop body
LE: loop exit
PB: predicated region body
PF: predicated region fallthrough
CT: control target
= control target key end

     0   :  { %vm18_vm0 = vcmask 523264   ;;  %vm1389_vm1 = vcmask 519168   ;;  %s2852_s1 = inlined_call_operand.vmem [shape: bf16[256,64], index: 1, kind: input, shape index: {}]   ;;  %s2853_s0 = inlined_call_operand.vmem [shape: bf16[512,256], index: 0, kind: input, shape index: {}]   ;;  %s2854_s2 = inlined_call_operand.vmem [shape: f32[1,64], index: 2, kind: input, shape index: {}]   ;;  %s2855_s3 = inlined_call_operand.vmem [shape: bf16[512,64], index: 3, kind: output, shape index: {}]  }
   0x1   :  { %v1849_v0 = vld [vmem:[%s2852_s1 + $0x38] sm:$0xff]  ;;  %v1848_v2 = vld [vmem:[%s2852_s1 + $0x30] sm:$0xff]  ;;  %v1847_v4 = vld [vmem:[%s2852_s1 + $0x28] sm:$0xff] }
   0x2   :  { %v1857_v1 = vld [vmem:[%s2852_s1 + $0x78] sm:$0xff]  ;;  %659 = vmatpush.bf16.msra.mxu0 %v1849_v0  ;;  %1858 = vmatpush.bf16.msra.mxu2 %v1849_v0  ;;  %v1856_v3 = vld [vmem:[%s2852_s1 + $0x70] sm:$0xff]  ;;  %v1855_v5 = vld [vmem:[%s2852_s1 + $0x68] sm:$0xff] }
   0x3   :  { %828 = vmatpush.bf16.msra.mxu1 %v1857_v1  ;;  %1866 = vmatpush.bf16.msra.mxu3 %v1857_v1  ;;  %v1846_v6 = vld [vmem:[%s2852_s1 + $0x20] sm:$0xff]  ;;  %v1845_v8 = vld [vmem:[%s2852_s1 + $0x18] sm:$0xff]  ;;  %v1844_v10 = vld [vmem:[%s2852_s1 + $0x10] sm:$0xff] }
   0x4   :  { %v1854_v7 = vld [vmem:[%s2852_s1 + $0x60] sm:$0xff]  ;;  %v1853_v9 = vld [vmem:[%s2852_s1 + $0x58] sm:$0xff]  ;;  %v1852_v11 = vld [vmem:[%s2852_s1 + $0x50] sm:$0xff] }
   0x5   :  { %v1843_v12 = vld [vmem:[%s2852_s1 + $0x8] sm:$0xff]  ;;  %v1842_v14 = vld [vmem:[%s2852_s1] sm:$0xff]  ;;  %v1468_v28 = vld [vmem:[%s2853_s0 + $0x10] sm:$0xf] }
   0x6   :  { %660 = vmatpush.bf16.msra.mxu0 %v1848_v2  ;;  %1859 = vmatpush.bf16.msra.mxu2 %v1848_v2  ;;  %v1851_v13 = vld [vmem:[%s2852_s1 + $0x48] sm:$0xff]  ;;  %v1850_v15 = vld [vmem:[%s2852_s1 + $0x40] sm:$0xff]  ;;  %v1781_v29 = vld [vmem:[%s2853_s0 + $0x14] sm:$0xf0] }
   0x7   :  { %829 = vmatpush.bf16.msra.mxu1 %v1856_v3  ;;  %1867 = vmatpush.bf16.msra.mxu3 %v1856_v3  ;;  %v1460_v16 = vld [vmem:[%s2853_s0] sm:$0xf]  ;;  %v1779_v17 = vld [vmem:[%s2853_s0 + $0x4] sm:$0xf0]  ;;  %v1778_v20 = vld [vmem:[%s2853_s0 + $0x4] sm:$0xf]  ;;  %v1469_v36 = vor.u32 %v1781_v29, %v1468_v28 }
   0x8   :  { %v1588_v18 = vld [vmem:[%s2853_s0 + $0x100] sm:$0xf]  ;;  %v1811_v19 = vld [vmem:[%s2853_s0 + $0x104] sm:$0xf0]  ;;  %v1462_v21 = vld [vmem:[%s2853_s0 + $0x8] sm:$0xf0]  ;;  %v1461_v24 = vor.u32 %v1779_v17, %v1460_v16 }
   0x9   :  { %v1810_v22 = vld [vmem:[%s2853_s0 + $0x104] sm:$0xf]  ;;  %v1590_v23 = vld [vmem:[%s2853_s0 + $0x108] sm:$0xf0]  ;;  %v1589_v25 = vor.u32 %v1811_v19, %v1588_v18  ;;  %v1465_v26 = vor.u32 %v1778_v20, %v1462_v21  ;;  %v1596_v30 = vld [vmem:[%s2853_s0 + $0x110] sm:$0xf] }
   0xa   :  { %661 = vmatpush.bf16.msra.mxu0 %v1847_v4  ;;  %1860 = vmatpush.bf16.msra.mxu2 %v1847_v4  ;;  %v1593_v27 = vor.u32 %v1810_v22, %v1590_v23  ;;  %v1813_v31 = vld [vmem:[%s2853_s0 + $0x114] sm:$0xf0]  ;;  %v1780_v32 = vld [vmem:[%s2853_s0 + $0x14] sm:$0xf]  ;;  %v1470_v33 = vld [vmem:[%s2853_s0 + $0x18] sm:$0xf0] }
   0xb   :  { %830 = vmatpush.bf16.msra.mxu1 %v1855_v5  ;;  %1868 = vmatpush.bf16.msra.mxu3 %v1855_v5  ;;  %v1812_v34 = vld [vmem:[%s2853_s0 + $0x114] sm:$0xf]  ;;  %v1598_v35 = vld [vmem:[%s2853_s0 + $0x118] sm:$0xf0]  ;;  %v1597_v37 = vor.u32 %v1813_v31, %v1596_v30  ;;  %v1473_v38 = vor.u32 %v1780_v32, %v1470_v33  ;;  %v1476_v40 = vld [vmem:[%s2853_s0 + $0x20] sm:$0xf] }
   0xc   :  { %v1601_v39 = vor.u32 %v1812_v34, %v1598_v35  ;;  %v1783_v41 = vld [vmem:[%s2853_s0 + $0x24] sm:$0xf0]  ;;  %v1604_v42 = vld [vmem:[%s2853_s0 + $0x120] sm:$0xf]  ;;  %v1782_v44 = vld [vmem:[%s2853_s0 + $0x24] sm:$0xf] }
   0xd   :  { %v1815_v43 = vld [vmem:[%s2853_s0 + $0x124] sm:$0xf0]  ;;  %v1478_v45 = vld [vmem:[%s2853_s0 + $0x28] sm:$0xf0]  ;;  %v1814_v46 = vld [vmem:[%s2853_s0 + $0x124] sm:$0xf]  ;;  %v1477_v48 = vor.u32 %v1783_v41, %v1476_v40 }
   0xe   :  { %662 = vmatpush.bf16.msra.mxu0 %v1846_v6  ;;  %1861 = vmatpush.bf16.msra.mxu2 %v1846_v6  ;;  %v1606_v47 = vld [vmem:[%s2853_s0 + $0x128] sm:$0xf0]  ;;  %v1605_v49 = vor.u32 %v1815_v43, %v1604_v42  ;;  %v1481_v50 = vor.u32 %v1782_v44, %v1478_v45  ;;  %v1484_v52 = vld [vmem:[%s2853_s0 + $0x30] sm:$0xf]  ;;  %v1785_v53 = vld [vmem:[%s2853_s0 + $0x34] sm:$0xf0] }
   0xf   :  { %831 = vmatpush.bf16.msra.mxu1 %v1854_v7  ;;  %1869 = vmatpush.bf16.msra.mxu3 %v1854_v7  ;;  %v1609_v51 = vor.u32 %v1814_v46, %v1606_v47  ;;  %v1612_v54 = vld [vmem:[%s2853_s0 + $0x130] sm:$0xf]  ;;  %v1817_v55 = vld [vmem:[%s2853_s0 + $0x134] sm:$0xf0]  ;;  %v1784_v56 = vld [vmem:[%s2853_s0 + $0x34] sm:$0xf]  ;;  %v1485_v60 = vor.u32 %v1785_v53, %v1484_v52 }
  0x10   :  { %v1486_v57 = vld [vmem:[%s2853_s0 + $0x38] sm:$0xf0]  ;;  %v1816_v58 = vld [vmem:[%s2853_s0 + $0x134] sm:$0xf]  ;;  %v1613_v61 = vor.u32 %v1817_v55, %v1612_v54  ;;  %v1492_v0 = vld [vmem:[%s2853_s0 + $0x40] sm:$0xf] }
  0x11   :  { %v1614_v59 = vld [vmem:[%s2853_s0 + $0x138] sm:$0xf0]  ;;  %v1489_v62 = vor.u32 %v1784_v56, %v1486_v57  ;;  %v1787_v1 = vld [vmem:[%s2853_s0 + $0x44] sm:$0xf0]  ;;  %v1620_v2 = vld [vmem:[%s2853_s0 + $0x140] sm:$0xf] }
  0x12   :  { %663 = vmatpush.bf16.msra.mxu0 %v1845_v8  ;;  %1862 = vmatpush.bf16.msra.mxu2 %v1845_v8  ;;  %v1617_v63 = vor.u32 %v1816_v58, %v1614_v59  ;;  %v1819_v3 = vld [vmem:[%s2853_s0 + $0x144] sm:$0xf0]  ;;  %v1786_v4 = vld [vmem:[%s2853_s0 + $0x44] sm:$0xf]  ;;  %v1494_v5 = vld [vmem:[%s2853_s0 + $0x48] sm:$0xf0]  ;;  %v1493_v8 = vor.u32 %v1787_v1, %v1492_v0 }
  0x13   :  { %832 = vmatpush.bf16.msra.mxu1 %v1853_v9  ;;  %1870 = vmatpush.bf16.msra.mxu3 %v1853_v9  ;;  %v1818_v6 = vld [vmem:[%s2853_s0 + $0x144] sm:$0xf]  ;;  %v1622_v7 = vld [vmem:[%s2853_s0 + $0x148] sm:$0xf0]  ;;  %v1621_v9 = vor.u32 %v1819_v3, %v1620_v2  ;;  %v1788_v16 = vld [vmem:[%s2853_s0 + $0x54] sm:$0xf] }
  0x14   :  { %v1502_v17 = vld [vmem:[%s2853_s0 + $0x58] sm:$0xf0]  ;;  %v1820_v18 = vld [vmem:[%s2853_s0 + $0x154] sm:$0xf]  ;;  %v1790_v28 = vld [vmem:[%s2853_s0 + $0x64] sm:$0xf] }
  0x15   :  { %v1630_v19 = vld [vmem:[%s2853_s0 + $0x158] sm:$0xf0]  ;;  %v1505_v22 = vor.u32 %v1788_v16, %v1502_v17  ;;  %v1510_v29 = vld [vmem:[%s2853_s0 + $0x68] sm:$0xf0]  ;;  %v1822_v30 = vld [vmem:[%s2853_s0 + $0x164] sm:$0xf] }
  0x16   :  { %664 = vmatpush.bf16.msra.mxu0 %v1844_v10  ;;  %1863 = vmatpush.bf16.msra.mxu2 %v1844_v10  ;;  %v1497_v10 = vor.u32 %v1786_v4, %v1494_v5  ;;  %v1633_v23 = vor.u32 %v1820_v18, %v1630_v19  ;;  %v1638_v31 = vld [vmem:[%s2853_s0 + $0x168] sm:$0xf0]  ;;  %v1513_v34 = vor.u32 %v1790_v28, %v1510_v29  ;;  %v1825_v40 = vld [vmem:[%s2853_s0 + $0x174] sm:$0xf0]  ;;  %v1792_v41 = vld [vmem:[%s2853_s0 + $0x74] sm:$0xf] }
  0x17   :  { %833 = vmatpush.bf16.msra.mxu1 %v1852_v11  ;;  %1871 = vmatpush.bf16.msra.mxu3 %v1852_v11  ;;  %v1625_v11 = vor.u32 %v1818_v6, %v1622_v7  ;;  %v1641_v35 = vor.u32 %v1822_v30, %v1638_v31  ;;  %v1518_v42 = vld [vmem:[%s2853_s0 + $0x78] sm:$0xf0]  ;;  %v1824_v43 = vld [vmem:[%s2853_s0 + $0x174] sm:$0xf]  ;;  %v1827_v52 = vld [vmem:[%s2853_s0 + $0x184] sm:$0xf0] }
  0x18   :  { %v1646_v44 = vld [vmem:[%s2853_s0 + $0x178] sm:$0xf0]  ;;  %v1521_v47 = vor.u32 %v1792_v41, %v1518_v42  ;;  %v1794_v53 = vld [vmem:[%s2853_s0 + $0x84] sm:$0xf]  ;;  %v1526_v54 = vld [vmem:[%s2853_s0 + $0x88] sm:$0xf0] }
  0x19   :  { %v1826_v55 = vld [vmem:[%s2853_s0 + $0x184] sm:$0xf]  ;;  %v1654_v56 = vld [vmem:[%s2853_s0 + $0x188] sm:$0xf0]  ;;  %v2244_v5 = vld [vmem:[%s2854_s2] ss:$0 sm:$0xff] }
  0x1a   :  { %665 = vmatpush.bf16.msra.mxu0 %v1843_v12  ;;  %1864 = vmatpush.bf16.msra.mxu2 %v1843_v12  ;;  %v1500_v12 = vld [vmem:[%s2853_s0 + $0x50] sm:$0xf]  ;;  %v1540_v31 = vld [vmem:[%s2853_s0 + $0xa0] sm:$0xf] }
  0x1b   :  { %834 = vmatpush.bf16.msra.mxu1 %v1851_v13  ;;  %1872 = vmatpush.bf16.msra.mxu3 %v1851_v13  ;;  %v1789_v13 = vld [vmem:[%s2853_s0 + $0x54] sm:$0xf0]  ;;  %v1532_v7 = vld [vmem:[%s2853_s0 + $0x90] sm:$0xf] }
  0x1c   :  { %v1501_v20 = vor.u32 %v1789_v13, %v1500_v12  ;;  %v1534_v12 = vld [vmem:[%s2853_s0 + $0x98] sm:$0xf0] }
  0x1e   :  { %666 = vmatpush.bf16.msra.mxu0 %v1842_v14  ;;  %1865 = vmatpush.bf16.msra.mxu2 %v1842_v14  ;;  %v1628_v14 = vld [vmem:[%s2853_s0 + $0x150] sm:$0xf] }
  0x1f   :  { %835 = vmatpush.bf16.msra.mxu1 %v1850_v15  ;;  %1873 = vmatpush.bf16.msra.mxu3 %v1850_v15  ;;  %v1821_v15 = vld [vmem:[%s2853_s0 + $0x154] sm:$0xf0] }
  0x20   :  { %v1629_v21 = vor.u32 %v1821_v15, %v1628_v14  ;;  %v1828_v14 = vld [vmem:[%s2853_s0 + $0x194] sm:$0xf]  ;;  %v1662_v15 = vld [vmem:[%s2853_s0 + $0x198] sm:$0xf0] }
  0x21   :  { %667 = vmatmul.bf16.vlgmr.msra.gmra.mxu0 %v1461_v24  ;;  %747 = vmatmul.bf16.vlgmr.msra.gmra.mxu2 %v1589_v25  ;;  %v1508_v24 = vld [vmem:[%s2853_s0 + $0x60] sm:$0xf]  ;;  %v1791_v25 = vld [vmem:[%s2853_s0 + $0x64] sm:$0xf0] }
  0x22   :  { %836 = vmatmul.bf16.vlgmr.msra.gmra.mxu1 %v1465_v26  ;;  %916 = vmatmul.bf16.vlgmr.msra.gmra.mxu3 %v1593_v27  ;;  %v1636_v26 = vld [vmem:[%s2853_s0 + $0x160] sm:$0xf]  ;;  %v1823_v27 = vld [vmem:[%s2853_s0 + $0x164] sm:$0xf0]  ;;  %v1509_v32 = vor.u32 %v1791_v25, %v1508_v24  ;;  %v1665_v24 = vor.u32 %v1828_v14, %v1662_v15 }
  0x23   :  { %v1637_v33 = vor.u32 %v1823_v27, %v1636_v26 }
  0x31   :  { %672 = vmatmul.bf16.gmra.mxu0 %v1469_v36  ;;  %752 = vmatmul.bf16.gmra.mxu2 %v1597_v37  ;;  %v1877_v36 = vmov 0.0   ;;  %v1516_v37 = vld [vmem:[%s2853_s0 + $0x70] sm:$0xf] }
  0x32   :  { %841 = vmatmul.bf16.gmra.mxu1 %v1473_v38  ;;  %921 = vmatmul.bf16.gmra.mxu3 %v1601_v39  ;;  %19 = vst.msk [vmem:[#allocation2] sm:$0xff] %vm18_vm0, %v1877_v36  ;;  %v1793_v38 = vld [vmem:[%s2853_s0 + $0x74] sm:$0xf0]  ;;  %v1644_v39 = vld [vmem:[%s2853_s0 + $0x170] sm:$0xf] }
  0x33   :  { %20 = vst.msk [vmem:[#allocation2 + $0x8] sm:$0xff] %vm18_vm0, %v1877_v36  ;;  %v1517_v45 = vor.u32 %v1793_v38, %v1516_v37  ;;  %v1645_v46 = vor.u32 %v1825_v40, %v1644_v39  ;;  %v1798_v39 = vld [vmem:[%s2853_s0 + $0xa4] sm:$0xf]  ;;  %v1542_v40 = vld [vmem:[%s2853_s0 + $0xa8] sm:$0xf0] }
  0x34   :  { %21 = vst.msk [vmem:[#allocation2 + $0x10] sm:$0xff] %vm18_vm0, %v1877_v36 }
  0x35   :  { %22 = vst.msk [vmem:[#allocation2 + $0x18] sm:$0xff] %vm18_vm0, %v1877_v36 }
  0x36   :  { %23 = vst.msk [vmem:[#allocation2 + $0x20] sm:$0xff] %vm18_vm0, %v1877_v36 }
  0x37   :  { %24 = vst.msk [vmem:[#allocation2 + $0x28] sm:$0xff] %vm18_vm0, %v1877_v36 }
  0x38   :  { %25 = vst.msk [vmem:[#allocation2 + $0x30] sm:$0xff] %vm18_vm0, %v1877_v36 }
  0x39   :  { %26 = vst.msk [vmem:[#allocation2 + $0x38] sm:$0xff] %vm18_vm0, %v1877_v36 }
  0x3a   :  { %27 = vst.msk [vmem:[#allocation2 + $0x40] sm:$0xff] %vm18_vm0, %v1877_v36  ;;  %v84_v41 = vld [vmem:[#allocation2 + $0x8] sm:$0xff] }
  0x3b   :  { %28 = vst.msk [vmem:[#allocation2 + $0x48] sm:$0xff] %vm18_vm0, %v1877_v36 }
  0x3c   :  { %29 = vst.msk [vmem:[#allocation2 + $0x50] sm:$0xff] %vm18_vm0, %v1877_v36 }
  0x3d   :  { %30 = vst.msk [vmem:[#allocation2 + $0x58] sm:$0xff] %vm18_vm0, %v1877_v36 }
  0x3e   :  { %31 = vst.msk [vmem:[#allocation2 + $0x60] sm:$0xff] %vm18_vm0, %v1877_v36 }
  0x3f   :  { %32 = vst.msk [vmem:[#allocation2 + $0x68] sm:$0xff] %vm18_vm0, %v1877_v36 }
  0x40   :  { %33 = vst.msk [vmem:[#allocation2 + $0x70] sm:$0xff] %vm18_vm0, %v1877_v36 }
  0x41   :  { %677 = vmatmul.bf16.gmra.mxu0 %v1477_v48  ;;  %757 = vmatmul.bf16.gmra.mxu2 %v1605_v49  ;;  %v1649_v48 = vor.u32 %v1824_v43, %v1646_v44  ;;  %34 = vst.msk [vmem:[#allocation2 + $0x78] sm:$0xff] %vm18_vm0, %v1877_v36  ;;  %v1524_v49 = vld [vmem:[%s2853_s0 + $0x80] sm:$0xf]  ;;  %v1830_v43 = vld [vmem:[%s2853_s0 + $0x1a4] sm:$0xf] }
  0x42   :  { %846 = vmatmul.bf16.gmra.mxu1 %v1481_v50  ;;  %926 = vmatmul.bf16.gmra.mxu3 %v1609_v51  ;;  %35 = vst.msk [vmem:[#allocation2 + $0x80] sm:$0xff] %vm18_vm0, %v1877_v36  ;;  %v1795_v50 = vld [vmem:[%s2853_s0 + $0x84] sm:$0xf0]  ;;  %v1652_v51 = vld [vmem:[%s2853_s0 + $0x180] sm:$0xf] }
  0x43   :  { %36 = vst.msk [vmem:[#allocation2 + $0x88] sm:$0xff] %vm18_vm0, %v1877_v36  ;;  %v1525_v57 = vor.u32 %v1795_v50, %v1524_v49  ;;  %v1653_v58 = vor.u32 %v1827_v52, %v1652_v51  ;;  %v1670_v44 = vld [vmem:[%s2853_s0 + $0x1a8] sm:$0xf0]  ;;  %v85_v49 = vld [vmem:[#allocation2 + $0x10] sm:$0xff] }
  0x44   :  { %37 = vst.msk [vmem:[#allocation2 + $0x90] sm:$0xff] %vm18_vm0, %v1877_v36 }
  0x45   :  { %38 = vst.msk [vmem:[#allocation2 + $0x98] sm:$0xff] %vm18_vm0, %v1877_v36 }
  0x46   :  { %39 = vst.msk [vmem:[#allocation2 + $0xa0] sm:$0xff] %vm18_vm0, %v1877_v36 }
  0x47   :  { %40 = vst.msk [vmem:[#allocation2 + $0xa8] sm:$0xff] %vm18_vm0, %v1877_v36 }
  0x48   :  { %41 = vst.msk [vmem:[#allocation2 + $0xb0] sm:$0xff] %vm18_vm0, %v1877_v36 }
  0x49   :  { %42 = vst.msk [vmem:[#allocation2 + $0xb8] sm:$0xff] %vm18_vm0, %v1877_v36 }
  0x4a   :  { %43 = vst.msk [vmem:[#allocation2 + $0xc0] sm:$0xff] %vm18_vm0, %v1877_v36 }
  0x4b   :  { %44 = vst.msk [vmem:[#allocation2 + $0xc8] sm:$0xff] %vm18_vm0, %v1877_v36 }
  0x4c   :  { %45 = vst.msk [vmem:[#allocation2 + $0xd0] sm:$0xff] %vm18_vm0, %v1877_v36 }
  0x4d   :  { %46 = vst.msk [vmem:[#allocation2 + $0xd8] sm:$0xff] %vm18_vm0, %v1877_v36 }
  0x4e   :  { %47 = vst.msk [vmem:[#allocation2 + $0xe0] sm:$0xff] %vm18_vm0, %v1877_v36 }
  0x4f   :  { %48 = vst.msk [vmem:[#allocation2 + $0xe8] sm:$0xff] %vm18_vm0, %v1877_v36 }
  0x50   :  { %49 = vst.msk [vmem:[#allocation2 + $0xf0] sm:$0xff] %vm18_vm0, %v1877_v36 }
  0x51   :  { %682 = vmatmul.bf16.gmra.mxu0 %v1485_v60  ;;  %762 = vmatmul.bf16.gmra.mxu2 %v1613_v61  ;;  %50 = vst.msk [vmem:[#allocation2 + $0xf8] sm:$0xff] %vm18_vm0, %v1877_v36  ;;  %v1529_v60 = vor.u32 %v1794_v53, %v1526_v54  ;;  %v1657_v61 = vor.u32 %v1826_v55, %v1654_v56 }
  0x52   :  { %851 = vmatmul.bf16.gmra.mxu1 %v1489_v62  ;;  %931 = vmatmul.bf16.gmra.mxu3 %v1617_v63  ;;  %v83_v62 = vld [vmem:[#allocation2] sm:$0xff]  ;;  %51 = vst.msk [vmem:[#allocation2 + $0x100] sm:$0xff] %vm18_vm0, %v1877_v36 }
  0x53   :  { %52 = vst.msk [vmem:[#allocation2 + $0x108] sm:$0xff] %vm18_vm0, %v1877_v36 }
  0x54   :  { %53 = vst.msk [vmem:[#allocation2 + $0x110] sm:$0xff] %vm18_vm0, %v1877_v36 }
  0x55   :  { %54 = vst.msk [vmem:[#allocation2 + $0x118] sm:$0xff] %vm18_vm0, %v1877_v36 }
  0x56   :  { %55 = vst.msk [vmem:[#allocation2 + $0x120] sm:$0xff] %vm18_vm0, %v1877_v36 }
  0x57   :  { %56 = vst.msk [vmem:[#allocation2 + $0x128] sm:$0xff] %vm18_vm0, %v1877_v36 }
  0x58   :  { %57 = vst.msk [vmem:[#allocation2 + $0x130] sm:$0xff] %vm18_vm0, %v1877_v36 }
  0x59   :  { %58 = vst.msk [vmem:[#allocation2 + $0x138] sm:$0xff] %vm18_vm0, %v1877_v36  ;;  %v115_v37 = vld [vmem:[#allocation2 + $0x100] sm:$0xff] }
  0x5a   :  { %59 = vst.msk [vmem:[#allocation2 + $0x140] sm:$0xff] %vm18_vm0, %v1877_v36 }
  0x5b   :  { %60 = vst.msk [vmem:[#allocation2 + $0x148] sm:$0xff] %vm18_vm0, %v1877_v36  ;;  %v117_v55 = vld [vmem:[#allocation2 + $0x110] sm:$0xff] }
  0x5c   :  { %61 = vst.msk [vmem:[#allocation2 + $0x150] sm:$0xff] %vm18_vm0, %v1877_v36 }
  0x5d   :  { %62 = vst.msk [vmem:[#allocation2 + $0x158] sm:$0xff] %vm18_vm0, %v1877_v36 }
  0x5e   :  { %63 = vst.msk [vmem:[#allocation2 + $0x160] sm:$0xff] %vm18_vm0, %v1877_v36 }
  0x5f   :  { %64 = vst.msk [vmem:[#allocation2 + $0x168] sm:$0xff] %vm18_vm0, %v1877_v36 }
  0x60   :  { %65 = vst.msk [vmem:[#allocation2 + $0x170] sm:$0xff] %vm18_vm0, %v1877_v36 }
  0x61   :  { %687 = vmatmul.bf16.gmra.mxu0 %v1493_v8  ;;  %767 = vmatmul.bf16.gmra.mxu2 %v1621_v9  ;;  %v1797_v8 = vld [vmem:[%s2853_s0 + $0x94] sm:$0xf0]  ;;  %v1660_v9 = vld [vmem:[%s2853_s0 + $0x190] sm:$0xf]  ;;  %66 = vst.msk [vmem:[#allocation2 + $0x178] sm:$0xff] %vm18_vm0, %v1877_v36 }
  0x62   :  { %856 = vmatmul.bf16.gmra.mxu1 %v1497_v10  ;;  %936 = vmatmul.bf16.gmra.mxu3 %v1625_v11  ;;  %v1829_v10 = vld [vmem:[%s2853_s0 + $0x194] sm:$0xf0]  ;;  %v1796_v11 = vld [vmem:[%s2853_s0 + $0x94] sm:$0xf]  ;;  %v1533_v19 = vor.u32 %v1797_v8, %v1532_v7  ;;  %67 = vst.msk [vmem:[#allocation2 + $0x180] sm:$0xff] %vm18_vm0, %v1877_v36 }
  0x63   :  { %68 = vst.msk [vmem:[#allocation2 + $0x188] sm:$0xff] %vm18_vm0, %v1877_v36 }
  0x64   :  { %69 = vst.msk [vmem:[#allocation2 + $0x190] sm:$0xff] %vm18_vm0, %v1877_v36 }
  0x65   :  { %70 = vst.msk [vmem:[#allocation2 + $0x198] sm:$0xff] %vm18_vm0, %v1877_v36 }
  0x66   :  { %71 = vst.msk [vmem:[#allocation2 + $0x1a0] sm:$0xff] %vm18_vm0, %v1877_v36 }
  0x67   :  { %72 = vst.msk [vmem:[#allocation2 + $0x1a8] sm:$0xff] %vm18_vm0, %v1877_v36 }
  0x68   :  { %73 = vst.msk [vmem:[#allocation2 + $0x1b0] sm:$0xff] %vm18_vm0, %v1877_v36 }
  0x69   :  { %74 = vst.msk [vmem:[#allocation2 + $0x1b8] sm:$0xff] %vm18_vm0, %v1877_v36 }
  0x6a   :  { %75 = vst.msk [vmem:[#allocation2 + $0x1c0] sm:$0xff] %vm18_vm0, %v1877_v36 }
  0x6b   :  { %76 = vst.msk [vmem:[#allocation2 + $0x1c8] sm:$0xff] %vm18_vm0, %v1877_v36 }
  0x6c   :  { %77 = vst.msk [vmem:[#allocation2 + $0x1d0] sm:$0xff] %vm18_vm0, %v1877_v36 }
  0x6d   :  { %78 = vst.msk [vmem:[#allocation2 + $0x1d8] sm:$0xff] %vm18_vm0, %v1877_v36 }
  0x6e   :  { %79 = vst.msk [vmem:[#allocation2 + $0x1e0] sm:$0xff] %vm18_vm0, %v1877_v36 }
  0x6f   :  { %80 = vst.msk [vmem:[#allocation2 + $0x1e8] sm:$0xff] %vm18_vm0, %v1877_v36 }
  0x70   :  { %81 = vst.msk [vmem:[#allocation2 + $0x1f0] sm:$0xff] %vm18_vm0, %v1877_v36 }
  0x71   :  { %692 = vmatmul.bf16.gmra.mxu0 %v1501_v20  ;;  %772 = vmatmul.bf16.gmra.mxu2 %v1629_v21  ;;  %v1661_v20 = vor.u32 %v1829_v10, %v1660_v9  ;;  %82 = vst.msk [vmem:[#allocation2 + $0x1f8] sm:$0xff] %vm18_vm0, %v1877_v36  ;;  %v119_v9 = vld [vmem:[#allocation2 + $0x120] sm:$0xff] }
  0x72   :  { %861 = vmatmul.bf16.gmra.mxu1 %v1505_v22  ;;  %941 = vmatmul.bf16.gmra.mxu3 %v1633_v23  ;;  %v1537_v23 = vor.u32 %v1796_v11, %v1534_v12 }
  0x81   :  { %697 = vmatmul.bf16.gmra.mxu0 %v1509_v32  ;;  %777 = vmatmul.bf16.gmra.mxu2 %v1637_v33  ;;  %v1799_v32 = vld [vmem:[%s2853_s0 + $0xa4] sm:$0xf0] }
  0x82   :  { %866 = vmatmul.bf16.gmra.mxu1 %v1513_v34  ;;  %946 = vmatmul.bf16.gmra.mxu3 %v1641_v35  ;;  %v1668_v34 = vld [vmem:[%s2853_s0 + $0x1a0] sm:$0xf]  ;;  %v1831_v35 = vld [vmem:[%s2853_s0 + $0x1a4] sm:$0xf0]  ;;  %v1541_v52 = vor.u32 %v1799_v32, %v1540_v31  ;;  %v1832_v32 = vld [vmem:[%s2853_s0 + $0x1b4] sm:$0xf] }
  0x83   :  { %v1669_v53 = vor.u32 %v1831_v35, %v1668_v34 }
  0x91   :  { %702 = vmatmul.bf16.gmra.mxu0 %v1517_v45  ;;  %782 = vmatmul.bf16.gmra.mxu2 %v1645_v46  ;;  %v116_v45 = vld [vmem:[#allocation2 + $0x108] sm:$0xff] }
  0x92   :  { %871 = vmatmul.bf16.gmra.mxu1 %v1521_v47  ;;  %951 = vmatmul.bf16.gmra.mxu3 %v1649_v48 }
  0x9e   :  { %v668_v59 = vpop.f32.mrf.mxu0 }
  0x9f   :  { %v837_v63 = vpop.f32.mrf.mxu1 }
  0xa0   :  { %v838_v0 = vadd.f32 %v837_v63, %v668_v59  ;;  %v1673_v59 = vor.u32 %v1830_v43, %v1670_v44 }
  0xa1   :  { %707 = vmatmul.bf16.gmra.mxu0 %v1525_v57  ;;  %787 = vmatmul.bf16.gmra.mxu2 %v1653_v58  ;;  %v1545_v58 = vor.u32 %v1798_v39, %v1542_v40 }
  0xa2   :  { %v997_v1 = vadd.f32 %v838_v0, %v83_v62  ;;  %876 = vmatmul.bf16.gmra.mxu1 %v1529_v60  ;;  %956 = vmatmul.bf16.gmra.mxu3 %v1657_v61  ;;  %v86_v61 = vld [vmem:[#allocation2 + $0x18] sm:$0xff] }
  0xa4   :  { %1062 = vst.msk [vmem:[#allocation2] sm:$0xff] %vm18_vm0, %v997_v1  ;;  %v748_v2 = vpop.f32.mrf.mxu2  ;;  %v118_v1 = vld [vmem:[#allocation2 + $0x118] sm:$0xff] }
  0xa5   :  { %v917_v3 = vpop.f32.mrf.mxu3 }
  0xa6   :  { %v670_v4 = vpop.f32.mrf.mxu0  ;;  %v918_v33 = vadd.f32 %v917_v3, %v748_v2 }
  0xa7   :  { %v839_v6 = vpop.f32.mrf.mxu1 }
  0xa8   :  { %v840_v38 = vadd.f32 %v839_v6, %v670_v4  ;;  %v1029_v48 = vadd.f32 %v918_v33, %v115_v37  ;;  %v87_v4 = vld [vmem:[#allocation2 + $0x20] sm:$0xff]  ;;  %v1678_v33 = vld [vmem:[%s2853_s0 + $0x1b8] sm:$0xf0] }
  0xaa   :  { %v998_v54 = vadd.f32 %v840_v38, %v84_v41  ;;  %1094 = vst.msk [vmem:[#allocation2 + $0x100] sm:$0xff] %vm18_vm0, %v1029_v48 }
  0xab   :  { %v1129_v13 = vld [vmem:[#allocation2] sm:$0xff] }
  0xac   :  { %v1197_v16 = vadd.f32 %v2244_v5, %v1129_v13  ;;  %v750_v17 = vpop.f32.mrf.mxu2  ;;  %1063 = vst.msk [vmem:[#allocation2 + $0x8] sm:$0xff] %vm18_vm0, %v998_v54  ;;  %v88_v13 = vld [vmem:[#allocation2 + $0x28] sm:$0xff] }
  0xad   :  { %v919_v18 = vpop.f32.mrf.mxu3 }
  0xae   :  { %v1261_v21 = vmax.f32 %v1197_v16, 0.0  ;;  %v673_v22 = vpop.f32.mrf.mxu0  ;;  %v920_v42 = vadd.f32 %v919_v18, %v750_v17  ;;  %v1548_v18 = vld [vmem:[%s2853_s0 + $0xb0] sm:$0xf] }
  0xaf   :  { %v842_v25 = vpop.f32.mrf.mxu1 }
  0xb0   :  { %v1325_v26 = vpack.c.bf16 %v1261_v21, %v1261_v21  ;;  %v843_v46 = vadd.f32 %v842_v25, %v673_v22  ;;  %v1030_v60 = vadd.f32 %v920_v42, %v116_v45  ;;  %v1676_v22 = vld [vmem:[%s2853_s0 + $0x1b0] sm:$0xf] }
  0xb1   :  { %712 = vmatmul.bf16.gmra.mxu0 %v1533_v19  ;;  %792 = vmatmul.bf16.gmra.mxu2 %v1661_v20  ;;  %v1161_v15 = vld [vmem:[#allocation2 + $0x100] sm:$0xff]  ;;  %v1801_v19 = vld [vmem:[%s2853_s0 + $0xb4] sm:$0xf0] }
  0xb2   :  { %1390 = vst.msk [vmem:[%s2855_s3] sm:$0xf] %vm1389_vm1, %v1325_v26  ;;  %881 = vmatmul.bf16.gmra.mxu1 %v1537_v23  ;;  %961 = vmatmul.bf16.gmra.mxu3 %v1665_v24  ;;  %v999_v0 = vadd.f32 %v843_v46, %v85_v49  ;;  %v1229_v20 = vadd.f32 %v2244_v5, %v1161_v15  ;;  %v1833_v23 = vld [vmem:[%s2853_s0 + $0x1b4] sm:$0xf0]  ;;  %v121_v15 = vld [vmem:[#allocation2 + $0x130] sm:$0xff] }
  0xb3   :  { %1095 = vst.msk [vmem:[#allocation2 + $0x108] sm:$0xff] %vm18_vm0, %v1030_v60  ;;  %v1130_v21 = vld [vmem:[#allocation2 + $0x8] sm:$0xff]  ;;  %v1549_v39 = vor.u32 %v1801_v19, %v1548_v18  ;;  %v1677_v40 = vor.u32 %v1833_v23, %v1676_v22 }
  0xb4   :  { %v753_v27 = vpop.f32.mrf.mxu2  ;;  %1064 = vst.msk [vmem:[#allocation2 + $0x10] sm:$0xff] %vm18_vm0, %v999_v0  ;;  %v1198_v24 = vadd.f32 %v2244_v5, %v1130_v21  ;;  %v90_v21 = vld [vmem:[#allocation2 + $0x38] sm:$0xff] }
  0xb5   :  { %v922_v28 = vpop.f32.mrf.mxu3 }
  0xb6   :  { %v675_v29 = vpop.f32.mrf.mxu0  ;;  %v923_v50 = vadd.f32 %v922_v28, %v753_v27  ;;  %v1800_v27 = vld [vmem:[%s2853_s0 + $0xb4] sm:$0xf]  ;;  %v1550_v28 = vld [vmem:[%s2853_s0 + $0xb8] sm:$0xf0]  ;;  %v1262_v34 = vmax.f32 %v1198_v24, 0.0 }
  0xb7   :  { %v844_v30 = vpop.f32.mrf.mxu1  ;;  %v1553_v46 = vor.u32 %v1800_v27, %v1550_v28  ;;  %v1803_v27 = vld [vmem:[%s2853_s0 + $0xc4] sm:$0xf0]  ;;  %v1684_v28 = vld [vmem:[%s2853_s0 + $0x1c0] sm:$0xf] }
  0xb8   :  { %v845_v56 = vadd.f32 %v844_v30, %v675_v29  ;;  %v1031_v3 = vadd.f32 %v923_v50, %v117_v55  ;;  %v1293_v29 = vmax.f32 %v1229_v20, 0.0 }
  0xba   :  { %v1000_v6 = vadd.f32 %v845_v56, %v86_v61  ;;  %1096 = vst.msk [vmem:[#allocation2 + $0x110] sm:$0xff] %vm18_vm0, %v1031_v3  ;;  %v1162_v25 = vld [vmem:[#allocation2 + $0x108] sm:$0xff]  ;;  %v1357_v41 = vpack.c.bf16 %v1293_v29, %v1293_v29 }
  0xbb   :  { %v1230_v30 = vadd.f32 %v2244_v5, %v1162_v25  ;;  %v1131_v31 = vld [vmem:[#allocation2 + $0x10] sm:$0xff]  ;;  %v1835_v29 = vld [vmem:[%s2853_s0 + $0x1c4] sm:$0xf0] }
  0xbc   :  { %v755_v47 = vpop.f32.mrf.mxu2  ;;  %1065 = vst.msk [vmem:[#allocation2 + $0x18] sm:$0xff] %vm18_vm0, %v1000_v6  ;;  %v1199_v35 = vadd.f32 %v2244_v5, %v1131_v31  ;;  %v1802_v31 = vld [vmem:[%s2853_s0 + $0xc4] sm:$0xf] }
  0xbd   :  { %v924_v51 = vpop.f32.mrf.mxu3  ;;  %v1294_v42 = vmax.f32 %v1230_v30, 0.0  ;;  %1422 = vst.msk [vmem:[%s2855_s3 + $0x80] sm:$0xf] %vm1389_vm1, %v1357_v41 }
  0xbe   :  { %v678_v57 = vpop.f32.mrf.mxu0  ;;  %v925_v62 = vadd.f32 %v924_v51, %v755_v47  ;;  %v1326_v47 = vpack.c.bf16 %v1262_v34, %v1262_v34  ;;  %v1263_v48 = vmax.f32 %v1199_v35, 0.0  ;;  %v1686_v34 = vld [vmem:[%s2853_s0 + $0x1c8] sm:$0xf0] }
  0xbf   :  { %v847_v63 = vpop.f32.mrf.mxu1 }
  0xc0   :  { %v848_v2 = vadd.f32 %v847_v63, %v678_v57  ;;  %v1032_v7 = vadd.f32 %v925_v62, %v118_v1  ;;  %1391 = vst.msk [vmem:[%s2855_s3 + $0x4] sm:$0xf] %vm1389_vm1, %v1326_v47  ;;  %v120_v62 = vld [vmem:[#allocation2 + $0x128] sm:$0xff]  ;;  %v91_v47 = vld [vmem:[#allocation2 + $0x40] sm:$0xff] }
  0xc1   :  { %717 = vmatmul.bf16.gmra.mxu0 %v1541_v52  ;;  %797 = vmatmul.bf16.gmra.mxu2 %v1669_v53  ;;  %v1163_v37 = vld [vmem:[#allocation2 + $0x110] sm:$0xff]  ;;  %v1681_v52 = vor.u32 %v1832_v32, %v1678_v33  ;;  %v1358_v53 = vpack.c.bf16 %v1294_v42, %v1294_v42  ;;  %v1558_v32 = vld [vmem:[%s2853_s0 + $0xc8] sm:$0xf0]  ;;  %v1834_v33 = vld [vmem:[%s2853_s0 + $0x1c4] sm:$0xf] }
  0xc2   :  { %886 = vmatmul.bf16.gmra.mxu1 %v1545_v58  ;;  %966 = vmatmul.bf16.gmra.mxu3 %v1673_v59  ;;  %v1001_v36 = vadd.f32 %v848_v2, %v87_v4  ;;  %1097 = vst.msk [vmem:[#allocation2 + $0x118] sm:$0xff] %vm18_vm0, %v1032_v7  ;;  %v1231_v43 = vadd.f32 %v2244_v5, %v1163_v37  ;;  %v89_v7 = vld [vmem:[#allocation2 + $0x30] sm:$0xff]  ;;  %v122_v37 = vld [vmem:[#allocation2 + $0x138] sm:$0xff] }
  0xc3   :  { %v1132_v44 = vld [vmem:[#allocation2 + $0x18] sm:$0xff]  ;;  %v1327_v59 = vpack.c.bf16 %v1263_v48, %v1263_v48  ;;  %1423 = vst.msk [vmem:[%s2855_s3 + $0x84] sm:$0xf] %vm1389_vm1, %v1358_v53 }
  0xc4   :  { %v758_v8 = vpop.f32.mrf.mxu2  ;;  %1066 = vst.msk [vmem:[#allocation2 + $0x20] sm:$0xff] %vm18_vm0, %v1001_v36  ;;  %v1200_v49 = vadd.f32 %v2244_v5, %v1132_v44  ;;  %v1295_v54 = vmax.f32 %v1231_v43, 0.0  ;;  %v1561_v44 = vor.u32 %v1802_v31, %v1558_v32 }
  0xc5   :  { %v927_v10 = vpop.f32.mrf.mxu3  ;;  %1392 = vst.msk [vmem:[%s2855_s3 + $0x8] sm:$0xf] %vm1389_vm1, %v1327_v59 }
  0xc6   :  { %v928_v11 = vadd.f32 %v927_v10, %v758_v8  ;;  %v680_v12 = vpop.f32.mrf.mxu0  ;;  %v1264_v60 = vmax.f32 %v1200_v49, 0.0  ;;  %v1359_v63 = vpack.c.bf16 %v1295_v54, %v1295_v54 }
  0xc7   :  { %v849_v14 = vpop.f32.mrf.mxu1 }
  0xc8   :  { %v1033_v16 = vadd.f32 %v928_v11, %v119_v9  ;;  %v850_v17 = vadd.f32 %v849_v14, %v680_v12  ;;  %v1328_v3 = vpack.c.bf16 %v1264_v60, %v1264_v60  ;;  %1424 = vst.msk [vmem:[%s2855_s3 + $0x88] sm:$0xf] %vm1389_vm1, %v1359_v63 }
  0xc9   :  { %v1164_v50 = vld [vmem:[#allocation2 + $0x118] sm:$0xff] }
  0xca   :  { %1098 = vst.msk [vmem:[#allocation2 + $0x120] sm:$0xff] %vm18_vm0, %v1033_v16  ;;  %v1002_v26 = vadd.f32 %v850_v17, %v88_v13  ;;  %v1232_v55 = vadd.f32 %v2244_v5, %v1164_v50 }
  0xcb   :  { %v1133_v56 = vld [vmem:[#allocation2 + $0x20] sm:$0xff]  ;;  %1393 = vst.msk [vmem:[%s2855_s3 + $0xc] sm:$0xf] %vm1389_vm1, %v1328_v3 }
  0xcc   :  { %1067 = vst.msk [vmem:[#allocation2 + $0x28] sm:$0xff] %vm18_vm0, %v1002_v26  ;;  %v760_v38 = vpop.f32.mrf.mxu2  ;;  %v1201_v61 = vadd.f32 %v2244_v5, %v1133_v56  ;;  %v1296_v0 = vmax.f32 %v1232_v55, 0.0  ;;  %v1556_v26 = vld [vmem:[%s2853_s0 + $0xc0] sm:$0xf] }
  0xcd   :  { %v929_v45 = vpop.f32.mrf.mxu3 }
  0xce   :  { %v683_v51 = vpop.f32.mrf.mxu0  ;;  %v930_v57 = vadd.f32 %v929_v45, %v760_v38  ;;  %v1265_v4 = vmax.f32 %v1201_v61, 0.0  ;;  %v1360_v36 = vpack.c.bf16 %v1296_v0, %v1296_v0  ;;  %v1689_v45 = vor.u32 %v1834_v33, %v1686_v34  ;;  %v123_v0 = vld [vmem:[#allocation2 + $0x140] sm:$0xff] }
  0xcf   :  { %v852_v58 = vpop.f32.mrf.mxu1 }
  0xd0   :  { %v853_v2 = vadd.f32 %v852_v58, %v683_v51  ;;  %v1034_v9 = vadd.f32 %v930_v57, %v120_v62  ;;  %v1329_v10 = vpack.c.bf16 %v1265_v4, %v1265_v4  ;;  %1425 = vst.msk [vmem:[%s2855_s3 + $0x8c] sm:$0xf] %vm1389_vm1, %v1360_v36 }
  0xd1   :  { %v1165_v1 = vld [vmem:[#allocation2 + $0x120] sm:$0xff]  ;;  %722 = vmatmul.bf16.gmra.mxu0 %v1549_v39  ;;  %802 = vmatmul.bf16.gmra.mxu2 %v1677_v40  ;;  %v1557_v39 = vor.u32 %v1803_v27, %v1556_v26  ;;  %v1685_v40 = vor.u32 %v1835_v29, %v1684_v28  ;;  %v124_v26 = vld [vmem:[#allocation2 + $0x148] sm:$0xff] }
  0xd2   :  { %v1233_v6 = vadd.f32 %v2244_v5, %v1165_v1  ;;  %891 = vmatmul.bf16.gmra.mxu1 %v1553_v46  ;;  %971 = vmatmul.bf16.gmra.mxu3 %v1681_v52  ;;  %v1003_v14 = vadd.f32 %v853_v2, %v89_v7  ;;  %1394 = vst.msk [vmem:[%s2855_s3 + $0x10] sm:$0xf] %vm1389_vm1, %v1329_v10  ;;  %v92_v7 = vld [vmem:[#allocation2 + $0x48] sm:$0xff] }
  0xd3   :  { %v1134_v8 = vld [vmem:[#allocation2 + $0x28] sm:$0xff]  ;;  %1099 = vst.msk [vmem:[#allocation2 + $0x128] sm:$0xff] %vm18_vm0, %v1034_v9 }
  0xd4   :  { %v1297_v11 = vmax.f32 %v1233_v6, 0.0  ;;  %v1202_v12 = vadd.f32 %v2244_v5, %v1134_v8  ;;  %v763_v13 = vpop.f32.mrf.mxu2  ;;  %1068 = vst.msk [vmem:[#allocation2 + $0x30] sm:$0xff] %vm18_vm0, %v1003_v14 }
  0xd5   :  { %v932_v16 = vpop.f32.mrf.mxu3 }
  0xd6   :  { %v1361_v17 = vpack.c.bf16 %v1297_v11, %v1297_v11  ;;  %v1266_v18 = vmax.f32 %v1202_v12, 0.0  ;;  %v933_v19 = vadd.f32 %v932_v16, %v763_v13  ;;  %v685_v20 = vpop.f32.mrf.mxu0  ;;  %v1564_v11 = vld [vmem:[%s2853_s0 + $0xd0] sm:$0xf]  ;;  %v1805_v12 = vld [vmem:[%s2853_s0 + $0xd4] sm:$0xf0] }
  0xd7   :  { %v854_v22 = vpop.f32.mrf.mxu1  ;;  %v1692_v13 = vld [vmem:[%s2853_s0 + $0x1d0] sm:$0xf]  ;;  %v1565_v28 = vor.u32 %v1805_v12, %v1564_v11  ;;  %v126_v11 = vld [vmem:[#allocation2 + $0x158] sm:$0xff] }
  0xd8   :  { %1426 = vst.msk [vmem:[%s2855_s3 + $0x90] sm:$0xf] %vm1389_vm1, %v1361_v17  ;;  %v1330_v23 = vpack.c.bf16 %v1266_v18, %v1266_v18  ;;  %v1035_v24 = vadd.f32 %v933_v19, %v121_v15  ;;  %v855_v25 = vadd.f32 %v854_v22, %v685_v20  ;;  %v1837_v15 = vld [vmem:[%s2853_s0 + $0x1d4] sm:$0xf0]  ;;  %v1804_v18 = vld [vmem:[%s2853_s0 + $0xd4] sm:$0xf] }
  0xd9   :  { %v1566_v19 = vld [vmem:[%s2853_s0 + $0xd8] sm:$0xf0]  ;;  %v1693_v29 = vor.u32 %v1837_v15, %v1692_v13 }
  0xda   :  { %1395 = vst.msk [vmem:[%s2855_s3 + $0x14] sm:$0xf] %vm1389_vm1, %v1330_v23  ;;  %v1004_v30 = vadd.f32 %v855_v25, %v90_v21  ;;  %v1166_v41 = vld [vmem:[#allocation2 + $0x128] sm:$0xff]  ;;  %v1836_v21 = vld [vmem:[%s2853_s0 + $0x1d4] sm:$0xf] }
  0xdb   :  { %1100 = vst.msk [vmem:[#allocation2 + $0x130] sm:$0xff] %vm18_vm0, %v1035_v24  ;;  %v1234_v46 = vadd.f32 %v2244_v5, %v1166_v41  ;;  %v1135_v49 = vld [vmem:[#allocation2 + $0x30] sm:$0xff]  ;;  %v1694_v22 = vld [vmem:[%s2853_s0 + $0x1d8] sm:$0xf0] }
  0xdc   :  { %1069 = vst.msk [vmem:[#allocation2 + $0x38] sm:$0xff] %vm18_vm0, %v1004_v30  ;;  %v765_v35 = vpop.f32.mrf.mxu2  ;;  %v1203_v53 = vadd.f32 %v2244_v5, %v1135_v49  ;;  %v1569_v30 = vor.u32 %v1804_v18, %v1566_v19  ;;  %v125_v49 = vld [vmem:[#allocation2 + $0x150] sm:$0xff] }
  0xdd   :  { %v934_v38 = vpop.f32.mrf.mxu3  ;;  %v1298_v52 = vmax.f32 %v1234_v46, 0.0 }
  0xde   :  { %v935_v42 = vadd.f32 %v934_v38, %v765_v35  ;;  %v688_v43 = vpop.f32.mrf.mxu0  ;;  %v1267_v57 = vmax.f32 %v1203_v53, 0.0  ;;  %v1697_v35 = vor.u32 %v1836_v21, %v1694_v22  ;;  %v95_v21 = vld [vmem:[#allocation2 + $0x60] sm:$0xff] }
  0xdf   :  { %v857_v48 = vpop.f32.mrf.mxu1  ;;  %v1362_v56 = vpack.c.bf16 %v1298_v52, %v1298_v52 }
  0xe0   :  { %v1036_v50 = vadd.f32 %v935_v42, %v122_v37  ;;  %v858_v51 = vadd.f32 %v857_v48, %v688_v43  ;;  %v1331_v62 = vpack.c.bf16 %v1267_v57, %v1267_v57  ;;  %v93_v37 = vld [vmem:[#allocation2 + $0x50] sm:$0xff] }
  0xe1   :  { %727 = vmatmul.bf16.gmra.mxu0 %v1557_v39  ;;  %807 = vmatmul.bf16.gmra.mxu2 %v1685_v40  ;;  %1427 = vst.msk [vmem:[%s2855_s3 + $0x94] sm:$0xf] %vm1389_vm1, %v1362_v56 }
  0xe2   :  { %v1167_v54 = vld [vmem:[#allocation2 + $0x130] sm:$0xff]  ;;  %1101 = vst.msk [vmem:[#allocation2 + $0x138] sm:$0xff] %vm18_vm0, %v1036_v50  ;;  %v1005_v55 = vadd.f32 %v858_v51, %v91_v47  ;;  %896 = vmatmul.bf16.gmra.mxu1 %v1561_v44  ;;  %976 = vmatmul.bf16.gmra.mxu3 %v1689_v45 }
  0xe3   :  { %v1235_v58 = vadd.f32 %v2244_v5, %v1167_v54  ;;  %v1136_v59 = vld [vmem:[#allocation2 + $0x38] sm:$0xff]  ;;  %1396 = vst.msk [vmem:[%s2855_s3 + $0x18] sm:$0xf] %vm1389_vm1, %v1331_v62  ;;  %v1700_v62 = vld [vmem:[%s2853_s0 + $0x1e0] sm:$0xf] }
  0xe4   :  { %v1204_v60 = vadd.f32 %v2244_v5, %v1136_v59  ;;  %1070 = vst.msk [vmem:[#allocation2 + $0x40] sm:$0xff] %vm18_vm0, %v1005_v55  ;;  %v768_v61 = vpop.f32.mrf.mxu2  ;;  %v94_v55 = vld [vmem:[#allocation2 + $0x58] sm:$0xff] }
  0xe5   :  { %v1299_v63 = vmax.f32 %v1235_v58, 0.0  ;;  %v937_v1 = vpop.f32.mrf.mxu3 }
  0xe6   :  { %v1268_v2 = vmax.f32 %v1204_v60, 0.0  ;;  %v938_v3 = vadd.f32 %v937_v1, %v768_v61  ;;  %v690_v4 = vpop.f32.mrf.mxu0  ;;  %v1572_v60 = vld [vmem:[%s2853_s0 + $0xe0] sm:$0xf]  ;;  %v1807_v61 = vld [vmem:[%s2853_s0 + $0xe4] sm:$0xf0] }
  0xe7   :  { %v1363_v6 = vpack.c.bf16 %v1299_v63, %v1299_v63  ;;  %v859_v36 = vpop.f32.mrf.mxu1  ;;  %v1839_v63 = vld [vmem:[%s2853_s0 + $0x1e4] sm:$0xf0]  ;;  %v1573_v13 = vor.u32 %v1807_v61, %v1572_v60 }
  0xe8   :  { %v1332_v8 = vpack.c.bf16 %v1268_v2, %v1268_v2  ;;  %v1037_v9 = vadd.f32 %v938_v3, %v123_v0  ;;  %v860_v10 = vadd.f32 %v859_v36, %v690_v4  ;;  %v1806_v0 = vld [vmem:[%s2853_s0 + $0xe4] sm:$0xf]  ;;  %v1574_v3 = vld [vmem:[%s2853_s0 + $0xe8] sm:$0xf0] }
  0xe9   :  { %1428 = vst.msk [vmem:[%s2855_s3 + $0x98] sm:$0xf] %vm1389_vm1, %v1363_v6  ;;  %v1168_v14 = vld [vmem:[#allocation2 + $0x138] sm:$0xff]  ;;  %v1702_v36 = vld [vmem:[%s2853_s0 + $0x1e8] sm:$0xf0]  ;;  %v1577_v18 = vor.u32 %v1806_v0, %v1574_v3 }
  0xea   :  { %1397 = vst.msk [vmem:[%s2855_s3 + $0x1c] sm:$0xf] %vm1389_vm1, %v1332_v8  ;;  %v1236_v16 = vadd.f32 %v2244_v5, %v1168_v14  ;;  %v1006_v17 = vadd.f32 %v860_v10, %v92_v7  ;;  %v1838_v7 = vld [vmem:[%s2853_s0 + $0x1e4] sm:$0xf]  ;;  %v1701_v14 = vor.u32 %v1839_v63, %v1700_v62  ;;  %v128_v60 = vld [vmem:[#allocation2 + $0x168] sm:$0xff] }
  0xeb   :  { %v1137_v20 = vld [vmem:[#allocation2 + $0x40] sm:$0xff]  ;;  %1102 = vst.msk [vmem:[#allocation2 + $0x140] sm:$0xff] %vm18_vm0, %v1037_v9  ;;  %v1705_v19 = vor.u32 %v1838_v7, %v1702_v36  ;;  %v97_v7 = vld [vmem:[#allocation2 + $0x70] sm:$0xff] }
  0xec   :  { %v1300_v23 = vmax.f32 %v1236_v16, 0.0  ;;  %v1205_v24 = vadd.f32 %v2244_v5, %v1137_v20  ;;  %1071 = vst.msk [vmem:[#allocation2 + $0x48] sm:$0xff] %vm18_vm0, %v1006_v17  ;;  %v770_v25 = vpop.f32.mrf.mxu2 }
  0xed   :  { %v939_v27 = vpop.f32.mrf.mxu3 }
  0xee   :  { %v1364_v31 = vpack.c.bf16 %v1300_v23, %v1300_v23  ;;  %v1269_v32 = vmax.f32 %v1205_v24, 0.0  ;;  %v940_v33 = vadd.f32 %v939_v27, %v770_v25  ;;  %v693_v34 = vpop.f32.mrf.mxu0 }
  0xef   :  { %v862_v38 = vpop.f32.mrf.mxu1 }
  0xf0   :  { %1429 = vst.msk [vmem:[%s2855_s3 + $0x9c] sm:$0xf] %vm1389_vm1, %v1364_v31  ;;  %v1333_v39 = vpack.c.bf16 %v1269_v32, %v1269_v32  ;;  %v1038_v40 = vadd.f32 %v940_v33, %v124_v26  ;;  %v863_v41 = vadd.f32 %v862_v38, %v693_v34  ;;  %v127_v33 = vld [vmem:[#allocation2 + $0x160] sm:$0xff] }
  0xf1   :  { %732 = vmatmul.bf16.gmra.mxu0 %v1565_v28  ;;  %812 = vmatmul.bf16.gmra.mxu2 %v1693_v29 }
  0xf2   :  { %1398 = vst.msk [vmem:[%s2855_s3 + $0x20] sm:$0xf] %vm1389_vm1, %v1333_v39  ;;  %v1169_v42 = vld [vmem:[#allocation2 + $0x140] sm:$0xff]  ;;  %v1007_v43 = vadd.f32 %v863_v41, %v93_v37  ;;  %901 = vmatmul.bf16.gmra.mxu1 %v1569_v30  ;;  %981 = vmatmul.bf16.gmra.mxu3 %v1697_v35 }
  0xf3   :  { %v1237_v44 = vadd.f32 %v2244_v5, %v1169_v42  ;;  %v1138_v45 = vld [vmem:[#allocation2 + $0x48] sm:$0xff]  ;;  %1103 = vst.msk [vmem:[#allocation2 + $0x148] sm:$0xff] %vm18_vm0, %v1038_v40 }
  0xf4   :  { %v1206_v46 = vadd.f32 %v2244_v5, %v1138_v45  ;;  %1072 = vst.msk [vmem:[#allocation2 + $0x50] sm:$0xff] %vm18_vm0, %v1007_v43  ;;  %v773_v47 = vpop.f32.mrf.mxu2  ;;  %v96_v40 = vld [vmem:[#allocation2 + $0x68] sm:$0xff]  ;;  %v1580_v45 = vld [vmem:[%s2853_s0 + $0xf0] sm:$0xf] }
  0xf5   :  { %v1301_v48 = vmax.f32 %v1237_v44, 0.0  ;;  %v942_v50 = vpop.f32.mrf.mxu3 }
  0xf6   :  { %v1270_v51 = vmax.f32 %v1206_v46, 0.0  ;;  %v943_v52 = vadd.f32 %v942_v50, %v773_v47  ;;  %v695_v53 = vpop.f32.mrf.mxu0  ;;  %v1809_v46 = vld [vmem:[%s2853_s0 + $0xf4] sm:$0xf0]  ;;  %v1708_v47 = vld [vmem:[%s2853_s0 + $0x1f0] sm:$0xf] }
  0xf7   :  { %v1365_v54 = vpack.c.bf16 %v1301_v48, %v1301_v48  ;;  %v864_v56 = vpop.f32.mrf.mxu1  ;;  %v1841_v48 = vld [vmem:[%s2853_s0 + $0x1f4] sm:$0xf0]  ;;  %v1581_v62 = vor.u32 %v1809_v46, %v1580_v45 }
  0xf8   :  { %v1334_v57 = vpack.c.bf16 %v1270_v51, %v1270_v51  ;;  %v1039_v58 = vadd.f32 %v943_v52, %v125_v49  ;;  %v865_v59 = vadd.f32 %v864_v56, %v695_v53  ;;  %v1808_v49 = vld [vmem:[%s2853_s0 + $0xf4] sm:$0xf]  ;;  %v1582_v52 = vld [vmem:[%s2853_s0 + $0xf8] sm:$0xf0]  ;;  %v1709_v63 = vor.u32 %v1841_v48, %v1708_v47 }
  0xf9   :  { %1430 = vst.msk [vmem:[%s2855_s3 + $0xa0] sm:$0xf] %vm1389_vm1, %v1365_v54  ;;  %v1710_v56 = vld [vmem:[%s2853_s0 + $0x1f8] sm:$0xf0]  ;;  %v1585_v3 = vor.u32 %v1808_v49, %v1582_v52 }
  0xfa   :  { %1399 = vst.msk [vmem:[%s2855_s3 + $0x24] sm:$0xf] %vm1389_vm1, %v1334_v57  ;;  %v1170_v1 = vld [vmem:[#allocation2 + $0x148] sm:$0xff]  ;;  %v1008_v2 = vadd.f32 %v865_v59, %v94_v55  ;;  %v1840_v55 = vld [vmem:[%s2853_s0 + $0x1f4] sm:$0xf] }
  0xfb   :  { %v1238_v4 = vadd.f32 %v2244_v5, %v1170_v1  ;;  %v1139_v6 = vld [vmem:[#allocation2 + $0x50] sm:$0xff]  ;;  %1104 = vst.msk [vmem:[#allocation2 + $0x150] sm:$0xff] %vm18_vm0, %v1039_v58 }
  0xfc   :  { %v1207_v8 = vadd.f32 %v2244_v5, %v1139_v6  ;;  %1073 = vst.msk [vmem:[#allocation2 + $0x58] sm:$0xff] %vm18_vm0, %v1008_v2  ;;  %v775_v9 = vpop.f32.mrf.mxu2 }
  0xfd   :  { %v1302_v10 = vmax.f32 %v1238_v4, 0.0  ;;  %v944_v12 = vpop.f32.mrf.mxu3  ;;  %v1713_v4 = vor.u32 %v1840_v55, %v1710_v56  ;;  %v131_v55 = vld [vmem:[#allocation2 + $0x180] sm:$0xff] }
  0xfe   :  { %v1271_v15 = vmax.f32 %v1207_v8, 0.0  ;;  %v945_v16 = vadd.f32 %v944_v12, %v775_v9  ;;  %v698_v17 = vpop.f32.mrf.mxu0 }
  0xff   :  { %v1366_v20 = vpack.c.bf16 %v1302_v10, %v1302_v10  ;;  %v867_v22 = vpop.f32.mrf.mxu1 }
 0x100   :  { %v1335_v23 = vpack.c.bf16 %v1271_v15, %v1271_v15  ;;  %v1040_v24 = vadd.f32 %v945_v16, %v126_v11  ;;  %v868_v25 = vadd.f32 %v867_v22, %v698_v17 }
 0x101   :  { %1431 = vst.msk [vmem:[%s2855_s3 + $0xa4] sm:$0xf] %vm1389_vm1, %v1366_v20  ;;  %737 = vmatmul.bf16.gmra.mxu0 %v1573_v13  ;;  %817 = vmatmul.bf16.gmra.mxu2 %v1701_v14 }
 0x102   :  { %1400 = vst.msk [vmem:[%s2855_s3 + $0x28] sm:$0xf] %vm1389_vm1, %v1335_v23  ;;  %v1171_v26 = vld [vmem:[#allocation2 + $0x150] sm:$0xff]  ;;  %v1009_v27 = vadd.f32 %v868_v25, %v95_v21  ;;  %906 = vmatmul.bf16.gmra.mxu1 %v1577_v18  ;;  %986 = vmatmul.bf16.gmra.mxu3 %v1705_v19 }
 0x103   :  { %v1239_v28 = vadd.f32 %v2244_v5, %v1171_v26  ;;  %v1140_v29 = vld [vmem:[#allocation2 + $0x58] sm:$0xff]  ;;  %1105 = vst.msk [vmem:[#allocation2 + $0x158] sm:$0xff] %vm18_vm0, %v1040_v24  ;;  %v129_v18 = vld [vmem:[#allocation2 + $0x170] sm:$0xff] }
 0x104   :  { %v1208_v30 = vadd.f32 %v2244_v5, %v1140_v29  ;;  %1074 = vst.msk [vmem:[#allocation2 + $0x60] sm:$0xff] %vm18_vm0, %v1009_v27  ;;  %v778_v31 = vpop.f32.mrf.mxu2  ;;  %v98_v24 = vld [vmem:[#allocation2 + $0x78] sm:$0xff] }
 0x105   :  { %v1303_v32 = vmax.f32 %v1239_v28, 0.0  ;;  %v947_v34 = vpop.f32.mrf.mxu3 }
 0x106   :  { %v1272_v35 = vmax.f32 %v1208_v30, 0.0  ;;  %v948_v37 = vadd.f32 %v947_v34, %v778_v31  ;;  %v700_v38 = vpop.f32.mrf.mxu0 }
 0x107   :  { %v1367_v39 = vpack.c.bf16 %v1303_v32, %v1303_v32  ;;  %v869_v41 = vpop.f32.mrf.mxu1 }
 0x108   :  { %v1336_v42 = vpack.c.bf16 %v1272_v35, %v1272_v35  ;;  %v1041_v43 = vadd.f32 %v948_v37, %v127_v33  ;;  %v870_v44 = vadd.f32 %v869_v41, %v700_v38  ;;  %v130_v37 = vld [vmem:[#allocation2 + $0x178] sm:$0xff] }
 0x109   :  { %1432 = vst.msk [vmem:[%s2855_s3 + $0xa8] sm:$0xf] %vm1389_vm1, %v1367_v39 }
 0x10a   :  { %1401 = vst.msk [vmem:[%s2855_s3 + $0x2c] sm:$0xf] %vm1389_vm1, %v1336_v42  ;;  %v1172_v50 = vld [vmem:[#allocation2 + $0x158] sm:$0xff]  ;;  %v1010_v51 = vadd.f32 %v870_v44, %v96_v40 }
 0x10b   :  { %v1240_v53 = vadd.f32 %v2244_v5, %v1172_v50  ;;  %v1141_v54 = vld [vmem:[#allocation2 + $0x60] sm:$0xff]  ;;  %1106 = vst.msk [vmem:[#allocation2 + $0x160] sm:$0xff] %vm18_vm0, %v1041_v43 }
 0x10c   :  { %v1209_v57 = vadd.f32 %v2244_v5, %v1141_v54  ;;  %1075 = vst.msk [vmem:[#allocation2 + $0x68] sm:$0xff] %vm18_vm0, %v1010_v51  ;;  %v780_v58 = vpop.f32.mrf.mxu2  ;;  %v99_v43 = vld [vmem:[#allocation2 + $0x80] sm:$0xff] }
 0x10d   :  { %v1304_v59 = vmax.f32 %v1240_v53, 0.0  ;;  %v949_v61 = vpop.f32.mrf.mxu3 }
 0x10e   :  { %v1273_v0 = vmax.f32 %v1209_v57, 0.0  ;;  %v950_v1 = vadd.f32 %v949_v61, %v780_v58  ;;  %v703_v2 = vpop.f32.mrf.mxu0  ;;  %v100_v61 = vld [vmem:[#allocation2 + $0x88] sm:$0xff] }
 0x10f   :  { %v1368_v6 = vpack.c.bf16 %v1304_v59, %v1304_v59  ;;  %v872_v36 = vpop.f32.mrf.mxu1 }
 0x110   :  { %v1337_v8 = vpack.c.bf16 %v1273_v0, %v1273_v0  ;;  %v1042_v9 = vadd.f32 %v950_v1, %v128_v60  ;;  %v873_v10 = vadd.f32 %v872_v36, %v703_v2 }
 0x111   :  { %1433 = vst.msk [vmem:[%s2855_s3 + $0xac] sm:$0xf] %vm1389_vm1, %v1368_v6  ;;  %742 = vmatmul.bf16.gmra.mxu0 %v1581_v62  ;;  %822 = vmatmul.bf16.gmra.mxu2 %v1709_v63 }
 0x112   :  { %1402 = vst.msk [vmem:[%s2855_s3 + $0x30] sm:$0xf] %vm1389_vm1, %v1337_v8  ;;  %v1173_v11 = vld [vmem:[#allocation2 + $0x160] sm:$0xff]  ;;  %v1011_v12 = vadd.f32 %v873_v10, %v97_v7  ;;  %911 = vmatmul.bf16.gmra.mxu1 %v1585_v3  ;;  %991 = vmatmul.bf16.gmra.mxu3 %v1713_v4 }
 0x113   :  { %v1241_v13 = vadd.f32 %v2244_v5, %v1173_v11  ;;  %v1142_v14 = vld [vmem:[#allocation2 + $0x68] sm:$0xff]  ;;  %1107 = vst.msk [vmem:[#allocation2 + $0x168] sm:$0xff] %vm18_vm0, %v1042_v9 }
 0x114   :  { %v1210_v15 = vadd.f32 %v2244_v5, %v1142_v14  ;;  %1076 = vst.msk [vmem:[#allocation2 + $0x70] sm:$0xff] %vm18_vm0, %v1011_v12  ;;  %v783_v16 = vpop.f32.mrf.mxu2  ;;  %v132_v9 = vld [vmem:[#allocation2 + $0x188] sm:$0xff] }
 0x115   :  { %v1305_v17 = vmax.f32 %v1241_v13, 0.0  ;;  %v952_v19 = vpop.f32.mrf.mxu3 }
 0x116   :  { %v1274_v20 = vmax.f32 %v1210_v15, 0.0  ;;  %v953_v21 = vadd.f32 %v952_v19, %v783_v16  ;;  %v705_v22 = vpop.f32.mrf.mxu0  ;;  %v101_v15 = vld [vmem:[#allocation2 + $0x90] sm:$0xff] }
 0x117   :  { %v1369_v23 = vpack.c.bf16 %v1305_v17, %v1305_v17  ;;  %v874_v25 = vpop.f32.mrf.mxu1 }
 0x118   :  { %v1338_v26 = vpack.c.bf16 %v1274_v20, %v1274_v20  ;;  %v1043_v27 = vadd.f32 %v953_v21, %v129_v18  ;;  %v875_v28 = vadd.f32 %v874_v25, %v705_v22  ;;  %v2666_v21 = vld [vmem:[%s2854_s2] ss:$0 sm:$0xff] }
 0x119   :  { %1434 = vst.msk [vmem:[%s2855_s3 + $0xb0] sm:$0xf] %vm1389_vm1, %v1369_v23 }
 0x11a   :  { %1403 = vst.msk [vmem:[%s2855_s3 + $0x34] sm:$0xf] %vm1389_vm1, %v1338_v26  ;;  %v1174_v29 = vld [vmem:[#allocation2 + $0x168] sm:$0xff]  ;;  %v1012_v30 = vadd.f32 %v875_v28, %v98_v24 }
 0x11b   :  { %v1242_v31 = vadd.f32 %v2244_v5, %v1174_v29  ;;  %v1143_v32 = vld [vmem:[#allocation2 + $0x70] sm:$0xff]  ;;  %1108 = vst.msk [vmem:[#allocation2 + $0x170] sm:$0xff] %vm18_vm0, %v1043_v27 }
 0x11c   :  { %v1211_v33 = vadd.f32 %v2244_v5, %v1143_v32  ;;  %1077 = vst.msk [vmem:[#allocation2 + $0x78] sm:$0xff] %vm18_vm0, %v1012_v30  ;;  %v785_v34 = vpop.f32.mrf.mxu2  ;;  %v133_v27 = vld [vmem:[#allocation2 + $0x190] sm:$0xff] }
 0x11d   :  { %v1306_v35 = vmax.f32 %v1242_v31, 0.0  ;;  %v954_v38 = vpop.f32.mrf.mxu3 }
 0x11e   :  { %v1275_v39 = vmax.f32 %v1211_v33, 0.0  ;;  %v955_v40 = vadd.f32 %v954_v38, %v785_v34  ;;  %v708_v41 = vpop.f32.mrf.mxu0  ;;  %v102_v33 = vld [vmem:[#allocation2 + $0x98] sm:$0xff] }
 0x11f   :  { %v1370_v42 = vpack.c.bf16 %v1306_v35, %v1306_v35  ;;  %v877_v44 = vpop.f32.mrf.mxu1 }
 0x120   :  { %v1339_v45 = vpack.c.bf16 %v1275_v39, %v1275_v39  ;;  %v1044_v46 = vadd.f32 %v955_v40, %v130_v37  ;;  %v878_v47 = vadd.f32 %v877_v44, %v708_v41 }
 0x121   :  { %1435 = vst.msk [vmem:[%s2855_s3 + $0xb4] sm:$0xf] %vm1389_vm1, %v1370_v42 }
 0x122   :  { %1404 = vst.msk [vmem:[%s2855_s3 + $0x38] sm:$0xf] %vm1389_vm1, %v1339_v45  ;;  %v1175_v48 = vld [vmem:[#allocation2 + $0x170] sm:$0xff]  ;;  %v1013_v49 = vadd.f32 %v878_v47, %v99_v43 }
 0x123   :  { %v1243_v50 = vadd.f32 %v2244_v5, %v1175_v48  ;;  %v1144_v51 = vld [vmem:[#allocation2 + $0x78] sm:$0xff]  ;;  %1109 = vst.msk [vmem:[#allocation2 + $0x178] sm:$0xff] %vm18_vm0, %v1044_v46 }
 0x124   :  { %v1212_v52 = vadd.f32 %v2244_v5, %v1144_v51  ;;  %1078 = vst.msk [vmem:[#allocation2 + $0x80] sm:$0xff] %vm18_vm0, %v1013_v49  ;;  %v788_v53 = vpop.f32.mrf.mxu2  ;;  %v134_v46 = vld [vmem:[#allocation2 + $0x198] sm:$0xff] }
 0x125   :  { %v1307_v54 = vmax.f32 %v1243_v50, 0.0  ;;  %v957_v56 = vpop.f32.mrf.mxu3 }
 0x126   :  { %v1276_v57 = vmax.f32 %v1212_v52, 0.0  ;;  %v958_v58 = vadd.f32 %v957_v56, %v788_v53  ;;  %v710_v59 = vpop.f32.mrf.mxu0  ;;  %v103_v52 = vld [vmem:[#allocation2 + $0xa0] sm:$0xff] }
 0x127   :  { %v1371_v60 = vpack.c.bf16 %v1307_v54, %v1307_v54  ;;  %v879_v62 = vpop.f32.mrf.mxu1 }
 0x128   :  { %v1340_v63 = vpack.c.bf16 %v1276_v57, %v1276_v57  ;;  %v1045_v0 = vadd.f32 %v958_v58, %v131_v55  ;;  %v880_v1 = vadd.f32 %v879_v62, %v710_v59 }
 0x129   :  { %1436 = vst.msk [vmem:[%s2855_s3 + $0xb8] sm:$0xf] %vm1389_vm1, %v1371_v60 }
 0x12a   :  { %1405 = vst.msk [vmem:[%s2855_s3 + $0x3c] sm:$0xf] %vm1389_vm1, %v1340_v63  ;;  %v1176_v2 = vld [vmem:[#allocation2 + $0x178] sm:$0xff]  ;;  %v1014_v3 = vadd.f32 %v880_v1, %v100_v61 }
 0x12b   :  { %v1244_v4 = vadd.f32 %v2244_v5, %v1176_v2  ;;  %v1145_v6 = vld [vmem:[#allocation2 + $0x80] sm:$0xff]  ;;  %1110 = vst.msk [vmem:[#allocation2 + $0x180] sm:$0xff] %vm18_vm0, %v1045_v0 }
 0x12c   :  { %v1213_v7 = vadd.f32 %v2244_v5, %v1145_v6  ;;  %1079 = vst.msk [vmem:[#allocation2 + $0x88] sm:$0xff] %vm18_vm0, %v1014_v3  ;;  %v790_v36 = vpop.f32.mrf.mxu2  ;;  %v135_v0 = vld [vmem:[#allocation2 + $0x1a0] sm:$0xff] }
 0x12d   :  { %v1308_v8 = vmax.f32 %v1244_v4, 0.0  ;;  %v959_v10 = vpop.f32.mrf.mxu3 }
 0x12e   :  { %v1277_v11 = vmax.f32 %v1213_v7, 0.0  ;;  %v960_v12 = vadd.f32 %v959_v10, %v790_v36  ;;  %v713_v13 = vpop.f32.mrf.mxu0  ;;  %v104_v7 = vld [vmem:[#allocation2 + $0xa8] sm:$0xff] }
 0x12f   :  { %v1372_v14 = vpack.c.bf16 %v1308_v8, %v1308_v8  ;;  %v882_v16 = vpop.f32.mrf.mxu1 }
 0x130   :  { %v1341_v17 = vpack.c.bf16 %v1277_v11, %v1277_v11  ;;  %v1046_v18 = vadd.f32 %v960_v12, %v132_v9  ;;  %v883_v19 = vadd.f32 %v882_v16, %v713_v13 }
 0x131   :  { %1437 = vst.msk [vmem:[%s2855_s3 + $0xbc] sm:$0xf] %vm1389_vm1, %v1372_v14 }
 0x132   :  { %1406 = vst.msk [vmem:[%s2855_s3 + $0x40] sm:$0xf] %vm1389_vm1, %v1341_v17  ;;  %v1177_v5 = vld [vmem:[#allocation2 + $0x180] sm:$0xff]  ;;  %v1015_v20 = vadd.f32 %v883_v19, %v101_v15 }
 0x133   :  { %v1245_v22 = vadd.f32 %v2666_v21, %v1177_v5  ;;  %v1146_v23 = vld [vmem:[#allocation2 + $0x88] sm:$0xff]  ;;  %1111 = vst.msk [vmem:[#allocation2 + $0x188] sm:$0xff] %vm18_vm0, %v1046_v18 }
 0x134   :  { %v1214_v24 = vadd.f32 %v2666_v21, %v1146_v23  ;;  %1080 = vst.msk [vmem:[#allocation2 + $0x90] sm:$0xff] %vm18_vm0, %v1015_v20  ;;  %v793_v25 = vpop.f32.mrf.mxu2  ;;  %v136_v18 = vld [vmem:[#allocation2 + $0x1a8] sm:$0xff] }
 0x135   :  { %v1309_v26 = vmax.f32 %v1245_v22, 0.0  ;;  %v962_v28 = vpop.f32.mrf.mxu3 }
 0x136   :  { %v1278_v29 = vmax.f32 %v1214_v24, 0.0  ;;  %v963_v30 = vadd.f32 %v962_v28, %v793_v25  ;;  %v715_v31 = vpop.f32.mrf.mxu0  ;;  %v105_v24 = vld [vmem:[#allocation2 + $0xb0] sm:$0xff] }
 0x137   :  { %v1373_v32 = vpack.c.bf16 %v1309_v26, %v1309_v26  ;;  %v884_v34 = vpop.f32.mrf.mxu1 }
 0x138   :  { %v1342_v35 = vpack.c.bf16 %v1278_v29, %v1278_v29  ;;  %v1047_v37 = vadd.f32 %v963_v30, %v133_v27  ;;  %v885_v38 = vadd.f32 %v884_v34, %v715_v31 }
 0x139   :  { %1438 = vst.msk [vmem:[%s2855_s3 + $0xc0] sm:$0xf] %vm1389_vm1, %v1373_v32 }
 0x13a   :  { %1407 = vst.msk [vmem:[%s2855_s3 + $0x44] sm:$0xf] %vm1389_vm1, %v1342_v35  ;;  %v1178_v39 = vld [vmem:[#allocation2 + $0x188] sm:$0xff]  ;;  %v1016_v40 = vadd.f32 %v885_v38, %v102_v33 }
 0x13b   :  { %v1246_v41 = vadd.f32 %v2666_v21, %v1178_v39  ;;  %v1147_v42 = vld [vmem:[#allocation2 + $0x90] sm:$0xff]  ;;  %1112 = vst.msk [vmem:[#allocation2 + $0x190] sm:$0xff] %vm18_vm0, %v1047_v37 }
 0x13c   :  { %v1215_v43 = vadd.f32 %v2666_v21, %v1147_v42  ;;  %1081 = vst.msk [vmem:[#allocation2 + $0x98] sm:$0xff] %vm18_vm0, %v1016_v40  ;;  %v795_v44 = vpop.f32.mrf.mxu2  ;;  %v137_v37 = vld [vmem:[#allocation2 + $0x1b0] sm:$0xff] }
 0x13d   :  { %v1310_v45 = vmax.f32 %v1246_v41, 0.0  ;;  %v964_v47 = vpop.f32.mrf.mxu3 }
 0x13e   :  { %v1279_v48 = vmax.f32 %v1215_v43, 0.0  ;;  %v965_v49 = vadd.f32 %v964_v47, %v795_v44  ;;  %v718_v50 = vpop.f32.mrf.mxu0  ;;  %v106_v43 = vld [vmem:[#allocation2 + $0xb8] sm:$0xff] }
 0x13f   :  { %v1374_v51 = vpack.c.bf16 %v1310_v45, %v1310_v45  ;;  %v887_v53 = vpop.f32.mrf.mxu1 }
 0x140   :  { %v1343_v54 = vpack.c.bf16 %v1279_v48, %v1279_v48  ;;  %v1048_v55 = vadd.f32 %v965_v49, %v134_v46  ;;  %v888_v56 = vadd.f32 %v887_v53, %v718_v50 }
 0x141   :  { %1439 = vst.msk [vmem:[%s2855_s3 + $0xc4] sm:$0xf] %vm1389_vm1, %v1374_v51 }
 0x142   :  { %1408 = vst.msk [vmem:[%s2855_s3 + $0x48] sm:$0xf] %vm1389_vm1, %v1343_v54  ;;  %v1179_v57 = vld [vmem:[#allocation2 + $0x190] sm:$0xff]  ;;  %v1017_v58 = vadd.f32 %v888_v56, %v103_v52 }
 0x143   :  { %v1247_v59 = vadd.f32 %v2666_v21, %v1179_v57  ;;  %v1148_v60 = vld [vmem:[#allocation2 + $0x98] sm:$0xff]  ;;  %1113 = vst.msk [vmem:[#allocation2 + $0x198] sm:$0xff] %vm18_vm0, %v1048_v55 }
 0x144   :  { %v1216_v61 = vadd.f32 %v2666_v21, %v1148_v60  ;;  %1082 = vst.msk [vmem:[#allocation2 + $0xa0] sm:$0xff] %vm18_vm0, %v1017_v58  ;;  %v798_v62 = vpop.f32.mrf.mxu2  ;;  %v138_v55 = vld [vmem:[#allocation2 + $0x1b8] sm:$0xff] }
 0x145   :  { %v1311_v63 = vmax.f32 %v1247_v59, 0.0  ;;  %v967_v1 = vpop.f32.mrf.mxu3 }
 0x146   :  { %v1280_v2 = vmax.f32 %v1216_v61, 0.0  ;;  %v968_v3 = vadd.f32 %v967_v1, %v798_v62  ;;  %v720_v4 = vpop.f32.mrf.mxu0  ;;  %v107_v61 = vld [vmem:[#allocation2 + $0xc0] sm:$0xff] }
 0x147   :  { %v1375_v6 = vpack.c.bf16 %v1311_v63, %v1311_v63  ;;  %v889_v36 = vpop.f32.mrf.mxu1 }
 0x148   :  { %v1344_v8 = vpack.c.bf16 %v1280_v2, %v1280_v2  ;;  %v1049_v9 = vadd.f32 %v968_v3, %v135_v0  ;;  %v890_v10 = vadd.f32 %v889_v36, %v720_v4 }
 0x149   :  { %1440 = vst.msk [vmem:[%s2855_s3 + $0xc8] sm:$0xf] %vm1389_vm1, %v1375_v6 }
 0x14a   :  { %1409 = vst.msk [vmem:[%s2855_s3 + $0x4c] sm:$0xf] %vm1389_vm1, %v1344_v8  ;;  %v1180_v11 = vld [vmem:[#allocation2 + $0x198] sm:$0xff]  ;;  %v1018_v12 = vadd.f32 %v890_v10, %v104_v7 }
 0x14b   :  { %v1248_v13 = vadd.f32 %v2666_v21, %v1180_v11  ;;  %v1149_v14 = vld [vmem:[#allocation2 + $0xa0] sm:$0xff]  ;;  %1114 = vst.msk [vmem:[#allocation2 + $0x1a0] sm:$0xff] %vm18_vm0, %v1049_v9 }
 0x14c   :  { %v1217_v15 = vadd.f32 %v2666_v21, %v1149_v14  ;;  %1083 = vst.msk [vmem:[#allocation2 + $0xa8] sm:$0xff] %vm18_vm0, %v1018_v12  ;;  %v800_v16 = vpop.f32.mrf.mxu2  ;;  %v139_v9 = vld [vmem:[#allocation2 + $0x1c0] sm:$0xff] }
 0x14d   :  { %v1312_v17 = vmax.f32 %v1248_v13, 0.0  ;;  %v969_v19 = vpop.f32.mrf.mxu3 }
 0x14e   :  { %v1281_v5 = vmax.f32 %v1217_v15, 0.0  ;;  %v970_v20 = vadd.f32 %v969_v19, %v800_v16  ;;  %v723_v22 = vpop.f32.mrf.mxu0  ;;  %v108_v15 = vld [vmem:[#allocation2 + $0xc8] sm:$0xff] }
 0x14f   :  { %v1376_v23 = vpack.c.bf16 %v1312_v17, %v1312_v17  ;;  %v892_v25 = vpop.f32.mrf.mxu1 }
 0x150   :  { %v1345_v26 = vpack.c.bf16 %v1281_v5, %v1281_v5  ;;  %v1050_v27 = vadd.f32 %v970_v20, %v136_v18  ;;  %v893_v28 = vadd.f32 %v892_v25, %v723_v22 }
 0x151   :  { %1441 = vst.msk [vmem:[%s2855_s3 + $0xcc] sm:$0xf] %vm1389_vm1, %v1376_v23 }
 0x152   :  { %1410 = vst.msk [vmem:[%s2855_s3 + $0x50] sm:$0xf] %vm1389_vm1, %v1345_v26  ;;  %v1181_v29 = vld [vmem:[#allocation2 + $0x1a0] sm:$0xff]  ;;  %v1019_v30 = vadd.f32 %v893_v28, %v105_v24 }
 0x153   :  { %v1249_v31 = vadd.f32 %v2666_v21, %v1181_v29  ;;  %v1150_v32 = vld [vmem:[#allocation2 + $0xa8] sm:$0xff]  ;;  %1115 = vst.msk [vmem:[#allocation2 + $0x1a8] sm:$0xff] %vm18_vm0, %v1050_v27 }
 0x154   :  { %v1218_v33 = vadd.f32 %v2666_v21, %v1150_v32  ;;  %1084 = vst.msk [vmem:[#allocation2 + $0xb0] sm:$0xff] %vm18_vm0, %v1019_v30  ;;  %v803_v34 = vpop.f32.mrf.mxu2  ;;  %v140_v27 = vld [vmem:[#allocation2 + $0x1c8] sm:$0xff] }
 0x155   :  { %v1313_v35 = vmax.f32 %v1249_v31, 0.0  ;;  %v972_v38 = vpop.f32.mrf.mxu3 }
 0x156   :  { %v1282_v39 = vmax.f32 %v1218_v33, 0.0  ;;  %v973_v40 = vadd.f32 %v972_v38, %v803_v34  ;;  %v725_v41 = vpop.f32.mrf.mxu0  ;;  %v109_v33 = vld [vmem:[#allocation2 + $0xd0] sm:$0xff] }
 0x157   :  { %v1377_v42 = vpack.c.bf16 %v1313_v35, %v1313_v35  ;;  %v894_v44 = vpop.f32.mrf.mxu1 }
 0x158   :  { %v1346_v45 = vpack.c.bf16 %v1282_v39, %v1282_v39  ;;  %v1051_v46 = vadd.f32 %v973_v40, %v137_v37  ;;  %v895_v47 = vadd.f32 %v894_v44, %v725_v41 }
 0x159   :  { %1442 = vst.msk [vmem:[%s2855_s3 + $0xd0] sm:$0xf] %vm1389_vm1, %v1377_v42 }
 0x15a   :  { %1411 = vst.msk [vmem:[%s2855_s3 + $0x54] sm:$0xf] %vm1389_vm1, %v1346_v45  ;;  %v1182_v48 = vld [vmem:[#allocation2 + $0x1a8] sm:$0xff]  ;;  %v1020_v49 = vadd.f32 %v895_v47, %v106_v43 }
 0x15b   :  { %v1250_v50 = vadd.f32 %v2666_v21, %v1182_v48  ;;  %v1151_v51 = vld [vmem:[#allocation2 + $0xb0] sm:$0xff]  ;;  %1116 = vst.msk [vmem:[#allocation2 + $0x1b0] sm:$0xff] %vm18_vm0, %v1051_v46 }
 0x15c   :  { %v1219_v52 = vadd.f32 %v2666_v21, %v1151_v51  ;;  %1085 = vst.msk [vmem:[#allocation2 + $0xb8] sm:$0xff] %vm18_vm0, %v1020_v49  ;;  %v805_v53 = vpop.f32.mrf.mxu2  ;;  %v141_v46 = vld [vmem:[#allocation2 + $0x1d0] sm:$0xff] }
 0x15d   :  { %v1314_v54 = vmax.f32 %v1250_v50, 0.0  ;;  %v974_v56 = vpop.f32.mrf.mxu3 }
 0x15e   :  { %v1283_v57 = vmax.f32 %v1219_v52, 0.0  ;;  %v975_v58 = vadd.f32 %v974_v56, %v805_v53  ;;  %v728_v59 = vpop.f32.mrf.mxu0  ;;  %v110_v52 = vld [vmem:[#allocation2 + $0xd8] sm:$0xff] }
 0x15f   :  { %v1378_v60 = vpack.c.bf16 %v1314_v54, %v1314_v54  ;;  %v897_v62 = vpop.f32.mrf.mxu1 }
 0x160   :  { %v1347_v63 = vpack.c.bf16 %v1283_v57, %v1283_v57  ;;  %v1052_v0 = vadd.f32 %v975_v58, %v138_v55  ;;  %v898_v1 = vadd.f32 %v897_v62, %v728_v59 }
 0x161   :  { %1443 = vst.msk [vmem:[%s2855_s3 + $0xd4] sm:$0xf] %vm1389_vm1, %v1378_v60 }
 0x162   :  { %1412 = vst.msk [vmem:[%s2855_s3 + $0x58] sm:$0xf] %vm1389_vm1, %v1347_v63  ;;  %v1183_v2 = vld [vmem:[#allocation2 + $0x1b0] sm:$0xff]  ;;  %v1021_v3 = vadd.f32 %v898_v1, %v107_v61 }
 0x163   :  { %v1251_v4 = vadd.f32 %v2666_v21, %v1183_v2  ;;  %v1152_v6 = vld [vmem:[#allocation2 + $0xb8] sm:$0xff]  ;;  %1117 = vst.msk [vmem:[#allocation2 + $0x1b8] sm:$0xff] %vm18_vm0, %v1052_v0 }
 0x164   :  { %v1220_v7 = vadd.f32 %v2666_v21, %v1152_v6  ;;  %1086 = vst.msk [vmem:[#allocation2 + $0xc0] sm:$0xff] %vm18_vm0, %v1021_v3  ;;  %v808_v36 = vpop.f32.mrf.mxu2  ;;  %v142_v0 = vld [vmem:[#allocation2 + $0x1d8] sm:$0xff] }
 0x165   :  { %v1315_v8 = vmax.f32 %v1251_v4, 0.0  ;;  %v977_v10 = vpop.f32.mrf.mxu3 }
 0x166   :  { %v1284_v11 = vmax.f32 %v1220_v7, 0.0  ;;  %v978_v12 = vadd.f32 %v977_v10, %v808_v36  ;;  %v730_v13 = vpop.f32.mrf.mxu0  ;;  %v111_v7 = vld [vmem:[#allocation2 + $0xe0] sm:$0xff] }
 0x167   :  { %v1379_v14 = vpack.c.bf16 %v1315_v8, %v1315_v8  ;;  %v899_v16 = vpop.f32.mrf.mxu1 }
 0x168   :  { %v1348_v17 = vpack.c.bf16 %v1284_v11, %v1284_v11  ;;  %v1053_v18 = vadd.f32 %v978_v12, %v139_v9  ;;  %v900_v19 = vadd.f32 %v899_v16, %v730_v13 }
 0x169   :  { %1444 = vst.msk [vmem:[%s2855_s3 + $0xd8] sm:$0xf] %vm1389_vm1, %v1379_v14 }
 0x16a   :  { %1413 = vst.msk [vmem:[%s2855_s3 + $0x5c] sm:$0xf] %vm1389_vm1, %v1348_v17  ;;  %v1184_v5 = vld [vmem:[#allocation2 + $0x1b8] sm:$0xff]  ;;  %v1022_v20 = vadd.f32 %v900_v19, %v108_v15 }
 0x16b   :  { %v1252_v22 = vadd.f32 %v2666_v21, %v1184_v5  ;;  %v1153_v23 = vld [vmem:[#allocation2 + $0xc0] sm:$0xff]  ;;  %1118 = vst.msk [vmem:[#allocation2 + $0x1c0] sm:$0xff] %vm18_vm0, %v1053_v18 }
 0x16c   :  { %v1221_v24 = vadd.f32 %v2666_v21, %v1153_v23  ;;  %1087 = vst.msk [vmem:[#allocation2 + $0xc8] sm:$0xff] %vm18_vm0, %v1022_v20  ;;  %v810_v25 = vpop.f32.mrf.mxu2  ;;  %v143_v18 = vld [vmem:[#allocation2 + $0x1e0] sm:$0xff] }
 0x16d   :  { %v1316_v26 = vmax.f32 %v1252_v22, 0.0  ;;  %v979_v28 = vpop.f32.mrf.mxu3 }
 0x16e   :  { %v1285_v29 = vmax.f32 %v1221_v24, 0.0  ;;  %v980_v30 = vadd.f32 %v979_v28, %v810_v25  ;;  %v733_v31 = vpop.f32.mrf.mxu0  ;;  %v112_v24 = vld [vmem:[#allocation2 + $0xe8] sm:$0xff] }
 0x16f   :  { %v1380_v32 = vpack.c.bf16 %v1316_v26, %v1316_v26  ;;  %v902_v34 = vpop.f32.mrf.mxu1 }
 0x170   :  { %v1349_v35 = vpack.c.bf16 %v1285_v29, %v1285_v29  ;;  %v1054_v37 = vadd.f32 %v980_v30, %v140_v27  ;;  %v903_v38 = vadd.f32 %v902_v34, %v733_v31 }
 0x171   :  { %1445 = vst.msk [vmem:[%s2855_s3 + $0xdc] sm:$0xf] %vm1389_vm1, %v1380_v32 }
 0x172   :  { %1414 = vst.msk [vmem:[%s2855_s3 + $0x60] sm:$0xf] %vm1389_vm1, %v1349_v35  ;;  %v1185_v39 = vld [vmem:[#allocation2 + $0x1c0] sm:$0xff]  ;;  %v1023_v40 = vadd.f32 %v903_v38, %v109_v33 }
 0x173   :  { %v1253_v41 = vadd.f32 %v2666_v21, %v1185_v39  ;;  %v1154_v42 = vld [vmem:[#allocation2 + $0xc8] sm:$0xff]  ;;  %1119 = vst.msk [vmem:[#allocation2 + $0x1c8] sm:$0xff] %vm18_vm0, %v1054_v37 }
 0x174   :  { %v1222_v43 = vadd.f32 %v2666_v21, %v1154_v42  ;;  %1088 = vst.msk [vmem:[#allocation2 + $0xd0] sm:$0xff] %vm18_vm0, %v1023_v40  ;;  %v813_v44 = vpop.f32.mrf.mxu2  ;;  %v144_v37 = vld [vmem:[#allocation2 + $0x1e8] sm:$0xff] }
 0x175   :  { %v1317_v45 = vmax.f32 %v1253_v41, 0.0  ;;  %v982_v47 = vpop.f32.mrf.mxu3 }
 0x176   :  { %v1286_v48 = vmax.f32 %v1222_v43, 0.0  ;;  %v983_v49 = vadd.f32 %v982_v47, %v813_v44  ;;  %v735_v50 = vpop.f32.mrf.mxu0  ;;  %v113_v43 = vld [vmem:[#allocation2 + $0xf0] sm:$0xff] }
 0x177   :  { %v1381_v51 = vpack.c.bf16 %v1317_v45, %v1317_v45  ;;  %v904_v53 = vpop.f32.mrf.mxu1 }
 0x178   :  { %v1350_v54 = vpack.c.bf16 %v1286_v48, %v1286_v48  ;;  %v1055_v55 = vadd.f32 %v983_v49, %v141_v46  ;;  %v905_v56 = vadd.f32 %v904_v53, %v735_v50 }
 0x179   :  { %1446 = vst.msk [vmem:[%s2855_s3 + $0xe0] sm:$0xf] %vm1389_vm1, %v1381_v51 }
 0x17a   :  { %1415 = vst.msk [vmem:[%s2855_s3 + $0x64] sm:$0xf] %vm1389_vm1, %v1350_v54  ;;  %v1186_v57 = vld [vmem:[#allocation2 + $0x1c8] sm:$0xff]  ;;  %v1024_v58 = vadd.f32 %v905_v56, %v110_v52 }
 0x17b   :  { %v1254_v59 = vadd.f32 %v2666_v21, %v1186_v57  ;;  %v1155_v60 = vld [vmem:[#allocation2 + $0xd0] sm:$0xff]  ;;  %1120 = vst.msk [vmem:[#allocation2 + $0x1d0] sm:$0xff] %vm18_vm0, %v1055_v55 }
 0x17c   :  { %v1223_v61 = vadd.f32 %v2666_v21, %v1155_v60  ;;  %1089 = vst.msk [vmem:[#allocation2 + $0xd8] sm:$0xff] %vm18_vm0, %v1024_v58  ;;  %v815_v62 = vpop.f32.mrf.mxu2  ;;  %v145_v55 = vld [vmem:[#allocation2 + $0x1f0] sm:$0xff] }
 0x17d   :  { %v1318_v63 = vmax.f32 %v1254_v59, 0.0  ;;  %v984_v1 = vpop.f32.mrf.mxu3 }
 0x17e   :  { %v1287_v2 = vmax.f32 %v1223_v61, 0.0  ;;  %v985_v3 = vadd.f32 %v984_v1, %v815_v62  ;;  %v738_v4 = vpop.f32.mrf.mxu0  ;;  %v114_v61 = vld [vmem:[#allocation2 + $0xf8] sm:$0xff] }
 0x17f   :  { %v1382_v6 = vpack.c.bf16 %v1318_v63, %v1318_v63  ;;  %v907_v36 = vpop.f32.mrf.mxu1 }
 0x180   :  { %v1351_v8 = vpack.c.bf16 %v1287_v2, %v1287_v2  ;;  %v1056_v9 = vadd.f32 %v985_v3, %v142_v0  ;;  %v908_v10 = vadd.f32 %v907_v36, %v738_v4 }
 0x181   :  { %1447 = vst.msk [vmem:[%s2855_s3 + $0xe4] sm:$0xf] %vm1389_vm1, %v1382_v6 }
 0x182   :  { %1416 = vst.msk [vmem:[%s2855_s3 + $0x68] sm:$0xf] %vm1389_vm1, %v1351_v8  ;;  %v1187_v11 = vld [vmem:[#allocation2 + $0x1d0] sm:$0xff]  ;;  %v1025_v12 = vadd.f32 %v908_v10, %v111_v7 }
 0x183   :  { %v1255_v13 = vadd.f32 %v2666_v21, %v1187_v11  ;;  %v1156_v14 = vld [vmem:[#allocation2 + $0xd8] sm:$0xff]  ;;  %1121 = vst.msk [vmem:[#allocation2 + $0x1d8] sm:$0xff] %vm18_vm0, %v1056_v9 }
 0x184   :  { %v1224_v15 = vadd.f32 %v2666_v21, %v1156_v14  ;;  %1090 = vst.msk [vmem:[#allocation2 + $0xe0] sm:$0xff] %vm18_vm0, %v1025_v12  ;;  %v818_v16 = vpop.f32.mrf.mxu2  ;;  %v146_v9 = vld [vmem:[#allocation2 + $0x1f8] sm:$0xff] }
 0x185   :  { %v1319_v17 = vmax.f32 %v1255_v13, 0.0  ;;  %v987_v19 = vpop.f32.mrf.mxu3 }
 0x186   :  { %v1288_v5 = vmax.f32 %v1224_v15, 0.0  ;;  %v988_v20 = vadd.f32 %v987_v19, %v818_v16  ;;  %v740_v22 = vpop.f32.mrf.mxu0 }
 0x187   :  { %v1383_v23 = vpack.c.bf16 %v1319_v17, %v1319_v17  ;;  %v909_v25 = vpop.f32.mrf.mxu1 }
 0x188   :  { %v1352_v26 = vpack.c.bf16 %v1288_v5, %v1288_v5  ;;  %v1057_v27 = vadd.f32 %v988_v20, %v143_v18  ;;  %v910_v28 = vadd.f32 %v909_v25, %v740_v22 }
 0x189   :  { %1448 = vst.msk [vmem:[%s2855_s3 + $0xe8] sm:$0xf] %vm1389_vm1, %v1383_v23 }
 0x18a   :  { %1417 = vst.msk [vmem:[%s2855_s3 + $0x6c] sm:$0xf] %vm1389_vm1, %v1352_v26  ;;  %v1188_v29 = vld [vmem:[#allocation2 + $0x1d8] sm:$0xff]  ;;  %v1026_v30 = vadd.f32 %v910_v28, %v112_v24 }
 0x18b   :  { %v1256_v31 = vadd.f32 %v2666_v21, %v1188_v29  ;;  %v1157_v32 = vld [vmem:[#allocation2 + $0xe0] sm:$0xff]  ;;  %1122 = vst.msk [vmem:[#allocation2 + $0x1e0] sm:$0xff] %vm18_vm0, %v1057_v27 }
 0x18c   :  { %v1225_v33 = vadd.f32 %v2666_v21, %v1157_v32  ;;  %1091 = vst.msk [vmem:[#allocation2 + $0xe8] sm:$0xff] %vm18_vm0, %v1026_v30  ;;  %v820_v34 = vpop.f32.mrf.mxu2 }
 0x18d   :  { %v1320_v35 = vmax.f32 %v1256_v31, 0.0  ;;  %v989_v38 = vpop.f32.mrf.mxu3 }
 0x18e   :  { %v1289_v39 = vmax.f32 %v1225_v33, 0.0  ;;  %v990_v40 = vadd.f32 %v989_v38, %v820_v34  ;;  %v743_v41 = vpop.f32.mrf.mxu0 }
 0x18f   :  { %v1384_v42 = vpack.c.bf16 %v1320_v35, %v1320_v35  ;;  %v912_v44 = vpop.f32.mrf.mxu1 }
 0x190   :  { %v1353_v45 = vpack.c.bf16 %v1289_v39, %v1289_v39  ;;  %v1058_v46 = vadd.f32 %v990_v40, %v144_v37  ;;  %v913_v47 = vadd.f32 %v912_v44, %v743_v41 }
 0x191   :  { %1449 = vst.msk [vmem:[%s2855_s3 + $0xec] sm:$0xf] %vm1389_vm1, %v1384_v42 }
 0x192   :  { %1418 = vst.msk [vmem:[%s2855_s3 + $0x70] sm:$0xf] %vm1389_vm1, %v1353_v45  ;;  %v1189_v48 = vld [vmem:[#allocation2 + $0x1e0] sm:$0xff]  ;;  %v1027_v49 = vadd.f32 %v913_v47, %v113_v43 }
 0x193   :  { %v1257_v50 = vadd.f32 %v2666_v21, %v1189_v48  ;;  %v1158_v51 = vld [vmem:[#allocation2 + $0xe8] sm:$0xff]  ;;  %1123 = vst.msk [vmem:[#allocation2 + $0x1e8] sm:$0xff] %vm18_vm0, %v1058_v46 }
 0x194   :  { %v1226_v52 = vadd.f32 %v2666_v21, %v1158_v51  ;;  %1092 = vst.msk [vmem:[#allocation2 + $0xf0] sm:$0xff] %vm18_vm0, %v1027_v49  ;;  %v823_v53 = vpop.f32.mrf.mxu2 }
 0x195   :  { %v1321_v54 = vmax.f32 %v1257_v50, 0.0  ;;  %v992_v56 = vpop.f32.mrf.mxu3 }
 0x196   :  { %v1290_v57 = vmax.f32 %v1226_v52, 0.0  ;;  %v993_v58 = vadd.f32 %v992_v56, %v823_v53  ;;  %v745_v59 = vpop.f32.mrf.mxu0 }
 0x197   :  { %v1385_v60 = vpack.c.bf16 %v1321_v54, %v1321_v54  ;;  %v914_v62 = vpop.f32.mrf.mxu1 }
 0x198   :  { %v1354_v63 = vpack.c.bf16 %v1290_v57, %v1290_v57  ;;  %v1059_v0 = vadd.f32 %v993_v58, %v145_v55  ;;  %v915_v1 = vadd.f32 %v914_v62, %v745_v59 }
 0x199   :  { %1450 = vst.msk [vmem:[%s2855_s3 + $0xf0] sm:$0xf] %vm1389_vm1, %v1385_v60 }
 0x19a   :  { %1419 = vst.msk [vmem:[%s2855_s3 + $0x74] sm:$0xf] %vm1389_vm1, %v1354_v63  ;;  %v1190_v2 = vld [vmem:[#allocation2 + $0x1e8] sm:$0xff]  ;;  %v1028_v3 = vadd.f32 %v915_v1, %v114_v61 }
 0x19b   :  { %v1258_v4 = vadd.f32 %v2666_v21, %v1190_v2  ;;  %v1159_v6 = vld [vmem:[#allocation2 + $0xf0] sm:$0xff]  ;;  %1124 = vst.msk [vmem:[#allocation2 + $0x1f0] sm:$0xff] %vm18_vm0, %v1059_v0 }
 0x19c   :  { %v1227_v7 = vadd.f32 %v2666_v21, %v1159_v6  ;;  %1093 = vst.msk [vmem:[#allocation2 + $0xf8] sm:$0xff] %vm18_vm0, %v1028_v3  ;;  %v825_v36 = vpop.f32.mrf.mxu2 }
 0x19d   :  { %v1322_v8 = vmax.f32 %v1258_v4, 0.0  ;;  %v994_v10 = vpop.f32.mrf.mxu3 }
 0x19e   :  { %v1291_v11 = vmax.f32 %v1227_v7, 0.0  ;;  %v995_v12 = vadd.f32 %v994_v10, %v825_v36 }
 0x19f   :  { %v1386_v13 = vpack.c.bf16 %v1322_v8, %v1322_v8 }
 0x1a0   :  { %v1355_v14 = vpack.c.bf16 %v1291_v11, %v1291_v11  ;;  %v1060_v15 = vadd.f32 %v995_v12, %v146_v9 }
 0x1a1   :  { %1451 = vst.msk [vmem:[%s2855_s3 + $0xf4] sm:$0xf] %vm1389_vm1, %v1386_v13 }
 0x1a2   :  { %1420 = vst.msk [vmem:[%s2855_s3 + $0x78] sm:$0xf] %vm1389_vm1, %v1355_v14  ;;  %v1191_v16 = vld [vmem:[#allocation2 + $0x1f0] sm:$0xff] }
 0x1a3   :  { %v1259_v17 = vadd.f32 %v2666_v21, %v1191_v16  ;;  %v1160_v18 = vld [vmem:[#allocation2 + $0xf8] sm:$0xff]  ;;  %1125 = vst.msk [vmem:[#allocation2 + $0x1f8] sm:$0xff] %vm18_vm0, %v1060_v15 }
 0x1a4   :  { %v1228_v19 = vadd.f32 %v2666_v21, %v1160_v18 }
 0x1a5   :  { %v1323_v5 = vmax.f32 %v1259_v17, 0.0 }
 0x1a6   :  { %v1292_v20 = vmax.f32 %v1228_v19, 0.0 }
 0x1a7   :  { %v1387_v22 = vpack.c.bf16 %v1323_v5, %v1323_v5 }
 0x1a8   :  { %v1356_v23 = vpack.c.bf16 %v1292_v20, %v1292_v20 }
 0x1a9   :  { %1452 = vst.msk [vmem:[%s2855_s3 + $0xf8] sm:$0xf] %vm1389_vm1, %v1387_v22 }
 0x1aa   :  { %1421 = vst.msk [vmem:[%s2855_s3 + $0x7c] sm:$0xf] %vm1389_vm1, %v1356_v23  ;;  %v1192_v24 = vld [vmem:[#allocation2 + $0x1f8] sm:$0xff] }
 0x1ab   :  { %v1260_v25 = vadd.f32 %v2666_v21, %v1192_v24 }
 0x1ad   :  { %v1324_v26 = vmax.f32 %v1260_v25, 0.0 }
 0x1af   :  { %v1388_v27 = vpack.c.bf16 %v1324_v26, %v1324_v26 }
 0x1b1   :  { %1453 = vst.msk [vmem:[%s2855_s3 + $0xfc] sm:$0xf] %vm1389_vm1, %v1388_v27 }

// kernel: resnet_forward.23
= control target key start
LH: loop header
LB: loop body
LE: loop exit
PB: predicated region body
PF: predicated region fallthrough
CT: control target
= control target key end

     0   :  { %s478_s0 = inlined_call_operand.vmem [shape: bf16[16,512], index: 0, kind: input, shape index: {}]   ;;  %s479_s1 = inlined_call_operand.vmem [shape: bf16[16,512], index: 1, kind: input, shape index: {}]   ;;  %s480_s2 = inlined_call_operand.vmem [shape: bf16[16,512], index: 2, kind: input, shape index: {}]   ;;  %s481_s3 = inlined_call_operand.vmem [shape: bf16[16,512], index: 3, kind: input, shape index: {}]   ;;  %s482_s4 = inlined_call_operand.vmem [shape: bf16[16,512], index: 4, kind: input, shape index: {}]   ;;  %s483_s5 = inlined_call_operand.vmem [shape: bf16[16,512], index: 5, kind: input, shape index: {}]   ;;  %s484_s6 = inlined_call_operand.vmem [shape: bf16[16,512], index: 6, kind: input, shape index: {}]   ;;  %s485_s7 = inlined_call_operand.vmem [shape: bf16[16,512], index: 7, kind: input, shape index: {}]   ;;  %s486_s8 = inlined_call_operand.vmem [shape: bf16[16,512], index: 8, kind: input, shape index: {}]   ;;  %s487_s9 = inlined_call_operand.vmem [shape: bf16[16,512], index: 9, kind: output, shape index: {}]  }
   0x1   :  { %v32_v0 = vld [vmem:[%s478_s0] sm:$0xff]  ;;  %v33_v20 = vld [vmem:[%s478_s0 + $0x8] sm:$0xff]  ;;  %v34_v61 = vld [vmem:[%s478_s0 + $0x10] sm:$0xff] }
   0x2   :  { %v36_v1 = vld [vmem:[%s479_s1] sm:$0xff]  ;;  %v40_v3 = vunpack.c.l.bf16 %v32_v0  ;;  %v41_v4 = vunpack.c.h.bf16 %v32_v0  ;;  %v37_v25 = vld [vmem:[%s479_s1 + $0x8] sm:$0xff]  ;;  %v42_v34 = vunpack.c.l.bf16 %v33_v20  ;;  %v43_v35 = vunpack.c.h.bf16 %v33_v20 }
   0x3   :  { %v68_v2 = vld [vmem:[%s480_s2] sm:$0xff]  ;;  %v48_v5 = vunpack.c.l.bf16 %v36_v1  ;;  %v49_v6 = vunpack.c.h.bf16 %v36_v1  ;;  %v69_v30 = vld [vmem:[%s480_s2 + $0x8] sm:$0xff]  ;;  %v50_v38 = vunpack.c.l.bf16 %v37_v25  ;;  %v51_v39 = vunpack.c.h.bf16 %v37_v25  ;;  %v134_v25 = vld [vmem:[%s482_s4 + $0x10] sm:$0xff] }
   0x4   :  { %v100_v7 = vld [vmem:[%s481_s3] sm:$0xff]  ;;  %v80_v10 = vunpack.c.l.bf16 %v68_v2  ;;  %v81_v11 = vunpack.c.h.bf16 %v68_v2  ;;  %v101_v31 = vld [vmem:[%s481_s3 + $0x8] sm:$0xff]  ;;  %v82_v42 = vunpack.c.l.bf16 %v69_v30  ;;  %v83_v43 = vunpack.c.h.bf16 %v69_v30  ;;  %v166_v30 = vld [vmem:[%s483_s5 + $0x10] sm:$0xff] }
   0x5   :  { %v132_v8 = vld [vmem:[%s482_s4] sm:$0xff]  ;;  %v112_v12 = vunpack.c.l.bf16 %v100_v7  ;;  %v56_v15 = vmax.f32 %v40_v3, %v48_v5  ;;  %v57_v16 = vmax.f32 %v41_v4, %v49_v6  ;;  %v113_v17 = vunpack.c.h.bf16 %v100_v7  ;;  %v133_v40 = vld [vmem:[%s482_s4 + $0x8] sm:$0xff]  ;;  %v38_v6 = vld [vmem:[%s479_s1 + $0x10] sm:$0xff] }
   0x6   :  { %v164_v9 = vld [vmem:[%s483_s5] sm:$0xff]  ;;  %v144_v18 = vunpack.c.l.bf16 %v132_v8  ;;  %v145_v21 = vunpack.c.h.bf16 %v132_v8  ;;  %v165_v41 = vld [vmem:[%s483_s5 + $0x8] sm:$0xff]  ;;  %v114_v44 = vunpack.c.l.bf16 %v101_v31  ;;  %v115_v45 = vunpack.c.h.bf16 %v101_v31  ;;  %v70_v7 = vld [vmem:[%s480_s2 + $0x10] sm:$0xff] }
   0x7   :  { %v196_v13 = vld [vmem:[%s484_s6] sm:$0xff]  ;;  %v176_v22 = vunpack.c.l.bf16 %v164_v9  ;;  %v177_v23 = vunpack.c.h.bf16 %v164_v9  ;;  %v88_v26 = vmax.f32 %v56_v15, %v80_v10  ;;  %v89_v27 = vmax.f32 %v57_v16, %v81_v11  ;;  %v197_v50 = vld [vmem:[%s484_s6 + $0x8] sm:$0xff]  ;;  %v102_v16 = vld [vmem:[%s481_s3 + $0x10] sm:$0xff] }
   0x8   :  { %v374_v14 = vld [vmem:[%s485_s7] sm:$0xff]  ;;  %v208_v24 = vunpack.c.l.bf16 %v196_v13  ;;  %v209_v28 = vunpack.c.h.bf16 %v196_v13  ;;  %v58_v48 = vmax.f32 %v42_v34, %v50_v38  ;;  %v59_v49 = vmax.f32 %v43_v35, %v51_v39  ;;  %v229_v51 = vld [vmem:[%s485_s7 + $0x8] sm:$0xff] }
   0x9   :  { %v379_v19 = vld [vmem:[%s486_s8] sm:$0xff]  ;;  %v240_v29 = vunpack.c.l.bf16 %v374_v14  ;;  %v241_v32 = vunpack.c.h.bf16 %v374_v14  ;;  %v120_v36 = vmax.f32 %v88_v26, %v112_v12  ;;  %v121_v37 = vmax.f32 %v89_v27, %v113_v17  ;;  %v261_v60 = vld [vmem:[%s486_s8 + $0x8] sm:$0xff] }
   0xa   :  { %v272_v33 = vunpack.c.l.bf16 %v379_v19  ;;  %v273_v52 = vunpack.c.h.bf16 %v379_v19  ;;  %v146_v53 = vunpack.c.l.bf16 %v133_v40  ;;  %v147_v54 = vunpack.c.h.bf16 %v133_v40  ;;  %v230_v40 = vld [vmem:[%s485_s7 + $0x10] sm:$0xff] }
   0xb   :  { %v152_v46 = vmax.f32 %v120_v36, %v144_v18  ;;  %v153_v47 = vmax.f32 %v121_v37, %v145_v21  ;;  %v178_v55 = vunpack.c.l.bf16 %v165_v41  ;;  %v90_v58 = vmax.f32 %v58_v48, %v82_v42 }
   0xc   :  { %v91_v59 = vmax.f32 %v59_v49, %v83_v43  ;;  %v179_v62 = vunpack.c.h.bf16 %v165_v41  ;;  %v210_v63 = vunpack.c.l.bf16 %v197_v50  ;;  %v211_v0 = vunpack.c.h.bf16 %v197_v50  ;;  %v39_v49 = vld [vmem:[%s479_s1 + $0x18] sm:$0xff] }
   0xd   :  { %v184_v56 = vmax.f32 %v152_v46, %v176_v22  ;;  %v185_v57 = vmax.f32 %v153_v47, %v177_v23  ;;  %v242_v1 = vunpack.c.l.bf16 %v229_v51  ;;  %v122_v4 = vmax.f32 %v90_v58, %v114_v44  ;;  %v35_v44 = vld [vmem:[%s478_s0 + $0x18] sm:$0xff] }
   0xe   :  { %v123_v5 = vmax.f32 %v91_v59, %v115_v45  ;;  %v243_v8 = vunpack.c.h.bf16 %v229_v51  ;;  %v274_v9 = vunpack.c.l.bf16 %v261_v60  ;;  %v44_v10 = vunpack.c.l.bf16 %v34_v61  ;;  %v103_v59 = vld [vmem:[%s481_s3 + $0x18] sm:$0xff] }
   0xf   :  { %v216_v2 = vmax.f32 %v184_v56, %v208_v24  ;;  %v217_v3 = vmax.f32 %v185_v57, %v209_v28  ;;  %v45_v11 = vunpack.c.h.bf16 %v34_v61  ;;  %v154_v14 = vmax.f32 %v122_v4, %v146_v53  ;;  %v262_v61 = vld [vmem:[%s486_s8 + $0x10] sm:$0xff] }
  0x10   :  { %v155_v15 = vmax.f32 %v123_v5, %v147_v54  ;;  %v52_v17 = vunpack.c.l.bf16 %v38_v6  ;;  %v53_v18 = vunpack.c.h.bf16 %v38_v6  ;;  %v84_v19 = vunpack.c.l.bf16 %v70_v7  ;;  %v71_v54 = vld [vmem:[%s480_s2 + $0x18] sm:$0xff] }
  0x11   :  { %v248_v12 = vmax.f32 %v216_v2, %v240_v29  ;;  %v249_v13 = vmax.f32 %v217_v3, %v241_v32  ;;  %v85_v20 = vunpack.c.h.bf16 %v70_v7  ;;  %v186_v23 = vmax.f32 %v154_v14, %v178_v55  ;;  %v135_v5 = vld [vmem:[%s482_s4 + $0x18] sm:$0xff] }
  0x12   :  { %v187_v24 = vmax.f32 %v155_v15, %v179_v62  ;;  %v60_v26 = vmax.f32 %v44_v10, %v52_v17  ;;  %v61_v27 = vmax.f32 %v45_v11, %v53_v18  ;;  %v116_v28 = vunpack.c.l.bf16 %v102_v16  ;;  %v167_v14 = vld [vmem:[%s483_s5 + $0x18] sm:$0xff] }
  0x13   :  { %v280_v21 = vmax.f32 %v248_v12, %v272_v33  ;;  %v281_v22 = vmax.f32 %v249_v13, %v273_v52  ;;  %v117_v29 = vunpack.c.h.bf16 %v102_v16  ;;  %v218_v32 = vmax.f32 %v186_v23, %v210_v63  ;;  %v198_v33 = vld [vmem:[%s484_s6 + $0x10] sm:$0xff] }
  0x14   :  { %v219_v34 = vmax.f32 %v187_v24, %v211_v0  ;;  %v275_v35 = vunpack.c.h.bf16 %v261_v60  ;;  %v92_v36 = vmax.f32 %v60_v26, %v84_v19  ;;  %v93_v37 = vmax.f32 %v61_v27, %v85_v20 }
  0x15   :  { %v288_v31 = vpack.c.bf16 %v281_v22, %v280_v21  ;;  %v148_v38 = vunpack.c.l.bf16 %v134_v25  ;;  %v149_v39 = vunpack.c.h.bf16 %v134_v25  ;;  %v250_v41 = vmax.f32 %v218_v32, %v242_v1  ;;  %v199_v21 = vld [vmem:[%s484_s6 + $0x18] sm:$0xff] }
  0x16   :  { %v251_v42 = vmax.f32 %v219_v34, %v243_v8  ;;  %v180_v43 = vunpack.c.l.bf16 %v166_v30  ;;  %v124_v45 = vmax.f32 %v92_v36, %v116_v28  ;;  %v125_v46 = vmax.f32 %v93_v37, %v117_v29  ;;  %v231_v28 = vld [vmem:[%s485_s7 + $0x18] sm:$0xff] }
  0x17   :  { %292 = vst [vmem:[%s487_s9] sm:$0xff] %v288_v31  ;;  %v181_v47 = vunpack.c.h.bf16 %v166_v30  ;;  %v212_v48 = vunpack.c.l.bf16 %v198_v33  ;;  %v282_v50 = vmax.f32 %v250_v41, %v274_v9  ;;  %v213_v52 = vunpack.c.h.bf16 %v198_v33 }
  0x18   :  { %v283_v51 = vmax.f32 %v251_v42, %v275_v35  ;;  %v244_v53 = vunpack.c.l.bf16 %v230_v40  ;;  %v156_v55 = vmax.f32 %v124_v45, %v148_v38  ;;  %v157_v56 = vmax.f32 %v125_v46, %v149_v39  ;;  %v263_v35 = vld [vmem:[%s486_s8 + $0x18] sm:$0xff] }
  0x19   :  { %v245_v57 = vunpack.c.h.bf16 %v230_v40  ;;  %v46_v58 = vunpack.c.l.bf16 %v35_v44  ;;  %v47_v62 = vunpack.c.h.bf16 %v35_v44  ;;  %v54_v63 = vunpack.c.l.bf16 %v39_v49 }
  0x1a   :  { %v289_v60 = vpack.c.bf16 %v283_v51, %v282_v50  ;;  %v55_v0 = vunpack.c.h.bf16 %v39_v49  ;;  %v188_v1 = vmax.f32 %v156_v55, %v180_v43  ;;  %v189_v2 = vmax.f32 %v157_v56, %v181_v47 }
  0x1b   :  { %v86_v3 = vunpack.c.l.bf16 %v71_v54  ;;  %v87_v4 = vunpack.c.h.bf16 %v71_v54  ;;  %v62_v6 = vmax.f32 %v46_v58, %v54_v63  ;;  %v118_v8 = vunpack.c.l.bf16 %v103_v59 }
  0x1c   :  { %293 = vst [vmem:[%s487_s9 + $0x8] sm:$0xff] %v289_v60  ;;  %v63_v7 = vmax.f32 %v47_v62, %v55_v0  ;;  %v119_v9 = vunpack.c.h.bf16 %v103_v59  ;;  %v220_v10 = vmax.f32 %v188_v1, %v212_v48  ;;  %v221_v11 = vmax.f32 %v189_v2, %v213_v52 }
  0x1d   :  { %v276_v12 = vunpack.c.l.bf16 %v262_v61  ;;  %v277_v13 = vunpack.c.h.bf16 %v262_v61  ;;  %v94_v15 = vmax.f32 %v62_v6, %v86_v3  ;;  %v150_v17 = vunpack.c.l.bf16 %v135_v5 }
  0x1e   :  { %v95_v16 = vmax.f32 %v63_v7, %v87_v4  ;;  %v151_v18 = vunpack.c.h.bf16 %v135_v5  ;;  %v252_v19 = vmax.f32 %v220_v10, %v244_v53  ;;  %v253_v20 = vmax.f32 %v221_v11, %v245_v57 }
  0x1f   :  { %v126_v22 = vmax.f32 %v94_v15, %v118_v8  ;;  %v182_v24 = vunpack.c.l.bf16 %v167_v14  ;;  %v183_v25 = vunpack.c.h.bf16 %v167_v14  ;;  %v214_v31 = vunpack.c.l.bf16 %v199_v21 }
  0x20   :  { %v127_v23 = vmax.f32 %v95_v16, %v119_v9  ;;  %v284_v26 = vmax.f32 %v252_v19, %v276_v12  ;;  %v285_v27 = vmax.f32 %v253_v20, %v277_v13  ;;  %v215_v32 = vunpack.c.h.bf16 %v199_v21 }
  0x21   :  { %v158_v29 = vmax.f32 %v126_v22, %v150_v17  ;;  %v246_v37 = vunpack.c.l.bf16 %v231_v28  ;;  %v247_v38 = vunpack.c.h.bf16 %v231_v28  ;;  %v278_v41 = vunpack.c.l.bf16 %v263_v35 }
  0x22   :  { %v159_v30 = vmax.f32 %v127_v23, %v151_v18  ;;  %v290_v34 = vpack.c.bf16 %v285_v27, %v284_v26  ;;  %v279_v42 = vunpack.c.h.bf16 %v263_v35 }
  0x23   :  { %v190_v33 = vmax.f32 %v158_v29, %v182_v24 }
  0x24   :  { %v191_v36 = vmax.f32 %v159_v30, %v183_v25  ;;  %294 = vst [vmem:[%s487_s9 + $0x10] sm:$0xff] %v290_v34 }
  0x25   :  { %v222_v39 = vmax.f32 %v190_v33, %v214_v31 }
  0x26   :  { %v223_v40 = vmax.f32 %v191_v36, %v215_v32 }
  0x27   :  { %v254_v43 = vmax.f32 %v222_v39, %v246_v37 }
  0x28   :  { %v255_v44 = vmax.f32 %v223_v40, %v247_v38 }
  0x29   :  { %v286_v45 = vmax.f32 %v254_v43, %v278_v41 }
  0x2a   :  { %v287_v46 = vmax.f32 %v255_v44, %v279_v42 }
  0x2c   :  { %v291_v47 = vpack.c.bf16 %v287_v46, %v286_v45 }
  0x2e   :  { %295 = vst [vmem:[%s487_s9 + $0x18] sm:$0xff] %v291_v47 }

// kernel: resnet_forward.24
= control target key start
LH: loop header
LB: loop body
LE: loop exit
PB: predicated region body
PF: predicated region fallthrough
CT: control target
= control target key end

     0   :  { %s1024_s12 = smov 0   ;;  %s1026_s13 = smov 0   ;;  %s1228_s0 = inlined_call_operand.vmem [shape: bf16[128,640], index: 0, kind: input, shape index: {}]   ;;  %s1229_s1 = inlined_call_operand.vmem [shape: bf16[640,64], index: 1, kind: input, shape index: {}]   ;;  %s1230_s2 = inlined_call_operand.vmem [shape: f32[1,64], index: 2, kind: input, shape index: {}]   ;;  %s1231_s3 = inlined_call_operand.vmem [shape: bf16[128,64], index: 3, kind: output, shape index: {}]  }
   0x1   :  { %s1028_s14 = smov 0   ;;  %s1030_s15 = smov 0  }
   0x2   :  { %s1032_s16 = smov 0  }
   0x3 LB: > { %s25_s17 = sadd.s32 1, %s997_s15  ;;  %p48_p1 = scmp.ne.s32.totalorder %s989_s13, %s985_s12  ;;  %s1001_s16 = sphi %s1032_s16, %s13_s16   ;;  %s997_s15 = sphi %s1030_s15, %s1235_s15   ;;  %s993_s14 = sphi %s1028_s14, %s1234_s14   ;;  %s989_s13 = sphi %s1026_s13, %s1233_s13   ;;  %s985_s12 = sphi %s1024_s12, %s1232_s12  }
   0x4   : > { %p26_p0 = scmp.ge.s32.totalorder %s25_s17, 5  ;;  %p49_p2 = scmp.eq.s32.totalorder %s1001_s16, 0 }
   0x5   : > { %s41_s19 = sadd.s32 1, %s989_s13  ;;  %p804_p5 = scmp.ge.s32.totalorder %s1001_s16, 5 }
   0x6   : > { %s1237_s17 = smov (%p26_p0, %s25_s17), 0  ;;  %p50_p3 = por %p49_p2, %p48_p1 }
   0x7   : > { %s37_s18 = ssub.s32 %s997_s15, %s1237_s17  ;;  %162 = sbr.rel (%p804_p5) target bundleno = 32 (0x20), region = 20 }
   0x8   : > { %p39_p4 = scmp.eq.s32.totalorder %s37_s18, 0 }
   0xa   : > { %s1059_s20 = scalar_select %p39_p4, %s989_s13, %s41_s19  }
   0xc   : > { %165 = sbr.rel (!%p50_p3) target bundleno = 32 (0x20), region = 24  ;;  %s167_s21 = sand.u32 (%p50_p3), 1, %s989_s13  }
   0xd   : > { %s806_s22 = sshll.u32 (%p50_p3), %s997_s15, 2  ;;  %s805_s23 = sshll.u32 (%p50_p3), %s167_s21, 6 }
   0xe   : > { %s1067_s26 = scalar_lea.vmem (%p50_p3), %s1228_s0, %s806_s22  ;;  %s169_s27 = scalar_lea.vmem (%p50_p3), [#allocation3], %s805_s23 }
   0xf   : > { %v191_v0 = vld [vmem:[%s1067_s26] sm:$0xf] (%p50_p3)  ;;  %v193_v1 = vld [vmem:[%s1067_s26 + $0x14] sm:$0xf] (%p50_p3)  ;;  %v195_v2 = vld [vmem:[%s1067_s26 + $0x28] sm:$0xf] (%p50_p3) }
  0x10   : > { %192 = vst [vmem:[%s169_s27] sm:$0xf] (%p50_p3), %v191_v0  ;;  %v197_v3 = vld [vmem:[%s1067_s26 + $0x3c] sm:$0xf] (%p50_p3)  ;;  %v199_v4 = vld [vmem:[%s1067_s26 + $0x50] sm:$0xf] (%p50_p3) }
  0x11   : > { %194 = vst [vmem:[%s169_s27 + $0x4] sm:$0xf] %v193_v1  ;;  %v201_v5 = vld [vmem:[%s1067_s26 + $0x64] sm:$0xf]  ;;  %v203_v6 = vld [vmem:[%s1067_s26 + $0x78] sm:$0xf] }
  0x12   : > { %196 = vst [vmem:[%s169_s27 + $0x8] sm:$0xf] %v195_v2  ;;  %v205_v7 = vld [vmem:[%s1067_s26 + $0x8c] sm:$0xf]  ;;  %v207_v8 = vld [vmem:[%s1067_s26 + $0xa0] sm:$0xf] }
  0x13   : > { %198 = vst [vmem:[%s169_s27 + $0xc] sm:$0xf] %v197_v3  ;;  %v209_v9 = vld [vmem:[%s1067_s26 + $0xb4] sm:$0xf]  ;;  %v211_v10 = vld [vmem:[%s1067_s26 + $0xc8] sm:$0xf] }
  0x14   : > { %200 = vst [vmem:[%s169_s27 + $0x10] sm:$0xf] %v199_v4  ;;  %v213_v11 = vld [vmem:[%s1067_s26 + $0xdc] sm:$0xf]  ;;  %v215_v12 = vld [vmem:[%s1067_s26 + $0xf0] sm:$0xf] }
  0x15   : > { %202 = vst [vmem:[%s169_s27 + $0x14] sm:$0xf] %v201_v5  ;;  %v217_v13 = vld [vmem:[%s1067_s26 + $0x104] sm:$0xf]  ;;  %v219_v14 = vld [vmem:[%s1067_s26 + $0x118] sm:$0xf] }
  0x16   : > { %204 = vst [vmem:[%s169_s27 + $0x18] sm:$0xf] %v203_v6  ;;  %v221_v15 = vld [vmem:[%s1067_s26 + $0x12c] sm:$0xf] }
  0x17   : > { %206 = vst [vmem:[%s169_s27 + $0x1c] sm:$0xf] %v205_v7 }
  0x18   : > { %208 = vst [vmem:[%s169_s27 + $0x20] sm:$0xf] %v207_v8 }
  0x19   : > { %210 = vst [vmem:[%s169_s27 + $0x24] sm:$0xf] %v209_v9 }
  0x1a   : > { %212 = vst [vmem:[%s169_s27 + $0x28] sm:$0xf] %v211_v10 }
  0x1b   : > { %214 = vst [vmem:[%s169_s27 + $0x2c] sm:$0xf] %v213_v11 }
  0x1c   : > { %216 = vst [vmem:[%s169_s27 + $0x30] sm:$0xf] %v215_v12 }
  0x1d   : > { %218 = vst [vmem:[%s169_s27 + $0x34] sm:$0xf] %v217_v13 }
  0x1e   : > { %220 = vst [vmem:[%s169_s27 + $0x38] sm:$0xf] %v219_v14 }
  0x1f   : > { %222 = vst [vmem:[%s169_s27 + $0x3c] sm:$0xf] %v221_v15 }
  0x20 PF: > { %p807_p6 = scmp.ge.s32.totalorder %s1001_s16, 1  ;;  %p289_p7 = scmp.lt.s32.totalorder %s1001_s16, 6 }
  0x22   : > { %p290_p8 = pnand %p807_p6, %p289_p7 }
  0x23   : > { %s296_s28 = sand.u32 (!%p290_p8), 1, %s985_s12   ;;  %s809_s29 = sshll.u32 (!%p290_p8), %s993_s14, 4 }
  0x24   : > { %293 = sbr.rel (%p290_p8) target bundleno = 280 (0x118), region = 69  ;;  %s808_s30 = sshll.u32 (!%p290_p8), %s296_s28, 6 }
  0x25   : > { %p335_p9 = scmp.lt.s32.totalorder (!%p290_p8), %s809_s29, 79  ;;  %s1094_s8 = scalar_lea.vmem (!%p290_p8), [#allocation3], %s808_s30 }
  0x26   : > { %p811_p10 = scmp.ne.s32.totalorder (!%p290_p8), %s993_s14, 0 }
  0x29   : > { %s1239_s29 = smov (!%p335_p9, %s809_s29), 79  ;;  %358 = sbr.rel (%p811_p10) target bundleno = 63 (0x3f), region = 77 }
  0x2a   : > { %s810_s4 = sshll.u32 %s1239_s29, 2 }
  0x2b   : > { %s1092_s7 = scalar_lea.vmem %s1229_s1, %s810_s4 }
  0x2e   : > { %vm359_vm0 = vcmask 523264   ;;  %v1003_v16 = vmov 0.0  }
  0x2f   : > { %360 = vst.msk [vmem:[#allocation2] sm:$0xff] %vm359_vm0, %v1003_v16 }
  0x30   : > { %361 = vst.msk [vmem:[#allocation2 + $0x8] sm:$0xff] %vm359_vm0, %v1003_v16 }
  0x31   : > { %362 = vst.msk [vmem:[#allocation2 + $0x10] sm:$0xff] %vm359_vm0, %v1003_v16 }
  0x32   : > { %363 = vst.msk [vmem:[#allocation2 + $0x18] sm:$0xff] %vm359_vm0, %v1003_v16 }
  0x33   : > { %364 = vst.msk [vmem:[#allocation2 + $0x20] sm:$0xff] %vm359_vm0, %v1003_v16 }
  0x34   : > { %365 = vst.msk [vmem:[#allocation2 + $0x28] sm:$0xff] %vm359_vm0, %v1003_v16 }
  0x35   : > { %366 = vst.msk [vmem:[#allocation2 + $0x30] sm:$0xff] %vm359_vm0, %v1003_v16 }
  0x36   : > { %367 = vst.msk [vmem:[#allocation2 + $0x38] sm:$0xff] %vm359_vm0, %v1003_v16 }
  0x37   : > { %368 = vst.msk [vmem:[#allocation2 + $0x40] sm:$0xff] %vm359_vm0, %v1003_v16 }
  0x38   : > { %369 = vst.msk [vmem:[#allocation2 + $0x48] sm:$0xff] %vm359_vm0, %v1003_v16 }
  0x39   : > { %370 = vst.msk [vmem:[#allocation2 + $0x50] sm:$0xff] %vm359_vm0, %v1003_v16 }
  0x3a   : > { %371 = vst.msk [vmem:[#allocation2 + $0x58] sm:$0xff] %vm359_vm0, %v1003_v16 }
  0x3b   : > { %372 = vst.msk [vmem:[#allocation2 + $0x60] sm:$0xff] %vm359_vm0, %v1003_v16 }
  0x3c   : > { %373 = vst.msk [vmem:[#allocation2 + $0x68] sm:$0xff] %vm359_vm0, %v1003_v16 }
  0x3d   : > { %374 = vst.msk [vmem:[#allocation2 + $0x70] sm:$0xff] %vm359_vm0, %v1003_v16 }
  0x3e   : > { %375 = vst.msk [vmem:[#allocation2 + $0x78] sm:$0xff] %vm359_vm0, %v1003_v16 }
  0x3f PF: > { %v896_v17 = vld [vmem:[%s1092_s7 + $0x38] sm:$0xff]  ;;  %v895_v18 = vld [vmem:[%s1092_s7 + $0x30] sm:$0xff]  ;;  %v894_v19 = vld [vmem:[%s1092_s7 + $0x28] sm:$0xff]  ;;  %vm585_vm1 = vcmask 523264   ;;  %p876_p11 = scmp.ne.s32.totalorder %s993_s14, 4 }
  0x40   : > { %520 = vmatpush.bf16.msra.mxu0 %v896_v17  ;;  %897 = vmatpush.bf16.msra.mxu1 %v896_v17  ;;  %v893_v20 = vld [vmem:[%s1092_s7 + $0x20] sm:$0xff]  ;;  %v892_v21 = vld [vmem:[%s1092_s7 + $0x18] sm:$0xff]  ;;  %v891_v22 = vld [vmem:[%s1092_s7 + $0x10] sm:$0xff] }
  0x41   : > { %898 = vmatpush.bf16.msra.mxu2 %v896_v17  ;;  %899 = vmatpush.bf16.msra.mxu3 %v896_v17  ;;  %v890_v23 = vld [vmem:[%s1092_s7 + $0x8] sm:$0xff]  ;;  %v889_v24 = vld [vmem:[%s1092_s7] sm:$0xff]  ;;  %v883_v26 = vld [vmem:[%s1094_s8 + $0x10] sm:$0xff] }
  0x42   : > { %v881_v25 = vld [vmem:[%s1094_s8] sm:$0xff]  ;;  %v887_v28 = vld [vmem:[%s1094_s8 + $0x30] sm:$0xff]  ;;  %v882_v29 = vld [vmem:[%s1094_s8 + $0x8] sm:$0xff] }
  0x43   : > { %v885_v27 = vld [vmem:[%s1094_s8 + $0x20] sm:$0xff]  ;;  %v884_v30 = vld [vmem:[%s1094_s8 + $0x18] sm:$0xff]  ;;  %v886_v31 = vld [vmem:[%s1094_s8 + $0x28] sm:$0xff] }
  0x44   : > { %521 = vmatpush.bf16.msra.mxu0 %v895_v18  ;;  %900 = vmatpush.bf16.msra.mxu1 %v895_v18  ;;  %v888_v32 = vld [vmem:[%s1094_s8 + $0x38] sm:$0xff]  ;;  %v376_v33 = vld [vmem:[#allocation2] sm:$0xff]  ;;  %v377_v41 = vld [vmem:[#allocation2 + $0x8] sm:$0xff] }
  0x45   : > { %901 = vmatpush.bf16.msra.mxu2 %v895_v18  ;;  %902 = vmatpush.bf16.msra.mxu3 %v895_v18  ;;  %v380_v34 = vld [vmem:[#allocation2 + $0x20] sm:$0xff]  ;;  %v381_v42 = vld [vmem:[#allocation2 + $0x28] sm:$0xff]  ;;  %v378_v53 = vld [vmem:[#allocation2 + $0x10] sm:$0xff] }
  0x46   : > { %v384_v39 = vld [vmem:[#allocation2 + $0x40] sm:$0xff]  ;;  %v385_v51 = vld [vmem:[#allocation2 + $0x48] sm:$0xff]  ;;  %v382_v54 = vld [vmem:[#allocation2 + $0x30] sm:$0xff] }
  0x47   : > { %v388_v40 = vld [vmem:[#allocation2 + $0x60] sm:$0xff]  ;;  %v389_v52 = vld [vmem:[#allocation2 + $0x68] sm:$0xff]  ;;  %v386_v63 = vld [vmem:[#allocation2 + $0x50] sm:$0xff] }
  0x48   : > { %522 = vmatpush.bf16.msra.mxu0 %v894_v19  ;;  %903 = vmatpush.bf16.msra.mxu1 %v894_v19  ;;  %v390_v0 = vld [vmem:[#allocation2 + $0x70] sm:$0xff]  ;;  %v379_v1 = vld [vmem:[#allocation2 + $0x18] sm:$0xff] }
  0x49   : > { %904 = vmatpush.bf16.msra.mxu2 %v894_v19  ;;  %905 = vmatpush.bf16.msra.mxu3 %v894_v19  ;;  %v383_v2 = vld [vmem:[#allocation2 + $0x38] sm:$0xff] }
  0x4a   : > { %v387_v11 = vld [vmem:[#allocation2 + $0x58] sm:$0xff] }
  0x4b   : > { %v391_v12 = vld [vmem:[#allocation2 + $0x78] sm:$0xff] }
  0x4c   : > { %523 = vmatpush.bf16.msra.mxu0 %v893_v20  ;;  %906 = vmatpush.bf16.msra.mxu1 %v893_v20 }
  0x4d   : > { %907 = vmatpush.bf16.msra.mxu2 %v893_v20  ;;  %908 = vmatpush.bf16.msra.mxu3 %v893_v20 }
  0x50   : > { %524 = vmatpush.bf16.msra.mxu0 %v892_v21  ;;  %909 = vmatpush.bf16.msra.mxu1 %v892_v21 }
  0x51   : > { %910 = vmatpush.bf16.msra.mxu2 %v892_v21  ;;  %911 = vmatpush.bf16.msra.mxu3 %v892_v21 }
  0x54   : > { %525 = vmatpush.bf16.msra.mxu0 %v891_v22  ;;  %912 = vmatpush.bf16.msra.mxu1 %v891_v22 }
  0x55   : > { %913 = vmatpush.bf16.msra.mxu2 %v891_v22  ;;  %914 = vmatpush.bf16.msra.mxu3 %v891_v22 }
  0x58   : > { %526 = vmatpush.bf16.msra.mxu0 %v890_v23  ;;  %915 = vmatpush.bf16.msra.mxu1 %v890_v23 }
  0x59   : > { %916 = vmatpush.bf16.msra.mxu2 %v890_v23  ;;  %917 = vmatpush.bf16.msra.mxu3 %v890_v23 }
  0x5c   : > { %527 = vmatpush.bf16.msra.mxu0 %v889_v24  ;;  %918 = vmatpush.bf16.msra.mxu1 %v889_v24 }
  0x5d   : > { %919 = vmatpush.bf16.msra.mxu2 %v889_v24  ;;  %920 = vmatpush.bf16.msra.mxu3 %v889_v24 }
  0x5f   : > { %528 = vmatmul.bf16.vlgmr.msra.gmra.mxu0 %v881_v25  ;;  %538 = vmatmul.bf16.vlgmr.msra.gmra.mxu1 %v883_v26 }
  0x60   : > { %548 = vmatmul.bf16.vlgmr.msra.gmra.mxu2 %v885_v27  ;;  %558 = vmatmul.bf16.vlgmr.msra.gmra.mxu3 %v887_v28 }
  0x6f   : > { %533 = vmatmul.bf16.gmra.mxu0 %v882_v29  ;;  %543 = vmatmul.bf16.gmra.mxu1 %v884_v30 }
  0x70   : > { %553 = vmatmul.bf16.gmra.mxu2 %v886_v31  ;;  %563 = vmatmul.bf16.gmra.mxu3 %v888_v32 }
  0xdc   : > { %v529_v35 = vpop.f32.mrf.mxu0  ;;  %v539_v36 = vpop.f32.mrf.mxu1 }
  0xdd   : > { %v569_v37 = vadd.f32 %v529_v35, %v376_v33  ;;  %v573_v38 = vadd.f32 %v539_v36, %v380_v34 }
  0xdf   : > { %586 = vst.msk [vmem:[#allocation2] sm:$0xff] %vm585_vm1, %v569_v37 }
  0xe0   : > { %590 = vst.msk [vmem:[#allocation2 + $0x20] sm:$0xff] %vm585_vm1, %v573_v38 }
  0xe3   : > { %v549_v43 = vpop.f32.mrf.mxu2  ;;  %v559_v44 = vpop.f32.mrf.mxu3 }
  0xe4   : > { %v577_v45 = vadd.f32 %v549_v43, %v384_v39  ;;  %v581_v46 = vadd.f32 %v559_v44, %v388_v40  ;;  %v531_v47 = vpop.f32.mrf.mxu0  ;;  %v541_v48 = vpop.f32.mrf.mxu1 }
  0xe5   : > { %v570_v49 = vadd.f32 %v531_v47, %v377_v41  ;;  %v574_v50 = vadd.f32 %v541_v48, %v381_v42 }
  0xe6   : > { %594 = vst.msk [vmem:[#allocation2 + $0x40] sm:$0xff] %vm585_vm1, %v577_v45 }
  0xe7   : > { %598 = vst.msk [vmem:[#allocation2 + $0x60] sm:$0xff] %vm585_vm1, %v581_v46 }
  0xe8   : > { %587 = vst.msk [vmem:[#allocation2 + $0x8] sm:$0xff] %vm585_vm1, %v570_v49 }
  0xe9   : > { %591 = vst.msk [vmem:[#allocation2 + $0x28] sm:$0xff] %vm585_vm1, %v574_v50 }
  0xeb   : > { %v551_v55 = vpop.f32.mrf.mxu2  ;;  %v561_v56 = vpop.f32.mrf.mxu3 }
  0xec   : > { %v578_v57 = vadd.f32 %v551_v55, %v385_v51  ;;  %v582_v58 = vadd.f32 %v561_v56, %v389_v52  ;;  %v534_v59 = vpop.f32.mrf.mxu0  ;;  %v544_v60 = vpop.f32.mrf.mxu1 }
  0xed   : > { %v571_v61 = vadd.f32 %v534_v59, %v378_v53  ;;  %v575_v62 = vadd.f32 %v544_v60, %v382_v54 }
  0xee   : > { %595 = vst.msk [vmem:[#allocation2 + $0x48] sm:$0xff] %vm585_vm1, %v578_v57 }
  0xef   : > { %599 = vst.msk [vmem:[#allocation2 + $0x68] sm:$0xff] %vm585_vm1, %v582_v58 }
  0xf0   : > { %588 = vst.msk [vmem:[#allocation2 + $0x10] sm:$0xff] %vm585_vm1, %v571_v61 }
  0xf1   : > { %592 = vst.msk [vmem:[#allocation2 + $0x30] sm:$0xff] %vm585_vm1, %v575_v62 }
  0xf3   : > { %v554_v3 = vpop.f32.mrf.mxu2  ;;  %v564_v4 = vpop.f32.mrf.mxu3 }
  0xf4   : > { %v579_v5 = vadd.f32 %v554_v3, %v386_v63  ;;  %v583_v6 = vadd.f32 %v564_v4, %v390_v0  ;;  %v536_v7 = vpop.f32.mrf.mxu0  ;;  %v546_v8 = vpop.f32.mrf.mxu1 }
  0xf5   : > { %v572_v9 = vadd.f32 %v536_v7, %v379_v1  ;;  %v576_v10 = vadd.f32 %v546_v8, %v383_v2 }
  0xf6   : > { %596 = vst.msk [vmem:[#allocation2 + $0x50] sm:$0xff] %vm585_vm1, %v579_v5 }
  0xf7   : > { %600 = vst.msk [vmem:[#allocation2 + $0x70] sm:$0xff] %vm585_vm1, %v583_v6 }
  0xf8   : > { %589 = vst.msk [vmem:[#allocation2 + $0x18] sm:$0xff] %vm585_vm1, %v572_v9 }
  0xf9   : > { %593 = vst.msk [vmem:[#allocation2 + $0x38] sm:$0xff] %vm585_vm1, %v576_v10 }
  0xfb   : > { %v556_v13 = vpop.f32.mrf.mxu2  ;;  %v566_v14 = vpop.f32.mrf.mxu3  ;;  %605 = sbr.rel (%p876_p11) target bundleno = 280 (0x118), region = 81 }
  0xfc   : > { %v580_v15 = vadd.f32 %v556_v13, %v387_v11  ;;  %v584_v16 = vadd.f32 %v566_v14, %v391_v12 }
  0xfe   : > { %597 = vst.msk [vmem:[#allocation2 + $0x58] sm:$0xff] %vm585_vm1, %v580_v15 }
  0xff   : > { %601 = vst.msk [vmem:[#allocation2 + $0x78] sm:$0xff] %vm585_vm1, %v584_v16 }
 0x100   : > { %v606_v17 = vld [vmem:[#allocation2] sm:$0xff]  ;;  %v607_v19 = vld [vmem:[#allocation2 + $0x8] sm:$0xff]  ;;  %v608_v20 = vld [vmem:[#allocation2 + $0x10] sm:$0xff]  ;;  %vm674_vm2 = vcmask 519168  }
 0x101   : > { %v962_v18 = vld [vmem:[%s1230_s2] ss:$0 sm:$0xff]  ;;  %v609_v21 = vld [vmem:[#allocation2 + $0x18] sm:$0xff]  ;;  %v611_v27 = vld [vmem:[#allocation2 + $0x28] sm:$0xff] }
 0x102   : > { %v626_v22 = vadd.f32 %v962_v18, %v606_v17  ;;  %v627_v23 = vadd.f32 %v962_v18, %v607_v19  ;;  %v628_v24 = vadd.f32 %v962_v18, %v608_v20  ;;  %v629_v25 = vadd.f32 %v962_v18, %v609_v21  ;;  %v610_v26 = vld [vmem:[#allocation2 + $0x20] sm:$0xff]  ;;  %v612_v28 = vld [vmem:[#allocation2 + $0x30] sm:$0xff]  ;;  %v613_v32 = vld [vmem:[#allocation2 + $0x38] sm:$0xff] }
 0x103   : > { %v630_v29 = vadd.f32 %v962_v18, %v610_v26  ;;  %v631_v30 = vadd.f32 %v962_v18, %v611_v27  ;;  %v632_v31 = vadd.f32 %v962_v18, %v612_v28  ;;  %v614_v37 = vld [vmem:[#allocation2 + $0x40] sm:$0xff]  ;;  %v633_v41 = vadd.f32 %v962_v18, %v613_v32  ;;  %v615_v42 = vld [vmem:[#allocation2 + $0x48] sm:$0xff]  ;;  %v616_v43 = vld [vmem:[#allocation2 + $0x50] sm:$0xff] }
 0x104   : > { %v642_v33 = vmax.f32 %v626_v22, 0.0  ;;  %v643_v34 = vmax.f32 %v627_v23, 0.0  ;;  %v644_v35 = vmax.f32 %v628_v24, 0.0  ;;  %v645_v36 = vmax.f32 %v629_v25, 0.0  ;;  %v618_v48 = vld [vmem:[#allocation2 + $0x60] sm:$0xff]  ;;  %v619_v49 = vld [vmem:[#allocation2 + $0x68] sm:$0xff] }
 0x105   : > { %v646_v38 = vmax.f32 %v630_v29, 0.0  ;;  %v647_v39 = vmax.f32 %v631_v30, 0.0  ;;  %v648_v40 = vmax.f32 %v632_v31, 0.0  ;;  %v617_v44 = vld [vmem:[#allocation2 + $0x58] sm:$0xff]  ;;  %v649_v52 = vmax.f32 %v633_v41, 0.0  ;;  %v620_v53 = vld [vmem:[#allocation2 + $0x70] sm:$0xff] }
 0x106   : > { %v658_v45 = vpack.c.bf16 %v642_v33, %v642_v33  ;;  %v659_v46 = vpack.c.bf16 %v643_v34, %v643_v34  ;;  %v660_v47 = vpack.c.bf16 %v644_v35, %v644_v35  ;;  %v661_v50 = vpack.c.bf16 %v645_v36, %v645_v36  ;;  %v621_v58 = vld [vmem:[#allocation2 + $0x78] sm:$0xff] }
 0x107   : > { %v662_v51 = vpack.c.bf16 %v646_v38, %v646_v38  ;;  %v634_v54 = vadd.f32 %v962_v18, %v614_v37  ;;  %v635_v55 = vadd.f32 %v962_v18, %v615_v42  ;;  %v636_v56 = vadd.f32 %v962_v18, %v616_v43 }
 0x108   : > { %675 = vst.msk [vmem:[%s1231_s3] sm:$0xf] %vm674_vm2, %v658_v45  ;;  %v637_v57 = vadd.f32 %v962_v18, %v617_v44  ;;  %v663_v59 = vpack.c.bf16 %v647_v39, %v647_v39  ;;  %v664_v60 = vpack.c.bf16 %v648_v40, %v648_v40  ;;  %v638_v61 = vadd.f32 %v962_v18, %v618_v48 }
 0x109   : > { %676 = vst.msk [vmem:[%s1231_s3 + $0x4] sm:$0xf] %vm674_vm2, %v659_v46  ;;  %v639_v62 = vadd.f32 %v962_v18, %v619_v49  ;;  %v650_v63 = vmax.f32 %v634_v54, 0.0  ;;  %v651_v0 = vmax.f32 %v635_v55, 0.0  ;;  %v652_v1 = vmax.f32 %v636_v56, 0.0 }
 0x10a   : > { %677 = vst.msk [vmem:[%s1231_s3 + $0x8] sm:$0xf] %vm674_vm2, %v660_v47  ;;  %v640_v2 = vadd.f32 %v962_v18, %v620_v53  ;;  %v665_v3 = vpack.c.bf16 %v649_v52, %v649_v52  ;;  %v653_v4 = vmax.f32 %v637_v57, 0.0  ;;  %v641_v5 = vadd.f32 %v962_v18, %v621_v58 }
 0x10b   : > { %678 = vst.msk [vmem:[%s1231_s3 + $0xc] sm:$0xf] %vm674_vm2, %v661_v50  ;;  %v666_v6 = vpack.c.bf16 %v650_v63, %v650_v63  ;;  %v654_v7 = vmax.f32 %v638_v61, 0.0  ;;  %v667_v8 = vpack.c.bf16 %v651_v0, %v651_v0  ;;  %v655_v9 = vmax.f32 %v639_v62, 0.0 }
 0x10c   : > { %679 = vst.msk [vmem:[%s1231_s3 + $0x10] sm:$0xf] %vm674_vm2, %v662_v51  ;;  %v668_v10 = vpack.c.bf16 %v652_v1, %v652_v1  ;;  %v656_v11 = vmax.f32 %v640_v2, 0.0  ;;  %v669_v12 = vpack.c.bf16 %v653_v4, %v653_v4  ;;  %v657_v13 = vmax.f32 %v641_v5, 0.0 }
 0x10d   : > { %680 = vst.msk [vmem:[%s1231_s3 + $0x14] sm:$0xf] %vm674_vm2, %v663_v59  ;;  %v670_v14 = vpack.c.bf16 %v654_v7, %v654_v7  ;;  %v671_v15 = vpack.c.bf16 %v655_v9, %v655_v9 }
 0x10e   : > { %681 = vst.msk [vmem:[%s1231_s3 + $0x18] sm:$0xf] %vm674_vm2, %v664_v60  ;;  %v672_v16 = vpack.c.bf16 %v656_v11, %v656_v11  ;;  %v673_v17 = vpack.c.bf16 %v657_v13, %v657_v13 }
 0x10f   : > { %682 = vst.msk [vmem:[%s1231_s3 + $0x1c] sm:$0xf] %vm674_vm2, %v665_v3 }
 0x110   : > { %683 = vst.msk [vmem:[%s1231_s3 + $0x20] sm:$0xf] %vm674_vm2, %v666_v6 }
 0x111   : > { %684 = vst.msk [vmem:[%s1231_s3 + $0x24] sm:$0xf] %vm674_vm2, %v667_v8 }
 0x112   : > { %685 = vst.msk [vmem:[%s1231_s3 + $0x28] sm:$0xf] %vm674_vm2, %v668_v10 }
 0x113   : > { %686 = vst.msk [vmem:[%s1231_s3 + $0x2c] sm:$0xf] %vm674_vm2, %v669_v12 }
 0x114   : > { %687 = vst.msk [vmem:[%s1231_s3 + $0x30] sm:$0xf] %vm674_vm2, %v670_v14 }
 0x115   : > { %688 = vst.msk [vmem:[%s1231_s3 + $0x34] sm:$0xf] %vm674_vm2, %v671_v15 }
 0x116   : > { %689 = vst.msk [vmem:[%s1231_s3 + $0x38] sm:$0xf] %vm674_vm2, %v672_v16 }
 0x117   : > { %690 = vst.msk [vmem:[%s1231_s3 + $0x3c] sm:$0xf] %vm674_vm2, %v673_v17 }
 0x118 PF: > { %s13_s16 = sadd.s32 1, %s1001_s16   ;;  %s1232_s12 = smov %s989_s13 }
 0x119   : > { %p10_p12 = scmp.ge.s32.totalorder %s13_s16, 7   ;;  %s1233_s13 = smov %s1059_s20 }
 0x11a   : > { %s1234_s14 = smov %s997_s15  ;;  %s1235_s15 = smov %s1237_s17 }
 0x11b   :  { %12 = sbr.rel (!%p10_p12) target bundleno = 3 (0x3), region = 122 }

// kernel: resnet_forward.25
= control target key start
LH: loop header
LB: loop body
LE: loop exit
PB: predicated region body
PF: predicated region fallthrough
CT: control target
= control target key end

     0   :  { %s1195_s15 = smov 0   ;;  %s1197_s16 = smov 0   ;;  %s1441_s0 = inlined_call_operand.vmem [shape: bf16[128,640], index: 0, kind: input, shape index: {}]   ;;  %s1442_s1 = inlined_call_operand.vmem [shape: bf16[640,64], index: 1, kind: input, shape index: {}]   ;;  %s1443_s2 = inlined_call_operand.vmem [shape: f32[1,64], index: 2, kind: input, shape index: {}]   ;;  %s1444_s3 = inlined_call_operand.vmem [shape: bf16[128,64], index: 3, kind: input, shape index: {}]   ;;  %s1445_s4 = inlined_call_operand.vmem [shape: bf16[128,64], index: 4, kind: output, shape index: {}]  }
   0x1   :  { %s1199_s17 = smov 0   ;;  %s1201_s18 = smov 0  }
   0x2   :  { %s1203_s19 = smov 0  }
   0x3 LB: > { %s26_s20 = sadd.s32 1, %s1163_s18  ;;  %p49_p1 = scmp.ne.s32.totalorder %s1155_s16, %s1151_s15  ;;  %s1167_s19 = sphi %s1203_s19, %s14_s19   ;;  %s1163_s18 = sphi %s1201_s18, %s1449_s18   ;;  %s1159_s17 = sphi %s1199_s17, %s1448_s17   ;;  %s1155_s16 = sphi %s1197_s16, %s1447_s16   ;;  %s1151_s15 = sphi %s1195_s15, %s1446_s15  }
   0x4   : > { %p27_p0 = scmp.ge.s32.totalorder %s26_s20, 5  ;;  %p50_p2 = scmp.eq.s32.totalorder %s1167_s19, 0 }
   0x5   : > { %s42_s22 = sadd.s32 1, %s1155_s16  ;;  %p931_p5 = scmp.ge.s32.totalorder %s1167_s19, 5 }
   0x6   : > { %s1451_s20 = smov (%p27_p0, %s26_s20), 0  ;;  %p51_p3 = por %p50_p2, %p49_p1 }
   0x7   : > { %s38_s21 = ssub.s32 %s1163_s18, %s1451_s20  ;;  %203 = sbr.rel (%p931_p5) target bundleno = 32 (0x20), region = 24 }
   0x8   : > { %p40_p4 = scmp.eq.s32.totalorder %s38_s21, 0 }
   0xa   : > { %s1230_s23 = scalar_select %p40_p4, %s1155_s16, %s42_s22  }
   0xc   : > { %206 = sbr.rel (!%p51_p3) target bundleno = 32 (0x20), region = 28  ;;  %s208_s24 = sand.u32 (%p51_p3), 1, %s1155_s16  }
   0xd   : > { %s933_s25 = sshll.u32 (%p51_p3), %s1163_s18, 2  ;;  %s932_s26 = sshll.u32 (%p51_p3), %s208_s24, 6 }
   0xe   : > { %s1238_s29 = scalar_lea.vmem (%p51_p3), %s1441_s0, %s933_s25  ;;  %s210_s30 = scalar_lea.vmem (%p51_p3), [#allocation3], %s932_s26 }
   0xf   : > { %v232_v0 = vld [vmem:[%s1238_s29] sm:$0xf] (%p51_p3)  ;;  %v234_v1 = vld [vmem:[%s1238_s29 + $0x14] sm:$0xf] (%p51_p3)  ;;  %v236_v2 = vld [vmem:[%s1238_s29 + $0x28] sm:$0xf] (%p51_p3) }
  0x10   : > { %233 = vst [vmem:[%s210_s30] sm:$0xf] (%p51_p3), %v232_v0  ;;  %v238_v3 = vld [vmem:[%s1238_s29 + $0x3c] sm:$0xf] (%p51_p3)  ;;  %v240_v4 = vld [vmem:[%s1238_s29 + $0x50] sm:$0xf] (%p51_p3) }
  0x11   : > { %235 = vst [vmem:[%s210_s30 + $0x4] sm:$0xf] %v234_v1  ;;  %v242_v5 = vld [vmem:[%s1238_s29 + $0x64] sm:$0xf]  ;;  %v244_v6 = vld [vmem:[%s1238_s29 + $0x78] sm:$0xf] }
  0x12   : > { %237 = vst [vmem:[%s210_s30 + $0x8] sm:$0xf] %v236_v2  ;;  %v246_v7 = vld [vmem:[%s1238_s29 + $0x8c] sm:$0xf]  ;;  %v248_v8 = vld [vmem:[%s1238_s29 + $0xa0] sm:$0xf] }
  0x13   : > { %239 = vst [vmem:[%s210_s30 + $0xc] sm:$0xf] %v238_v3  ;;  %v250_v9 = vld [vmem:[%s1238_s29 + $0xb4] sm:$0xf]  ;;  %v252_v10 = vld [vmem:[%s1238_s29 + $0xc8] sm:$0xf] }
  0x14   : > { %241 = vst [vmem:[%s210_s30 + $0x10] sm:$0xf] %v240_v4  ;;  %v254_v11 = vld [vmem:[%s1238_s29 + $0xdc] sm:$0xf]  ;;  %v256_v12 = vld [vmem:[%s1238_s29 + $0xf0] sm:$0xf] }
  0x15   : > { %243 = vst [vmem:[%s210_s30 + $0x14] sm:$0xf] %v242_v5  ;;  %v258_v13 = vld [vmem:[%s1238_s29 + $0x104] sm:$0xf]  ;;  %v260_v14 = vld [vmem:[%s1238_s29 + $0x118] sm:$0xf] }
  0x16   : > { %245 = vst [vmem:[%s210_s30 + $0x18] sm:$0xf] %v244_v6  ;;  %v262_v15 = vld [vmem:[%s1238_s29 + $0x12c] sm:$0xf] }
  0x17   : > { %247 = vst [vmem:[%s210_s30 + $0x1c] sm:$0xf] %v246_v7 }
  0x18   : > { %249 = vst [vmem:[%s210_s30 + $0x20] sm:$0xf] %v248_v8 }
  0x19   : > { %251 = vst [vmem:[%s210_s30 + $0x24] sm:$0xf] %v250_v9 }
  0x1a   : > { %253 = vst [vmem:[%s210_s30 + $0x28] sm:$0xf] %v252_v10 }
  0x1b   : > { %255 = vst [vmem:[%s210_s30 + $0x2c] sm:$0xf] %v254_v11 }
  0x1c   : > { %257 = vst [vmem:[%s210_s30 + $0x30] sm:$0xf] %v256_v12 }
  0x1d   : > { %259 = vst [vmem:[%s210_s30 + $0x34] sm:$0xf] %v258_v13 }
  0x1e   : > { %261 = vst [vmem:[%s210_s30 + $0x38] sm:$0xf] %v260_v14 }
  0x1f   : > { %263 = vst [vmem:[%s210_s30 + $0x3c] sm:$0xf] %v262_v15 }
  0x20 PF: > { %p934_p6 = scmp.ge.s32.totalorder %s1167_s19, 1  ;;  %p330_p7 = scmp.lt.s32.totalorder %s1167_s19, 6 }
  0x22   : > { %p331_p8 = pnand %p934_p6, %p330_p7 }
  0x23   : > { %s337_s5 = sand.u32 (!%p331_p8), 1, %s1151_s15   ;;  %s936_s6 = sshll.u32 (!%p331_p8), %s1159_s17, 4 }
  0x24   : > { %334 = sbr.rel (%p331_p8) target bundleno = 284 (0x11c), region = 73  ;;  %s935_s7 = sshll.u32 (!%p331_p8), %s337_s5, 6 }
  0x25   : > { %p386_p9 = scmp.lt.s32.totalorder (!%p331_p8), %s936_s6, 79  ;;  %s1265_s12 = scalar_lea.vmem (!%p331_p8), [#allocation3], %s935_s7 }
  0x26   : > { %p938_p10 = scmp.ne.s32.totalorder (!%p331_p8), %s1159_s17, 0 }
  0x29   : > { %s1453_s6 = smov (!%p386_p9, %s936_s6), 79  ;;  %418 = sbr.rel (%p938_p10) target bundleno = 63 (0x3f), region = 81 }
  0x2a   : > { %s937_s8 = sshll.u32 %s1453_s6, 2 }
  0x2b   : > { %s1263_s11 = scalar_lea.vmem %s1442_s1, %s937_s8 }
  0x2e   : > { %vm419_vm0 = vcmask 523264   ;;  %v1169_v16 = vmov 0.0  }
  0x2f   : > { %420 = vst.msk [vmem:[#allocation2] sm:$0xff] %vm419_vm0, %v1169_v16 }
  0x30   : > { %421 = vst.msk [vmem:[#allocation2 + $0x8] sm:$0xff] %vm419_vm0, %v1169_v16 }
  0x31   : > { %422 = vst.msk [vmem:[#allocation2 + $0x10] sm:$0xff] %vm419_vm0, %v1169_v16 }
  0x32   : > { %423 = vst.msk [vmem:[#allocation2 + $0x18] sm:$0xff] %vm419_vm0, %v1169_v16 }
  0x33   : > { %424 = vst.msk [vmem:[#allocation2 + $0x20] sm:$0xff] %vm419_vm0, %v1169_v16 }
  0x34   : > { %425 = vst.msk [vmem:[#allocation2 + $0x28] sm:$0xff] %vm419_vm0, %v1169_v16 }
  0x35   : > { %426 = vst.msk [vmem:[#allocation2 + $0x30] sm:$0xff] %vm419_vm0, %v1169_v16 }
  0x36   : > { %427 = vst.msk [vmem:[#allocation2 + $0x38] sm:$0xff] %vm419_vm0, %v1169_v16 }
  0x37   : > { %428 = vst.msk [vmem:[#allocation2 + $0x40] sm:$0xff] %vm419_vm0, %v1169_v16 }
  0x38   : > { %429 = vst.msk [vmem:[#allocation2 + $0x48] sm:$0xff] %vm419_vm0, %v1169_v16 }
  0x39   : > { %430 = vst.msk [vmem:[#allocation2 + $0x50] sm:$0xff] %vm419_vm0, %v1169_v16 }
  0x3a   : > { %431 = vst.msk [vmem:[#allocation2 + $0x58] sm:$0xff] %vm419_vm0, %v1169_v16 }
  0x3b   : > { %432 = vst.msk [vmem:[#allocation2 + $0x60] sm:$0xff] %vm419_vm0, %v1169_v16 }
  0x3c   : > { %433 = vst.msk [vmem:[#allocation2 + $0x68] sm:$0xff] %vm419_vm0, %v1169_v16 }
  0x3d   : > { %434 = vst.msk [vmem:[#allocation2 + $0x70] sm:$0xff] %vm419_vm0, %v1169_v16 }
  0x3e   : > { %435 = vst.msk [vmem:[#allocation2 + $0x78] sm:$0xff] %vm419_vm0, %v1169_v16 }
  0x3f PF: > { %v1023_v17 = vld [vmem:[%s1263_s11 + $0x38] sm:$0xff]  ;;  %v1022_v18 = vld [vmem:[%s1263_s11 + $0x30] sm:$0xff]  ;;  %v1021_v19 = vld [vmem:[%s1263_s11 + $0x28] sm:$0xff]  ;;  %vm645_vm1 = vcmask 523264   ;;  %p1003_p11 = scmp.ne.s32.totalorder %s1159_s17, 4 }
  0x40   : > { %580 = vmatpush.bf16.msra.mxu0 %v1023_v17  ;;  %1063 = vmatpush.bf16.msra.mxu1 %v1023_v17  ;;  %v1020_v20 = vld [vmem:[%s1263_s11 + $0x20] sm:$0xff]  ;;  %v1019_v21 = vld [vmem:[%s1263_s11 + $0x18] sm:$0xff]  ;;  %v1018_v22 = vld [vmem:[%s1263_s11 + $0x10] sm:$0xff] }
  0x41   : > { %1064 = vmatpush.bf16.msra.mxu2 %v1023_v17  ;;  %1065 = vmatpush.bf16.msra.mxu3 %v1023_v17  ;;  %v1017_v23 = vld [vmem:[%s1263_s11 + $0x8] sm:$0xff]  ;;  %v1016_v24 = vld [vmem:[%s1263_s11] sm:$0xff]  ;;  %v1010_v26 = vld [vmem:[%s1265_s12 + $0x10] sm:$0xff] }
  0x42   : > { %v1008_v25 = vld [vmem:[%s1265_s12] sm:$0xff]  ;;  %v1014_v28 = vld [vmem:[%s1265_s12 + $0x30] sm:$0xff]  ;;  %v1009_v29 = vld [vmem:[%s1265_s12 + $0x8] sm:$0xff] }
  0x43   : > { %v1012_v27 = vld [vmem:[%s1265_s12 + $0x20] sm:$0xff]  ;;  %v1011_v30 = vld [vmem:[%s1265_s12 + $0x18] sm:$0xff]  ;;  %v1013_v31 = vld [vmem:[%s1265_s12 + $0x28] sm:$0xff] }
  0x44   : > { %581 = vmatpush.bf16.msra.mxu0 %v1022_v18  ;;  %1066 = vmatpush.bf16.msra.mxu1 %v1022_v18  ;;  %v1015_v32 = vld [vmem:[%s1265_s12 + $0x38] sm:$0xff]  ;;  %v436_v33 = vld [vmem:[#allocation2] sm:$0xff]  ;;  %v437_v41 = vld [vmem:[#allocation2 + $0x8] sm:$0xff] }
  0x45   : > { %1067 = vmatpush.bf16.msra.mxu2 %v1022_v18  ;;  %1068 = vmatpush.bf16.msra.mxu3 %v1022_v18  ;;  %v440_v34 = vld [vmem:[#allocation2 + $0x20] sm:$0xff]  ;;  %v441_v42 = vld [vmem:[#allocation2 + $0x28] sm:$0xff]  ;;  %v438_v53 = vld [vmem:[#allocation2 + $0x10] sm:$0xff] }
  0x46   : > { %v444_v39 = vld [vmem:[#allocation2 + $0x40] sm:$0xff]  ;;  %v445_v51 = vld [vmem:[#allocation2 + $0x48] sm:$0xff]  ;;  %v442_v54 = vld [vmem:[#allocation2 + $0x30] sm:$0xff] }
  0x47   : > { %v448_v40 = vld [vmem:[#allocation2 + $0x60] sm:$0xff]  ;;  %v449_v52 = vld [vmem:[#allocation2 + $0x68] sm:$0xff]  ;;  %v446_v63 = vld [vmem:[#allocation2 + $0x50] sm:$0xff] }
  0x48   : > { %582 = vmatpush.bf16.msra.mxu0 %v1021_v19  ;;  %1069 = vmatpush.bf16.msra.mxu1 %v1021_v19  ;;  %v450_v0 = vld [vmem:[#allocation2 + $0x70] sm:$0xff]  ;;  %v439_v1 = vld [vmem:[#allocation2 + $0x18] sm:$0xff] }
  0x49   : > { %1070 = vmatpush.bf16.msra.mxu2 %v1021_v19  ;;  %1071 = vmatpush.bf16.msra.mxu3 %v1021_v19  ;;  %v443_v2 = vld [vmem:[#allocation2 + $0x38] sm:$0xff] }
  0x4a   : > { %v447_v11 = vld [vmem:[#allocation2 + $0x58] sm:$0xff] }
  0x4b   : > { %v451_v12 = vld [vmem:[#allocation2 + $0x78] sm:$0xff] }
  0x4c   : > { %583 = vmatpush.bf16.msra.mxu0 %v1020_v20  ;;  %1072 = vmatpush.bf16.msra.mxu1 %v1020_v20 }
  0x4d   : > { %1073 = vmatpush.bf16.msra.mxu2 %v1020_v20  ;;  %1074 = vmatpush.bf16.msra.mxu3 %v1020_v20 }
  0x50   : > { %584 = vmatpush.bf16.msra.mxu0 %v1019_v21  ;;  %1075 = vmatpush.bf16.msra.mxu1 %v1019_v21 }
  0x51   : > { %1076 = vmatpush.bf16.msra.mxu2 %v1019_v21  ;;  %1077 = vmatpush.bf16.msra.mxu3 %v1019_v21 }
  0x54   : > { %585 = vmatpush.bf16.msra.mxu0 %v1018_v22  ;;  %1078 = vmatpush.bf16.msra.mxu1 %v1018_v22 }
  0x55   : > { %1079 = vmatpush.bf16.msra.mxu2 %v1018_v22  ;;  %1080 = vmatpush.bf16.msra.mxu3 %v1018_v22 }
  0x58   : > { %586 = vmatpush.bf16.msra.mxu0 %v1017_v23  ;;  %1081 = vmatpush.bf16.msra.mxu1 %v1017_v23 }
  0x59   : > { %1082 = vmatpush.bf16.msra.mxu2 %v1017_v23  ;;  %1083 = vmatpush.bf16.msra.mxu3 %v1017_v23 }
  0x5c   : > { %587 = vmatpush.bf16.msra.mxu0 %v1016_v24  ;;  %1084 = vmatpush.bf16.msra.mxu1 %v1016_v24 }
  0x5d   : > { %1085 = vmatpush.bf16.msra.mxu2 %v1016_v24  ;;  %1086 = vmatpush.bf16.msra.mxu3 %v1016_v24 }
  0x5f   : > { %588 = vmatmul.bf16.vlgmr.msra.gmra.mxu0 %v1008_v25  ;;  %598 = vmatmul.bf16.vlgmr.msra.gmra.mxu1 %v1010_v26 }
  0x60   : > { %608 = vmatmul.bf16.vlgmr.msra.gmra.mxu2 %v1012_v27  ;;  %618 = vmatmul.bf16.vlgmr.msra.gmra.mxu3 %v1014_v28 }
  0x6f   : > { %593 = vmatmul.bf16.gmra.mxu0 %v1009_v29  ;;  %603 = vmatmul.bf16.gmra.mxu1 %v1011_v30 }
  0x70   : > { %613 = vmatmul.bf16.gmra.mxu2 %v1013_v31  ;;  %623 = vmatmul.bf16.gmra.mxu3 %v1015_v32 }
  0xdc   : > { %v589_v35 = vpop.f32.mrf.mxu0  ;;  %v599_v36 = vpop.f32.mrf.mxu1 }
  0xdd   : > { %v629_v37 = vadd.f32 %v589_v35, %v436_v33  ;;  %v633_v38 = vadd.f32 %v599_v36, %v440_v34 }
  0xdf   : > { %646 = vst.msk [vmem:[#allocation2] sm:$0xff] %vm645_vm1, %v629_v37 }
  0xe0   : > { %650 = vst.msk [vmem:[#allocation2 + $0x20] sm:$0xff] %vm645_vm1, %v633_v38 }
  0xe3   : > { %v609_v43 = vpop.f32.mrf.mxu2  ;;  %v619_v44 = vpop.f32.mrf.mxu3 }
  0xe4   : > { %v637_v45 = vadd.f32 %v609_v43, %v444_v39  ;;  %v641_v46 = vadd.f32 %v619_v44, %v448_v40  ;;  %v591_v47 = vpop.f32.mrf.mxu0  ;;  %v601_v48 = vpop.f32.mrf.mxu1 }
  0xe5   : > { %v630_v49 = vadd.f32 %v591_v47, %v437_v41  ;;  %v634_v50 = vadd.f32 %v601_v48, %v441_v42 }
  0xe6   : > { %654 = vst.msk [vmem:[#allocation2 + $0x40] sm:$0xff] %vm645_vm1, %v637_v45 }
  0xe7   : > { %658 = vst.msk [vmem:[#allocation2 + $0x60] sm:$0xff] %vm645_vm1, %v641_v46 }
  0xe8   : > { %647 = vst.msk [vmem:[#allocation2 + $0x8] sm:$0xff] %vm645_vm1, %v630_v49 }
  0xe9   : > { %651 = vst.msk [vmem:[#allocation2 + $0x28] sm:$0xff] %vm645_vm1, %v634_v50 }
  0xeb   : > { %v611_v55 = vpop.f32.mrf.mxu2  ;;  %v621_v56 = vpop.f32.mrf.mxu3 }
  0xec   : > { %v638_v57 = vadd.f32 %v611_v55, %v445_v51  ;;  %v642_v58 = vadd.f32 %v621_v56, %v449_v52  ;;  %v594_v59 = vpop.f32.mrf.mxu0  ;;  %v604_v60 = vpop.f32.mrf.mxu1 }
  0xed   : > { %v631_v61 = vadd.f32 %v594_v59, %v438_v53  ;;  %v635_v62 = vadd.f32 %v604_v60, %v442_v54 }
  0xee   : > { %655 = vst.msk [vmem:[#allocation2 + $0x48] sm:$0xff] %vm645_vm1, %v638_v57 }
  0xef   : > { %659 = vst.msk [vmem:[#allocation2 + $0x68] sm:$0xff] %vm645_vm1, %v642_v58 }
  0xf0   : > { %648 = vst.msk [vmem:[#allocation2 + $0x10] sm:$0xff] %vm645_vm1, %v631_v61 }
  0xf1   : > { %652 = vst.msk [vmem:[#allocation2 + $0x30] sm:$0xff] %vm645_vm1, %v635_v62 }
  0xf3   : > { %v614_v3 = vpop.f32.mrf.mxu2  ;;  %v624_v4 = vpop.f32.mrf.mxu3 }
  0xf4   : > { %v639_v5 = vadd.f32 %v614_v3, %v446_v63  ;;  %v643_v6 = vadd.f32 %v624_v4, %v450_v0  ;;  %v596_v7 = vpop.f32.mrf.mxu0  ;;  %v606_v8 = vpop.f32.mrf.mxu1 }
  0xf5   : > { %v632_v9 = vadd.f32 %v596_v7, %v439_v1  ;;  %v636_v10 = vadd.f32 %v606_v8, %v443_v2 }
  0xf6   : > { %656 = vst.msk [vmem:[#allocation2 + $0x50] sm:$0xff] %vm645_vm1, %v639_v5 }
  0xf7   : > { %660 = vst.msk [vmem:[#allocation2 + $0x70] sm:$0xff] %vm645_vm1, %v643_v6 }
  0xf8   : > { %649 = vst.msk [vmem:[#allocation2 + $0x18] sm:$0xff] %vm645_vm1, %v632_v9 }
  0xf9   : > { %653 = vst.msk [vmem:[#allocation2 + $0x38] sm:$0xff] %vm645_vm1, %v636_v10 }
  0xfb   : > { %v616_v13 = vpop.f32.mrf.mxu2  ;;  %v626_v14 = vpop.f32.mrf.mxu3  ;;  %665 = sbr.rel (%p1003_p11) target bundleno = 284 (0x11c), region = 85 }
  0xfc   : > { %v640_v15 = vadd.f32 %v616_v13, %v447_v11  ;;  %v644_v16 = vadd.f32 %v626_v14, %v451_v12 }
  0xfe   : > { %657 = vst.msk [vmem:[#allocation2 + $0x58] sm:$0xff] %vm645_vm1, %v640_v15 }
  0xff   : > { %661 = vst.msk [vmem:[#allocation2 + $0x78] sm:$0xff] %vm645_vm1, %v644_v16 }
 0x100   : > { %v666_v17 = vld [vmem:[#allocation2] sm:$0xff]  ;;  %vm782_vm2 = vcmask 519168   ;;  %v667_v20 = vld [vmem:[#allocation2 + $0x8] sm:$0xff]  ;;  %v668_v21 = vld [vmem:[#allocation2 + $0x10] sm:$0xff] }
 0x101   : > { %v1320_v18 = vld [vmem:[%s1443_s2] ss:$0 sm:$0xff]  ;;  %v1056_v26 = vld [vmem:[%s1444_s3 + $0x8] sm:$0xff]   ;;  %v669_v27 = vld [vmem:[#allocation2 + $0x18] sm:$0xff] }
 0x102   : > { %v1025_v19 = vld [vmem:[%s1444_s3] sm:$0xff]   ;;  %v686_v22 = vadd.f32 %v1320_v18, %v666_v17  ;;  %v687_v24 = vadd.f32 %v1320_v18, %v667_v20  ;;  %v688_v29 = vadd.f32 %v1320_v18, %v668_v21  ;;  %v1030_v30 = vunpack.c.l.bf16 %v1056_v26  ;;  %v1057_v33 = vld [vmem:[%s1444_s3 + $0x10] sm:$0xff]   ;;  %v671_v34 = vld [vmem:[#allocation2 + $0x28] sm:$0xff] }
 0x103   : > { %v1026_v23 = vunpack.c.l.bf16 %v1025_v19  ;;  %v1027_v25 = vunpack.c.h.bf16 %v1025_v19  ;;  %v670_v28 = vld [vmem:[#allocation2 + $0x20] sm:$0xff]  ;;  %v689_v31 = vadd.f32 %v1320_v18, %v669_v27  ;;  %v1031_v32 = vunpack.c.h.bf16 %v1056_v26  ;;  %v672_v35 = vld [vmem:[#allocation2 + $0x30] sm:$0xff]  ;;  %v1058_v40 = vld [vmem:[%s1444_s3 + $0x18] sm:$0xff]  }
 0x104   : > { %v690_v38 = vadd.f32 %v1320_v18, %v670_v28  ;;  %v1034_v39 = vunpack.c.l.bf16 %v1057_v33  ;;  %v736_v41 = vadd.f32 %v1030_v30, %v688_v29  ;;  %v691_v43 = vadd.f32 %v1320_v18, %v671_v34  ;;  %v673_v45 = vld [vmem:[#allocation2 + $0x38] sm:$0xff]  ;;  %v674_v54 = vld [vmem:[#allocation2 + $0x40] sm:$0xff]  ;;  %v675_v60 = vld [vmem:[#allocation2 + $0x48] sm:$0xff] }
 0x105   : > { %v734_v36 = vadd.f32 %v1026_v23, %v686_v22  ;;  %v735_v37 = vadd.f32 %v1027_v25, %v687_v24  ;;  %v737_v42 = vadd.f32 %v1031_v32, %v689_v31  ;;  %v1035_v44 = vunpack.c.h.bf16 %v1057_v33  ;;  %v1059_v55 = vld [vmem:[%s1444_s3 + $0x20] sm:$0xff]   ;;  %v676_v1 = vld [vmem:[#allocation2 + $0x50] sm:$0xff]  ;;  %v1060_v2 = vld [vmem:[%s1444_s3 + $0x28] sm:$0xff]  }
 0x106   : > { %v738_v48 = vadd.f32 %v1034_v39, %v690_v38  ;;  %v692_v49 = vadd.f32 %v1320_v18, %v672_v35  ;;  %v752_v50 = vmax.f32 %v736_v41, 0.0  ;;  %v1038_v53 = vunpack.c.l.bf16 %v1058_v40  ;;  %v677_v7 = vld [vmem:[#allocation2 + $0x58] sm:$0xff]  ;;  %v678_v12 = vld [vmem:[#allocation2 + $0x60] sm:$0xff]  ;;  %v1061_v17 = vld [vmem:[%s1444_s3 + $0x30] sm:$0xff]  }
 0x107   : > { %v750_v46 = vmax.f32 %v734_v36, 0.0  ;;  %v751_v47 = vmax.f32 %v735_v37, 0.0  ;;  %v753_v51 = vmax.f32 %v737_v42, 0.0  ;;  %v739_v52 = vadd.f32 %v1035_v44, %v691_v43  ;;  %v679_v19 = vld [vmem:[#allocation2 + $0x68] sm:$0xff]  ;;  %v680_v28 = vld [vmem:[#allocation2 + $0x70] sm:$0xff]  ;;  %v1062_v33 = vld [vmem:[%s1444_s3 + $0x38] sm:$0xff]  }
 0x108   : > { %v754_v58 = vmax.f32 %v738_v48, 0.0  ;;  %v693_v59 = vadd.f32 %v1320_v18, %v673_v45  ;;  %v768_v61 = vpack.c.bf16 %v752_v50, %v752_v50  ;;  %v740_v0 = vadd.f32 %v1038_v53, %v692_v49  ;;  %v681_v34 = vld [vmem:[#allocation2 + $0x78] sm:$0xff] }
 0x109   : > { %v766_v56 = vpack.c.bf16 %v750_v46, %v750_v46  ;;  %v767_v57 = vpack.c.bf16 %v751_v47, %v751_v47  ;;  %v769_v62 = vpack.c.bf16 %v753_v51, %v753_v51  ;;  %v755_v63 = vmax.f32 %v739_v52, 0.0 }
 0x10a   : > { %v770_v3 = vpack.c.bf16 %v754_v58, %v754_v58  ;;  %v1039_v4 = vunpack.c.h.bf16 %v1058_v40  ;;  %v694_v5 = vadd.f32 %v1320_v18, %v674_v54  ;;  %v1042_v6 = vunpack.c.l.bf16 %v1059_v55  ;;  %785 = vst.msk [vmem:[%s1445_s4 + $0x8] sm:$0xf] %vm782_vm2, %v768_v61 }
 0x10b   : > { %783 = vst.msk [vmem:[%s1445_s4] sm:$0xf] %vm782_vm2, %v766_v56  ;;  %v771_v8 = vpack.c.bf16 %v755_v63, %v755_v63  ;;  %v756_v9 = vmax.f32 %v740_v0, 0.0  ;;  %v695_v10 = vadd.f32 %v1320_v18, %v675_v60  ;;  %v1043_v11 = vunpack.c.h.bf16 %v1059_v55 }
 0x10c   : > { %784 = vst.msk [vmem:[%s1445_s4 + $0x4] sm:$0xf] %vm782_vm2, %v767_v57  ;;  %v741_v13 = vadd.f32 %v1039_v4, %v693_v59  ;;  %v742_v14 = vadd.f32 %v1042_v6, %v694_v5  ;;  %v696_v15 = vadd.f32 %v1320_v18, %v676_v1  ;;  %v1046_v16 = vunpack.c.l.bf16 %v1060_v2 }
 0x10d   : > { %786 = vst.msk [vmem:[%s1445_s4 + $0xc] sm:$0xf] %vm782_vm2, %v769_v62  ;;  %v772_v20 = vpack.c.bf16 %v756_v9, %v756_v9  ;;  %v743_v21 = vadd.f32 %v1043_v11, %v695_v10  ;;  %v697_v22 = vadd.f32 %v1320_v18, %v677_v7  ;;  %v1047_v23 = vunpack.c.h.bf16 %v1060_v2 }
 0x10e   : > { %787 = vst.msk [vmem:[%s1445_s4 + $0x10] sm:$0xf] %vm782_vm2, %v770_v3  ;;  %v757_v24 = vmax.f32 %v741_v13, 0.0  ;;  %v758_v25 = vmax.f32 %v742_v14, 0.0  ;;  %v744_v26 = vadd.f32 %v1046_v16, %v696_v15  ;;  %v698_v27 = vadd.f32 %v1320_v18, %v678_v12 }
 0x10f   : > { %788 = vst.msk [vmem:[%s1445_s4 + $0x14] sm:$0xf] %vm782_vm2, %v771_v8  ;;  %v759_v29 = vmax.f32 %v743_v21, 0.0  ;;  %v745_v30 = vadd.f32 %v1047_v23, %v697_v22  ;;  %v1050_v31 = vunpack.c.l.bf16 %v1061_v17  ;;  %v699_v32 = vadd.f32 %v1320_v18, %v679_v19 }
 0x110   : > { %789 = vst.msk [vmem:[%s1445_s4 + $0x18] sm:$0xf] %vm782_vm2, %v772_v20  ;;  %v773_v35 = vpack.c.bf16 %v757_v24, %v757_v24  ;;  %v774_v36 = vpack.c.bf16 %v758_v25, %v758_v25  ;;  %v760_v37 = vmax.f32 %v744_v26, 0.0  ;;  %v1051_v38 = vunpack.c.h.bf16 %v1061_v17 }
 0x111   : > { %v775_v39 = vpack.c.bf16 %v759_v29, %v759_v29  ;;  %v761_v40 = vmax.f32 %v745_v30, 0.0  ;;  %v746_v41 = vadd.f32 %v1050_v31, %v698_v27  ;;  %v700_v42 = vadd.f32 %v1320_v18, %v680_v28 }
 0x112   : > { %790 = vst.msk [vmem:[%s1445_s4 + $0x1c] sm:$0xf] %vm782_vm2, %v773_v35  ;;  %v776_v43 = vpack.c.bf16 %v760_v37, %v760_v37  ;;  %v747_v44 = vadd.f32 %v1051_v38, %v699_v32  ;;  %v1054_v45 = vunpack.c.l.bf16 %v1062_v33  ;;  %v701_v46 = vadd.f32 %v1320_v18, %v681_v34 }
 0x113   : > { %791 = vst.msk [vmem:[%s1445_s4 + $0x20] sm:$0xf] %vm782_vm2, %v774_v36  ;;  %v777_v47 = vpack.c.bf16 %v761_v40, %v761_v40  ;;  %v762_v48 = vmax.f32 %v746_v41, 0.0  ;;  %v1055_v49 = vunpack.c.h.bf16 %v1062_v33 }
 0x114   : > { %792 = vst.msk [vmem:[%s1445_s4 + $0x24] sm:$0xf] %vm782_vm2, %v775_v39  ;;  %v763_v50 = vmax.f32 %v747_v44, 0.0  ;;  %v748_v51 = vadd.f32 %v1054_v45, %v700_v42 }
 0x115   : > { %793 = vst.msk [vmem:[%s1445_s4 + $0x28] sm:$0xf] %vm782_vm2, %v776_v43  ;;  %v778_v18 = vpack.c.bf16 %v762_v48, %v762_v48  ;;  %v749_v52 = vadd.f32 %v1055_v49, %v701_v46 }
 0x116   : > { %794 = vst.msk [vmem:[%s1445_s4 + $0x2c] sm:$0xf] %vm782_vm2, %v777_v47  ;;  %v779_v53 = vpack.c.bf16 %v763_v50, %v763_v50  ;;  %v764_v54 = vmax.f32 %v748_v51, 0.0 }
 0x117   : > { %795 = vst.msk [vmem:[%s1445_s4 + $0x30] sm:$0xf] %vm782_vm2, %v778_v18  ;;  %v765_v55 = vmax.f32 %v749_v52, 0.0 }
 0x118   : > { %796 = vst.msk [vmem:[%s1445_s4 + $0x34] sm:$0xf] %vm782_vm2, %v779_v53  ;;  %v780_v56 = vpack.c.bf16 %v764_v54, %v764_v54 }
 0x119   : > { %v781_v57 = vpack.c.bf16 %v765_v55, %v765_v55 }
 0x11a   : > { %797 = vst.msk [vmem:[%s1445_s4 + $0x38] sm:$0xf] %vm782_vm2, %v780_v56 }
 0x11b   : > { %798 = vst.msk [vmem:[%s1445_s4 + $0x3c] sm:$0xf] %vm782_vm2, %v781_v57 }
 0x11c PF: > { %s14_s19 = sadd.s32 1, %s1167_s19   ;;  %s1446_s15 = smov %s1155_s16 }
 0x11d   : > { %p11_p12 = scmp.ge.s32.totalorder %s14_s19, 7   ;;  %s1447_s16 = smov %s1230_s23 }
 0x11e   : > { %s1448_s17 = smov %s1163_s18  ;;  %s1449_s18 = smov %s1451_s20 }
 0x11f   :  { %13 = sbr.rel (!%p11_p12) target bundleno = 3 (0x3), region = 129 }

// kernel: resnet_forward.28
= control target key start
LH: loop header
LB: loop body
LE: loop exit
PB: predicated region body
PF: predicated region fallthrough
CT: control target
= control target key end

     0   :  { %s752_s12 = smov 0   ;;  %s754_s13 = smov 0   ;;  %s845_s0 = inlined_call_operand.vmem [shape: bf16[32,640], index: 0, kind: input, shape index: {}]   ;;  %s846_s1 = inlined_call_operand.vmem [shape: bf16[640,128], index: 1, kind: input, shape index: {}]   ;;  %s847_s2 = inlined_call_operand.vmem [shape: f32[1,128], index: 2, kind: input, shape index: {}]   ;;  %s848_s3 = inlined_call_operand.vmem [shape: bf16[32,128], index: 3, kind: output, shape index: {}]  }
   0x1   :  { %s756_s14 = smov 0   ;;  %s758_s15 = smov 0  }
   0x2   :  { %s760_s16 = smov 0  }
   0x3 LB: > { %s25_s17 = sadd.s32 1, %s725_s15  ;;  %p48_p1 = scmp.ne.s32.totalorder %s717_s13, %s713_s12  ;;  %s729_s16 = sphi %s760_s16, %s13_s16   ;;  %s725_s15 = sphi %s758_s15, %s852_s15   ;;  %s721_s14 = sphi %s756_s14, %s851_s14   ;;  %s717_s13 = sphi %s754_s13, %s850_s13   ;;  %s713_s12 = sphi %s752_s12, %s849_s12  }
   0x4   : > { %p26_p0 = scmp.ge.s32.totalorder %s25_s17, 5  ;;  %p49_p2 = scmp.eq.s32.totalorder %s729_s16, 0 }
   0x5   : > { %s41_s19 = sadd.s32 1, %s717_s13  ;;  %p567_p5 = scmp.ge.s32.totalorder %s729_s16, 5 }
   0x6   : > { %s854_s17 = smov (%p26_p0, %s25_s17), 0  ;;  %p50_p3 = por %p49_p2, %p48_p1 }
   0x7   : > { %s37_s18 = ssub.s32 %s725_s15, %s854_s17  ;;  %162 = sbr.rel (%p567_p5) target bundleno = 20 (0x14), region = 20 }
   0x8   : > { %p39_p4 = scmp.eq.s32.totalorder %s37_s18, 0 }
   0xa   : > { %s787_s20 = scalar_select %p39_p4, %s717_s13, %s41_s19  }
   0xc   : > { %165 = sbr.rel (!%p50_p3) target bundleno = 20 (0x14), region = 24  ;;  %s167_s21 = sand.u32 (%p50_p3), 1, %s717_s13  }
   0xd   : > { %s569_s22 = sshll.u32 (%p50_p3), %s725_s15, 2  ;;  %s568_s23 = sshll.u32 (%p50_p3), %s167_s21, 4 }
   0xe   : > { %s174_s26 = scalar_lea.vmem (%p50_p3), %s845_s0, %s569_s22  ;;  %s169_s27 = scalar_lea.vmem (%p50_p3), [#allocation3], %s568_s23 }
   0xf   : > { %v191_v0 = vld [vmem:[%s174_s26] sm:$0xf] (%p50_p3)  ;;  %v193_v1 = vld [vmem:[%s174_s26 + $0x14] sm:$0xf] (%p50_p3)  ;;  %v195_v2 = vld [vmem:[%s174_s26 + $0x28] sm:$0xf] (%p50_p3) }
  0x10   : > { %192 = vst [vmem:[%s169_s27] sm:$0xf] (%p50_p3), %v191_v0  ;;  %v197_v3 = vld [vmem:[%s174_s26 + $0x3c] sm:$0xf] (%p50_p3) }
  0x11   : > { %194 = vst [vmem:[%s169_s27 + $0x4] sm:$0xf] %v193_v1 }
  0x12   : > { %196 = vst [vmem:[%s169_s27 + $0x8] sm:$0xf] %v195_v2 }
  0x13   : > { %198 = vst [vmem:[%s169_s27 + $0xc] sm:$0xf] %v197_v3 }
  0x14 PF: > { %p570_p6 = scmp.ge.s32.totalorder %s729_s16, 1  ;;  %p241_p7 = scmp.lt.s32.totalorder %s729_s16, 6 }
  0x16   : > { %p242_p8 = pnand %p570_p6, %p241_p7 }
  0x17   : > { %s248_s28 = sand.u32 (!%p242_p8), 1, %s713_s12   ;;  %s572_s29 = sshll.u32 (!%p242_p8), %s721_s14, 4 }
  0x18   : > { %245 = sbr.rel (%p242_p8) target bundleno = 223 (0xdf), region = 69  ;;  %s799_s30 = sshll.u32 (!%p242_p8), %s248_s28, 4 }
  0x19   : > { %p287_p9 = scmp.lt.s32.totalorder (!%p242_p8), %s572_s29, 79  ;;  %s250_s8 = scalar_lea.vmem (!%p242_p8), [#allocation3], %s799_s30 }
  0x1a   : > { %p574_p10 = scmp.ne.s32.totalorder (!%p242_p8), %s721_s14, 0 }
  0x1d   : > { %s856_s29 = smov (!%p287_p9, %s572_s29), 79  ;;  %310 = sbr.rel (%p574_p10) target bundleno = 39 (0x27), region = 77 }
  0x1e   : > { %s573_s4 = sshll.u32 %s856_s29, 2 }
  0x1f   : > { %s804_s7 = scalar_lea.vmem %s846_s1, %s573_s4 }
  0x22   : > { %v731_v4 = vmov 0.0  }
  0x23   : > { %311 = vst [vmem:[#allocation2 + $0x10] sm:$0xff] %v731_v4 }
  0x24   : > { %312 = vst [vmem:[#allocation2] sm:$0xff] %v731_v4 }
  0x25   : > { %313 = vst [vmem:[#allocation2 + $0x18] sm:$0xff] %v731_v4 }
  0x26   : > { %314 = vst [vmem:[#allocation2 + $0x8] sm:$0xff] %v731_v4 }
  0x27 PF: > { %v629_v5 = vld [vmem:[%s804_s7 + $0x38] sm:$0xff]  ;;  %v628_v6 = vld [vmem:[%s804_s7 + $0x30] sm:$0xff]  ;;  %v627_v7 = vld [vmem:[%s804_s7 + $0x28] sm:$0xff]  ;;  %p615_p11 = scmp.ne.s32.totalorder %s721_s14, 4 }
  0x28   : > { %399 = vmatpush.bf16.msra.mxu0 %v629_v5  ;;  %641 = vmatpush.bf16.msra.mxu1 %v629_v5  ;;  %v626_v8 = vld [vmem:[%s804_s7 + $0x20] sm:$0xff]  ;;  %v625_v9 = vld [vmem:[%s804_s7 + $0x18] sm:$0xff]  ;;  %v624_v10 = vld [vmem:[%s804_s7 + $0x10] sm:$0xff] }
  0x29   : > { %v623_v11 = vld [vmem:[%s804_s7 + $0x8] sm:$0xff]  ;;  %v622_v12 = vld [vmem:[%s804_s7] sm:$0xff] }
  0x2a   : > { %v620_v13 = vld [vmem:[%s250_s8] sm:$0xff]  ;;  %v621_v14 = vld [vmem:[%s250_s8 + $0x8] sm:$0xff] }
  0x2b   : > { %v315_v15 = vld [vmem:[#allocation2 + $0x10] sm:$0xff]  ;;  %v316_v21 = vld [vmem:[#allocation2] sm:$0xff] }
  0x2c   : > { %400 = vmatpush.bf16.msra.mxu0 %v628_v6  ;;  %642 = vmatpush.bf16.msra.mxu1 %v628_v6  ;;  %v317_v16 = vld [vmem:[#allocation2 + $0x18] sm:$0xff] }
  0x2d   : > { %v318_v22 = vld [vmem:[#allocation2 + $0x8] sm:$0xff] }
  0x30   : > { %401 = vmatpush.bf16.msra.mxu0 %v627_v7  ;;  %643 = vmatpush.bf16.msra.mxu1 %v627_v7 }
  0x34   : > { %402 = vmatpush.bf16.msra.mxu0 %v626_v8  ;;  %644 = vmatpush.bf16.msra.mxu1 %v626_v8 }
  0x38   : > { %403 = vmatpush.bf16.msra.mxu0 %v625_v9  ;;  %645 = vmatpush.bf16.msra.mxu1 %v625_v9 }
  0x3c   : > { %404 = vmatpush.bf16.msra.mxu0 %v624_v10  ;;  %646 = vmatpush.bf16.msra.mxu1 %v624_v10 }
  0x40   : > { %405 = vmatpush.bf16.msra.mxu0 %v623_v11  ;;  %647 = vmatpush.bf16.msra.mxu1 %v623_v11 }
  0x44   : > { %406 = vmatpush.bf16.msra.mxu0 %v622_v12  ;;  %648 = vmatpush.bf16.msra.mxu1 %v622_v12 }
  0x47   : > { %407 = vmatmul.bf16.vlgmr.msra.gmra.mxu0 %v620_v13  ;;  %412 = vmatmul.bf16.vlgmr.msra.gmra.mxu1 %v621_v14 }
  0xc4   : > { %v408_v17 = vpop.f32.mrf.mxu0  ;;  %v413_v18 = vpop.f32.mrf.mxu1 }
  0xc5   : > { %v418_v19 = vadd.f32 %v408_v17, %v315_v15  ;;  %v420_v20 = vadd.f32 %v413_v18, %v317_v16 }
  0xc7   : > { %422 = vst [vmem:[#allocation2 + $0x10] sm:$0xff] %v418_v19 }
  0xc8   : > { %424 = vst [vmem:[#allocation2 + $0x18] sm:$0xff] %v420_v20 }
  0xcc   : > { %v410_v23 = vpop.f32.mrf.mxu0  ;;  %v415_v24 = vpop.f32.mrf.mxu1  ;;  %429 = sbr.rel (%p615_p11) target bundleno = 223 (0xdf), region = 81 }
  0xcd   : > { %v419_v25 = vadd.f32 %v410_v23, %v316_v21  ;;  %v421_v26 = vadd.f32 %v415_v24, %v318_v22 }
  0xcf   : > { %423 = vst [vmem:[#allocation2] sm:$0xff] %v419_v25 }
  0xd0   : > { %425 = vst [vmem:[#allocation2 + $0x8] sm:$0xff] %v421_v26 }
  0xd1   : > { %v430_v27 = vld [vmem:[#allocation2 + $0x10] sm:$0xff]  ;;  %v690_v29 = vld [vmem:[%s847_s2] ss:$0 sm:$0xff]  ;;  %v432_v30 = vld [vmem:[#allocation2 + $0x18] sm:$0xff] }
  0xd2   : > { %v438_v32 = vadd.f32 %v690_v29, %v430_v27  ;;  %v440_v34 = vadd.f32 %v690_v29, %v432_v30 }
  0xd4   : > { %v442_v36 = vmax.f32 %v438_v32, 0.0  ;;  %v444_v38 = vmax.f32 %v440_v34, 0.0 }
  0xd6   : > { %v431_v28 = vld [vmem:[#allocation2] sm:$0xff] }
  0xd7   : > { %v433_v31 = vld [vmem:[#allocation2 + $0x8] sm:$0xff]  ;;  %v439_v33 = vadd.f32 %v690_v29, %v431_v28 }
  0xd8   : > { %v441_v35 = vadd.f32 %v690_v29, %v433_v31 }
  0xd9   : > { %v443_v37 = vmax.f32 %v439_v33, 0.0 }
  0xda   : > { %v445_v39 = vmax.f32 %v441_v35, 0.0 }
  0xdb   : > { %v633_v40 = vpack.c.bf16 %v443_v37, %v442_v36 }
  0xdc   : > { %v638_v41 = vpack.c.bf16 %v445_v39, %v444_v38 }
  0xdd   : > { %634 = vst [vmem:[%s848_s3] sm:$0xff] %v633_v40  }
  0xde   : > { %640 = vst [vmem:[%s848_s3 + $0x8] sm:$0xff] %v638_v41  }
  0xdf PF: > { %s13_s16 = sadd.s32 1, %s729_s16   ;;  %s849_s12 = smov %s717_s13 }
  0xe0   : > { %p10_p12 = scmp.ge.s32.totalorder %s13_s16, 7   ;;  %s850_s13 = smov %s787_s20 }
  0xe1   : > { %s851_s14 = smov %s725_s15  ;;  %s852_s15 = smov %s854_s17 }
  0xe2   :  { %12 = sbr.rel (!%p10_p12) target bundleno = 3 (0x3), region = 122 }

// kernel: resnet_forward.30
= control target key start
LH: loop header
LB: loop body
LE: loop exit
PB: predicated region body
PF: predicated region fallthrough
CT: control target
= control target key end

     0   :  { %s1150_s15 = smov 0   ;;  %s1152_s16 = smov 0   ;;  %s1272_s0 = inlined_call_operand.vmem [shape: bf16[32,1152], index: 0, kind: input, shape index: {}]   ;;  %s1273_s1 = inlined_call_operand.vmem [shape: bf16[1152,128], index: 1, kind: input, shape index: {}]   ;;  %s1274_s2 = inlined_call_operand.vmem [shape: f32[1,128], index: 2, kind: input, shape index: {}]   ;;  %s1275_s3 = inlined_call_operand.vmem [shape: bf16[32,128], index: 3, kind: input, shape index: {}]   ;;  %s1276_s4 = inlined_call_operand.vmem [shape: bf16[32,128], index: 4, kind: output, shape index: {}]  }
   0x1   :  { %s1154_s17 = smov 0   ;;  %s1156_s18 = smov 0  }
   0x2   :  { %s1158_s19 = smov 0  }
   0x3 LB: > { %s26_s20 = sadd.s32 1, %s1118_s18  ;;  %p49_p1 = scmp.ne.s32.totalorder %s1110_s16, %s1106_s15  ;;  %s1122_s19 = sphi %s1158_s19, %s14_s19   ;;  %s1118_s18 = sphi %s1156_s18, %s1280_s18   ;;  %s1114_s17 = sphi %s1154_s17, %s1279_s17   ;;  %s1110_s16 = sphi %s1152_s16, %s1278_s16   ;;  %s1106_s15 = sphi %s1150_s15, %s1277_s15  }
   0x4   : > { %p27_p0 = scmp.ge.s32.totalorder %s26_s20, 3  ;;  %p50_p2 = scmp.eq.s32.totalorder %s1122_s19, 0 }
   0x5   : > { %s42_s22 = sadd.s32 1, %s1110_s16  ;;  %p843_p5 = scmp.ge.s32.totalorder %s1122_s19, 3 }
   0x6   : > { %s1282_s20 = smov (%p27_p0, %s26_s20), 0  ;;  %p51_p3 = por %p50_p2, %p49_p1 }
   0x7   : > { %s38_s21 = ssub.s32 %s1118_s18, %s1282_s20  ;;  %203 = sbr.rel (%p843_p5) target bundleno = 25 (0x19), region = 24 }
   0x8   : > { %p40_p4 = scmp.eq.s32.totalorder %s38_s21, 0 }
   0xa   : > { %s1185_s23 = scalar_select %p40_p4, %s1110_s16, %s42_s22  }
   0xc   : > { %206 = sbr.rel (!%p51_p3) target bundleno = 25 (0x19), region = 28  ;;  %s208_s24 = sand.u32 (%p51_p3), 1, %s1110_s16  }
   0xd   : > { %s981_s25 = smul.u32 (%p51_p3), 12, %s1118_s18 }
   0xe   : > { %s1040_s26 = smul.u32 (%p51_p3), 48, %s208_s24 }
   0xf   : > { %s216_s29 = scalar_lea.vmem (%p51_p3), %s1272_s0, %s981_s25 }
  0x10   : > { %v231_v0 = vld [vmem:[%s216_s29] sm:$0xff] (%p51_p3)  ;;  %v235_v2 = vld [vmem:[%s216_s29 + $0x48] sm:$0xff] (%p51_p3)  ;;  %s210_s30 = scalar_lea.vmem (%p51_p3), [#allocation3], %s1040_s26  ;;  %v849_v6 = vld [vmem:[%s216_s29 + $0x50] sm:$0xf] (%p51_p3) }
  0x11   : > { %v233_v1 = vld [vmem:[%s216_s29 + $0x24] sm:$0xff]  ;;  %232 = vst [vmem:[%s210_s30] sm:$0xff] %v231_v0  ;;  %v237_v3 = vld [vmem:[%s216_s29 + $0x6c] sm:$0xff]  ;;  %v851_v7 = vld [vmem:[%s216_s29 + $0x74] sm:$0xf] }
  0x12   : > { %234 = vst [vmem:[%s210_s30 + $0xc] sm:$0xff] %v233_v1  ;;  %v845_v4 = vld [vmem:[%s216_s29 + $0x8] sm:$0xf]  ;;  %v847_v5 = vld [vmem:[%s216_s29 + $0x2c] sm:$0xf] }
  0x13   : > { %236 = vst [vmem:[%s210_s30 + $0x18] sm:$0xff] %v235_v2 }
  0x14   : > { %238 = vst [vmem:[%s210_s30 + $0x24] sm:$0xff] %v237_v3 }
  0x15   : > { %846 = vst [vmem:[%s210_s30 + $0x8] sm:$0xf] %v845_v4 }
  0x16   : > { %848 = vst [vmem:[%s210_s30 + $0x14] sm:$0xf] %v847_v5 }
  0x17   : > { %850 = vst [vmem:[%s210_s30 + $0x20] sm:$0xf] %v849_v6 }
  0x18   : > { %852 = vst [vmem:[%s210_s30 + $0x2c] sm:$0xf] %v851_v7 }
  0x19 PF: > { %p853_p6 = scmp.ge.s32.totalorder %s1122_s19, 1  ;;  %p271_p7 = scmp.lt.s32.totalorder %s1122_s19, 4 }
  0x1b   : > { %p272_p8 = pnand %p853_p6, %p271_p7 }
  0x1c   : > { %s278_s5 = sand.u32 (!%p272_p8), 1, %s1106_s15   ;;  %s327_s6 = smul.u32 (!%p272_p8), 48, %s1114_s17 }
  0x1d   : > { %275 = sbr.rel (%p272_p8) target bundleno = 255 (0xff), region = 58  ;;  %p855_p10 = scmp.ne.s32.totalorder (!%p272_p8), %s1114_s17, 0 }
  0x1e   : > { %s1041_s7 = smul.u32 (!%p272_p8), 48, %s278_s5  ;;  %p328_p9 = scmp.lt.s32.totalorder (!%p272_p8), %s327_s6, 143 }
  0x20   : > { %s1202_s12 = scalar_lea.vmem (!%p272_p8), [#allocation3], %s1041_s7 }
  0x22   : > { %s1284_s6 = smov (!%p328_p9, %s327_s6), 143  ;;  %360 = sbr.rel (%p855_p10) target bundleno = 44 (0x2c), region = 66 }
  0x23   : > { %s854_s8 = sshll.u32 %s1284_s6, 2 }
  0x24   : > { %s1200_s11 = scalar_lea.vmem %s1273_s1, %s854_s8 }
  0x27   : > { %v1124_v8 = vmov 0.0  }
  0x28   : > { %361 = vst [vmem:[#allocation2 + $0x10] sm:$0xff] %v1124_v8 }
  0x29   : > { %362 = vst [vmem:[#allocation2] sm:$0xff] %v1124_v8 }
  0x2a   : > { %363 = vst [vmem:[#allocation2 + $0x18] sm:$0xff] %v1124_v8 }
  0x2b   : > { %364 = vst [vmem:[#allocation2 + $0x8] sm:$0xff] %v1124_v8 }
  0x2c PF: > { %v995_v9 = vld [vmem:[%s1200_s11 + $0x38] sm:$0xff]  ;;  %v994_v12 = vld [vmem:[%s1200_s11 + $0x30] sm:$0xff]  ;;  %v993_v15 = vld [vmem:[%s1200_s11 + $0x28] sm:$0xff]  ;;  %p976_p11 = scmp.ne.s32.totalorder %s1114_s17, 2 }
  0x2d   : > { %v1003_v10 = vld [vmem:[%s1200_s11 + $0x78] sm:$0xff]  ;;  %601 = vmatpush.bf16.msra.mxu0 %v995_v9  ;;  %v1002_v13 = vld [vmem:[%s1200_s11 + $0x70] sm:$0xff]  ;;  %1032 = vmatpush.bf16.msra.mxu3 %v995_v9  ;;  %v1001_v16 = vld [vmem:[%s1200_s11 + $0x68] sm:$0xff] }
  0x2e   : > { %v1011_v11 = vld [vmem:[%s1200_s11 + $0xb8] sm:$0xff]  ;;  %620 = vmatpush.bf16.msra.mxu1 %v1003_v10  ;;  %v1010_v14 = vld [vmem:[%s1200_s11 + $0xb0] sm:$0xff]  ;;  %v1009_v17 = vld [vmem:[%s1200_s11 + $0xa8] sm:$0xff] }
  0x2f   : > { %639 = vmatpush.bf16.msra.mxu2 %v1011_v11  ;;  %v992_v18 = vld [vmem:[%s1200_s11 + $0x20] sm:$0xff]  ;;  %v991_v21 = vld [vmem:[%s1200_s11 + $0x18] sm:$0xff]  ;;  %v990_v24 = vld [vmem:[%s1200_s11 + $0x10] sm:$0xff] }
  0x30   : > { %v1000_v19 = vld [vmem:[%s1200_s11 + $0x60] sm:$0xff]  ;;  %v999_v22 = vld [vmem:[%s1200_s11 + $0x58] sm:$0xff]  ;;  %v998_v25 = vld [vmem:[%s1200_s11 + $0x50] sm:$0xff] }
  0x31   : > { %602 = vmatpush.bf16.msra.mxu0 %v994_v12  ;;  %1033 = vmatpush.bf16.msra.mxu3 %v994_v12  ;;  %v1008_v20 = vld [vmem:[%s1200_s11 + $0xa0] sm:$0xff]  ;;  %v1007_v23 = vld [vmem:[%s1200_s11 + $0x98] sm:$0xff]  ;;  %v1006_v26 = vld [vmem:[%s1200_s11 + $0x90] sm:$0xff] }
  0x32   : > { %621 = vmatpush.bf16.msra.mxu1 %v1002_v13  ;;  %v989_v27 = vld [vmem:[%s1200_s11 + $0x8] sm:$0xff]  ;;  %v988_v30 = vld [vmem:[%s1200_s11] sm:$0xff]  ;;  %v365_v54 = vld [vmem:[#allocation2 + $0x10] sm:$0xff] }
  0x33   : > { %640 = vmatpush.bf16.msra.mxu2 %v1010_v14  ;;  %v997_v28 = vld [vmem:[%s1200_s11 + $0x48] sm:$0xff]  ;;  %v996_v31 = vld [vmem:[%s1200_s11 + $0x40] sm:$0xff]  ;;  %v367_v4 = vld [vmem:[#allocation2 + $0x18] sm:$0xff] }
  0x34   : > { %v1005_v29 = vld [vmem:[%s1200_s11 + $0x88] sm:$0xff]  ;;  %v1004_v32 = vld [vmem:[%s1200_s11 + $0x80] sm:$0xff] }
  0x35   : > { %603 = vmatpush.bf16.msra.mxu0 %v993_v15  ;;  %1034 = vmatpush.bf16.msra.mxu3 %v993_v15  ;;  %v858_v33 = vld [vmem:[%s1202_s12] sm:$0xf]  ;;  %v983_v34 = vld [vmem:[%s1202_s12 + $0x8] sm:$0xf0]  ;;  %v982_v35 = vld [vmem:[%s1202_s12 + $0x4] sm:$0xf] }
  0x36   : > { %622 = vmatpush.bf16.msra.mxu1 %v1001_v16  ;;  %v860_v36 = vld [vmem:[%s1202_s12 + $0xc] sm:$0xf0]  ;;  %v866_v37 = vld [vmem:[%s1202_s12 + $0x8] sm:$0xf]  ;;  %v984_v38 = vld [vmem:[%s1202_s12 + $0x10] sm:$0xf0]  ;;  %v859_v41 = vor.u32 %v983_v34, %v858_v33 }
  0x37   : > { %641 = vmatpush.bf16.msra.mxu2 %v1009_v17  ;;  %v870_v39 = vld [vmem:[%s1202_s12 + $0x18] sm:$0xf]  ;;  %v986_v40 = vld [vmem:[%s1202_s12 + $0x20] sm:$0xf0]  ;;  %v863_v42 = vor.u32 %v982_v35, %v860_v36  ;;  %v867_v43 = vor.u32 %v984_v38, %v866_v37  ;;  %v985_v45 = vld [vmem:[%s1202_s12 + $0x1c] sm:$0xf] }
  0x38   : > { %v871_v44 = vor.u32 %v986_v40, %v870_v39  ;;  %v872_v46 = vld [vmem:[%s1202_s12 + $0x24] sm:$0xf0]  ;;  %v878_v47 = vld [vmem:[%s1202_s12 + $0x20] sm:$0xf]  ;;  %v987_v48 = vld [vmem:[%s1202_s12 + $0x28] sm:$0xf0] }
  0x39   : > { %604 = vmatpush.bf16.msra.mxu0 %v992_v18  ;;  %1035 = vmatpush.bf16.msra.mxu3 %v992_v18  ;;  %v875_v49 = vor.u32 %v985_v45, %v872_v46  ;;  %v879_v50 = vor.u32 %v987_v48, %v878_v47  ;;  %v366_v61 = vld [vmem:[#allocation2] sm:$0xff]  ;;  %v368_v11 = vld [vmem:[#allocation2 + $0x8] sm:$0xff] }
  0x3a   : > { %623 = vmatpush.bf16.msra.mxu1 %v1000_v19 }
  0x3b   : > { %642 = vmatpush.bf16.msra.mxu2 %v1008_v20 }
  0x3d   : > { %605 = vmatpush.bf16.msra.mxu0 %v991_v21  ;;  %1036 = vmatpush.bf16.msra.mxu3 %v991_v21 }
  0x3e   : > { %624 = vmatpush.bf16.msra.mxu1 %v999_v22 }
  0x3f   : > { %643 = vmatpush.bf16.msra.mxu2 %v1007_v23 }
  0x41   : > { %606 = vmatpush.bf16.msra.mxu0 %v990_v24  ;;  %1037 = vmatpush.bf16.msra.mxu3 %v990_v24 }
  0x42   : > { %625 = vmatpush.bf16.msra.mxu1 %v998_v25 }
  0x43   : > { %644 = vmatpush.bf16.msra.mxu2 %v1006_v26 }
  0x45   : > { %607 = vmatpush.bf16.msra.mxu0 %v989_v27  ;;  %1038 = vmatpush.bf16.msra.mxu3 %v989_v27 }
  0x46   : > { %626 = vmatpush.bf16.msra.mxu1 %v997_v28 }
  0x47   : > { %645 = vmatpush.bf16.msra.mxu2 %v1005_v29 }
  0x49   : > { %608 = vmatpush.bf16.msra.mxu0 %v988_v30  ;;  %1039 = vmatpush.bf16.msra.mxu3 %v988_v30 }
  0x4a   : > { %627 = vmatpush.bf16.msra.mxu1 %v996_v31 }
  0x4b   : > { %646 = vmatpush.bf16.msra.mxu2 %v1004_v32 }
  0x4c   : > { %609 = vmatmul.bf16.vlgmr.msra.gmra.mxu0 %v859_v41  ;;  %614 = vmatmul.bf16.vlgmr.msra.gmra.mxu3 %v871_v44 }
  0x4d   : > { %628 = vmatmul.bf16.vlgmr.msra.gmra.mxu1 %v863_v42 }
  0x4e   : > { %647 = vmatmul.bf16.vlgmr.msra.gmra.mxu2 %v867_v43 }
  0x5d   : > { %633 = vmatmul.bf16.gmra.mxu1 %v875_v49 }
  0x5e   : > { %652 = vmatmul.bf16.gmra.mxu2 %v879_v50 }
  0xc9   : > { %v610_v52 = vpop.f32.mrf.mxu0 }
  0xca   : > { %v629_v51 = vpop.f32.mrf.mxu1 }
  0xcb   : > { %v630_v53 = vadd.f32 %v629_v51, %v610_v52 }
  0xcf   : > { %v615_v2 = vpop.f32.mrf.mxu3 }
  0xd1   : > { %v648_v55 = vpop.f32.mrf.mxu2  ;;  %v612_v59 = vpop.f32.mrf.mxu0 }
  0xd2   : > { %v649_v56 = vadd.f32 %v648_v55, %v630_v53  ;;  %v631_v57 = vpop.f32.mrf.mxu1 }
  0xd3   : > { %v632_v60 = vadd.f32 %v631_v57, %v612_v59 }
  0xd4   : > { %v658_v58 = vadd.f32 %v649_v56, %v365_v54 }
  0xd6   : > { %662 = vst [vmem:[#allocation2 + $0x10] sm:$0xff] %v658_v58 }
  0xd7   : > { %v617_v9 = vpop.f32.mrf.mxu3 }
  0xd9   : > { %v650_v62 = vpop.f32.mrf.mxu2 }
  0xda   : > { %v651_v63 = vadd.f32 %v650_v62, %v632_v60  ;;  %v634_v0 = vpop.f32.mrf.mxu1 }
  0xdb   : > { %v635_v3 = vadd.f32 %v634_v0, %v615_v2 }
  0xdc   : > { %v659_v1 = vadd.f32 %v651_v63, %v366_v61 }
  0xde   : > { %663 = vst [vmem:[#allocation2] sm:$0xff] %v659_v1 }
  0xe1   : > { %v653_v5 = vpop.f32.mrf.mxu2 }
  0xe2   : > { %v654_v6 = vadd.f32 %v653_v5, %v635_v3  ;;  %v636_v8 = vpop.f32.mrf.mxu1 }
  0xe3   : > { %v637_v10 = vadd.f32 %v636_v8, %v617_v9 }
  0xe4   : > { %v660_v7 = vadd.f32 %v654_v6, %v367_v4 }
  0xe6   : > { %664 = vst [vmem:[#allocation2 + $0x18] sm:$0xff] %v660_v7 }
  0xe9   : > { %v655_v12 = vpop.f32.mrf.mxu2 }
  0xea   : > { %v656_v13 = vadd.f32 %v655_v12, %v637_v10  ;;  %669 = sbr.rel (%p976_p11) target bundleno = 255 (0xff), region = 70 }
  0xec   : > { %v661_v14 = vadd.f32 %v656_v13, %v368_v11 }
  0xee   : > { %665 = vst [vmem:[#allocation2 + $0x8] sm:$0xff] %v661_v14 }
  0xef   : > { %v670_v15 = vld [vmem:[#allocation2 + $0x10] sm:$0xff]  ;;  %v671_v16 = vld [vmem:[#allocation2] sm:$0xff]  ;;  %v672_v19 = vld [vmem:[#allocation2 + $0x18] sm:$0xff] }
  0xf0   : > { %v1083_v17 = vld [vmem:[%s1274_s2] ss:$0 sm:$0xff]  ;;  %v1030_v23 = vld [vmem:[%s1275_s3 + $0x8] sm:$0xff]  }
  0xf1   : > { %v1013_v18 = vld [vmem:[%s1275_s3] sm:$0xff]   ;;  %v678_v24 = vadd.f32 %v1083_v17, %v670_v15  ;;  %v679_v25 = vadd.f32 %v1083_v17, %v671_v16  ;;  %v680_v26 = vadd.f32 %v1083_v17, %v672_v19  ;;  %v1018_v28 = vunpack.c.l.bf16 %v1030_v23 }
  0xf2   : > { %v1014_v20 = vunpack.c.l.bf16 %v1013_v18  ;;  %v1015_v21 = vunpack.c.h.bf16 %v1013_v18  ;;  %v1019_v29 = vunpack.c.h.bf16 %v1030_v23 }
  0xf3   : > { %v692_v32 = vadd.f32 %v1018_v28, %v680_v26 }
  0xf4   : > { %v690_v30 = vadd.f32 %v1014_v20, %v678_v24  ;;  %v691_v31 = vadd.f32 %v1015_v21, %v679_v25 }
  0xf5   : > { %v673_v22 = vld [vmem:[#allocation2 + $0x8] sm:$0xff]  ;;  %v696_v36 = vmax.f32 %v692_v32, 0.0 }
  0xf6   : > { %v681_v27 = vadd.f32 %v1083_v17, %v673_v22  ;;  %v694_v34 = vmax.f32 %v690_v30, 0.0  ;;  %v695_v35 = vmax.f32 %v691_v31, 0.0 }
  0xf8   : > { %v693_v33 = vadd.f32 %v1019_v29, %v681_v27  ;;  %v1023_v38 = vpack.c.bf16 %v695_v35, %v694_v34 }
  0xfa   : > { %v697_v37 = vmax.f32 %v693_v33, 0.0  ;;  %1024 = vst [vmem:[%s1276_s4] sm:$0xff] %v1023_v38  }
  0xfc   : > { %v1028_v39 = vpack.c.bf16 %v697_v37, %v696_v36 }
  0xfe   : > { %1031 = vst [vmem:[%s1276_s4 + $0x8] sm:$0xff] %v1028_v39  }
  0xff PF: > { %s14_s19 = sadd.s32 1, %s1122_s19   ;;  %s1277_s15 = smov %s1110_s16 }
 0x100   : > { %p11_p12 = scmp.ge.s32.totalorder %s14_s19, 5   ;;  %s1278_s16 = smov %s1185_s23 }
 0x101   : > { %s1279_s17 = smov %s1118_s18  ;;  %s1280_s18 = smov %s1282_s20 }
 0x102   :  { %13 = sbr.rel (!%p11_p12) target bundleno = 3 (0x3), region = 120 }

// kernel: resnet_forward.29
= control target key start
LH: loop header
LB: loop body
LE: loop exit
PB: predicated region body
PF: predicated region fallthrough
CT: control target
= control target key end

     0   :  { %s289_s1 = inlined_call_operand.vmem [shape: bf16[128,128], index: 1, kind: input, shape index: {}]   ;;  %s290_s2 = inlined_call_operand.vmem [shape: f32[1,128], index: 2, kind: input, shape index: {}]   ;;  %s291_s0 = inlined_call_operand.vmem [shape: bf16[32,128], index: 0, kind: input, shape index: {}]   ;;  %s292_s3 = inlined_call_operand.vmem [shape: bf16[32,128], index: 3, kind: output, shape index: {}]  }
   0x1   :  { %v209_v0 = vld [vmem:[%s289_s1 + $0x38] sm:$0xff]  ;;  %v208_v1 = vld [vmem:[%s289_s1 + $0x30] sm:$0xff]  ;;  %v207_v2 = vld [vmem:[%s289_s1 + $0x28] sm:$0xff] }
   0x2   :  { %106 = vmatpush.bf16.msra.mxu0 %v209_v0  ;;  %221 = vmatpush.bf16.msra.mxu1 %v209_v0  ;;  %v206_v3 = vld [vmem:[%s289_s1 + $0x20] sm:$0xff]  ;;  %v205_v4 = vld [vmem:[%s289_s1 + $0x18] sm:$0xff]  ;;  %v204_v5 = vld [vmem:[%s289_s1 + $0x10] sm:$0xff] }
   0x3   :  { %v203_v6 = vld [vmem:[%s289_s1 + $0x8] sm:$0xff]  ;;  %v202_v7 = vld [vmem:[%s289_s1] sm:$0xff] }
   0x4   :  { %v200_v8 = vld [vmem:[%s291_s0] sm:$0xff]  ;;  %v201_v9 = vld [vmem:[%s291_s0 + $0x8] sm:$0xff] }
   0x5   :  { %v229_v12 = vld [vmem:[%s290_s2] ss:$0 sm:$0xff] }
   0x6   :  { %107 = vmatpush.bf16.msra.mxu0 %v208_v1  ;;  %222 = vmatpush.bf16.msra.mxu1 %v208_v1 }
   0xa   :  { %108 = vmatpush.bf16.msra.mxu0 %v207_v2  ;;  %223 = vmatpush.bf16.msra.mxu1 %v207_v2 }
   0xe   :  { %109 = vmatpush.bf16.msra.mxu0 %v206_v3  ;;  %224 = vmatpush.bf16.msra.mxu1 %v206_v3 }
  0x12   :  { %110 = vmatpush.bf16.msra.mxu0 %v205_v4  ;;  %225 = vmatpush.bf16.msra.mxu1 %v205_v4 }
  0x16   :  { %111 = vmatpush.bf16.msra.mxu0 %v204_v5  ;;  %226 = vmatpush.bf16.msra.mxu1 %v204_v5 }
  0x1a   :  { %112 = vmatpush.bf16.msra.mxu0 %v203_v6  ;;  %227 = vmatpush.bf16.msra.mxu1 %v203_v6 }
  0x1e   :  { %113 = vmatpush.bf16.msra.mxu0 %v202_v7  ;;  %228 = vmatpush.bf16.msra.mxu1 %v202_v7 }
  0x21   :  { %114 = vmatmul.bf16.vlgmr.msra.gmra.mxu0 %v200_v8  ;;  %119 = vmatmul.bf16.vlgmr.msra.gmra.mxu1 %v201_v9 }
  0x9e   :  { %v115_v10 = vpop.f32.mrf.mxu0  ;;  %v120_v11 = vpop.f32.mrf.mxu1 }
  0x9f   :  { %v144_v15 = vadd.f32 %v229_v12, %v115_v10  ;;  %v146_v16 = vadd.f32 %v229_v12, %v120_v11 }
  0xa6   :  { %v117_v13 = vpop.f32.mrf.mxu0  ;;  %v122_v14 = vpop.f32.mrf.mxu1 }
  0xa7   :  { %v145_v17 = vadd.f32 %v229_v12, %v117_v13  ;;  %v147_v18 = vadd.f32 %v229_v12, %v122_v14 }
  0xa9   :  { %v213_v19 = vpack.c.bf16 %v145_v17, %v144_v15  ;;  %v218_v20 = vpack.c.bf16 %v147_v18, %v146_v16 }
  0xab   :  { %214 = vst [vmem:[%s292_s3] sm:$0xff] %v213_v19  }
  0xac   :  { %220 = vst [vmem:[%s292_s3 + $0x8] sm:$0xff] %v218_v20  }

// kernel: resnet_forward.31
= control target key start
LH: loop header
LB: loop body
LE: loop exit
PB: predicated region body
PF: predicated region fallthrough
CT: control target
= control target key end

     0   :  { %s1045_s12 = smov 0   ;;  %s1047_s13 = smov 0   ;;  %s1161_s0 = inlined_call_operand.vmem [shape: bf16[32,1152], index: 0, kind: input, shape index: {}]   ;;  %s1162_s1 = inlined_call_operand.vmem [shape: bf16[1152,128], index: 1, kind: input, shape index: {}]   ;;  %s1163_s2 = inlined_call_operand.vmem [shape: f32[1,128], index: 2, kind: input, shape index: {}]   ;;  %s1164_s3 = inlined_call_operand.vmem [shape: bf16[32,128], index: 3, kind: output, shape index: {}]  }
   0x1   :  { %s1049_s14 = smov 0   ;;  %s1051_s15 = smov 0  }
   0x2   :  { %s1053_s16 = smov 0  }
   0x3 LB: > { %s25_s17 = sadd.s32 1, %s1018_s15  ;;  %p48_p1 = scmp.ne.s32.totalorder %s1010_s13, %s1006_s12  ;;  %s1022_s16 = sphi %s1053_s16, %s13_s16   ;;  %s1018_s15 = sphi %s1051_s15, %s1168_s15   ;;  %s1014_s14 = sphi %s1049_s14, %s1167_s14   ;;  %s1010_s13 = sphi %s1047_s13, %s1166_s13   ;;  %s1006_s12 = sphi %s1045_s12, %s1165_s12  }
   0x4   : > { %p26_p0 = scmp.ge.s32.totalorder %s25_s17, 3  ;;  %p49_p2 = scmp.eq.s32.totalorder %s1022_s16, 0 }
   0x5   : > { %s41_s19 = sadd.s32 1, %s1010_s13  ;;  %p752_p5 = scmp.ge.s32.totalorder %s1022_s16, 3 }
   0x6   : > { %s1170_s17 = smov (%p26_p0, %s25_s17), 0  ;;  %p50_p3 = por %p49_p2, %p48_p1 }
   0x7   : > { %s37_s18 = ssub.s32 %s1018_s15, %s1170_s17  ;;  %162 = sbr.rel (%p752_p5) target bundleno = 25 (0x19), region = 20 }
   0x8   : > { %p39_p4 = scmp.eq.s32.totalorder %s37_s18, 0 }
   0xa   : > { %s1080_s20 = scalar_select %p39_p4, %s1010_s13, %s41_s19  }
   0xc   : > { %165 = sbr.rel (!%p50_p3) target bundleno = 25 (0x19), region = 24  ;;  %s167_s21 = sand.u32 (%p50_p3), 1, %s1010_s13  }
   0xd   : > { %s890_s22 = smul.u32 (%p50_p3), 12, %s1018_s15 }
   0xe   : > { %s940_s23 = smul.u32 (%p50_p3), 48, %s167_s21 }
   0xf   : > { %s175_s26 = scalar_lea.vmem (%p50_p3), %s1161_s0, %s890_s22 }
  0x10   : > { %v190_v0 = vld [vmem:[%s175_s26] sm:$0xff] (%p50_p3)  ;;  %v194_v2 = vld [vmem:[%s175_s26 + $0x48] sm:$0xff] (%p50_p3)  ;;  %s169_s27 = scalar_lea.vmem (%p50_p3), [#allocation3], %s940_s23  ;;  %v758_v6 = vld [vmem:[%s175_s26 + $0x50] sm:$0xf] (%p50_p3) }
  0x11   : > { %v192_v1 = vld [vmem:[%s175_s26 + $0x24] sm:$0xff]  ;;  %191 = vst [vmem:[%s169_s27] sm:$0xff] %v190_v0  ;;  %v196_v3 = vld [vmem:[%s175_s26 + $0x6c] sm:$0xff]  ;;  %v760_v7 = vld [vmem:[%s175_s26 + $0x74] sm:$0xf] }
  0x12   : > { %193 = vst [vmem:[%s169_s27 + $0xc] sm:$0xff] %v192_v1  ;;  %v754_v4 = vld [vmem:[%s175_s26 + $0x8] sm:$0xf]  ;;  %v756_v5 = vld [vmem:[%s175_s26 + $0x2c] sm:$0xf] }
  0x13   : > { %195 = vst [vmem:[%s169_s27 + $0x18] sm:$0xff] %v194_v2 }
  0x14   : > { %197 = vst [vmem:[%s169_s27 + $0x24] sm:$0xff] %v196_v3 }
  0x15   : > { %755 = vst [vmem:[%s169_s27 + $0x8] sm:$0xf] %v754_v4 }
  0x16   : > { %757 = vst [vmem:[%s169_s27 + $0x14] sm:$0xf] %v756_v5 }
  0x17   : > { %759 = vst [vmem:[%s169_s27 + $0x20] sm:$0xf] %v758_v6 }
  0x18   : > { %761 = vst [vmem:[%s169_s27 + $0x2c] sm:$0xf] %v760_v7 }
  0x19 PF: > { %p762_p6 = scmp.ge.s32.totalorder %s1022_s16, 1  ;;  %p230_p7 = scmp.lt.s32.totalorder %s1022_s16, 4 }
  0x1b   : > { %p231_p8 = pnand %p762_p6, %p230_p7 }
  0x1c   : > { %s237_s28 = sand.u32 (!%p231_p8), 1, %s1006_s12   ;;  %s276_s29 = smul.u32 (!%p231_p8), 48, %s1014_s14 }
  0x1d   : > { %234 = sbr.rel (%p231_p8) target bundleno = 253 (0xfd), region = 54  ;;  %p764_p10 = scmp.ne.s32.totalorder (!%p231_p8), %s1014_s14, 0 }
  0x1e   : > { %s941_s30 = smul.u32 (!%p231_p8), 48, %s237_s28  ;;  %p277_p9 = scmp.lt.s32.totalorder (!%p231_p8), %s276_s29, 143 }
  0x20   : > { %s1097_s8 = scalar_lea.vmem (!%p231_p8), [#allocation3], %s941_s30 }
  0x22   : > { %s1172_s29 = smov (!%p277_p9, %s276_s29), 143  ;;  %300 = sbr.rel (%p764_p10) target bundleno = 44 (0x2c), region = 62 }
  0x23   : > { %s763_s4 = sshll.u32 %s1172_s29, 2 }
  0x24   : > { %s1095_s7 = scalar_lea.vmem %s1162_s1, %s763_s4 }
  0x27   : > { %v1024_v8 = vmov 0.0  }
  0x28   : > { %301 = vst [vmem:[#allocation2 + $0x10] sm:$0xff] %v1024_v8 }
  0x29   : > { %302 = vst [vmem:[#allocation2] sm:$0xff] %v1024_v8 }
  0x2a   : > { %303 = vst [vmem:[#allocation2 + $0x18] sm:$0xff] %v1024_v8 }
  0x2b   : > { %304 = vst [vmem:[#allocation2 + $0x8] sm:$0xff] %v1024_v8 }
  0x2c PF: > { %v904_v9 = vld [vmem:[%s1095_s7 + $0x38] sm:$0xff]  ;;  %v903_v12 = vld [vmem:[%s1095_s7 + $0x30] sm:$0xff]  ;;  %v902_v15 = vld [vmem:[%s1095_s7 + $0x28] sm:$0xff]  ;;  %p885_p11 = scmp.ne.s32.totalorder %s1014_s14, 2 }
  0x2d   : > { %v912_v10 = vld [vmem:[%s1095_s7 + $0x78] sm:$0xff]  ;;  %541 = vmatpush.bf16.msra.mxu0 %v904_v9  ;;  %v911_v13 = vld [vmem:[%s1095_s7 + $0x70] sm:$0xff]  ;;  %932 = vmatpush.bf16.msra.mxu3 %v904_v9  ;;  %v910_v16 = vld [vmem:[%s1095_s7 + $0x68] sm:$0xff] }
  0x2e   : > { %v920_v11 = vld [vmem:[%s1095_s7 + $0xb8] sm:$0xff]  ;;  %560 = vmatpush.bf16.msra.mxu1 %v912_v10  ;;  %v919_v14 = vld [vmem:[%s1095_s7 + $0xb0] sm:$0xff]  ;;  %v918_v17 = vld [vmem:[%s1095_s7 + $0xa8] sm:$0xff] }
  0x2f   : > { %579 = vmatpush.bf16.msra.mxu2 %v920_v11  ;;  %v901_v18 = vld [vmem:[%s1095_s7 + $0x20] sm:$0xff]  ;;  %v900_v21 = vld [vmem:[%s1095_s7 + $0x18] sm:$0xff]  ;;  %v899_v24 = vld [vmem:[%s1095_s7 + $0x10] sm:$0xff] }
  0x30   : > { %v909_v19 = vld [vmem:[%s1095_s7 + $0x60] sm:$0xff]  ;;  %v908_v22 = vld [vmem:[%s1095_s7 + $0x58] sm:$0xff]  ;;  %v907_v25 = vld [vmem:[%s1095_s7 + $0x50] sm:$0xff] }
  0x31   : > { %542 = vmatpush.bf16.msra.mxu0 %v903_v12  ;;  %933 = vmatpush.bf16.msra.mxu3 %v903_v12  ;;  %v917_v20 = vld [vmem:[%s1095_s7 + $0xa0] sm:$0xff]  ;;  %v916_v23 = vld [vmem:[%s1095_s7 + $0x98] sm:$0xff]  ;;  %v915_v26 = vld [vmem:[%s1095_s7 + $0x90] sm:$0xff] }
  0x32   : > { %561 = vmatpush.bf16.msra.mxu1 %v911_v13  ;;  %v898_v27 = vld [vmem:[%s1095_s7 + $0x8] sm:$0xff]  ;;  %v897_v30 = vld [vmem:[%s1095_s7] sm:$0xff]  ;;  %v305_v54 = vld [vmem:[#allocation2 + $0x10] sm:$0xff] }
  0x33   : > { %580 = vmatpush.bf16.msra.mxu2 %v919_v14  ;;  %v906_v28 = vld [vmem:[%s1095_s7 + $0x48] sm:$0xff]  ;;  %v905_v31 = vld [vmem:[%s1095_s7 + $0x40] sm:$0xff]  ;;  %v307_v4 = vld [vmem:[#allocation2 + $0x18] sm:$0xff] }
  0x34   : > { %v914_v29 = vld [vmem:[%s1095_s7 + $0x88] sm:$0xff]  ;;  %v913_v32 = vld [vmem:[%s1095_s7 + $0x80] sm:$0xff] }
  0x35   : > { %543 = vmatpush.bf16.msra.mxu0 %v902_v15  ;;  %934 = vmatpush.bf16.msra.mxu3 %v902_v15  ;;  %v767_v33 = vld [vmem:[%s1097_s8] sm:$0xf]  ;;  %v892_v34 = vld [vmem:[%s1097_s8 + $0x8] sm:$0xf0]  ;;  %v891_v35 = vld [vmem:[%s1097_s8 + $0x4] sm:$0xf] }
  0x36   : > { %562 = vmatpush.bf16.msra.mxu1 %v910_v16  ;;  %v769_v36 = vld [vmem:[%s1097_s8 + $0xc] sm:$0xf0]  ;;  %v775_v37 = vld [vmem:[%s1097_s8 + $0x8] sm:$0xf]  ;;  %v893_v38 = vld [vmem:[%s1097_s8 + $0x10] sm:$0xf0]  ;;  %v768_v41 = vor.u32 %v892_v34, %v767_v33 }
  0x37   : > { %581 = vmatpush.bf16.msra.mxu2 %v918_v17  ;;  %v779_v39 = vld [vmem:[%s1097_s8 + $0x18] sm:$0xf]  ;;  %v895_v40 = vld [vmem:[%s1097_s8 + $0x20] sm:$0xf0]  ;;  %v772_v42 = vor.u32 %v891_v35, %v769_v36  ;;  %v776_v43 = vor.u32 %v893_v38, %v775_v37  ;;  %v894_v45 = vld [vmem:[%s1097_s8 + $0x1c] sm:$0xf] }
  0x38   : > { %v780_v44 = vor.u32 %v895_v40, %v779_v39  ;;  %v781_v46 = vld [vmem:[%s1097_s8 + $0x24] sm:$0xf0]  ;;  %v787_v47 = vld [vmem:[%s1097_s8 + $0x20] sm:$0xf]  ;;  %v896_v48 = vld [vmem:[%s1097_s8 + $0x28] sm:$0xf0] }
  0x39   : > { %544 = vmatpush.bf16.msra.mxu0 %v901_v18  ;;  %935 = vmatpush.bf16.msra.mxu3 %v901_v18  ;;  %v784_v49 = vor.u32 %v894_v45, %v781_v46  ;;  %v788_v50 = vor.u32 %v896_v48, %v787_v47  ;;  %v306_v61 = vld [vmem:[#allocation2] sm:$0xff]  ;;  %v308_v11 = vld [vmem:[#allocation2 + $0x8] sm:$0xff] }
  0x3a   : > { %563 = vmatpush.bf16.msra.mxu1 %v909_v19 }
  0x3b   : > { %582 = vmatpush.bf16.msra.mxu2 %v917_v20 }
  0x3d   : > { %545 = vmatpush.bf16.msra.mxu0 %v900_v21  ;;  %936 = vmatpush.bf16.msra.mxu3 %v900_v21 }
  0x3e   : > { %564 = vmatpush.bf16.msra.mxu1 %v908_v22 }
  0x3f   : > { %583 = vmatpush.bf16.msra.mxu2 %v916_v23 }
  0x41   : > { %546 = vmatpush.bf16.msra.mxu0 %v899_v24  ;;  %937 = vmatpush.bf16.msra.mxu3 %v899_v24 }
  0x42   : > { %565 = vmatpush.bf16.msra.mxu1 %v907_v25 }
  0x43   : > { %584 = vmatpush.bf16.msra.mxu2 %v915_v26 }
  0x45   : > { %547 = vmatpush.bf16.msra.mxu0 %v898_v27  ;;  %938 = vmatpush.bf16.msra.mxu3 %v898_v27 }
  0x46   : > { %566 = vmatpush.bf16.msra.mxu1 %v906_v28 }
  0x47   : > { %585 = vmatpush.bf16.msra.mxu2 %v914_v29 }
  0x49   : > { %548 = vmatpush.bf16.msra.mxu0 %v897_v30  ;;  %939 = vmatpush.bf16.msra.mxu3 %v897_v30 }
  0x4a   : > { %567 = vmatpush.bf16.msra.mxu1 %v905_v31 }
  0x4b   : > { %586 = vmatpush.bf16.msra.mxu2 %v913_v32 }
  0x4c   : > { %549 = vmatmul.bf16.vlgmr.msra.gmra.mxu0 %v768_v41  ;;  %554 = vmatmul.bf16.vlgmr.msra.gmra.mxu3 %v780_v44 }
  0x4d   : > { %568 = vmatmul.bf16.vlgmr.msra.gmra.mxu1 %v772_v42 }
  0x4e   : > { %587 = vmatmul.bf16.vlgmr.msra.gmra.mxu2 %v776_v43 }
  0x5d   : > { %573 = vmatmul.bf16.gmra.mxu1 %v784_v49 }
  0x5e   : > { %592 = vmatmul.bf16.gmra.mxu2 %v788_v50 }
  0xc9   : > { %v550_v52 = vpop.f32.mrf.mxu0 }
  0xca   : > { %v569_v51 = vpop.f32.mrf.mxu1 }
  0xcb   : > { %v570_v53 = vadd.f32 %v569_v51, %v550_v52 }
  0xcf   : > { %v555_v2 = vpop.f32.mrf.mxu3 }
  0xd1   : > { %v588_v55 = vpop.f32.mrf.mxu2  ;;  %v552_v59 = vpop.f32.mrf.mxu0 }
  0xd2   : > { %v589_v56 = vadd.f32 %v588_v55, %v570_v53  ;;  %v571_v57 = vpop.f32.mrf.mxu1 }
  0xd3   : > { %v572_v60 = vadd.f32 %v571_v57, %v552_v59 }
  0xd4   : > { %v598_v58 = vadd.f32 %v589_v56, %v305_v54 }
  0xd6   : > { %602 = vst [vmem:[#allocation2 + $0x10] sm:$0xff] %v598_v58 }
  0xd7   : > { %v557_v9 = vpop.f32.mrf.mxu3 }
  0xd9   : > { %v590_v62 = vpop.f32.mrf.mxu2 }
  0xda   : > { %v591_v63 = vadd.f32 %v590_v62, %v572_v60  ;;  %v574_v0 = vpop.f32.mrf.mxu1 }
  0xdb   : > { %v575_v3 = vadd.f32 %v574_v0, %v555_v2 }
  0xdc   : > { %v599_v1 = vadd.f32 %v591_v63, %v306_v61 }
  0xde   : > { %603 = vst [vmem:[#allocation2] sm:$0xff] %v599_v1 }
  0xe1   : > { %v593_v5 = vpop.f32.mrf.mxu2 }
  0xe2   : > { %v594_v6 = vadd.f32 %v593_v5, %v575_v3  ;;  %v576_v8 = vpop.f32.mrf.mxu1 }
  0xe3   : > { %v577_v10 = vadd.f32 %v576_v8, %v557_v9 }
  0xe4   : > { %v600_v7 = vadd.f32 %v594_v6, %v307_v4 }
  0xe6   : > { %604 = vst [vmem:[#allocation2 + $0x18] sm:$0xff] %v600_v7 }
  0xe9   : > { %v595_v12 = vpop.f32.mrf.mxu2 }
  0xea   : > { %v596_v13 = vadd.f32 %v595_v12, %v577_v10  ;;  %609 = sbr.rel (%p885_p11) target bundleno = 253 (0xfd), region = 66 }
  0xec   : > { %v601_v14 = vadd.f32 %v596_v13, %v308_v11 }
  0xee   : > { %605 = vst [vmem:[#allocation2 + $0x8] sm:$0xff] %v601_v14 }
  0xef   : > { %v610_v15 = vld [vmem:[#allocation2 + $0x10] sm:$0xff]  ;;  %v611_v16 = vld [vmem:[#allocation2] sm:$0xff]  ;;  %v612_v18 = vld [vmem:[#allocation2 + $0x18] sm:$0xff] }
  0xf0   : > { %v983_v17 = vld [vmem:[%s1163_s2] ss:$0 sm:$0xff] }
  0xf1   : > { %v618_v20 = vadd.f32 %v983_v17, %v610_v15  ;;  %v619_v21 = vadd.f32 %v983_v17, %v611_v16  ;;  %v620_v22 = vadd.f32 %v983_v17, %v612_v18 }
  0xf3   : > { %v622_v24 = vmax.f32 %v618_v20, 0.0  ;;  %v623_v25 = vmax.f32 %v619_v21, 0.0  ;;  %v624_v26 = vmax.f32 %v620_v22, 0.0 }
  0xf5   : > { %v613_v19 = vld [vmem:[#allocation2 + $0x8] sm:$0xff]  ;;  %v924_v28 = vpack.c.bf16 %v623_v25, %v622_v24 }
  0xf6   : > { %v621_v23 = vadd.f32 %v983_v17, %v613_v19 }
  0xf7   : > { %925 = vst [vmem:[%s1164_s3] sm:$0xff] %v924_v28  }
  0xf8   : > { %v625_v27 = vmax.f32 %v621_v23, 0.0 }
  0xfa   : > { %v929_v29 = vpack.c.bf16 %v625_v27, %v624_v26 }
  0xfc   : > { %931 = vst [vmem:[%s1164_s3 + $0x8] sm:$0xff] %v929_v29  }
  0xfd PF: > { %s13_s16 = sadd.s32 1, %s1022_s16   ;;  %s1165_s12 = smov %s1010_s13 }
  0xfe   : > { %p10_p12 = scmp.ge.s32.totalorder %s13_s16, 5   ;;  %s1166_s13 = smov %s1080_s20 }
  0xff   : > { %s1167_s14 = smov %s1018_s15  ;;  %s1168_s15 = smov %s1170_s17 }
 0x100   :  { %12 = sbr.rel (!%p10_p12) target bundleno = 3 (0x3), region = 113 }

// kernel: resnet_forward.33
= control target key start
LH: loop header
LB: loop body
LE: loop exit
PB: predicated region body
PF: predicated region fallthrough
CT: control target
= control target key end

     0   :  { %s1128_s12 = smov 0   ;;  %s1130_s13 = smov 0   ;;  %s1279_s0 = inlined_call_operand.vmem [shape: bf16[8,1152], index: 0, kind: input, shape index: {}]   ;;  %s1280_s1 = inlined_call_operand.vmem [shape: bf16[1152,256], index: 1, kind: input, shape index: {}]   ;;  %s1281_s2 = inlined_call_operand.vmem [shape: f32[1,256], index: 2, kind: input, shape index: {}]   ;;  %s1282_s3 = inlined_call_operand.vmem [shape: bf16[8,256], index: 3, kind: output, shape index: {}]  }
   0x1   :  { %s1132_s14 = smov 0  }
   0x2 LB: > { %s25_s15 = sadd.s32 1, %s1101_s13  ;;  %p807_p0 = scmp.ge.s32.totalorder %s1105_s14, 1  ;;  %s1105_s14 = sphi %s1132_s14, %s13_s14   ;;  %s1101_s13 = sphi %s1130_s13, %s1284_s13   ;;  %s1097_s12 = sphi %s1128_s12, %s1283_s12  }
   0x3   : > { %p26_p1 = scmp.ge.s32.totalorder %s25_s15, 3  ;;  %p194_p2 = scmp.lt.s32.totalorder %s1105_s14, 4 }
   0x5   : > { %s1286_s15 = smov (%p26_p1, %s25_s15), 0  ;;  %p195_p3 = pnand %p807_p0, %p194_p2 }
   0x6   : > { %s240_s16 = smul.u32 (!%p195_p3), 3, %s1097_s12  ;;  %p811_p6 = scmp.ne.s32.totalorder (!%p195_p3), %s1097_s12, 0 }
   0x7   : > { %198 = sbr.rel (%p195_p3) target bundleno = 236 (0xec), region = 32 }
   0x8   : > { %s250_s17 = smul.u32 (!%p195_p3), 48, %s1097_s12  ;;  %p243_p4 = scmp.lt.s32.totalorder (!%p195_p3), %s240_s16, 8 }
   0xa   : > { %p252_p5 = scmp.lt.s32.totalorder (!%p195_p3), %s250_s17, 143 }
   0xc   : > { %s1288_s16 = smov (!%p243_p4, %s240_s16), 8  ;;  %s1290_s17 = smov (!%p252_p5, %s250_s17), 143 }
   0xd   : > { %s808_s18 = sshll.u32 %s1288_s16, 2  ;;  %s1009_s22 = sshll.u32 %s1290_s17, 3 }
   0xe   : > { %s1153_s21 = scalar_lea.vmem %s1279_s0, %s808_s18  ;;  %s1158_s25 = scalar_lea.vmem %s1280_s1, %s1009_s22 }
   0xf   : > { %280 = sbr.rel (%p811_p6) target bundleno = 23 (0x17), region = 36 }
  0x14   : > { %v1107_v0 = vmov 0.0  }
  0x15   : > { %281 = vst [vmem:[#allocation2] sm:$0xff] %v1107_v0 }
  0x16   : > { %282 = vst [vmem:[#allocation2 + $0x8] sm:$0xff] %v1107_v0 }
  0x17 PF: > { %v870_v1 = vld [vmem:[%s1158_s25 + $0x70] sm:$0xf]  ;;  %v1025_v2 = vld [vmem:[%s1158_s25 + $0x74] sm:$0xf0]  ;;  %v862_v6 = vld [vmem:[%s1158_s25 + $0x60] sm:$0xf] }
  0x18   : > { %v934_v3 = vld [vmem:[%s1158_s25 + $0xf0] sm:$0xf]  ;;  %v871_v4 = vor.u32 %v1025_v2, %v870_v1  ;;  %v1041_v5 = vld [vmem:[%s1158_s25 + $0xf4] sm:$0xf0]  ;;  %v1023_v7 = vld [vmem:[%s1158_s25 + $0x64] sm:$0xf0] }
  0x19   : > { %v935_v8 = vor.u32 %v1041_v5, %v934_v3  ;;  %v926_v9 = vld [vmem:[%s1158_s25 + $0xe0] sm:$0xf]  ;;  %v1039_v10 = vld [vmem:[%s1158_s25 + $0xe4] sm:$0xf0]  ;;  %v863_v11 = vor.u32 %v1023_v7, %v862_v6  ;;  %v854_v12 = vld [vmem:[%s1158_s25 + $0x50] sm:$0xf] }
  0x1a   : > { %586 = vmatpush.bf16.msra.mxu0 %v871_v4  ;;  %v927_v13 = vor.u32 %v1039_v10, %v926_v9  ;;  %v1021_v14 = vld [vmem:[%s1158_s25 + $0x54] sm:$0xf0]  ;;  %v998_v15 = vld [vmem:[%s1158_s25 + $0x170] sm:$0xf]  ;;  %v990_v20 = vld [vmem:[%s1158_s25 + $0x160] sm:$0xf] }
  0x1b   : > { %599 = vmatpush.bf16.msra.mxu1 %v935_v8  ;;  %v1057_v16 = vld [vmem:[%s1158_s25 + $0x174] sm:$0xf0]  ;;  %v918_v17 = vld [vmem:[%s1158_s25 + $0xd0] sm:$0xf]  ;;  %v1055_v21 = vld [vmem:[%s1158_s25 + $0x164] sm:$0xf0]  ;;  %v855_v23 = vor.u32 %v1021_v14, %v854_v12 }
  0x1c   : > { %v1037_v18 = vld [vmem:[%s1158_s25 + $0xd4] sm:$0xf0]  ;;  %v999_v19 = vor.u32 %v1057_v16, %v998_v15  ;;  %v1024_v22 = vld [vmem:[%s1158_s25 + $0x74] sm:$0xf]  ;;  %v846_v24 = vld [vmem:[%s1158_s25 + $0x40] sm:$0xf]  ;;  %v991_v26 = vor.u32 %v1055_v21, %v990_v20 }
  0x1d   : > { %v1019_v25 = vld [vmem:[%s1158_s25 + $0x44] sm:$0xf0]  ;;  %v872_v27 = vld [vmem:[%s1158_s25 + $0x78] sm:$0xf0]  ;;  %v919_v28 = vor.u32 %v1037_v18, %v918_v17  ;;  %v910_v29 = vld [vmem:[%s1158_s25 + $0xc0] sm:$0xf] }
  0x1e   : > { %587 = vmatpush.bf16.msra.mxu0 %v863_v11  ;;  %612 = vmatpush.bf16.msra.mxu2 %v999_v19  ;;  %v1035_v30 = vld [vmem:[%s1158_s25 + $0xc4] sm:$0xf0]  ;;  %v875_v31 = vor.u32 %v1024_v22, %v872_v27  ;;  %v982_v32 = vld [vmem:[%s1158_s25 + $0x150] sm:$0xf]  ;;  %v1053_v33 = vld [vmem:[%s1158_s25 + $0x154] sm:$0xf0]  ;;  %v847_v37 = vor.u32 %v1019_v25, %v846_v24 }
  0x1f   : > { %600 = vmatpush.bf16.msra.mxu1 %v927_v13  ;;  %v1022_v34 = vld [vmem:[%s1158_s25 + $0x64] sm:$0xf]  ;;  %v864_v35 = vld [vmem:[%s1158_s25 + $0x68] sm:$0xf0]  ;;  %v838_v38 = vld [vmem:[%s1158_s25 + $0x30] sm:$0xf]  ;;  %v983_v40 = vor.u32 %v1053_v33, %v982_v32  ;;  %v911_v42 = vor.u32 %v1035_v30, %v910_v29 }
  0x20   : > { %625 = vmatpush.bf16.msra.mxu3 %v875_v31  ;;  %v867_v36 = vor.u32 %v1022_v34, %v864_v35  ;;  %v1017_v39 = vld [vmem:[%s1158_s25 + $0x34] sm:$0xf0]  ;;  %v974_v41 = vld [vmem:[%s1158_s25 + $0x140] sm:$0xf]  ;;  %v1051_v43 = vld [vmem:[%s1158_s25 + $0x144] sm:$0xf0] }
  0x21   : > { %v1020_v44 = vld [vmem:[%s1158_s25 + $0x54] sm:$0xf]  ;;  %v856_v45 = vld [vmem:[%s1158_s25 + $0x58] sm:$0xf0]  ;;  %v902_v46 = vld [vmem:[%s1158_s25 + $0xb0] sm:$0xf]  ;;  %v839_v49 = vor.u32 %v1017_v39, %v838_v38  ;;  %v975_v51 = vor.u32 %v1051_v43, %v974_v41 }
  0x22   : > { %588 = vmatpush.bf16.msra.mxu0 %v855_v23  ;;  %613 = vmatpush.bf16.msra.mxu2 %v991_v26  ;;  %v1033_v47 = vld [vmem:[%s1158_s25 + $0xb4] sm:$0xf0]  ;;  %v859_v48 = vor.u32 %v1020_v44, %v856_v45  ;;  %v830_v50 = vld [vmem:[%s1158_s25 + $0x20] sm:$0xf]  ;;  %v1018_v52 = vld [vmem:[%s1158_s25 + $0x44] sm:$0xf] }
  0x23   : > { %601 = vmatpush.bf16.msra.mxu1 %v919_v28  ;;  %v848_v53 = vld [vmem:[%s1158_s25 + $0x48] sm:$0xf0]  ;;  %v903_v54 = vor.u32 %v1033_v47, %v902_v46  ;;  %v1015_v55 = vld [vmem:[%s1158_s25 + $0x24] sm:$0xf0]  ;;  %v966_v56 = vld [vmem:[%s1158_s25 + $0x130] sm:$0xf] }
  0x24   : > { %626 = vmatpush.bf16.msra.mxu3 %v867_v36  ;;  %v1049_v57 = vld [vmem:[%s1158_s25 + $0x134] sm:$0xf0]  ;;  %v894_v58 = vld [vmem:[%s1158_s25 + $0xa0] sm:$0xf]  ;;  %v1031_v59 = vld [vmem:[%s1158_s25 + $0xa4] sm:$0xf0]  ;;  %v851_v60 = vor.u32 %v1018_v52, %v848_v53  ;;  %v831_v61 = vor.u32 %v1015_v55, %v830_v50 }
  0x25   : > { %v822_v62 = vld [vmem:[%s1158_s25 + $0x10] sm:$0xf]  ;;  %v967_v63 = vor.u32 %v1049_v57, %v966_v56  ;;  %v1016_v0 = vld [vmem:[%s1158_s25 + $0x34] sm:$0xf]  ;;  %v840_v1 = vld [vmem:[%s1158_s25 + $0x38] sm:$0xf0]  ;;  %v895_v2 = vor.u32 %v1031_v59, %v894_v58 }
  0x26   : > { %589 = vmatpush.bf16.msra.mxu0 %v847_v37  ;;  %614 = vmatpush.bf16.msra.mxu2 %v983_v40  ;;  %v1013_v3 = vld [vmem:[%s1158_s25 + $0x14] sm:$0xf0]  ;;  %v958_v4 = vld [vmem:[%s1158_s25 + $0x120] sm:$0xf]  ;;  %v1047_v5 = vld [vmem:[%s1158_s25 + $0x124] sm:$0xf0]  ;;  %v843_v10 = vor.u32 %v1016_v0, %v840_v1 }
  0x27   : > { %602 = vmatpush.bf16.msra.mxu1 %v911_v42  ;;  %v886_v6 = vld [vmem:[%s1158_s25 + $0x90] sm:$0xf]  ;;  %v1029_v7 = vld [vmem:[%s1158_s25 + $0x94] sm:$0xf0]  ;;  %v814_v8 = vld [vmem:[%s1158_s25] sm:$0xf]  ;;  %v823_v11 = vor.u32 %v1013_v3, %v822_v62  ;;  %v959_v12 = vor.u32 %v1047_v5, %v958_v4 }
  0x28   : > { %627 = vmatpush.bf16.msra.mxu3 %v859_v48  ;;  %v1011_v9 = vld [vmem:[%s1158_s25 + $0x4] sm:$0xf0]  ;;  %v1014_v13 = vld [vmem:[%s1158_s25 + $0x24] sm:$0xf]  ;;  %v832_v14 = vld [vmem:[%s1158_s25 + $0x28] sm:$0xf0]  ;;  %v887_v16 = vor.u32 %v1029_v7, %v886_v6 }
  0x29   : > { %v285_v15 = vld [vmem:[%s1153_s21] sm:$0xff]  ;;  %v950_v18 = vld [vmem:[%s1158_s25 + $0x110] sm:$0xf]  ;;  %v1045_v19 = vld [vmem:[%s1158_s25 + $0x114] sm:$0xf0]  ;;  %v835_v25 = vor.u32 %v1014_v13, %v832_v14  ;;  %v815_v27 = vor.u32 %v1011_v9, %v814_v8  ;;  %p1004_p7 = scmp.ne.s32.totalorder %s1097_s12, 2 }
  0x2a   : > { %590 = vmatpush.bf16.msra.mxu0 %v839_v49  ;;  %615 = vmatpush.bf16.msra.mxu2 %v975_v51  ;;  %v878_v17 = vld [vmem:[%s1158_s25 + $0x80] sm:$0xf]  ;;  %v1027_v20 = vld [vmem:[%s1158_s25 + $0x84] sm:$0xf0]  ;;  %v1040_v21 = vld [vmem:[%s1158_s25 + $0xf4] sm:$0xf]  ;;  %v337_v26 = vunpack.c.l.b16 %v285_v15  ;;  %v951_v28 = vor.u32 %v1045_v19, %v950_v18  ;;  %v338_v29 = vunpack.c.h.b16 %v285_v15 }
  0x2b   : > { %603 = vmatpush.bf16.msra.mxu1 %v903_v54  ;;  %v936_v22 = vld [vmem:[%s1158_s25 + $0xf8] sm:$0xf0]  ;;  %v1056_v23 = vld [vmem:[%s1158_s25 + $0x174] sm:$0xf]  ;;  %v286_v32 = vld [vmem:[%s1153_s21 + $0x8] sm:$0xf]  ;;  %v879_v33 = vor.u32 %v1027_v20, %v878_v17 }
  0x2c   : > { %628 = vmatpush.bf16.msra.mxu3 %v851_v60  ;;  %v1000_v24 = vld [vmem:[%s1158_s25 + $0x178] sm:$0xf0]  ;;  %v1012_v30 = vld [vmem:[%s1158_s25 + $0x14] sm:$0xf]  ;;  %v939_v34 = vor.u32 %v1040_v21, %v936_v22  ;;  %v942_v35 = vld [vmem:[%s1158_s25 + $0x100] sm:$0xf]  ;;  %v340_v42 = vpack.c.b16 %v337_v26, %v337_v26  ;;  %v339_v44 = vunpack.c.l.b16 %v286_v32  ;;  %v1233_v45 = vpack.c.b16 %v338_v29, %v338_v29 }
  0x2d   : > { %v824_v31 = vld [vmem:[%s1158_s25 + $0x18] sm:$0xf0]  ;;  %v1043_v36 = vld [vmem:[%s1158_s25 + $0x104] sm:$0xf0]  ;;  %v1003_v37 = vor.u32 %v1056_v23, %v1000_v24  ;;  %v1038_v38 = vld [vmem:[%s1158_s25 + $0xe4] sm:$0xf] }
  0x2e   : > { %591 = vmatpush.bf16.msra.mxu0 %v831_v61  ;;  %616 = vmatpush.bf16.msra.mxu2 %v967_v63  ;;  %v928_v39 = vld [vmem:[%s1158_s25 + $0xe8] sm:$0xf0]  ;;  %v1054_v40 = vld [vmem:[%s1158_s25 + $0x164] sm:$0xf]  ;;  %v827_v43 = vor.u32 %v1012_v30, %v824_v31  ;;  %v943_v46 = vor.u32 %v1043_v36, %v942_v35  ;;  %v1036_v51 = vld [vmem:[%s1158_s25 + $0xd4] sm:$0xf]  ;;  %v342_v55 = vpack.c.b16 %v339_v44, %v339_v44 }
  0x2f   : > { %604 = vmatpush.bf16.msra.mxu1 %v895_v2  ;;  %v992_v41 = vld [vmem:[%s1158_s25 + $0x168] sm:$0xf0]  ;;  %v1010_v47 = vld [vmem:[%s1158_s25 + $0x4] sm:$0xf]  ;;  %v931_v49 = vor.u32 %v1038_v38, %v928_v39  ;;  %v920_v52 = vld [vmem:[%s1158_s25 + $0xd8] sm:$0xf0] }
  0x30   : > { %629 = vmatpush.bf16.msra.mxu3 %v843_v10  ;;  %v816_v48 = vld [vmem:[%s1158_s25 + $0x8] sm:$0xf0]  ;;  %v995_v50 = vor.u32 %v1054_v40, %v992_v41  ;;  %v1052_v53 = vld [vmem:[%s1158_s25 + $0x154] sm:$0xf]  ;;  %v984_v54 = vld [vmem:[%s1158_s25 + $0x158] sm:$0xf0]  ;;  %v923_v57 = vor.u32 %v1036_v51, %v920_v52 }
  0x31   : > { %v819_v56 = vor.u32 %v1010_v47, %v816_v48  ;;  %v987_v58 = vor.u32 %v1052_v53, %v984_v54  ;;  %v1034_v59 = vld [vmem:[%s1158_s25 + $0xc4] sm:$0xf]  ;;  %v912_v60 = vld [vmem:[%s1158_s25 + $0xc8] sm:$0xf0]  ;;  %v1032_v1 = vld [vmem:[%s1158_s25 + $0xb4] sm:$0xf] }
  0x32   : > { %592 = vmatpush.bf16.msra.mxu0 %v823_v11  ;;  %617 = vmatpush.bf16.msra.mxu2 %v959_v12  ;;  %v1050_v61 = vld [vmem:[%s1158_s25 + $0x144] sm:$0xf]  ;;  %v976_v62 = vld [vmem:[%s1158_s25 + $0x148] sm:$0xf0]  ;;  %v915_v63 = vor.u32 %v1034_v59, %v912_v60  ;;  %v904_v2 = vld [vmem:[%s1158_s25 + $0xb8] sm:$0xf0] }
  0x33   : > { %605 = vmatpush.bf16.msra.mxu1 %v887_v16  ;;  %v979_v0 = vor.u32 %v1050_v61, %v976_v62  ;;  %v1048_v3 = vld [vmem:[%s1158_s25 + $0x134] sm:$0xf]  ;;  %v968_v4 = vld [vmem:[%s1158_s25 + $0x138] sm:$0xf0]  ;;  %v907_v5 = vor.u32 %v1032_v1, %v904_v2  ;;  %v1030_v7 = vld [vmem:[%s1158_s25 + $0xa4] sm:$0xf] }
  0x34   : > { %630 = vmatpush.bf16.msra.mxu3 %v835_v25  ;;  %v971_v6 = vor.u32 %v1048_v3, %v968_v4  ;;  %v896_v8 = vld [vmem:[%s1158_s25 + $0xa8] sm:$0xf0]  ;;  %v1046_v9 = vld [vmem:[%s1158_s25 + $0x124] sm:$0xf]  ;;  %v1028_v13 = vld [vmem:[%s1158_s25 + $0x94] sm:$0xf] }
  0x35   : > { %v960_v10 = vld [vmem:[%s1158_s25 + $0x128] sm:$0xf0]  ;;  %v899_v11 = vor.u32 %v1030_v7, %v896_v8  ;;  %v888_v14 = vld [vmem:[%s1158_s25 + $0x98] sm:$0xf0]  ;;  %v1044_v15 = vld [vmem:[%s1158_s25 + $0x114] sm:$0xf] }
  0x36   : > { %593 = vmatpush.bf16.msra.mxu0 %v815_v27  ;;  %618 = vmatpush.bf16.msra.mxu2 %v951_v28  ;;  %v963_v12 = vor.u32 %v1046_v9, %v960_v10  ;;  %v952_v16 = vld [vmem:[%s1158_s25 + $0x118] sm:$0xf0]  ;;  %v891_v17 = vor.u32 %v1028_v13, %v888_v14  ;;  %v1026_v19 = vld [vmem:[%s1158_s25 + $0x84] sm:$0xf]  ;;  %v880_v20 = vld [vmem:[%s1158_s25 + $0x88] sm:$0xf0] }
  0x37   : > { %606 = vmatpush.bf16.msra.mxu1 %v879_v33  ;;  %v955_v18 = vor.u32 %v1044_v15, %v952_v16  ;;  %v1042_v21 = vld [vmem:[%s1158_s25 + $0x104] sm:$0xf]  ;;  %v944_v22 = vld [vmem:[%s1158_s25 + $0x108] sm:$0xf0]  ;;  %v883_v23 = vor.u32 %v1026_v19, %v880_v20 }
  0x38   : > { %631 = vmatpush.bf16.msra.mxu3 %v827_v43  ;;  %v947_v24 = vor.u32 %v1042_v21, %v944_v22  ;;  %v283_v30 = vld [vmem:[#allocation2] sm:$0xff]  ;;  %v284_v40 = vld [vmem:[#allocation2 + $0x8] sm:$0xff] }
  0x39   : > { %594 = vmatmul.bf16.vlgmr.msra.gmra.mxu0 %v340_v42 }
  0x3a   : > { %638 = vmatpush.bf16.msrb.mxu0 %v939_v34  ;;  %607 = vmatmul.bf16.vlgmr.msra.gmra.mxu1 %v1233_v45 }
  0x3b   : > { %651 = vmatpush.bf16.msrb.mxu1 %v1003_v37  ;;  %619 = vmatpush.bf16.msra.mxu2 %v943_v46 }
  0x3c   : > { %632 = vmatpush.bf16.msra.mxu3 %v819_v56 }
  0x3e   : > { %639 = vmatpush.bf16.msrb.mxu0 %v931_v49  ;;  %620 = vmatmul.bf16.vlgmr.msra.gmra.mxu2 %v342_v55 }
  0x3f   : > { %652 = vmatpush.bf16.msrb.mxu1 %v995_v50  ;;  %633 = vmatmul.bf16.vlgmr.msra.gmra.mxu3 %v340_v42 }
  0x42   : > { %640 = vmatpush.bf16.msrb.mxu0 %v923_v57 }
  0x43   : > { %653 = vmatpush.bf16.msrb.mxu1 %v987_v58 }
  0x46   : > { %641 = vmatpush.bf16.msrb.mxu0 %v915_v63 }
  0x47   : > { %654 = vmatpush.bf16.msrb.mxu1 %v979_v0 }
  0x4a   : > { %642 = vmatpush.bf16.msrb.mxu0 %v907_v5 }
  0x4b   : > { %655 = vmatpush.bf16.msrb.mxu1 %v971_v6 }
  0x4e   : > { %643 = vmatpush.bf16.msrb.mxu0 %v899_v11 }
  0x4f   : > { %656 = vmatpush.bf16.msrb.mxu1 %v963_v12 }
  0x52   : > { %644 = vmatpush.bf16.msrb.mxu0 %v891_v17 }
  0x53   : > { %657 = vmatpush.bf16.msrb.mxu1 %v955_v18 }
  0x56   : > { %645 = vmatpush.bf16.msrb.mxu0 %v883_v23 }
  0x57   : > { %658 = vmatpush.bf16.msrb.mxu1 %v947_v24 }
  0x59   : > { %646 = vmatmul.bf16.vlgmr.msrb.gmra.mxu0 %v1233_v45 }
  0x5a   : > { %659 = vmatmul.bf16.vlgmr.msrb.gmra.mxu1 %v342_v55 }
  0xb6   : > { %v595_v25 = vpop.f32.mrf.mxu0 }
  0xb7   : > { %v608_v26 = vpop.f32.mrf.mxu1 }
  0xb8   : > { %v609_v27 = vadd.f32 %v608_v26, %v595_v25 }
  0xbe   : > { %v597_v28 = vpop.f32.mrf.mxu0 }
  0xbf   : > { %v610_v29 = vpop.f32.mrf.mxu1 }
  0xc1   : > { %v621_v31 = vpop.f32.mrf.mxu2 }
  0xc2   : > { %v622_v32 = vadd.f32 %v621_v31, %v609_v27  ;;  %v634_v34 = vpop.f32.mrf.mxu3 }
  0xc4   : > { %v664_v33 = vadd.f32 %v622_v32, %v283_v30 }
  0xc6   : > { %666 = vst [vmem:[#allocation2] sm:$0xff] %v664_v33 }
  0xc9   : > { %v623_v35 = vpop.f32.mrf.mxu2 }
  0xca   : > { %v636_v36 = vpop.f32.mrf.mxu3 }
  0xd6   : > { %v647_v37 = vpop.f32.mrf.mxu0 }
  0xd7   : > { %v648_v38 = vadd.f32 %v647_v37, %v634_v34  ;;  %v660_v39 = vpop.f32.mrf.mxu1 }
  0xd9   : > { %v661_v41 = vadd.f32 %v660_v39, %v648_v38 }
  0xdb   : > { %v665_v42 = vadd.f32 %v661_v41, %v284_v40  ;;  %671 = sbr.rel (%p1004_p7) target bundleno = 236 (0xec), region = 40 }
  0xdd   : > { %667 = vst [vmem:[#allocation2 + $0x8] sm:$0xff] %v665_v42 }
  0xde   : > { %v649_v43 = vpop.f32.mrf.mxu0 }
  0xdf   : > { %v662_v44 = vpop.f32.mrf.mxu1 }
  0xe0   : > { %v672_v45 = vld [vmem:[#allocation2] sm:$0xff] }
  0xe1   : > { %v674_v47 = vld [vmem:[%s1281_s2] sm:$0x3] }
  0xe2   : > { %v676_v48 = vperm.slane %v674_v47, 0  ;;  %v677_v49 = vperm.slane %v674_v47, 1 }
  0xe4   : > { %v673_v46 = vld [vmem:[#allocation2 + $0x8] sm:$0xff]  ;;  %v680_v50 = vadd.f32 %v676_v48, %v672_v45 }
  0xe5   : > { %v681_v51 = vadd.f32 %v677_v49, %v673_v46 }
  0xe6   : > { %v682_v52 = vmax.f32 %v680_v50, 0.0 }
  0xe7   : > { %v683_v53 = vmax.f32 %v681_v51, 0.0 }
  0xe9   : > { %v684_v54 = vpack.c.bf16 %v683_v53, %v682_v52 }
  0xeb   : > { %685 = vst [vmem:[%s1282_s3] sm:$0xff] %v684_v54 }
  0xec PF: > { %s13_s14 = sadd.s32 1, %s1105_s14   ;;  %s1283_s12 = smov %s1101_s13 }
  0xed   : > { %p10_p8 = scmp.ge.s32.totalorder %s13_s14, 5   ;;  %s1284_s13 = smov %s1286_s15 }
  0xef   :  { %12 = sbr.rel (!%p10_p8) target bundleno = 2 (0x2), region = 76 }

// kernel: resnet_forward.34
= control target key start
LH: loop header
LB: loop body
LE: loop exit
PB: predicated region body
PF: predicated region fallthrough
CT: control target
= control target key end

     0   :  { %s373_s1 = inlined_call_operand.vmem [shape: bf16[128,256], index: 1, kind: input, shape index: {}]   ;;  %s374_s0 = inlined_call_operand.vmem [shape: bf16[8,128], index: 0, kind: input, shape index: {}]   ;;  %s375_s2 = inlined_call_operand.vmem [shape: f32[1,256], index: 2, kind: input, shape index: {}]   ;;  %s376_s3 = inlined_call_operand.vmem [shape: bf16[8,256], index: 3, kind: output, shape index: {}]  }
   0x1   :  { %v226_v0 = vld [vmem:[%s373_s1 + $0x70] sm:$0xf]  ;;  %v247_v1 = vld [vmem:[%s373_s1 + $0x74] sm:$0xf0]  ;;  %v246_v2 = vld [vmem:[%s373_s1 + $0x74] sm:$0xf] }
   0x2   :  { %v227_v3 = vor.u32 %v247_v1, %v226_v0  ;;  %v228_v4 = vld [vmem:[%s373_s1 + $0x78] sm:$0xf0]  ;;  %v218_v5 = vld [vmem:[%s373_s1 + $0x60] sm:$0xf]  ;;  %v245_v6 = vld [vmem:[%s373_s1 + $0x64] sm:$0xf0] }
   0x3   :  { %v231_v7 = vor.u32 %v246_v2, %v228_v4  ;;  %v244_v8 = vld [vmem:[%s373_s1 + $0x64] sm:$0xf]  ;;  %v220_v9 = vld [vmem:[%s373_s1 + $0x68] sm:$0xf0]  ;;  %v219_v10 = vor.u32 %v245_v6, %v218_v5  ;;  %v210_v12 = vld [vmem:[%s373_s1 + $0x50] sm:$0xf] }
   0x4   :  { %119 = vmatpush.bf16.msra.mxu0 %v227_v3  ;;  %v223_v11 = vor.u32 %v244_v8, %v220_v9  ;;  %v243_v13 = vld [vmem:[%s373_s1 + $0x54] sm:$0xf0]  ;;  %v242_v14 = vld [vmem:[%s373_s1 + $0x54] sm:$0xf]  ;;  %v212_v15 = vld [vmem:[%s373_s1 + $0x58] sm:$0xf0] }
   0x5   :  { %132 = vmatpush.bf16.msra.mxu1 %v231_v7  ;;  %v211_v16 = vor.u32 %v243_v13, %v210_v12  ;;  %v215_v17 = vor.u32 %v242_v14, %v212_v15  ;;  %v202_v18 = vld [vmem:[%s373_s1 + $0x40] sm:$0xf]  ;;  %v241_v19 = vld [vmem:[%s373_s1 + $0x44] sm:$0xf0]  ;;  %v240_v20 = vld [vmem:[%s373_s1 + $0x44] sm:$0xf] }
   0x6   :  { %v204_v21 = vld [vmem:[%s373_s1 + $0x48] sm:$0xf0]  ;;  %v203_v22 = vor.u32 %v241_v19, %v202_v18  ;;  %v194_v24 = vld [vmem:[%s373_s1 + $0x30] sm:$0xf]  ;;  %v239_v25 = vld [vmem:[%s373_s1 + $0x34] sm:$0xf0] }
   0x7   :  { %v207_v23 = vor.u32 %v240_v20, %v204_v21  ;;  %v238_v26 = vld [vmem:[%s373_s1 + $0x34] sm:$0xf]  ;;  %v196_v27 = vld [vmem:[%s373_s1 + $0x38] sm:$0xf0]  ;;  %v195_v28 = vor.u32 %v239_v25, %v194_v24  ;;  %v186_v30 = vld [vmem:[%s373_s1 + $0x20] sm:$0xf] }
   0x8   :  { %120 = vmatpush.bf16.msra.mxu0 %v219_v10  ;;  %v199_v29 = vor.u32 %v238_v26, %v196_v27  ;;  %v237_v31 = vld [vmem:[%s373_s1 + $0x24] sm:$0xf0]  ;;  %v236_v32 = vld [vmem:[%s373_s1 + $0x24] sm:$0xf]  ;;  %v188_v33 = vld [vmem:[%s373_s1 + $0x28] sm:$0xf0] }
   0x9   :  { %133 = vmatpush.bf16.msra.mxu1 %v223_v11  ;;  %v187_v34 = vor.u32 %v237_v31, %v186_v30  ;;  %v191_v35 = vor.u32 %v236_v32, %v188_v33  ;;  %v178_v36 = vld [vmem:[%s373_s1 + $0x10] sm:$0xf]  ;;  %v235_v37 = vld [vmem:[%s373_s1 + $0x14] sm:$0xf0]  ;;  %v234_v38 = vld [vmem:[%s373_s1 + $0x14] sm:$0xf] }
   0xa   :  { %v180_v39 = vld [vmem:[%s373_s1 + $0x18] sm:$0xf0]  ;;  %v179_v40 = vor.u32 %v235_v37, %v178_v36  ;;  %v170_v42 = vld [vmem:[%s373_s1] sm:$0xf]  ;;  %v233_v43 = vld [vmem:[%s373_s1 + $0x4] sm:$0xf0] }
   0xb   :  { %v183_v41 = vor.u32 %v234_v38, %v180_v39  ;;  %v232_v44 = vld [vmem:[%s373_s1 + $0x4] sm:$0xf]  ;;  %v172_v45 = vld [vmem:[%s373_s1 + $0x8] sm:$0xf0]  ;;  %v171_v46 = vor.u32 %v233_v43, %v170_v42  ;;  %v22_v48 = vld [vmem:[%s374_s0] sm:$0xf] }
   0xc   :  { %121 = vmatpush.bf16.msra.mxu0 %v211_v16  ;;  %v175_v47 = vor.u32 %v232_v44, %v172_v45  ;;  %v154_v49 = vld [vmem:[%s375_s2] sm:$0x3] }
   0xd   :  { %134 = vmatpush.bf16.msra.mxu1 %v215_v17  ;;  %v156_v50 = vperm.slane %v154_v49, 0  ;;  %v157_v51 = vperm.slane %v154_v49, 1 }
  0x10   :  { %122 = vmatpush.bf16.msra.mxu0 %v203_v22 }
  0x11   :  { %135 = vmatpush.bf16.msra.mxu1 %v207_v23 }
  0x14   :  { %123 = vmatpush.bf16.msra.mxu0 %v195_v28 }
  0x15   :  { %136 = vmatpush.bf16.msra.mxu1 %v199_v29 }
  0x18   :  { %124 = vmatpush.bf16.msra.mxu0 %v187_v34 }
  0x19   :  { %137 = vmatpush.bf16.msra.mxu1 %v191_v35 }
  0x1c   :  { %125 = vmatpush.bf16.msra.mxu0 %v179_v40 }
  0x1d   :  { %138 = vmatpush.bf16.msra.mxu1 %v183_v41 }
  0x20   :  { %126 = vmatpush.bf16.msra.mxu0 %v171_v46 }
  0x21   :  { %139 = vmatpush.bf16.msra.mxu1 %v175_v47 }
  0x23   :  { %127 = vmatmul.bf16.vlgmr.msra.gmra.mxu0 %v22_v48 }
  0x24   :  { %140 = vmatmul.bf16.vlgmr.msra.gmra.mxu1 %v22_v48 }
  0xa0   :  { %v128_v52 = vpop.f32.mrf.mxu0 }
  0xa1   :  { %v160_v53 = vadd.f32 %v156_v50, %v128_v52  ;;  %v141_v54 = vpop.f32.mrf.mxu1 }
  0xa2   :  { %v161_v55 = vadd.f32 %v157_v51, %v141_v54 }
  0xa4   :  { %v162_v56 = vpack.c.bf16 %v161_v55, %v160_v53 }
  0xa6   :  { %163 = vst [vmem:[%s376_s3] sm:$0xff] %v162_v56 }
  0xa8   :  { %v130_v57 = vpop.f32.mrf.mxu0 }
  0xa9   :  { %v143_v58 = vpop.f32.mrf.mxu1 }

// kernel: resnet_forward.35
= control target key start
LH: loop header
LB: loop body
LE: loop exit
PB: predicated region body
PF: predicated region fallthrough
CT: control target
= control target key end

     0   :  { %s1223_s15 = smov 0   ;;  %s1225_s16 = smov 0   ;;  %s1377_s0 = inlined_call_operand.vmem [shape: bf16[8,2304], index: 0, kind: input, shape index: {}]   ;;  %s1378_s1 = inlined_call_operand.vmem [shape: bf16[2304,256], index: 1, kind: input, shape index: {}]   ;;  %s1379_s2 = inlined_call_operand.vmem [shape: f32[1,256], index: 2, kind: input, shape index: {}]   ;;  %s1380_s3 = inlined_call_operand.vmem [shape: bf16[8,256], index: 3, kind: input, shape index: {}]   ;;  %s1381_s4 = inlined_call_operand.vmem [shape: bf16[8,256], index: 4, kind: output, shape index: {}]  }
   0x1   :  { %s1227_s17 = smov 0  }
   0x2 LB: > { %s26_s18 = sadd.s32 1, %s1191_s16  ;;  %p897_p0 = scmp.ge.s32.totalorder %s1195_s17, 1  ;;  %s1195_s17 = sphi %s1227_s17, %s14_s17   ;;  %s1191_s16 = sphi %s1225_s16, %s1383_s16   ;;  %s1187_s15 = sphi %s1223_s15, %s1382_s15  }
   0x3   : > { %p27_p1 = scmp.ge.s32.totalorder %s26_s18, 6  ;;  %p236_p2 = scmp.lt.s32.totalorder %s1195_s17, 7 }
   0x5   : > { %s1385_s18 = smov (%p27_p1, %s26_s18), 0  ;;  %p237_p3 = pnand %p897_p0, %p236_p2 }
   0x6   : > { %s293_s19 = smul.u32 (!%p237_p3), 3, %s1187_s15  ;;  %p901_p6 = scmp.ne.s32.totalorder (!%p237_p3), %s1187_s15, 0 }
   0x7   : > { %240 = sbr.rel (%p237_p3) target bundleno = 238 (0xee), region = 36 }
   0x8   : > { %s303_s20 = smul.u32 (!%p237_p3), 48, %s1187_s15  ;;  %p296_p4 = scmp.lt.s32.totalorder (!%p237_p3), %s293_s19, 17 }
   0xa   : > { %p305_p5 = scmp.lt.s32.totalorder (!%p237_p3), %s303_s20, 287 }
   0xc   : > { %s1387_s19 = smov (!%p296_p4, %s293_s19), 17  ;;  %s1389_s20 = smov (!%p305_p5, %s303_s20), 287 }
   0xd   : > { %s898_s21 = sshll.u32 %s1387_s19, 2  ;;  %s1099_s25 = sshll.u32 %s1389_s20, 3 }
   0xe   : > { %s1248_s24 = scalar_lea.vmem %s1377_s0, %s898_s21  ;;  %s1253_s28 = scalar_lea.vmem %s1378_s1, %s1099_s25 }
   0xf   : > { %343 = sbr.rel (%p901_p6) target bundleno = 23 (0x17), region = 40 }
  0x14   : > { %v1197_v0 = vmov 0.0  }
  0x15   : > { %344 = vst [vmem:[#allocation2] sm:$0xff] %v1197_v0 }
  0x16   : > { %345 = vst [vmem:[#allocation2 + $0x8] sm:$0xff] %v1197_v0 }
  0x17 PF: > { %v960_v1 = vld [vmem:[%s1253_s28 + $0x70] sm:$0xf]  ;;  %v1115_v2 = vld [vmem:[%s1253_s28 + $0x74] sm:$0xf0]  ;;  %v952_v6 = vld [vmem:[%s1253_s28 + $0x60] sm:$0xf] }
  0x18   : > { %v1024_v3 = vld [vmem:[%s1253_s28 + $0xf0] sm:$0xf]  ;;  %v961_v4 = vor.u32 %v1115_v2, %v960_v1  ;;  %v1131_v5 = vld [vmem:[%s1253_s28 + $0xf4] sm:$0xf0]  ;;  %v1113_v7 = vld [vmem:[%s1253_s28 + $0x64] sm:$0xf0] }
  0x19   : > { %v1025_v8 = vor.u32 %v1131_v5, %v1024_v3  ;;  %v1016_v9 = vld [vmem:[%s1253_s28 + $0xe0] sm:$0xf]  ;;  %v1129_v10 = vld [vmem:[%s1253_s28 + $0xe4] sm:$0xf0]  ;;  %v953_v11 = vor.u32 %v1113_v7, %v952_v6  ;;  %v944_v12 = vld [vmem:[%s1253_s28 + $0x50] sm:$0xf] }
  0x1a   : > { %649 = vmatpush.bf16.msra.mxu0 %v961_v4  ;;  %v1017_v13 = vor.u32 %v1129_v10, %v1016_v9  ;;  %v1111_v14 = vld [vmem:[%s1253_s28 + $0x54] sm:$0xf0]  ;;  %v1088_v15 = vld [vmem:[%s1253_s28 + $0x170] sm:$0xf]  ;;  %v1080_v20 = vld [vmem:[%s1253_s28 + $0x160] sm:$0xf] }
  0x1b   : > { %662 = vmatpush.bf16.msra.mxu1 %v1025_v8  ;;  %v1147_v16 = vld [vmem:[%s1253_s28 + $0x174] sm:$0xf0]  ;;  %v1008_v17 = vld [vmem:[%s1253_s28 + $0xd0] sm:$0xf]  ;;  %v1145_v21 = vld [vmem:[%s1253_s28 + $0x164] sm:$0xf0]  ;;  %v945_v23 = vor.u32 %v1111_v14, %v944_v12 }
  0x1c   : > { %v1127_v18 = vld [vmem:[%s1253_s28 + $0xd4] sm:$0xf0]  ;;  %v1089_v19 = vor.u32 %v1147_v16, %v1088_v15  ;;  %v1114_v22 = vld [vmem:[%s1253_s28 + $0x74] sm:$0xf]  ;;  %v936_v24 = vld [vmem:[%s1253_s28 + $0x40] sm:$0xf]  ;;  %v1081_v26 = vor.u32 %v1145_v21, %v1080_v20 }
  0x1d   : > { %v1109_v25 = vld [vmem:[%s1253_s28 + $0x44] sm:$0xf0]  ;;  %v962_v27 = vld [vmem:[%s1253_s28 + $0x78] sm:$0xf0]  ;;  %v1009_v28 = vor.u32 %v1127_v18, %v1008_v17  ;;  %v1000_v29 = vld [vmem:[%s1253_s28 + $0xc0] sm:$0xf] }
  0x1e   : > { %650 = vmatpush.bf16.msra.mxu0 %v953_v11  ;;  %675 = vmatpush.bf16.msra.mxu2 %v1089_v19  ;;  %v1125_v30 = vld [vmem:[%s1253_s28 + $0xc4] sm:$0xf0]  ;;  %v965_v31 = vor.u32 %v1114_v22, %v962_v27  ;;  %v1072_v32 = vld [vmem:[%s1253_s28 + $0x150] sm:$0xf]  ;;  %v1143_v33 = vld [vmem:[%s1253_s28 + $0x154] sm:$0xf0]  ;;  %v937_v37 = vor.u32 %v1109_v25, %v936_v24 }
  0x1f   : > { %663 = vmatpush.bf16.msra.mxu1 %v1017_v13  ;;  %v1112_v34 = vld [vmem:[%s1253_s28 + $0x64] sm:$0xf]  ;;  %v954_v35 = vld [vmem:[%s1253_s28 + $0x68] sm:$0xf0]  ;;  %v928_v38 = vld [vmem:[%s1253_s28 + $0x30] sm:$0xf]  ;;  %v1073_v40 = vor.u32 %v1143_v33, %v1072_v32  ;;  %v1001_v42 = vor.u32 %v1125_v30, %v1000_v29 }
  0x20   : > { %688 = vmatpush.bf16.msra.mxu3 %v965_v31  ;;  %v957_v36 = vor.u32 %v1112_v34, %v954_v35  ;;  %v1107_v39 = vld [vmem:[%s1253_s28 + $0x34] sm:$0xf0]  ;;  %v1064_v41 = vld [vmem:[%s1253_s28 + $0x140] sm:$0xf]  ;;  %v1141_v43 = vld [vmem:[%s1253_s28 + $0x144] sm:$0xf0] }
  0x21   : > { %v1110_v44 = vld [vmem:[%s1253_s28 + $0x54] sm:$0xf]  ;;  %v946_v45 = vld [vmem:[%s1253_s28 + $0x58] sm:$0xf0]  ;;  %v992_v46 = vld [vmem:[%s1253_s28 + $0xb0] sm:$0xf]  ;;  %v929_v49 = vor.u32 %v1107_v39, %v928_v38  ;;  %v1065_v51 = vor.u32 %v1141_v43, %v1064_v41 }
  0x22   : > { %651 = vmatpush.bf16.msra.mxu0 %v945_v23  ;;  %676 = vmatpush.bf16.msra.mxu2 %v1081_v26  ;;  %v1123_v47 = vld [vmem:[%s1253_s28 + $0xb4] sm:$0xf0]  ;;  %v949_v48 = vor.u32 %v1110_v44, %v946_v45  ;;  %v920_v50 = vld [vmem:[%s1253_s28 + $0x20] sm:$0xf]  ;;  %v1108_v52 = vld [vmem:[%s1253_s28 + $0x44] sm:$0xf] }
  0x23   : > { %664 = vmatpush.bf16.msra.mxu1 %v1009_v28  ;;  %v938_v53 = vld [vmem:[%s1253_s28 + $0x48] sm:$0xf0]  ;;  %v993_v54 = vor.u32 %v1123_v47, %v992_v46  ;;  %v1105_v55 = vld [vmem:[%s1253_s28 + $0x24] sm:$0xf0]  ;;  %v1056_v56 = vld [vmem:[%s1253_s28 + $0x130] sm:$0xf] }
  0x24   : > { %689 = vmatpush.bf16.msra.mxu3 %v957_v36  ;;  %v1139_v57 = vld [vmem:[%s1253_s28 + $0x134] sm:$0xf0]  ;;  %v984_v58 = vld [vmem:[%s1253_s28 + $0xa0] sm:$0xf]  ;;  %v1121_v59 = vld [vmem:[%s1253_s28 + $0xa4] sm:$0xf0]  ;;  %v941_v60 = vor.u32 %v1108_v52, %v938_v53  ;;  %v921_v61 = vor.u32 %v1105_v55, %v920_v50 }
  0x25   : > { %v912_v62 = vld [vmem:[%s1253_s28 + $0x10] sm:$0xf]  ;;  %v1057_v63 = vor.u32 %v1139_v57, %v1056_v56  ;;  %v1106_v0 = vld [vmem:[%s1253_s28 + $0x34] sm:$0xf]  ;;  %v930_v1 = vld [vmem:[%s1253_s28 + $0x38] sm:$0xf0]  ;;  %v985_v2 = vor.u32 %v1121_v59, %v984_v58 }
  0x26   : > { %652 = vmatpush.bf16.msra.mxu0 %v937_v37  ;;  %677 = vmatpush.bf16.msra.mxu2 %v1073_v40  ;;  %v1103_v3 = vld [vmem:[%s1253_s28 + $0x14] sm:$0xf0]  ;;  %v1048_v4 = vld [vmem:[%s1253_s28 + $0x120] sm:$0xf]  ;;  %v1137_v5 = vld [vmem:[%s1253_s28 + $0x124] sm:$0xf0]  ;;  %v933_v10 = vor.u32 %v1106_v0, %v930_v1 }
  0x27   : > { %665 = vmatpush.bf16.msra.mxu1 %v1001_v42  ;;  %v976_v6 = vld [vmem:[%s1253_s28 + $0x90] sm:$0xf]  ;;  %v1119_v7 = vld [vmem:[%s1253_s28 + $0x94] sm:$0xf0]  ;;  %v904_v8 = vld [vmem:[%s1253_s28] sm:$0xf]  ;;  %v913_v11 = vor.u32 %v1103_v3, %v912_v62  ;;  %v1049_v12 = vor.u32 %v1137_v5, %v1048_v4 }
  0x28   : > { %690 = vmatpush.bf16.msra.mxu3 %v949_v48  ;;  %v1101_v9 = vld [vmem:[%s1253_s28 + $0x4] sm:$0xf0]  ;;  %v1104_v13 = vld [vmem:[%s1253_s28 + $0x24] sm:$0xf]  ;;  %v922_v14 = vld [vmem:[%s1253_s28 + $0x28] sm:$0xf0]  ;;  %v977_v16 = vor.u32 %v1119_v7, %v976_v6 }
  0x29   : > { %v348_v15 = vld [vmem:[%s1248_s24] sm:$0xff]  ;;  %v1040_v18 = vld [vmem:[%s1253_s28 + $0x110] sm:$0xf]  ;;  %v1135_v19 = vld [vmem:[%s1253_s28 + $0x114] sm:$0xf0]  ;;  %v925_v25 = vor.u32 %v1104_v13, %v922_v14  ;;  %v905_v27 = vor.u32 %v1101_v9, %v904_v8  ;;  %p1094_p7 = scmp.ne.s32.totalorder %s1187_s15, 5 }
  0x2a   : > { %653 = vmatpush.bf16.msra.mxu0 %v929_v49  ;;  %678 = vmatpush.bf16.msra.mxu2 %v1065_v51  ;;  %v968_v17 = vld [vmem:[%s1253_s28 + $0x80] sm:$0xf]  ;;  %v1117_v20 = vld [vmem:[%s1253_s28 + $0x84] sm:$0xf0]  ;;  %v1130_v21 = vld [vmem:[%s1253_s28 + $0xf4] sm:$0xf]  ;;  %v400_v26 = vunpack.c.l.b16 %v348_v15  ;;  %v1041_v28 = vor.u32 %v1135_v19, %v1040_v18  ;;  %v401_v29 = vunpack.c.h.b16 %v348_v15 }
  0x2b   : > { %666 = vmatpush.bf16.msra.mxu1 %v993_v54  ;;  %v1026_v22 = vld [vmem:[%s1253_s28 + $0xf8] sm:$0xf0]  ;;  %v1146_v23 = vld [vmem:[%s1253_s28 + $0x174] sm:$0xf]  ;;  %v349_v32 = vld [vmem:[%s1248_s24 + $0x8] sm:$0xf]  ;;  %v969_v33 = vor.u32 %v1117_v20, %v968_v17 }
  0x2c   : > { %691 = vmatpush.bf16.msra.mxu3 %v941_v60  ;;  %v1090_v24 = vld [vmem:[%s1253_s28 + $0x178] sm:$0xf0]  ;;  %v1102_v30 = vld [vmem:[%s1253_s28 + $0x14] sm:$0xf]  ;;  %v1029_v34 = vor.u32 %v1130_v21, %v1026_v22  ;;  %v1032_v35 = vld [vmem:[%s1253_s28 + $0x100] sm:$0xf]  ;;  %v403_v42 = vpack.c.b16 %v400_v26, %v400_v26  ;;  %v402_v44 = vunpack.c.l.b16 %v349_v32  ;;  %v1328_v45 = vpack.c.b16 %v401_v29, %v401_v29 }
  0x2d   : > { %v914_v31 = vld [vmem:[%s1253_s28 + $0x18] sm:$0xf0]  ;;  %v1133_v36 = vld [vmem:[%s1253_s28 + $0x104] sm:$0xf0]  ;;  %v1093_v37 = vor.u32 %v1146_v23, %v1090_v24  ;;  %v1128_v38 = vld [vmem:[%s1253_s28 + $0xe4] sm:$0xf] }
  0x2e   : > { %654 = vmatpush.bf16.msra.mxu0 %v921_v61  ;;  %679 = vmatpush.bf16.msra.mxu2 %v1057_v63  ;;  %v1018_v39 = vld [vmem:[%s1253_s28 + $0xe8] sm:$0xf0]  ;;  %v1144_v40 = vld [vmem:[%s1253_s28 + $0x164] sm:$0xf]  ;;  %v917_v43 = vor.u32 %v1102_v30, %v914_v31  ;;  %v1033_v46 = vor.u32 %v1133_v36, %v1032_v35  ;;  %v1126_v51 = vld [vmem:[%s1253_s28 + $0xd4] sm:$0xf]  ;;  %v405_v55 = vpack.c.b16 %v402_v44, %v402_v44 }
  0x2f   : > { %667 = vmatpush.bf16.msra.mxu1 %v985_v2  ;;  %v1082_v41 = vld [vmem:[%s1253_s28 + $0x168] sm:$0xf0]  ;;  %v1100_v47 = vld [vmem:[%s1253_s28 + $0x4] sm:$0xf]  ;;  %v1021_v49 = vor.u32 %v1128_v38, %v1018_v39  ;;  %v1010_v52 = vld [vmem:[%s1253_s28 + $0xd8] sm:$0xf0] }
  0x30   : > { %692 = vmatpush.bf16.msra.mxu3 %v933_v10  ;;  %v906_v48 = vld [vmem:[%s1253_s28 + $0x8] sm:$0xf0]  ;;  %v1085_v50 = vor.u32 %v1144_v40, %v1082_v41  ;;  %v1142_v53 = vld [vmem:[%s1253_s28 + $0x154] sm:$0xf]  ;;  %v1074_v54 = vld [vmem:[%s1253_s28 + $0x158] sm:$0xf0]  ;;  %v1013_v57 = vor.u32 %v1126_v51, %v1010_v52 }
  0x31   : > { %v909_v56 = vor.u32 %v1100_v47, %v906_v48  ;;  %v1077_v58 = vor.u32 %v1142_v53, %v1074_v54  ;;  %v1124_v59 = vld [vmem:[%s1253_s28 + $0xc4] sm:$0xf]  ;;  %v1002_v60 = vld [vmem:[%s1253_s28 + $0xc8] sm:$0xf0]  ;;  %v1122_v1 = vld [vmem:[%s1253_s28 + $0xb4] sm:$0xf] }
  0x32   : > { %655 = vmatpush.bf16.msra.mxu0 %v913_v11  ;;  %680 = vmatpush.bf16.msra.mxu2 %v1049_v12  ;;  %v1140_v61 = vld [vmem:[%s1253_s28 + $0x144] sm:$0xf]  ;;  %v1066_v62 = vld [vmem:[%s1253_s28 + $0x148] sm:$0xf0]  ;;  %v1005_v63 = vor.u32 %v1124_v59, %v1002_v60  ;;  %v994_v2 = vld [vmem:[%s1253_s28 + $0xb8] sm:$0xf0] }
  0x33   : > { %668 = vmatpush.bf16.msra.mxu1 %v977_v16  ;;  %v1069_v0 = vor.u32 %v1140_v61, %v1066_v62  ;;  %v1138_v3 = vld [vmem:[%s1253_s28 + $0x134] sm:$0xf]  ;;  %v1058_v4 = vld [vmem:[%s1253_s28 + $0x138] sm:$0xf0]  ;;  %v997_v5 = vor.u32 %v1122_v1, %v994_v2  ;;  %v1120_v7 = vld [vmem:[%s1253_s28 + $0xa4] sm:$0xf] }
  0x34   : > { %693 = vmatpush.bf16.msra.mxu3 %v925_v25  ;;  %v1061_v6 = vor.u32 %v1138_v3, %v1058_v4  ;;  %v986_v8 = vld [vmem:[%s1253_s28 + $0xa8] sm:$0xf0]  ;;  %v1136_v9 = vld [vmem:[%s1253_s28 + $0x124] sm:$0xf]  ;;  %v1118_v13 = vld [vmem:[%s1253_s28 + $0x94] sm:$0xf] }
  0x35   : > { %v1050_v10 = vld [vmem:[%s1253_s28 + $0x128] sm:$0xf0]  ;;  %v989_v11 = vor.u32 %v1120_v7, %v986_v8  ;;  %v978_v14 = vld [vmem:[%s1253_s28 + $0x98] sm:$0xf0]  ;;  %v1134_v15 = vld [vmem:[%s1253_s28 + $0x114] sm:$0xf] }
  0x36   : > { %656 = vmatpush.bf16.msra.mxu0 %v905_v27  ;;  %681 = vmatpush.bf16.msra.mxu2 %v1041_v28  ;;  %v1053_v12 = vor.u32 %v1136_v9, %v1050_v10  ;;  %v1042_v16 = vld [vmem:[%s1253_s28 + $0x118] sm:$0xf0]  ;;  %v981_v17 = vor.u32 %v1118_v13, %v978_v14  ;;  %v1116_v19 = vld [vmem:[%s1253_s28 + $0x84] sm:$0xf]  ;;  %v970_v20 = vld [vmem:[%s1253_s28 + $0x88] sm:$0xf0] }
  0x37   : > { %669 = vmatpush.bf16.msra.mxu1 %v969_v33  ;;  %v1045_v18 = vor.u32 %v1134_v15, %v1042_v16  ;;  %v1132_v21 = vld [vmem:[%s1253_s28 + $0x104] sm:$0xf]  ;;  %v1034_v22 = vld [vmem:[%s1253_s28 + $0x108] sm:$0xf0]  ;;  %v973_v23 = vor.u32 %v1116_v19, %v970_v20 }
  0x38   : > { %694 = vmatpush.bf16.msra.mxu3 %v917_v43  ;;  %v1037_v24 = vor.u32 %v1132_v21, %v1034_v22  ;;  %v346_v30 = vld [vmem:[#allocation2] sm:$0xff]  ;;  %v347_v40 = vld [vmem:[#allocation2 + $0x8] sm:$0xff] }
  0x39   : > { %657 = vmatmul.bf16.vlgmr.msra.gmra.mxu0 %v403_v42 }
  0x3a   : > { %701 = vmatpush.bf16.msrb.mxu0 %v1029_v34  ;;  %670 = vmatmul.bf16.vlgmr.msra.gmra.mxu1 %v1328_v45 }
  0x3b   : > { %714 = vmatpush.bf16.msrb.mxu1 %v1093_v37  ;;  %682 = vmatpush.bf16.msra.mxu2 %v1033_v46 }
  0x3c   : > { %695 = vmatpush.bf16.msra.mxu3 %v909_v56 }
  0x3e   : > { %702 = vmatpush.bf16.msrb.mxu0 %v1021_v49  ;;  %683 = vmatmul.bf16.vlgmr.msra.gmra.mxu2 %v405_v55 }
  0x3f   : > { %715 = vmatpush.bf16.msrb.mxu1 %v1085_v50  ;;  %696 = vmatmul.bf16.vlgmr.msra.gmra.mxu3 %v403_v42 }
  0x42   : > { %703 = vmatpush.bf16.msrb.mxu0 %v1013_v57 }
  0x43   : > { %716 = vmatpush.bf16.msrb.mxu1 %v1077_v58 }
  0x46   : > { %704 = vmatpush.bf16.msrb.mxu0 %v1005_v63 }
  0x47   : > { %717 = vmatpush.bf16.msrb.mxu1 %v1069_v0 }
  0x4a   : > { %705 = vmatpush.bf16.msrb.mxu0 %v997_v5 }
  0x4b   : > { %718 = vmatpush.bf16.msrb.mxu1 %v1061_v6 }
  0x4e   : > { %706 = vmatpush.bf16.msrb.mxu0 %v989_v11 }
  0x4f   : > { %719 = vmatpush.bf16.msrb.mxu1 %v1053_v12 }
  0x52   : > { %707 = vmatpush.bf16.msrb.mxu0 %v981_v17 }
  0x53   : > { %720 = vmatpush.bf16.msrb.mxu1 %v1045_v18 }
  0x56   : > { %708 = vmatpush.bf16.msrb.mxu0 %v973_v23 }
  0x57   : > { %721 = vmatpush.bf16.msrb.mxu1 %v1037_v24 }
  0x59   : > { %709 = vmatmul.bf16.vlgmr.msrb.gmra.mxu0 %v1328_v45 }
  0x5a   : > { %722 = vmatmul.bf16.vlgmr.msrb.gmra.mxu1 %v405_v55 }
  0xb6   : > { %v658_v25 = vpop.f32.mrf.mxu0 }
  0xb7   : > { %v671_v26 = vpop.f32.mrf.mxu1 }
  0xb8   : > { %v672_v27 = vadd.f32 %v671_v26, %v658_v25 }
  0xbe   : > { %v660_v28 = vpop.f32.mrf.mxu0 }
  0xbf   : > { %v673_v29 = vpop.f32.mrf.mxu1 }
  0xc1   : > { %v684_v31 = vpop.f32.mrf.mxu2 }
  0xc2   : > { %v685_v32 = vadd.f32 %v684_v31, %v672_v27  ;;  %v697_v34 = vpop.f32.mrf.mxu3 }
  0xc4   : > { %v727_v33 = vadd.f32 %v685_v32, %v346_v30 }
  0xc6   : > { %729 = vst [vmem:[#allocation2] sm:$0xff] %v727_v33 }
  0xc9   : > { %v686_v35 = vpop.f32.mrf.mxu2 }
  0xca   : > { %v699_v36 = vpop.f32.mrf.mxu3 }
  0xd6   : > { %v710_v37 = vpop.f32.mrf.mxu0 }
  0xd7   : > { %v711_v38 = vadd.f32 %v710_v37, %v697_v34  ;;  %v723_v39 = vpop.f32.mrf.mxu1 }
  0xd9   : > { %v724_v41 = vadd.f32 %v723_v39, %v711_v38 }
  0xdb   : > { %v728_v42 = vadd.f32 %v724_v41, %v347_v40  ;;  %734 = sbr.rel (%p1094_p7) target bundleno = 238 (0xee), region = 44 }
  0xdd   : > { %730 = vst [vmem:[#allocation2 + $0x8] sm:$0xff] %v728_v42 }
  0xde   : > { %v712_v43 = vpop.f32.mrf.mxu0 }
  0xdf   : > { %v725_v44 = vpop.f32.mrf.mxu1 }
  0xe0   : > { %v735_v45 = vld [vmem:[#allocation2] sm:$0xff] }
  0xe1   : > { %v737_v47 = vld [vmem:[%s1379_s2] sm:$0x3] }
  0xe2   : > { %v739_v48 = vperm.slane %v737_v47, 0  ;;  %v740_v49 = vperm.slane %v737_v47, 1  ;;  %v745_v50 = vld [vmem:[%s1380_s3] sm:$0xff] }
  0xe3   : > { %v746_v51 = vunpack.c.l.bf16 %v745_v50  ;;  %v747_v52 = vunpack.c.h.bf16 %v745_v50 }
  0xe4   : > { %v736_v46 = vld [vmem:[#allocation2 + $0x8] sm:$0xff]  ;;  %v743_v53 = vadd.f32 %v739_v48, %v735_v45 }
  0xe5   : > { %v744_v54 = vadd.f32 %v740_v49, %v736_v46 }
  0xe6   : > { %v748_v55 = vadd.f32 %v746_v51, %v743_v53 }
  0xe7   : > { %v749_v56 = vadd.f32 %v747_v52, %v744_v54 }
  0xe8   : > { %v750_v57 = vmax.f32 %v748_v55, 0.0 }
  0xe9   : > { %v751_v58 = vmax.f32 %v749_v56, 0.0 }
  0xeb   : > { %v752_v59 = vpack.c.bf16 %v751_v58, %v750_v57 }
  0xed   : > { %753 = vst [vmem:[%s1381_s4] sm:$0xff] %v752_v59 }
  0xee PF: > { %s14_s17 = sadd.s32 1, %s1195_s17   ;;  %s1382_s15 = smov %s1191_s16 }
  0xef   : > { %p11_p8 = scmp.ge.s32.totalorder %s14_s17, 8   ;;  %s1383_s16 = smov %s1385_s18 }
  0xf1   :  { %13 = sbr.rel (!%p11_p8) target bundleno = 2 (0x2), region = 83 }

// kernel: resnet_forward.36
= control target key start
LH: loop header
LB: loop body
LE: loop exit
PB: predicated region body
PF: predicated region fallthrough
CT: control target
= control target key end

     0   :  { %s1128_s12 = smov 0   ;;  %s1130_s13 = smov 0   ;;  %s1279_s0 = inlined_call_operand.vmem [shape: bf16[8,2304], index: 0, kind: input, shape index: {}]   ;;  %s1280_s1 = inlined_call_operand.vmem [shape: bf16[2304,256], index: 1, kind: input, shape index: {}]   ;;  %s1281_s2 = inlined_call_operand.vmem [shape: f32[1,256], index: 2, kind: input, shape index: {}]   ;;  %s1282_s3 = inlined_call_operand.vmem [shape: bf16[8,256], index: 3, kind: output, shape index: {}]  }
   0x1   :  { %s1132_s14 = smov 0  }
   0x2 LB: > { %s25_s15 = sadd.s32 1, %s1101_s13  ;;  %p807_p0 = scmp.ge.s32.totalorder %s1105_s14, 1  ;;  %s1105_s14 = sphi %s1132_s14, %s13_s14   ;;  %s1101_s13 = sphi %s1130_s13, %s1284_s13   ;;  %s1097_s12 = sphi %s1128_s12, %s1283_s12  }
   0x3   : > { %p26_p1 = scmp.ge.s32.totalorder %s25_s15, 6  ;;  %p194_p2 = scmp.lt.s32.totalorder %s1105_s14, 7 }
   0x5   : > { %s1286_s15 = smov (%p26_p1, %s25_s15), 0  ;;  %p195_p3 = pnand %p807_p0, %p194_p2 }
   0x6   : > { %s240_s16 = smul.u32 (!%p195_p3), 3, %s1097_s12  ;;  %p811_p6 = scmp.ne.s32.totalorder (!%p195_p3), %s1097_s12, 0 }
   0x7   : > { %198 = sbr.rel (%p195_p3) target bundleno = 236 (0xec), region = 32 }
   0x8   : > { %s250_s17 = smul.u32 (!%p195_p3), 48, %s1097_s12  ;;  %p243_p4 = scmp.lt.s32.totalorder (!%p195_p3), %s240_s16, 17 }
   0xa   : > { %p252_p5 = scmp.lt.s32.totalorder (!%p195_p3), %s250_s17, 287 }
   0xc   : > { %s1288_s16 = smov (!%p243_p4, %s240_s16), 17  ;;  %s1290_s17 = smov (!%p252_p5, %s250_s17), 287 }
   0xd   : > { %s808_s18 = sshll.u32 %s1288_s16, 2  ;;  %s1009_s22 = sshll.u32 %s1290_s17, 3 }
   0xe   : > { %s1153_s21 = scalar_lea.vmem %s1279_s0, %s808_s18  ;;  %s1158_s25 = scalar_lea.vmem %s1280_s1, %s1009_s22 }
   0xf   : > { %280 = sbr.rel (%p811_p6) target bundleno = 23 (0x17), region = 36 }
  0x14   : > { %v1107_v0 = vmov 0.0  }
  0x15   : > { %281 = vst [vmem:[#allocation2] sm:$0xff] %v1107_v0 }
  0x16   : > { %282 = vst [vmem:[#allocation2 + $0x8] sm:$0xff] %v1107_v0 }
  0x17 PF: > { %v870_v1 = vld [vmem:[%s1158_s25 + $0x70] sm:$0xf]  ;;  %v1025_v2 = vld [vmem:[%s1158_s25 + $0x74] sm:$0xf0]  ;;  %v862_v6 = vld [vmem:[%s1158_s25 + $0x60] sm:$0xf] }
  0x18   : > { %v934_v3 = vld [vmem:[%s1158_s25 + $0xf0] sm:$0xf]  ;;  %v871_v4 = vor.u32 %v1025_v2, %v870_v1  ;;  %v1041_v5 = vld [vmem:[%s1158_s25 + $0xf4] sm:$0xf0]  ;;  %v1023_v7 = vld [vmem:[%s1158_s25 + $0x64] sm:$0xf0] }
  0x19   : > { %v935_v8 = vor.u32 %v1041_v5, %v934_v3  ;;  %v926_v9 = vld [vmem:[%s1158_s25 + $0xe0] sm:$0xf]  ;;  %v1039_v10 = vld [vmem:[%s1158_s25 + $0xe4] sm:$0xf0]  ;;  %v863_v11 = vor.u32 %v1023_v7, %v862_v6  ;;  %v854_v12 = vld [vmem:[%s1158_s25 + $0x50] sm:$0xf] }
  0x1a   : > { %586 = vmatpush.bf16.msra.mxu0 %v871_v4  ;;  %v927_v13 = vor.u32 %v1039_v10, %v926_v9  ;;  %v1021_v14 = vld [vmem:[%s1158_s25 + $0x54] sm:$0xf0]  ;;  %v998_v15 = vld [vmem:[%s1158_s25 + $0x170] sm:$0xf]  ;;  %v990_v20 = vld [vmem:[%s1158_s25 + $0x160] sm:$0xf] }
  0x1b   : > { %599 = vmatpush.bf16.msra.mxu1 %v935_v8  ;;  %v1057_v16 = vld [vmem:[%s1158_s25 + $0x174] sm:$0xf0]  ;;  %v918_v17 = vld [vmem:[%s1158_s25 + $0xd0] sm:$0xf]  ;;  %v1055_v21 = vld [vmem:[%s1158_s25 + $0x164] sm:$0xf0]  ;;  %v855_v23 = vor.u32 %v1021_v14, %v854_v12 }
  0x1c   : > { %v1037_v18 = vld [vmem:[%s1158_s25 + $0xd4] sm:$0xf0]  ;;  %v999_v19 = vor.u32 %v1057_v16, %v998_v15  ;;  %v1024_v22 = vld [vmem:[%s1158_s25 + $0x74] sm:$0xf]  ;;  %v846_v24 = vld [vmem:[%s1158_s25 + $0x40] sm:$0xf]  ;;  %v991_v26 = vor.u32 %v1055_v21, %v990_v20 }
  0x1d   : > { %v1019_v25 = vld [vmem:[%s1158_s25 + $0x44] sm:$0xf0]  ;;  %v872_v27 = vld [vmem:[%s1158_s25 + $0x78] sm:$0xf0]  ;;  %v919_v28 = vor.u32 %v1037_v18, %v918_v17  ;;  %v910_v29 = vld [vmem:[%s1158_s25 + $0xc0] sm:$0xf] }
  0x1e   : > { %587 = vmatpush.bf16.msra.mxu0 %v863_v11  ;;  %612 = vmatpush.bf16.msra.mxu2 %v999_v19  ;;  %v1035_v30 = vld [vmem:[%s1158_s25 + $0xc4] sm:$0xf0]  ;;  %v875_v31 = vor.u32 %v1024_v22, %v872_v27  ;;  %v982_v32 = vld [vmem:[%s1158_s25 + $0x150] sm:$0xf]  ;;  %v1053_v33 = vld [vmem:[%s1158_s25 + $0x154] sm:$0xf0]  ;;  %v847_v37 = vor.u32 %v1019_v25, %v846_v24 }
  0x1f   : > { %600 = vmatpush.bf16.msra.mxu1 %v927_v13  ;;  %v1022_v34 = vld [vmem:[%s1158_s25 + $0x64] sm:$0xf]  ;;  %v864_v35 = vld [vmem:[%s1158_s25 + $0x68] sm:$0xf0]  ;;  %v838_v38 = vld [vmem:[%s1158_s25 + $0x30] sm:$0xf]  ;;  %v983_v40 = vor.u32 %v1053_v33, %v982_v32  ;;  %v911_v42 = vor.u32 %v1035_v30, %v910_v29 }
  0x20   : > { %625 = vmatpush.bf16.msra.mxu3 %v875_v31  ;;  %v867_v36 = vor.u32 %v1022_v34, %v864_v35  ;;  %v1017_v39 = vld [vmem:[%s1158_s25 + $0x34] sm:$0xf0]  ;;  %v974_v41 = vld [vmem:[%s1158_s25 + $0x140] sm:$0xf]  ;;  %v1051_v43 = vld [vmem:[%s1158_s25 + $0x144] sm:$0xf0] }
  0x21   : > { %v1020_v44 = vld [vmem:[%s1158_s25 + $0x54] sm:$0xf]  ;;  %v856_v45 = vld [vmem:[%s1158_s25 + $0x58] sm:$0xf0]  ;;  %v902_v46 = vld [vmem:[%s1158_s25 + $0xb0] sm:$0xf]  ;;  %v839_v49 = vor.u32 %v1017_v39, %v838_v38  ;;  %v975_v51 = vor.u32 %v1051_v43, %v974_v41 }
  0x22   : > { %588 = vmatpush.bf16.msra.mxu0 %v855_v23  ;;  %613 = vmatpush.bf16.msra.mxu2 %v991_v26  ;;  %v1033_v47 = vld [vmem:[%s1158_s25 + $0xb4] sm:$0xf0]  ;;  %v859_v48 = vor.u32 %v1020_v44, %v856_v45  ;;  %v830_v50 = vld [vmem:[%s1158_s25 + $0x20] sm:$0xf]  ;;  %v1018_v52 = vld [vmem:[%s1158_s25 + $0x44] sm:$0xf] }
  0x23   : > { %601 = vmatpush.bf16.msra.mxu1 %v919_v28  ;;  %v848_v53 = vld [vmem:[%s1158_s25 + $0x48] sm:$0xf0]  ;;  %v903_v54 = vor.u32 %v1033_v47, %v902_v46  ;;  %v1015_v55 = vld [vmem:[%s1158_s25 + $0x24] sm:$0xf0]  ;;  %v966_v56 = vld [vmem:[%s1158_s25 + $0x130] sm:$0xf] }
  0x24   : > { %626 = vmatpush.bf16.msra.mxu3 %v867_v36  ;;  %v1049_v57 = vld [vmem:[%s1158_s25 + $0x134] sm:$0xf0]  ;;  %v894_v58 = vld [vmem:[%s1158_s25 + $0xa0] sm:$0xf]  ;;  %v1031_v59 = vld [vmem:[%s1158_s25 + $0xa4] sm:$0xf0]  ;;  %v851_v60 = vor.u32 %v1018_v52, %v848_v53  ;;  %v831_v61 = vor.u32 %v1015_v55, %v830_v50 }
  0x25   : > { %v822_v62 = vld [vmem:[%s1158_s25 + $0x10] sm:$0xf]  ;;  %v967_v63 = vor.u32 %v1049_v57, %v966_v56  ;;  %v1016_v0 = vld [vmem:[%s1158_s25 + $0x34] sm:$0xf]  ;;  %v840_v1 = vld [vmem:[%s1158_s25 + $0x38] sm:$0xf0]  ;;  %v895_v2 = vor.u32 %v1031_v59, %v894_v58 }
  0x26   : > { %589 = vmatpush.bf16.msra.mxu0 %v847_v37  ;;  %614 = vmatpush.bf16.msra.mxu2 %v983_v40  ;;  %v1013_v3 = vld [vmem:[%s1158_s25 + $0x14] sm:$0xf0]  ;;  %v958_v4 = vld [vmem:[%s1158_s25 + $0x120] sm:$0xf]  ;;  %v1047_v5 = vld [vmem:[%s1158_s25 + $0x124] sm:$0xf0]  ;;  %v843_v10 = vor.u32 %v1016_v0, %v840_v1 }
  0x27   : > { %602 = vmatpush.bf16.msra.mxu1 %v911_v42  ;;  %v886_v6 = vld [vmem:[%s1158_s25 + $0x90] sm:$0xf]  ;;  %v1029_v7 = vld [vmem:[%s1158_s25 + $0x94] sm:$0xf0]  ;;  %v814_v8 = vld [vmem:[%s1158_s25] sm:$0xf]  ;;  %v823_v11 = vor.u32 %v1013_v3, %v822_v62  ;;  %v959_v12 = vor.u32 %v1047_v5, %v958_v4 }
  0x28   : > { %627 = vmatpush.bf16.msra.mxu3 %v859_v48  ;;  %v1011_v9 = vld [vmem:[%s1158_s25 + $0x4] sm:$0xf0]  ;;  %v1014_v13 = vld [vmem:[%s1158_s25 + $0x24] sm:$0xf]  ;;  %v832_v14 = vld [vmem:[%s1158_s25 + $0x28] sm:$0xf0]  ;;  %v887_v16 = vor.u32 %v1029_v7, %v886_v6 }
  0x29   : > { %v285_v15 = vld [vmem:[%s1153_s21] sm:$0xff]  ;;  %v950_v18 = vld [vmem:[%s1158_s25 + $0x110] sm:$0xf]  ;;  %v1045_v19 = vld [vmem:[%s1158_s25 + $0x114] sm:$0xf0]  ;;  %v835_v25 = vor.u32 %v1014_v13, %v832_v14  ;;  %v815_v27 = vor.u32 %v1011_v9, %v814_v8  ;;  %p1004_p7 = scmp.ne.s32.totalorder %s1097_s12, 5 }
  0x2a   : > { %590 = vmatpush.bf16.msra.mxu0 %v839_v49  ;;  %615 = vmatpush.bf16.msra.mxu2 %v975_v51  ;;  %v878_v17 = vld [vmem:[%s1158_s25 + $0x80] sm:$0xf]  ;;  %v1027_v20 = vld [vmem:[%s1158_s25 + $0x84] sm:$0xf0]  ;;  %v1040_v21 = vld [vmem:[%s1158_s25 + $0xf4] sm:$0xf]  ;;  %v337_v26 = vunpack.c.l.b16 %v285_v15  ;;  %v951_v28 = vor.u32 %v1045_v19, %v950_v18  ;;  %v338_v29 = vunpack.c.h.b16 %v285_v15 }
  0x2b   : > { %603 = vmatpush.bf16.msra.mxu1 %v903_v54  ;;  %v936_v22 = vld [vmem:[%s1158_s25 + $0xf8] sm:$0xf0]  ;;  %v1056_v23 = vld [vmem:[%s1158_s25 + $0x174] sm:$0xf]  ;;  %v286_v32 = vld [vmem:[%s1153_s21 + $0x8] sm:$0xf]  ;;  %v879_v33 = vor.u32 %v1027_v20, %v878_v17 }
  0x2c   : > { %628 = vmatpush.bf16.msra.mxu3 %v851_v60  ;;  %v1000_v24 = vld [vmem:[%s1158_s25 + $0x178] sm:$0xf0]  ;;  %v1012_v30 = vld [vmem:[%s1158_s25 + $0x14] sm:$0xf]  ;;  %v939_v34 = vor.u32 %v1040_v21, %v936_v22  ;;  %v942_v35 = vld [vmem:[%s1158_s25 + $0x100] sm:$0xf]  ;;  %v340_v42 = vpack.c.b16 %v337_v26, %v337_v26  ;;  %v339_v44 = vunpack.c.l.b16 %v286_v32  ;;  %v1233_v45 = vpack.c.b16 %v338_v29, %v338_v29 }
  0x2d   : > { %v824_v31 = vld [vmem:[%s1158_s25 + $0x18] sm:$0xf0]  ;;  %v1043_v36 = vld [vmem:[%s1158_s25 + $0x104] sm:$0xf0]  ;;  %v1003_v37 = vor.u32 %v1056_v23, %v1000_v24  ;;  %v1038_v38 = vld [vmem:[%s1158_s25 + $0xe4] sm:$0xf] }
  0x2e   : > { %591 = vmatpush.bf16.msra.mxu0 %v831_v61  ;;  %616 = vmatpush.bf16.msra.mxu2 %v967_v63  ;;  %v928_v39 = vld [vmem:[%s1158_s25 + $0xe8] sm:$0xf0]  ;;  %v1054_v40 = vld [vmem:[%s1158_s25 + $0x164] sm:$0xf]  ;;  %v827_v43 = vor.u32 %v1012_v30, %v824_v31  ;;  %v943_v46 = vor.u32 %v1043_v36, %v942_v35  ;;  %v1036_v51 = vld [vmem:[%s1158_s25 + $0xd4] sm:$0xf]  ;;  %v342_v55 = vpack.c.b16 %v339_v44, %v339_v44 }
  0x2f   : > { %604 = vmatpush.bf16.msra.mxu1 %v895_v2  ;;  %v992_v41 = vld [vmem:[%s1158_s25 + $0x168] sm:$0xf0]  ;;  %v1010_v47 = vld [vmem:[%s1158_s25 + $0x4] sm:$0xf]  ;;  %v931_v49 = vor.u32 %v1038_v38, %v928_v39  ;;  %v920_v52 = vld [vmem:[%s1158_s25 + $0xd8] sm:$0xf0] }
  0x30   : > { %629 = vmatpush.bf16.msra.mxu3 %v843_v10  ;;  %v816_v48 = vld [vmem:[%s1158_s25 + $0x8] sm:$0xf0]  ;;  %v995_v50 = vor.u32 %v1054_v40, %v992_v41  ;;  %v1052_v53 = vld [vmem:[%s1158_s25 + $0x154] sm:$0xf]  ;;  %v984_v54 = vld [vmem:[%s1158_s25 + $0x158] sm:$0xf0]  ;;  %v923_v57 = vor.u32 %v1036_v51, %v920_v52 }
  0x31   : > { %v819_v56 = vor.u32 %v1010_v47, %v816_v48  ;;  %v987_v58 = vor.u32 %v1052_v53, %v984_v54  ;;  %v1034_v59 = vld [vmem:[%s1158_s25 + $0xc4] sm:$0xf]  ;;  %v912_v60 = vld [vmem:[%s1158_s25 + $0xc8] sm:$0xf0]  ;;  %v1032_v1 = vld [vmem:[%s1158_s25 + $0xb4] sm:$0xf] }
  0x32   : > { %592 = vmatpush.bf16.msra.mxu0 %v823_v11  ;;  %617 = vmatpush.bf16.msra.mxu2 %v959_v12  ;;  %v1050_v61 = vld [vmem:[%s1158_s25 + $0x144] sm:$0xf]  ;;  %v976_v62 = vld [vmem:[%s1158_s25 + $0x148] sm:$0xf0]  ;;  %v915_v63 = vor.u32 %v1034_v59, %v912_v60  ;;  %v904_v2 = vld [vmem:[%s1158_s25 + $0xb8] sm:$0xf0] }
  0x33   : > { %605 = vmatpush.bf16.msra.mxu1 %v887_v16  ;;  %v979_v0 = vor.u32 %v1050_v61, %v976_v62  ;;  %v1048_v3 = vld [vmem:[%s1158_s25 + $0x134] sm:$0xf]  ;;  %v968_v4 = vld [vmem:[%s1158_s25 + $0x138] sm:$0xf0]  ;;  %v907_v5 = vor.u32 %v1032_v1, %v904_v2  ;;  %v1030_v7 = vld [vmem:[%s1158_s25 + $0xa4] sm:$0xf] }
  0x34   : > { %630 = vmatpush.bf16.msra.mxu3 %v835_v25  ;;  %v971_v6 = vor.u32 %v1048_v3, %v968_v4  ;;  %v896_v8 = vld [vmem:[%s1158_s25 + $0xa8] sm:$0xf0]  ;;  %v1046_v9 = vld [vmem:[%s1158_s25 + $0x124] sm:$0xf]  ;;  %v1028_v13 = vld [vmem:[%s1158_s25 + $0x94] sm:$0xf] }
  0x35   : > { %v960_v10 = vld [vmem:[%s1158_s25 + $0x128] sm:$0xf0]  ;;  %v899_v11 = vor.u32 %v1030_v7, %v896_v8  ;;  %v888_v14 = vld [vmem:[%s1158_s25 + $0x98] sm:$0xf0]  ;;  %v1044_v15 = vld [vmem:[%s1158_s25 + $0x114] sm:$0xf] }
  0x36   : > { %593 = vmatpush.bf16.msra.mxu0 %v815_v27  ;;  %618 = vmatpush.bf16.msra.mxu2 %v951_v28  ;;  %v963_v12 = vor.u32 %v1046_v9, %v960_v10  ;;  %v952_v16 = vld [vmem:[%s1158_s25 + $0x118] sm:$0xf0]  ;;  %v891_v17 = vor.u32 %v1028_v13, %v888_v14  ;;  %v1026_v19 = vld [vmem:[%s1158_s25 + $0x84] sm:$0xf]  ;;  %v880_v20 = vld [vmem:[%s1158_s25 + $0x88] sm:$0xf0] }
  0x37   : > { %606 = vmatpush.bf16.msra.mxu1 %v879_v33  ;;  %v955_v18 = vor.u32 %v1044_v15, %v952_v16  ;;  %v1042_v21 = vld [vmem:[%s1158_s25 + $0x104] sm:$0xf]  ;;  %v944_v22 = vld [vmem:[%s1158_s25 + $0x108] sm:$0xf0]  ;;  %v883_v23 = vor.u32 %v1026_v19, %v880_v20 }
  0x38   : > { %631 = vmatpush.bf16.msra.mxu3 %v827_v43  ;;  %v947_v24 = vor.u32 %v1042_v21, %v944_v22  ;;  %v283_v30 = vld [vmem:[#allocation2] sm:$0xff]  ;;  %v284_v40 = vld [vmem:[#allocation2 + $0x8] sm:$0xff] }
  0x39   : > { %594 = vmatmul.bf16.vlgmr.msra.gmra.mxu0 %v340_v42 }
  0x3a   : > { %638 = vmatpush.bf16.msrb.mxu0 %v939_v34  ;;  %607 = vmatmul.bf16.vlgmr.msra.gmra.mxu1 %v1233_v45 }
  0x3b   : > { %651 = vmatpush.bf16.msrb.mxu1 %v1003_v37  ;;  %619 = vmatpush.bf16.msra.mxu2 %v943_v46 }
  0x3c   : > { %632 = vmatpush.bf16.msra.mxu3 %v819_v56 }
  0x3e   : > { %639 = vmatpush.bf16.msrb.mxu0 %v931_v49  ;;  %620 = vmatmul.bf16.vlgmr.msra.gmra.mxu2 %v342_v55 }
  0x3f   : > { %652 = vmatpush.bf16.msrb.mxu1 %v995_v50  ;;  %633 = vmatmul.bf16.vlgmr.msra.gmra.mxu3 %v340_v42 }
  0x42   : > { %640 = vmatpush.bf16.msrb.mxu0 %v923_v57 }
  0x43   : > { %653 = vmatpush.bf16.msrb.mxu1 %v987_v58 }
  0x46   : > { %641 = vmatpush.bf16.msrb.mxu0 %v915_v63 }
  0x47   : > { %654 = vmatpush.bf16.msrb.mxu1 %v979_v0 }
  0x4a   : > { %642 = vmatpush.bf16.msrb.mxu0 %v907_v5 }
  0x4b   : > { %655 = vmatpush.bf16.msrb.mxu1 %v971_v6 }
  0x4e   : > { %643 = vmatpush.bf16.msrb.mxu0 %v899_v11 }
  0x4f   : > { %656 = vmatpush.bf16.msrb.mxu1 %v963_v12 }
  0x52   : > { %644 = vmatpush.bf16.msrb.mxu0 %v891_v17 }
  0x53   : > { %657 = vmatpush.bf16.msrb.mxu1 %v955_v18 }
  0x56   : > { %645 = vmatpush.bf16.msrb.mxu0 %v883_v23 }
  0x57   : > { %658 = vmatpush.bf16.msrb.mxu1 %v947_v24 }
  0x59   : > { %646 = vmatmul.bf16.vlgmr.msrb.gmra.mxu0 %v1233_v45 }
  0x5a   : > { %659 = vmatmul.bf16.vlgmr.msrb.gmra.mxu1 %v342_v55 }
  0xb6   : > { %v595_v25 = vpop.f32.mrf.mxu0 }
  0xb7   : > { %v608_v26 = vpop.f32.mrf.mxu1 }
  0xb8   : > { %v609_v27 = vadd.f32 %v608_v26, %v595_v25 }
  0xbe   : > { %v597_v28 = vpop.f32.mrf.mxu0 }
  0xbf   : > { %v610_v29 = vpop.f32.mrf.mxu1 }
  0xc1   : > { %v621_v31 = vpop.f32.mrf.mxu2 }
  0xc2   : > { %v622_v32 = vadd.f32 %v621_v31, %v609_v27  ;;  %v634_v34 = vpop.f32.mrf.mxu3 }
  0xc4   : > { %v664_v33 = vadd.f32 %v622_v32, %v283_v30 }
  0xc6   : > { %666 = vst [vmem:[#allocation2] sm:$0xff] %v664_v33 }
  0xc9   : > { %v623_v35 = vpop.f32.mrf.mxu2 }
  0xca   : > { %v636_v36 = vpop.f32.mrf.mxu3 }
  0xd6   : > { %v647_v37 = vpop.f32.mrf.mxu0 }
  0xd7   : > { %v648_v38 = vadd.f32 %v647_v37, %v634_v34  ;;  %v660_v39 = vpop.f32.mrf.mxu1 }
  0xd9   : > { %v661_v41 = vadd.f32 %v660_v39, %v648_v38 }
  0xdb   : > { %v665_v42 = vadd.f32 %v661_v41, %v284_v40  ;;  %671 = sbr.rel (%p1004_p7) target bundleno = 236 (0xec), region = 40 }
  0xdd   : > { %667 = vst [vmem:[#allocation2 + $0x8] sm:$0xff] %v665_v42 }
  0xde   : > { %v649_v43 = vpop.f32.mrf.mxu0 }
  0xdf   : > { %v662_v44 = vpop.f32.mrf.mxu1 }
  0xe0   : > { %v672_v45 = vld [vmem:[#allocation2] sm:$0xff] }
  0xe1   : > { %v674_v47 = vld [vmem:[%s1281_s2] sm:$0x3] }
  0xe2   : > { %v676_v48 = vperm.slane %v674_v47, 0  ;;  %v677_v49 = vperm.slane %v674_v47, 1 }
  0xe4   : > { %v673_v46 = vld [vmem:[#allocation2 + $0x8] sm:$0xff]  ;;  %v680_v50 = vadd.f32 %v676_v48, %v672_v45 }
  0xe5   : > { %v681_v51 = vadd.f32 %v677_v49, %v673_v46 }
  0xe6   : > { %v682_v52 = vmax.f32 %v680_v50, 0.0 }
  0xe7   : > { %v683_v53 = vmax.f32 %v681_v51, 0.0 }
  0xe9   : > { %v684_v54 = vpack.c.bf16 %v683_v53, %v682_v52 }
  0xeb   : > { %685 = vst [vmem:[%s1282_s3] sm:$0xff] %v684_v54 }
  0xec PF: > { %s13_s14 = sadd.s32 1, %s1105_s14   ;;  %s1283_s12 = smov %s1101_s13 }
  0xed   : > { %p10_p8 = scmp.ge.s32.totalorder %s13_s14, 8   ;;  %s1284_s13 = smov %s1286_s15 }
  0xef   :  { %12 = sbr.rel (!%p10_p8) target bundleno = 2 (0x2), region = 76 }

// kernel: resnet_forward.38
= control target key start
LH: loop header
LB: loop body
LE: loop exit
PB: predicated region body
PF: predicated region fallthrough
CT: control target
= control target key end

     0   :  { %s1412_s12 = smov 0   ;;  %s1414_s13 = smov 0   ;;  %s1727_s0 = inlined_call_operand.vmem [shape: bf16[8,2304], index: 0, kind: input, shape index: {}]   ;;  %s1728_s1 = inlined_call_operand.vmem [shape: bf16[2304,512], index: 1, kind: input, shape index: {}]   ;;  %s1729_s2 = inlined_call_operand.vmem [shape: f32[1,512], index: 2, kind: input, shape index: {}]   ;;  %s1730_s3 = inlined_call_operand.vmem [shape: bf16[8,512], index: 3, kind: output, shape index: {}]  }
   0x1   :  { %s1416_s14 = smov 0   ;;  %s1418_s15 = smov 0  }
   0x2   :  { %s1420_s16 = smov 0   ;;  %s1422_s17 = smov 0  }
   0x3   :  { %s1424_s18 = smov 0  }
   0x4 LB: > { %s25_s19 = sadd.s32 1, %s1381_s16  ;;  %s28_s20 = sadd.s32 1, %s1385_s17  ;;  %s1389_s18 = sphi %s1424_s18, %s13_s18   ;;  %s1385_s17 = sphi %s1422_s17, %s1736_s17   ;;  %s1381_s16 = sphi %s1420_s16, %s1735_s16   ;;  %s1377_s15 = sphi %s1418_s15, %s1734_s15   ;;  %s1373_s14 = sphi %s1416_s14, %s1733_s14   ;;  %s1369_s13 = sphi %s1414_s13, %s1732_s13   ;;  %s1365_s12 = sphi %s1412_s12, %s1731_s12  }
   0x5   : > { %p26_p0 = scmp.ge.s32.totalorder %s25_s19, 6  ;;  %p76_p1 = scmp.ne.s32.totalorder %s1369_s13, %s1365_s12 }
   0x6   : > { %p77_p2 = scmp.eq.s32.totalorder %s1389_s18, 0  ;;  %s69_s24 = sadd.s32 1, %s1369_s13 }
   0x7   : > { %s1738_s19 = smov (%p26_p0, %s25_s19), 0  ;;  %s1740_s20 = smov (!%p26_p0, %s28_s20), %s1385_s17 }
   0x8   : > { %p78_p3 = por %p77_p2, %p76_p1  ;;  %p30_p4 = scmp.ge.s32.totalorder %s1740_s20, 2 }
   0x9   : > { %s64_s21 = ssub.s32 %s1381_s16, %s1738_s19  ;;  %p1022_p6 = scmp.ge.s32.totalorder %s1389_s18, 12 }
   0xa   : > { %s1742_s20 = smov (%p30_p4, %s1740_s20), 0 }
   0xb   : > { %s65_s22 = ssub.s32 %s1385_s17, %s1742_s20  ;;  %156 = sbr.rel (%p1022_p6) target bundleno = 72 (0x48), region = 16 }
   0xc   : > { %s66_s23 = sor.u32 %s65_s22, %s64_s21 }
   0xd   : > { %p67_p5 = scmp.eq.s32.totalorder %s66_s23, 0 }
   0xf   : > { %s1463_s25 = scalar_select %p67_p5, %s1369_s13, %s69_s24  }
  0x10   : > { %172 = sbr.rel (!%p78_p3) target bundleno = 72 (0x48), region = 24  ;;  %s174_s26 = sand.u32 (%p78_p3), 1, %s1369_s13  }
  0x11   : > { %s1276_s27 = smul.u32 (%p78_p3), 384, %s174_s26  ;;  %s1023_s28 = sshll.u32 (%p78_p3), %s1385_s17, 1 }
  0x12   : > { %s1227_s29 = smul.u32 (%p78_p3), 192, %s1381_s16 }
  0x13   : > { %s1477_s8 = scalar_lea.vmem (%p78_p3), [#allocation3], %s1276_s27 }
  0x14   : > { %s180_s30 = sadd.s32 (%p78_p3), %s1227_s29, %s1023_s28 }
  0x15   : > { %s1025_s4 = sshll.u32 %s180_s30, 2 }
  0x16   : > { %s1472_s7 = scalar_lea.vmem %s1728_s1, %s1025_s4 }
  0x17   : > { %v305_v0 = vld [vmem:[%s1472_s7] sm:$0xff]  ;;  %v307_v1 = vld [vmem:[%s1472_s7 + $0x10] sm:$0xff] }
  0x18   : > { %v309_v2 = vld [vmem:[%s1472_s7 + $0x20] sm:$0xff]  ;;  %306 = vst [vmem:[%s1477_s8] sm:$0xff] %v305_v0  ;;  %v311_v3 = vld [vmem:[%s1472_s7 + $0x30] sm:$0xff] }
  0x19   : > { %308 = vst [vmem:[%s1477_s8 + $0x8] sm:$0xff] %v307_v1  ;;  %v313_v4 = vld [vmem:[%s1472_s7 + $0x40] sm:$0xff]  ;;  %v315_v5 = vld [vmem:[%s1472_s7 + $0x50] sm:$0xff] }
  0x1a   : > { %310 = vst [vmem:[%s1477_s8 + $0x10] sm:$0xff] %v309_v2  ;;  %v317_v6 = vld [vmem:[%s1472_s7 + $0x60] sm:$0xff]  ;;  %v319_v7 = vld [vmem:[%s1472_s7 + $0x70] sm:$0xff] }
  0x1b   : > { %312 = vst [vmem:[%s1477_s8 + $0x18] sm:$0xff] %v311_v3  ;;  %v321_v8 = vld [vmem:[%s1472_s7 + $0x80] sm:$0xff]  ;;  %v323_v9 = vld [vmem:[%s1472_s7 + $0x90] sm:$0xff] }
  0x1c   : > { %314 = vst [vmem:[%s1477_s8 + $0x20] sm:$0xff] %v313_v4  ;;  %v325_v10 = vld [vmem:[%s1472_s7 + $0xa0] sm:$0xff]  ;;  %v327_v11 = vld [vmem:[%s1472_s7 + $0xb0] sm:$0xff] }
  0x1d   : > { %316 = vst [vmem:[%s1477_s8 + $0x28] sm:$0xff] %v315_v5  ;;  %v329_v12 = vld [vmem:[%s1472_s7 + $0xc0] sm:$0xff]  ;;  %v331_v13 = vld [vmem:[%s1472_s7 + $0xd0] sm:$0xff] }
  0x1e   : > { %318 = vst [vmem:[%s1477_s8 + $0x30] sm:$0xff] %v317_v6  ;;  %v333_v14 = vld [vmem:[%s1472_s7 + $0xe0] sm:$0xff]  ;;  %v335_v15 = vld [vmem:[%s1472_s7 + $0xf0] sm:$0xff] }
  0x1f   : > { %320 = vst [vmem:[%s1477_s8 + $0x38] sm:$0xff] %v319_v7  ;;  %v337_v16 = vld [vmem:[%s1472_s7 + $0x100] sm:$0xff]  ;;  %v339_v17 = vld [vmem:[%s1472_s7 + $0x110] sm:$0xff] }
  0x20   : > { %322 = vst [vmem:[%s1477_s8 + $0x40] sm:$0xff] %v321_v8  ;;  %v341_v18 = vld [vmem:[%s1472_s7 + $0x120] sm:$0xff]  ;;  %v343_v19 = vld [vmem:[%s1472_s7 + $0x130] sm:$0xff] }
  0x21   : > { %324 = vst [vmem:[%s1477_s8 + $0x48] sm:$0xff] %v323_v9  ;;  %v345_v20 = vld [vmem:[%s1472_s7 + $0x140] sm:$0xff]  ;;  %v347_v21 = vld [vmem:[%s1472_s7 + $0x150] sm:$0xff] }
  0x22   : > { %326 = vst [vmem:[%s1477_s8 + $0x50] sm:$0xff] %v325_v10  ;;  %v349_v22 = vld [vmem:[%s1472_s7 + $0x160] sm:$0xff]  ;;  %v351_v23 = vld [vmem:[%s1472_s7 + $0x170] sm:$0xff] }
  0x23   : > { %328 = vst [vmem:[%s1477_s8 + $0x58] sm:$0xff] %v327_v11  ;;  %v353_v24 = vld [vmem:[%s1472_s7 + $0x180] sm:$0xff]  ;;  %v355_v25 = vld [vmem:[%s1472_s7 + $0x190] sm:$0xff] }
  0x24   : > { %330 = vst [vmem:[%s1477_s8 + $0x60] sm:$0xff] %v329_v12  ;;  %v357_v26 = vld [vmem:[%s1472_s7 + $0x1a0] sm:$0xff]  ;;  %v359_v27 = vld [vmem:[%s1472_s7 + $0x1b0] sm:$0xff] }
  0x25   : > { %332 = vst [vmem:[%s1477_s8 + $0x68] sm:$0xff] %v331_v13  ;;  %v361_v28 = vld [vmem:[%s1472_s7 + $0x1c0] sm:$0xff]  ;;  %v363_v29 = vld [vmem:[%s1472_s7 + $0x1d0] sm:$0xff] }
  0x26   : > { %334 = vst [vmem:[%s1477_s8 + $0x70] sm:$0xff] %v333_v14  ;;  %v365_v30 = vld [vmem:[%s1472_s7 + $0x1e0] sm:$0xff]  ;;  %v367_v31 = vld [vmem:[%s1472_s7 + $0x1f0] sm:$0xff] }
  0x27   : > { %336 = vst [vmem:[%s1477_s8 + $0x78] sm:$0xff] %v335_v15  ;;  %v369_v32 = vld [vmem:[%s1472_s7 + $0x200] sm:$0xff]  ;;  %v371_v33 = vld [vmem:[%s1472_s7 + $0x210] sm:$0xff] }
  0x28   : > { %338 = vst [vmem:[%s1477_s8 + $0x80] sm:$0xff] %v337_v16  ;;  %v373_v34 = vld [vmem:[%s1472_s7 + $0x220] sm:$0xff]  ;;  %v375_v35 = vld [vmem:[%s1472_s7 + $0x230] sm:$0xff] }
  0x29   : > { %340 = vst [vmem:[%s1477_s8 + $0x88] sm:$0xff] %v339_v17  ;;  %v377_v36 = vld [vmem:[%s1472_s7 + $0x240] sm:$0xff]  ;;  %v379_v37 = vld [vmem:[%s1472_s7 + $0x250] sm:$0xff] }
  0x2a   : > { %342 = vst [vmem:[%s1477_s8 + $0x90] sm:$0xff] %v341_v18  ;;  %v381_v38 = vld [vmem:[%s1472_s7 + $0x260] sm:$0xff]  ;;  %v383_v39 = vld [vmem:[%s1472_s7 + $0x270] sm:$0xff] }
  0x2b   : > { %344 = vst [vmem:[%s1477_s8 + $0x98] sm:$0xff] %v343_v19  ;;  %v385_v40 = vld [vmem:[%s1472_s7 + $0x280] sm:$0xff]  ;;  %v387_v41 = vld [vmem:[%s1472_s7 + $0x290] sm:$0xff] }
  0x2c   : > { %346 = vst [vmem:[%s1477_s8 + $0xa0] sm:$0xff] %v345_v20  ;;  %v389_v42 = vld [vmem:[%s1472_s7 + $0x2a0] sm:$0xff]  ;;  %v391_v43 = vld [vmem:[%s1472_s7 + $0x2b0] sm:$0xff] }
  0x2d   : > { %348 = vst [vmem:[%s1477_s8 + $0xa8] sm:$0xff] %v347_v21  ;;  %v393_v44 = vld [vmem:[%s1472_s7 + $0x2c0] sm:$0xff]  ;;  %v395_v45 = vld [vmem:[%s1472_s7 + $0x2d0] sm:$0xff] }
  0x2e   : > { %350 = vst [vmem:[%s1477_s8 + $0xb0] sm:$0xff] %v349_v22  ;;  %v397_v46 = vld [vmem:[%s1472_s7 + $0x2e0] sm:$0xff]  ;;  %v399_v47 = vld [vmem:[%s1472_s7 + $0x2f0] sm:$0xff] }
  0x2f   : > { %352 = vst [vmem:[%s1477_s8 + $0xb8] sm:$0xff] %v351_v23 }
  0x30   : > { %354 = vst [vmem:[%s1477_s8 + $0xc0] sm:$0xff] %v353_v24 }
  0x31   : > { %356 = vst [vmem:[%s1477_s8 + $0xc8] sm:$0xff] %v355_v25 }
  0x32   : > { %358 = vst [vmem:[%s1477_s8 + $0xd0] sm:$0xff] %v357_v26 }
  0x33   : > { %360 = vst [vmem:[%s1477_s8 + $0xd8] sm:$0xff] %v359_v27 }
  0x34   : > { %362 = vst [vmem:[%s1477_s8 + $0xe0] sm:$0xff] %v361_v28 }
  0x35   : > { %364 = vst [vmem:[%s1477_s8 + $0xe8] sm:$0xff] %v363_v29 }
  0x36   : > { %366 = vst [vmem:[%s1477_s8 + $0xf0] sm:$0xff] %v365_v30 }
  0x37   : > { %368 = vst [vmem:[%s1477_s8 + $0xf8] sm:$0xff] %v367_v31 }
  0x38   : > { %370 = vst [vmem:[%s1477_s8 + $0x100] sm:$0xff] %v369_v32 }
  0x39   : > { %372 = vst [vmem:[%s1477_s8 + $0x108] sm:$0xff] %v371_v33 }
  0x3a   : > { %374 = vst [vmem:[%s1477_s8 + $0x110] sm:$0xff] %v373_v34 }
  0x3b   : > { %376 = vst [vmem:[%s1477_s8 + $0x118] sm:$0xff] %v375_v35 }
  0x3c   : > { %378 = vst [vmem:[%s1477_s8 + $0x120] sm:$0xff] %v377_v36 }
  0x3d   : > { %380 = vst [vmem:[%s1477_s8 + $0x128] sm:$0xff] %v379_v37 }
  0x3e   : > { %382 = vst [vmem:[%s1477_s8 + $0x130] sm:$0xff] %v381_v38 }
  0x3f   : > { %384 = vst [vmem:[%s1477_s8 + $0x138] sm:$0xff] %v383_v39 }
  0x40   : > { %386 = vst [vmem:[%s1477_s8 + $0x140] sm:$0xff] %v385_v40 }
  0x41   : > { %388 = vst [vmem:[%s1477_s8 + $0x148] sm:$0xff] %v387_v41 }
  0x42   : > { %390 = vst [vmem:[%s1477_s8 + $0x150] sm:$0xff] %v389_v42 }
  0x43   : > { %392 = vst [vmem:[%s1477_s8 + $0x158] sm:$0xff] %v391_v43 }
  0x44   : > { %394 = vst [vmem:[%s1477_s8 + $0x160] sm:$0xff] %v393_v44 }
  0x45   : > { %396 = vst [vmem:[%s1477_s8 + $0x168] sm:$0xff] %v395_v45 }
  0x46   : > { %398 = vst [vmem:[%s1477_s8 + $0x170] sm:$0xff] %v397_v46 }
  0x47   : > { %400 = vst [vmem:[%s1477_s8 + $0x178] sm:$0xff] %v399_v47 }
  0x48 PF: > { %p1026_p7 = scmp.ge.s32.totalorder %s1389_s18, 1  ;;  %p413_p8 = scmp.lt.s32.totalorder %s1389_s18, 13 }
  0x4a   : > { %p414_p9 = pnand %p1026_p7, %p413_p8 }
  0x4b   : > { %s420_s9 = sand.u32 (!%p414_p9), 1, %s1365_s12   ;;  %s460_s10 = smul.u32 (!%p414_p9), 3, %s1373_s14 }
  0x4c   : > { %417 = sbr.rel (%p414_p9) target bundleno = 305 (0x131), region = 66  ;;  %s1028_s21 = sshll.u32 (!%p414_p9), %s1377_s15, 1 }
  0x4d   : > { %s1277_s11 = smul.u32 (!%p414_p9), 384, %s420_s9  ;;  %p463_p10 = scmp.lt.s32.totalorder (!%p414_p9), %s460_s10, 17 }
  0x4e   : > { %p473_p11 = scmp.lt.s32.totalorder (!%p414_p9), %s1028_s21, 3  ;;  %p1031_p12 = scmp.ne.s32.totalorder (!%p414_p9), %s1373_s14, 0 }
  0x4f   : > { %s1594_s5 = scalar_lea.vmem (!%p414_p9), [#allocation3], %s1277_s11 }
  0x51   : > { %s1744_s10 = smov (!%p463_p10, %s460_s10), 17  ;;  %s1746_s21 = smov (!%p473_p11, %s1028_s21), 3 }
  0x52   : > { %s1027_s22 = sshll.u32 %s1744_s10, 2  ;;  %s475_s12 = scalar_lea.vmem %s1729_s2, %s1746_s21 }
  0x53   : > { %s1582_s26 = scalar_lea.vmem %s1727_s0, %s1027_s22  ;;  %s1030_s29 = sshll.u32 %s1746_s21, 2 }
  0x54   : > { %s1592_s4 = scalar_lea.vmem %s1730_s3, %s1030_s29  ;;  %490 = sbr.rel (%p1031_p12) target bundleno = 92 (0x5c), region = 74 }
  0x59   : > { %v1391_v48 = vmov 0.0  }
  0x5a   : > { %491 = vst [vmem:[#allocation2] sm:$0xff] %v1391_v48 }
  0x5b   : > { %492 = vst [vmem:[#allocation2 + $0x8] sm:$0xff] %v1391_v48 }
  0x5c PF: > { %v1090_v49 = vld [vmem:[%s1594_s5 + $0x70] sm:$0xf]  ;;  %v1243_v50 = vld [vmem:[%s1594_s5 + $0x74] sm:$0xf0]  ;;  %v1082_v54 = vld [vmem:[%s1594_s5 + $0x60] sm:$0xf] }
  0x5d   : > { %v1154_v51 = vld [vmem:[%s1594_s5 + $0xf0] sm:$0xf]  ;;  %v1091_v52 = vor.u32 %v1243_v50, %v1090_v49  ;;  %v1259_v53 = vld [vmem:[%s1594_s5 + $0xf4] sm:$0xf0]  ;;  %v1241_v55 = vld [vmem:[%s1594_s5 + $0x64] sm:$0xf0] }
  0x5e   : > { %v1155_v56 = vor.u32 %v1259_v53, %v1154_v51  ;;  %v1146_v57 = vld [vmem:[%s1594_s5 + $0xe0] sm:$0xf]  ;;  %v1257_v58 = vld [vmem:[%s1594_s5 + $0xe4] sm:$0xf0]  ;;  %v1083_v59 = vor.u32 %v1241_v55, %v1082_v54  ;;  %v1074_v60 = vld [vmem:[%s1594_s5 + $0x50] sm:$0xf] }
  0x5f   : > { %796 = vmatpush.bf16.msra.mxu0 %v1091_v52  ;;  %v1147_v61 = vor.u32 %v1257_v58, %v1146_v57  ;;  %v1239_v62 = vld [vmem:[%s1594_s5 + $0x54] sm:$0xf0]  ;;  %v1218_v63 = vld [vmem:[%s1594_s5 + $0x170] sm:$0xf]  ;;  %v1210_v4 = vld [vmem:[%s1594_s5 + $0x160] sm:$0xf] }
  0x60   : > { %809 = vmatpush.bf16.msra.mxu1 %v1155_v56  ;;  %v1275_v0 = vld [vmem:[%s1594_s5 + $0x174] sm:$0xf0]  ;;  %v1138_v1 = vld [vmem:[%s1594_s5 + $0xd0] sm:$0xf]  ;;  %v1273_v5 = vld [vmem:[%s1594_s5 + $0x164] sm:$0xf0]  ;;  %v1075_v7 = vor.u32 %v1239_v62, %v1074_v60 }
  0x61   : > { %v1255_v2 = vld [vmem:[%s1594_s5 + $0xd4] sm:$0xf0]  ;;  %v1219_v3 = vor.u32 %v1275_v0, %v1218_v63  ;;  %v1242_v6 = vld [vmem:[%s1594_s5 + $0x74] sm:$0xf]  ;;  %v1066_v8 = vld [vmem:[%s1594_s5 + $0x40] sm:$0xf]  ;;  %v1211_v10 = vor.u32 %v1273_v5, %v1210_v4 }
  0x62   : > { %v1237_v9 = vld [vmem:[%s1594_s5 + $0x44] sm:$0xf0]  ;;  %v1092_v11 = vld [vmem:[%s1594_s5 + $0x78] sm:$0xf0]  ;;  %v1139_v12 = vor.u32 %v1255_v2, %v1138_v1  ;;  %v1130_v13 = vld [vmem:[%s1594_s5 + $0xc0] sm:$0xf] }
  0x63   : > { %797 = vmatpush.bf16.msra.mxu0 %v1083_v59  ;;  %822 = vmatpush.bf16.msra.mxu2 %v1219_v3  ;;  %v1253_v14 = vld [vmem:[%s1594_s5 + $0xc4] sm:$0xf0]  ;;  %v1095_v15 = vor.u32 %v1242_v6, %v1092_v11  ;;  %v1202_v16 = vld [vmem:[%s1594_s5 + $0x150] sm:$0xf]  ;;  %v1271_v17 = vld [vmem:[%s1594_s5 + $0x154] sm:$0xf0]  ;;  %v1067_v21 = vor.u32 %v1237_v9, %v1066_v8 }
  0x64   : > { %810 = vmatpush.bf16.msra.mxu1 %v1147_v61  ;;  %v1240_v18 = vld [vmem:[%s1594_s5 + $0x64] sm:$0xf]  ;;  %v1084_v19 = vld [vmem:[%s1594_s5 + $0x68] sm:$0xf0]  ;;  %v1058_v22 = vld [vmem:[%s1594_s5 + $0x30] sm:$0xf]  ;;  %v1203_v24 = vor.u32 %v1271_v17, %v1202_v16  ;;  %v1131_v26 = vor.u32 %v1253_v14, %v1130_v13 }
  0x65   : > { %835 = vmatpush.bf16.msra.mxu3 %v1095_v15  ;;  %v1087_v20 = vor.u32 %v1240_v18, %v1084_v19  ;;  %v1235_v23 = vld [vmem:[%s1594_s5 + $0x34] sm:$0xf0]  ;;  %v1194_v25 = vld [vmem:[%s1594_s5 + $0x140] sm:$0xf]  ;;  %v1269_v27 = vld [vmem:[%s1594_s5 + $0x144] sm:$0xf0] }
  0x66   : > { %v1238_v28 = vld [vmem:[%s1594_s5 + $0x54] sm:$0xf]  ;;  %v1076_v29 = vld [vmem:[%s1594_s5 + $0x58] sm:$0xf0]  ;;  %v1122_v30 = vld [vmem:[%s1594_s5 + $0xb0] sm:$0xf]  ;;  %v1059_v33 = vor.u32 %v1235_v23, %v1058_v22  ;;  %v1195_v35 = vor.u32 %v1269_v27, %v1194_v25 }
  0x67   : > { %798 = vmatpush.bf16.msra.mxu0 %v1075_v7  ;;  %823 = vmatpush.bf16.msra.mxu2 %v1211_v10  ;;  %v1251_v31 = vld [vmem:[%s1594_s5 + $0xb4] sm:$0xf0]  ;;  %v1079_v32 = vor.u32 %v1238_v28, %v1076_v29  ;;  %v1050_v34 = vld [vmem:[%s1594_s5 + $0x20] sm:$0xf]  ;;  %v1236_v36 = vld [vmem:[%s1594_s5 + $0x44] sm:$0xf] }
  0x68   : > { %811 = vmatpush.bf16.msra.mxu1 %v1139_v12  ;;  %v1068_v37 = vld [vmem:[%s1594_s5 + $0x48] sm:$0xf0]  ;;  %v1123_v38 = vor.u32 %v1251_v31, %v1122_v30  ;;  %v1233_v39 = vld [vmem:[%s1594_s5 + $0x24] sm:$0xf0]  ;;  %v1186_v40 = vld [vmem:[%s1594_s5 + $0x130] sm:$0xf] }
  0x69   : > { %836 = vmatpush.bf16.msra.mxu3 %v1087_v20  ;;  %v1267_v41 = vld [vmem:[%s1594_s5 + $0x134] sm:$0xf0]  ;;  %v1114_v42 = vld [vmem:[%s1594_s5 + $0xa0] sm:$0xf]  ;;  %v1249_v43 = vld [vmem:[%s1594_s5 + $0xa4] sm:$0xf0]  ;;  %v1071_v44 = vor.u32 %v1236_v36, %v1068_v37  ;;  %v1051_v45 = vor.u32 %v1233_v39, %v1050_v34 }
  0x6a   : > { %v1042_v46 = vld [vmem:[%s1594_s5 + $0x10] sm:$0xf]  ;;  %v1187_v47 = vor.u32 %v1267_v41, %v1186_v40  ;;  %v1234_v48 = vld [vmem:[%s1594_s5 + $0x34] sm:$0xf]  ;;  %v1060_v49 = vld [vmem:[%s1594_s5 + $0x38] sm:$0xf0]  ;;  %v1115_v50 = vor.u32 %v1249_v43, %v1114_v42 }
  0x6b   : > { %799 = vmatpush.bf16.msra.mxu0 %v1067_v21  ;;  %824 = vmatpush.bf16.msra.mxu2 %v1203_v24  ;;  %v1231_v51 = vld [vmem:[%s1594_s5 + $0x14] sm:$0xf0]  ;;  %v1178_v52 = vld [vmem:[%s1594_s5 + $0x120] sm:$0xf]  ;;  %v1265_v53 = vld [vmem:[%s1594_s5 + $0x124] sm:$0xf0]  ;;  %v1063_v58 = vor.u32 %v1234_v48, %v1060_v49 }
  0x6c   : > { %812 = vmatpush.bf16.msra.mxu1 %v1131_v26  ;;  %v1106_v54 = vld [vmem:[%s1594_s5 + $0x90] sm:$0xf]  ;;  %v1247_v55 = vld [vmem:[%s1594_s5 + $0x94] sm:$0xf0]  ;;  %v1034_v56 = vld [vmem:[%s1594_s5] sm:$0xf]  ;;  %v1043_v59 = vor.u32 %v1231_v51, %v1042_v46  ;;  %v1179_v60 = vor.u32 %v1265_v53, %v1178_v52 }
  0x6d   : > { %837 = vmatpush.bf16.msra.mxu3 %v1079_v32  ;;  %v1229_v57 = vld [vmem:[%s1594_s5 + $0x4] sm:$0xf0]  ;;  %v1232_v61 = vld [vmem:[%s1594_s5 + $0x24] sm:$0xf]  ;;  %v1052_v62 = vld [vmem:[%s1594_s5 + $0x28] sm:$0xf0]  ;;  %v1107_v0 = vor.u32 %v1247_v55, %v1106_v54 }
  0x6e   : > { %v495_v63 = vld [vmem:[%s1582_s26] sm:$0xff]  ;;  %v1098_v1 = vld [vmem:[%s1594_s5 + $0x80] sm:$0xf]  ;;  %v1263_v3 = vld [vmem:[%s1594_s5 + $0x114] sm:$0xf0]  ;;  %v1055_v9 = vor.u32 %v1232_v61, %v1052_v62  ;;  %v1035_v11 = vor.u32 %v1229_v57, %v1034_v56  ;;  %p1224_p13 = scmp.ne.s32.totalorder %s1373_s14, 5 }
  0x6f   : > { %800 = vmatpush.bf16.msra.mxu0 %v1059_v33  ;;  %825 = vmatpush.bf16.msra.mxu2 %v1195_v35  ;;  %v1170_v2 = vld [vmem:[%s1594_s5 + $0x110] sm:$0xf]  ;;  %v1245_v4 = vld [vmem:[%s1594_s5 + $0x84] sm:$0xf0]  ;;  %v1258_v5 = vld [vmem:[%s1594_s5 + $0xf4] sm:$0xf]  ;;  %v547_v10 = vunpack.c.l.b16 %v495_v63  ;;  %v548_v13 = vunpack.c.h.b16 %v495_v63 }
  0x70   : > { %813 = vmatpush.bf16.msra.mxu1 %v1123_v38  ;;  %v1156_v6 = vld [vmem:[%s1594_s5 + $0xf8] sm:$0xf0]  ;;  %v1274_v7 = vld [vmem:[%s1594_s5 + $0x174] sm:$0xf]  ;;  %v1171_v12 = vor.u32 %v1263_v3, %v1170_v2  ;;  %v496_v16 = vld [vmem:[%s1582_s26 + $0x8] sm:$0xf]  ;;  %v1099_v17 = vor.u32 %v1245_v4, %v1098_v1 }
  0x71   : > { %838 = vmatpush.bf16.msra.mxu3 %v1071_v44  ;;  %v1220_v8 = vld [vmem:[%s1594_s5 + $0x178] sm:$0xf0]  ;;  %v1230_v14 = vld [vmem:[%s1594_s5 + $0x14] sm:$0xf]  ;;  %v1159_v18 = vor.u32 %v1258_v5, %v1156_v6  ;;  %v1162_v19 = vld [vmem:[%s1594_s5 + $0x100] sm:$0xf]  ;;  %v550_v26 = vpack.c.b16 %v547_v10, %v547_v10  ;;  %v549_v28 = vunpack.c.l.b16 %v496_v16  ;;  %v1669_v29 = vpack.c.b16 %v548_v13, %v548_v13 }
  0x72   : > { %v1044_v15 = vld [vmem:[%s1594_s5 + $0x18] sm:$0xf0]  ;;  %v1261_v20 = vld [vmem:[%s1594_s5 + $0x104] sm:$0xf0]  ;;  %v1223_v21 = vor.u32 %v1274_v7, %v1220_v8  ;;  %v1256_v22 = vld [vmem:[%s1594_s5 + $0xe4] sm:$0xf] }
  0x73   : > { %801 = vmatpush.bf16.msra.mxu0 %v1051_v45  ;;  %826 = vmatpush.bf16.msra.mxu2 %v1187_v47  ;;  %v1148_v23 = vld [vmem:[%s1594_s5 + $0xe8] sm:$0xf0]  ;;  %v1272_v24 = vld [vmem:[%s1594_s5 + $0x164] sm:$0xf]  ;;  %v1047_v27 = vor.u32 %v1230_v14, %v1044_v15  ;;  %v1163_v30 = vor.u32 %v1261_v20, %v1162_v19  ;;  %v1254_v35 = vld [vmem:[%s1594_s5 + $0xd4] sm:$0xf]  ;;  %v552_v39 = vpack.c.b16 %v549_v28, %v549_v28 }
  0x74   : > { %814 = vmatpush.bf16.msra.mxu1 %v1115_v50  ;;  %v1212_v25 = vld [vmem:[%s1594_s5 + $0x168] sm:$0xf0]  ;;  %v1228_v31 = vld [vmem:[%s1594_s5 + $0x4] sm:$0xf]  ;;  %v1151_v33 = vor.u32 %v1256_v22, %v1148_v23  ;;  %v1140_v36 = vld [vmem:[%s1594_s5 + $0xd8] sm:$0xf0] }
  0x75   : > { %839 = vmatpush.bf16.msra.mxu3 %v1063_v58  ;;  %v1036_v32 = vld [vmem:[%s1594_s5 + $0x8] sm:$0xf0]  ;;  %v1215_v34 = vor.u32 %v1272_v24, %v1212_v25  ;;  %v1270_v37 = vld [vmem:[%s1594_s5 + $0x154] sm:$0xf]  ;;  %v1204_v38 = vld [vmem:[%s1594_s5 + $0x158] sm:$0xf0]  ;;  %v1143_v41 = vor.u32 %v1254_v35, %v1140_v36 }
  0x76   : > { %v1039_v40 = vor.u32 %v1228_v31, %v1036_v32  ;;  %v1207_v42 = vor.u32 %v1270_v37, %v1204_v38  ;;  %v1252_v43 = vld [vmem:[%s1594_s5 + $0xc4] sm:$0xf]  ;;  %v1132_v44 = vld [vmem:[%s1594_s5 + $0xc8] sm:$0xf0]  ;;  %v1250_v49 = vld [vmem:[%s1594_s5 + $0xb4] sm:$0xf] }
  0x77   : > { %802 = vmatpush.bf16.msra.mxu0 %v1043_v59  ;;  %827 = vmatpush.bf16.msra.mxu2 %v1179_v60  ;;  %v1268_v45 = vld [vmem:[%s1594_s5 + $0x144] sm:$0xf]  ;;  %v1196_v46 = vld [vmem:[%s1594_s5 + $0x148] sm:$0xf0]  ;;  %v1135_v47 = vor.u32 %v1252_v43, %v1132_v44  ;;  %v1124_v50 = vld [vmem:[%s1594_s5 + $0xb8] sm:$0xf0] }
  0x78   : > { %815 = vmatpush.bf16.msra.mxu1 %v1107_v0  ;;  %v1199_v48 = vor.u32 %v1268_v45, %v1196_v46  ;;  %v1266_v51 = vld [vmem:[%s1594_s5 + $0x134] sm:$0xf]  ;;  %v1188_v52 = vld [vmem:[%s1594_s5 + $0x138] sm:$0xf0]  ;;  %v1127_v53 = vor.u32 %v1250_v49, %v1124_v50  ;;  %v1248_v55 = vld [vmem:[%s1594_s5 + $0xa4] sm:$0xf] }
  0x79   : > { %840 = vmatpush.bf16.msra.mxu3 %v1055_v9  ;;  %v1191_v54 = vor.u32 %v1266_v51, %v1188_v52  ;;  %v1116_v56 = vld [vmem:[%s1594_s5 + $0xa8] sm:$0xf0]  ;;  %v1264_v57 = vld [vmem:[%s1594_s5 + $0x124] sm:$0xf]  ;;  %v1246_v61 = vld [vmem:[%s1594_s5 + $0x94] sm:$0xf] }
  0x7a   : > { %v1180_v58 = vld [vmem:[%s1594_s5 + $0x128] sm:$0xf0]  ;;  %v1119_v59 = vor.u32 %v1248_v55, %v1116_v56  ;;  %v1108_v62 = vld [vmem:[%s1594_s5 + $0x98] sm:$0xf0]  ;;  %v1262_v63 = vld [vmem:[%s1594_s5 + $0x114] sm:$0xf] }
  0x7b   : > { %803 = vmatpush.bf16.msra.mxu0 %v1035_v11  ;;  %828 = vmatpush.bf16.msra.mxu2 %v1171_v12  ;;  %v1183_v60 = vor.u32 %v1264_v57, %v1180_v58  ;;  %v1172_v0 = vld [vmem:[%s1594_s5 + $0x118] sm:$0xf0]  ;;  %v1111_v1 = vor.u32 %v1246_v61, %v1108_v62  ;;  %v1244_v3 = vld [vmem:[%s1594_s5 + $0x84] sm:$0xf]  ;;  %v1100_v4 = vld [vmem:[%s1594_s5 + $0x88] sm:$0xf0] }
  0x7c   : > { %816 = vmatpush.bf16.msra.mxu1 %v1099_v17  ;;  %v1175_v2 = vor.u32 %v1262_v63, %v1172_v0  ;;  %v1260_v5 = vld [vmem:[%s1594_s5 + $0x104] sm:$0xf]  ;;  %v1164_v6 = vld [vmem:[%s1594_s5 + $0x108] sm:$0xf0]  ;;  %v1103_v7 = vor.u32 %v1244_v3, %v1100_v4  ;;  %v493_v14 = vld [vmem:[#allocation2] sm:$0xff] }
  0x7d   : > { %841 = vmatpush.bf16.msra.mxu3 %v1047_v27  ;;  %v1167_v8 = vor.u32 %v1260_v5, %v1164_v6  ;;  %v494_v24 = vld [vmem:[#allocation2 + $0x8] sm:$0xff] }
  0x7e   : > { %804 = vmatmul.bf16.vlgmr.msra.gmra.mxu0 %v550_v26 }
  0x7f   : > { %848 = vmatpush.bf16.msrb.mxu0 %v1159_v18  ;;  %817 = vmatmul.bf16.vlgmr.msra.gmra.mxu1 %v1669_v29 }
  0x80   : > { %861 = vmatpush.bf16.msrb.mxu1 %v1223_v21  ;;  %829 = vmatpush.bf16.msra.mxu2 %v1163_v30 }
  0x81   : > { %842 = vmatpush.bf16.msra.mxu3 %v1039_v40 }
  0x83   : > { %849 = vmatpush.bf16.msrb.mxu0 %v1151_v33  ;;  %830 = vmatmul.bf16.vlgmr.msra.gmra.mxu2 %v552_v39 }
  0x84   : > { %862 = vmatpush.bf16.msrb.mxu1 %v1215_v34  ;;  %843 = vmatmul.bf16.vlgmr.msra.gmra.mxu3 %v550_v26 }
  0x87   : > { %850 = vmatpush.bf16.msrb.mxu0 %v1143_v41 }
  0x88   : > { %863 = vmatpush.bf16.msrb.mxu1 %v1207_v42 }
  0x8b   : > { %851 = vmatpush.bf16.msrb.mxu0 %v1135_v47 }
  0x8c   : > { %864 = vmatpush.bf16.msrb.mxu1 %v1199_v48 }
  0x8f   : > { %852 = vmatpush.bf16.msrb.mxu0 %v1127_v53 }
  0x90   : > { %865 = vmatpush.bf16.msrb.mxu1 %v1191_v54 }
  0x93   : > { %853 = vmatpush.bf16.msrb.mxu0 %v1119_v59 }
  0x94   : > { %866 = vmatpush.bf16.msrb.mxu1 %v1183_v60 }
  0x97   : > { %854 = vmatpush.bf16.msrb.mxu0 %v1111_v1 }
  0x98   : > { %867 = vmatpush.bf16.msrb.mxu1 %v1175_v2 }
  0x9b   : > { %855 = vmatpush.bf16.msrb.mxu0 %v1103_v7 }
  0x9c   : > { %868 = vmatpush.bf16.msrb.mxu1 %v1167_v8 }
  0x9e   : > { %856 = vmatmul.bf16.vlgmr.msrb.gmra.mxu0 %v1669_v29 }
  0x9f   : > { %869 = vmatmul.bf16.vlgmr.msrb.gmra.mxu1 %v552_v39 }
  0xfb   : > { %v805_v9 = vpop.f32.mrf.mxu0 }
  0xfc   : > { %v818_v10 = vpop.f32.mrf.mxu1 }
  0xfd   : > { %v819_v11 = vadd.f32 %v818_v10, %v805_v9 }
 0x103   : > { %v807_v12 = vpop.f32.mrf.mxu0 }
 0x104   : > { %v820_v13 = vpop.f32.mrf.mxu1 }
 0x106   : > { %v831_v15 = vpop.f32.mrf.mxu2 }
 0x107   : > { %v832_v16 = vadd.f32 %v831_v15, %v819_v11  ;;  %v844_v18 = vpop.f32.mrf.mxu3 }
 0x109   : > { %v874_v17 = vadd.f32 %v832_v16, %v493_v14 }
 0x10b   : > { %876 = vst [vmem:[#allocation2] sm:$0xff] %v874_v17 }
 0x10e   : > { %v833_v19 = vpop.f32.mrf.mxu2 }
 0x10f   : > { %v846_v20 = vpop.f32.mrf.mxu3 }
 0x11b   : > { %v857_v21 = vpop.f32.mrf.mxu0 }
 0x11c   : > { %v858_v22 = vadd.f32 %v857_v21, %v844_v18  ;;  %v870_v23 = vpop.f32.mrf.mxu1 }
 0x11e   : > { %v871_v25 = vadd.f32 %v870_v23, %v858_v22 }
 0x120   : > { %v875_v26 = vadd.f32 %v871_v25, %v494_v24  ;;  %881 = sbr.rel (%p1224_p13) target bundleno = 305 (0x131), region = 78 }
 0x122   : > { %877 = vst [vmem:[#allocation2 + $0x8] sm:$0xff] %v875_v26 }
 0x123   : > { %v859_v27 = vpop.f32.mrf.mxu0 }
 0x124   : > { %v872_v28 = vpop.f32.mrf.mxu1 }
 0x125   : > { %v882_v29 = vld [vmem:[#allocation2] sm:$0xff] }
 0x126   : > { %v884_v31 = vld [vmem:[%s475_s12] sm:$0x3] }
 0x127   : > { %v886_v32 = vperm.slane %v884_v31, 0  ;;  %v887_v33 = vperm.slane %v884_v31, 1 }
 0x129   : > { %v883_v30 = vld [vmem:[#allocation2 + $0x8] sm:$0xff]  ;;  %v890_v34 = vadd.f32 %v886_v32, %v882_v29 }
 0x12a   : > { %v891_v35 = vadd.f32 %v887_v33, %v883_v30 }
 0x12b   : > { %v892_v36 = vmax.f32 %v890_v34, 0.0 }
 0x12c   : > { %v893_v37 = vmax.f32 %v891_v35, 0.0 }
 0x12e   : > { %v894_v38 = vpack.c.bf16 %v893_v37, %v892_v36 }
 0x130   : > { %895 = vst [vmem:[%s1592_s4] sm:$0xff] %v894_v38 }
 0x131 PF: > { %s13_s18 = sadd.s32 1, %s1389_s18   ;;  %s1731_s12 = smov %s1369_s13 }
 0x132   : > { %p10_p0 = scmp.ge.s32.totalorder %s13_s18, 14   ;;  %s1732_s13 = smov %s1463_s25 }
 0x133   : > { %s1733_s14 = smov %s1381_s16  ;;  %s1734_s15 = smov %s1385_s17 }
 0x134   : > { %s1735_s16 = smov %s1738_s19  ;;  %s1736_s17 = smov %s1742_s20 }
 0x135   :  { %12 = sbr.rel (!%p10_p0) target bundleno = 4 (0x4), region = 119 }

// kernel: resnet_forward.39
= control target key start
LH: loop header
LB: loop body
LE: loop exit
PB: predicated region body
PF: predicated region fallthrough
CT: control target
= control target key end

     0   :  { %s1101_s12 = smov 0   ;;  %s1103_s13 = smov 0   ;;  %s1306_s0 = inlined_call_operand.vmem [shape: bf16[8,256], index: 0, kind: input, shape index: {}]   ;;  %s1307_s1 = inlined_call_operand.vmem [shape: bf16[256,512], index: 1, kind: input, shape index: {}]   ;;  %s1308_s2 = inlined_call_operand.vmem [shape: f32[1,512], index: 2, kind: input, shape index: {}]   ;;  %s1309_s3 = inlined_call_operand.vmem [shape: bf16[8,512], index: 3, kind: output, shape index: {}]  }
   0x1   :  { %s1105_s14 = smov 0   ;;  %s1107_s15 = smov 0  }
   0x2   :  { %s1109_s16 = smov 0  }
   0x3 LB: > { %s28_s17 = sadd.s32 1, %s1075_s15  ;;  %p76_p1 = scmp.ne.s32.totalorder %s1067_s13, %s1063_s12  ;;  %s1079_s16 = sphi %s1109_s16, %s13_s16   ;;  %s1075_s15 = sphi %s1107_s15, %s1313_s15   ;;  %s1071_s14 = sphi %s1105_s14, %s1312_s14   ;;  %s1067_s13 = sphi %s1103_s13, %s1311_s13   ;;  %s1063_s12 = sphi %s1101_s12, %s1310_s12  }
   0x4   : > { %p30_p0 = scmp.ge.s32.totalorder %s28_s17, 2  ;;  %p77_p2 = scmp.eq.s32.totalorder %s1079_s16, 0 }
   0x5   : > { %s69_s19 = sadd.s32 1, %s1067_s13  ;;  %p829_p5 = scmp.ge.s32.totalorder %s1079_s16, 2 }
   0x6   : > { %s1315_s17 = smov (%p30_p0, %s28_s17), 0  ;;  %p78_p3 = por %p77_p2, %p76_p1 }
   0x7   : > { %s65_s18 = ssub.s32 %s1075_s15, %s1315_s17  ;;  %169 = sbr.rel (%p829_p5) target bundleno = 48 (0x30), region = 20 }
   0x8   : > { %p67_p4 = scmp.eq.s32.totalorder %s65_s18, 0 }
   0xa   : > { %s1136_s20 = scalar_select %p67_p4, %s1067_s13, %s69_s19  }
   0xc   : > { %172 = sbr.rel (!%p78_p3) target bundleno = 48 (0x30), region = 24  ;;  %s174_s21 = sand.u32 (%p78_p3), 1, %s1067_s13  }
   0xd   : > { %s968_s22 = sshll.u32 (%p78_p3), %s1075_s15, 3  ;;  %s830_s23 = sshll.u32 (%p78_p3), %s174_s21, 8 }
   0xe   : > { %s1144_s26 = scalar_lea.vmem (%p78_p3), %s1307_s1, %s968_s22  ;;  %s1149_s27 = scalar_lea.vmem (%p78_p3), [#allocation3], %s830_s23 }
   0xf   : > { %v273_v0 = vld [vmem:[%s1144_s26] sm:$0xff] (%p78_p3)  ;;  %v275_v1 = vld [vmem:[%s1144_s26 + $0x10] sm:$0xff] (%p78_p3) }
  0x10   : > { %v277_v2 = vld [vmem:[%s1144_s26 + $0x20] sm:$0xff] (%p78_p3)  ;;  %274 = vst [vmem:[%s1149_s27] sm:$0xff] (%p78_p3), %v273_v0  ;;  %v279_v3 = vld [vmem:[%s1144_s26 + $0x30] sm:$0xff] (%p78_p3) }
  0x11   : > { %276 = vst [vmem:[%s1149_s27 + $0x8] sm:$0xff] %v275_v1  ;;  %v281_v4 = vld [vmem:[%s1144_s26 + $0x40] sm:$0xff]  ;;  %v283_v5 = vld [vmem:[%s1144_s26 + $0x50] sm:$0xff] }
  0x12   : > { %278 = vst [vmem:[%s1149_s27 + $0x10] sm:$0xff] %v277_v2  ;;  %v285_v6 = vld [vmem:[%s1144_s26 + $0x60] sm:$0xff]  ;;  %v287_v7 = vld [vmem:[%s1144_s26 + $0x70] sm:$0xff] }
  0x13   : > { %280 = vst [vmem:[%s1149_s27 + $0x18] sm:$0xff] %v279_v3  ;;  %v289_v8 = vld [vmem:[%s1144_s26 + $0x80] sm:$0xff]  ;;  %v291_v9 = vld [vmem:[%s1144_s26 + $0x90] sm:$0xff] }
  0x14   : > { %282 = vst [vmem:[%s1149_s27 + $0x20] sm:$0xff] %v281_v4  ;;  %v293_v10 = vld [vmem:[%s1144_s26 + $0xa0] sm:$0xff]  ;;  %v295_v11 = vld [vmem:[%s1144_s26 + $0xb0] sm:$0xff] }
  0x15   : > { %284 = vst [vmem:[%s1149_s27 + $0x28] sm:$0xff] %v283_v5  ;;  %v297_v12 = vld [vmem:[%s1144_s26 + $0xc0] sm:$0xff]  ;;  %v299_v13 = vld [vmem:[%s1144_s26 + $0xd0] sm:$0xff] }
  0x16   : > { %286 = vst [vmem:[%s1149_s27 + $0x30] sm:$0xff] %v285_v6  ;;  %v301_v14 = vld [vmem:[%s1144_s26 + $0xe0] sm:$0xff]  ;;  %v303_v15 = vld [vmem:[%s1144_s26 + $0xf0] sm:$0xff] }
  0x17   : > { %288 = vst [vmem:[%s1149_s27 + $0x38] sm:$0xff] %v287_v7  ;;  %v305_v16 = vld [vmem:[%s1144_s26 + $0x100] sm:$0xff]  ;;  %v307_v17 = vld [vmem:[%s1144_s26 + $0x110] sm:$0xff] }
  0x18   : > { %290 = vst [vmem:[%s1149_s27 + $0x40] sm:$0xff] %v289_v8  ;;  %v309_v18 = vld [vmem:[%s1144_s26 + $0x120] sm:$0xff]  ;;  %v311_v19 = vld [vmem:[%s1144_s26 + $0x130] sm:$0xff] }
  0x19   : > { %292 = vst [vmem:[%s1149_s27 + $0x48] sm:$0xff] %v291_v9  ;;  %v313_v20 = vld [vmem:[%s1144_s26 + $0x140] sm:$0xff]  ;;  %v315_v21 = vld [vmem:[%s1144_s26 + $0x150] sm:$0xff] }
  0x1a   : > { %294 = vst [vmem:[%s1149_s27 + $0x50] sm:$0xff] %v293_v10  ;;  %v317_v22 = vld [vmem:[%s1144_s26 + $0x160] sm:$0xff]  ;;  %v319_v23 = vld [vmem:[%s1144_s26 + $0x170] sm:$0xff] }
  0x1b   : > { %296 = vst [vmem:[%s1149_s27 + $0x58] sm:$0xff] %v295_v11  ;;  %v321_v24 = vld [vmem:[%s1144_s26 + $0x180] sm:$0xff]  ;;  %v323_v25 = vld [vmem:[%s1144_s26 + $0x190] sm:$0xff] }
  0x1c   : > { %298 = vst [vmem:[%s1149_s27 + $0x60] sm:$0xff] %v297_v12  ;;  %v325_v26 = vld [vmem:[%s1144_s26 + $0x1a0] sm:$0xff]  ;;  %v327_v27 = vld [vmem:[%s1144_s26 + $0x1b0] sm:$0xff] }
  0x1d   : > { %300 = vst [vmem:[%s1149_s27 + $0x68] sm:$0xff] %v299_v13  ;;  %v329_v28 = vld [vmem:[%s1144_s26 + $0x1c0] sm:$0xff]  ;;  %v331_v29 = vld [vmem:[%s1144_s26 + $0x1d0] sm:$0xff] }
  0x1e   : > { %302 = vst [vmem:[%s1149_s27 + $0x70] sm:$0xff] %v301_v14  ;;  %v333_v30 = vld [vmem:[%s1144_s26 + $0x1e0] sm:$0xff]  ;;  %v335_v31 = vld [vmem:[%s1144_s26 + $0x1f0] sm:$0xff] }
  0x1f   : > { %304 = vst [vmem:[%s1149_s27 + $0x78] sm:$0xff] %v303_v15 }
  0x20   : > { %306 = vst [vmem:[%s1149_s27 + $0x80] sm:$0xff] %v305_v16 }
  0x21   : > { %308 = vst [vmem:[%s1149_s27 + $0x88] sm:$0xff] %v307_v17 }
  0x22   : > { %310 = vst [vmem:[%s1149_s27 + $0x90] sm:$0xff] %v309_v18 }
  0x23   : > { %312 = vst [vmem:[%s1149_s27 + $0x98] sm:$0xff] %v311_v19 }
  0x24   : > { %314 = vst [vmem:[%s1149_s27 + $0xa0] sm:$0xff] %v313_v20 }
  0x25   : > { %316 = vst [vmem:[%s1149_s27 + $0xa8] sm:$0xff] %v315_v21 }
  0x26   : > { %318 = vst [vmem:[%s1149_s27 + $0xb0] sm:$0xff] %v317_v22 }
  0x27   : > { %320 = vst [vmem:[%s1149_s27 + $0xb8] sm:$0xff] %v319_v23 }
  0x28   : > { %322 = vst [vmem:[%s1149_s27 + $0xc0] sm:$0xff] %v321_v24 }
  0x29   : > { %324 = vst [vmem:[%s1149_s27 + $0xc8] sm:$0xff] %v323_v25 }
  0x2a   : > { %326 = vst [vmem:[%s1149_s27 + $0xd0] sm:$0xff] %v325_v26 }
  0x2b   : > { %328 = vst [vmem:[%s1149_s27 + $0xd8] sm:$0xff] %v327_v27 }
  0x2c   : > { %330 = vst [vmem:[%s1149_s27 + $0xe0] sm:$0xff] %v329_v28 }
  0x2d   : > { %332 = vst [vmem:[%s1149_s27 + $0xe8] sm:$0xff] %v331_v29 }
  0x2e   : > { %334 = vst [vmem:[%s1149_s27 + $0xf0] sm:$0xff] %v333_v30 }
  0x2f   : > { %336 = vst [vmem:[%s1149_s27 + $0xf8] sm:$0xff] %v335_v31 }
  0x30 PF: > { %p833_p6 = scmp.ge.s32.totalorder %s1079_s16, 1  ;;  %p349_p7 = scmp.lt.s32.totalorder %s1079_s16, 3 }
  0x32   : > { %p350_p8 = pnand %p833_p6, %p349_p7 }
  0x33   : > { %s356_s28 = sand.u32 (!%p350_p8), 1, %s1063_s12   ;;  %s835_s6 = sshll.u32 (!%p350_p8), %s1071_s14, 1 }
  0x34   : > { %353 = sbr.rel (%p350_p8) target bundleno = 233 (0xe9), region = 66  ;;  %s834_s29 = sshll.u32 (!%p350_p8), %s356_s28, 8 }
  0x35   : > { %s1215_s30 = scalar_lea.vmem (!%p350_p8), [#allocation3], %s834_s29  ;;  %p409_p9 = scmp.lt.s32.totalorder (!%p350_p8), %s835_s6, 3 }
  0x39   : > { %v896_v32 = vld [vmem:[%s1215_s30 + $0x70] sm:$0xf]  ;;  %v984_v33 = vld [vmem:[%s1215_s30 + $0x74] sm:$0xf0]  ;;  %v983_v37 = vld [vmem:[%s1215_s30 + $0x74] sm:$0xf] }
  0x3a   : > { %v960_v34 = vld [vmem:[%s1215_s30 + $0xf0] sm:$0xf]  ;;  %v897_v35 = vor.u32 %v984_v33, %v896_v32  ;;  %v1000_v36 = vld [vmem:[%s1215_s30 + $0xf4] sm:$0xf0]  ;;  %v898_v38 = vld [vmem:[%s1215_s30 + $0x78] sm:$0xf0] }
  0x3b   : > { %v961_v39 = vor.u32 %v1000_v36, %v960_v34  ;;  %v901_v40 = vor.u32 %v983_v37, %v898_v38  ;;  %v999_v41 = vld [vmem:[%s1215_s30 + $0xf4] sm:$0xf]  ;;  %v962_v42 = vld [vmem:[%s1215_s30 + $0xf8] sm:$0xf0]  ;;  %v888_v43 = vld [vmem:[%s1215_s30 + $0x60] sm:$0xf] }
  0x3c   : > { %631 = vmatpush.bf16.msra.mxu0 %v897_v35  ;;  %v965_v44 = vor.u32 %v999_v41, %v962_v42  ;;  %v982_v45 = vld [vmem:[%s1215_s30 + $0x64] sm:$0xf0]  ;;  %v952_v46 = vld [vmem:[%s1215_s30 + $0xe0] sm:$0xf]  ;;  %v981_v50 = vld [vmem:[%s1215_s30 + $0x64] sm:$0xf] }
  0x3d   : > { %v998_v47 = vld [vmem:[%s1215_s30 + $0xe4] sm:$0xf0]  ;;  %644 = vmatpush.bf16.msra.mxu1 %v961_v39  ;;  %657 = vmatpush.bf16.msra.mxu2 %v901_v40  ;;  %v889_v48 = vor.u32 %v982_v45, %v888_v43  ;;  %v890_v51 = vld [vmem:[%s1215_s30 + $0x68] sm:$0xf0]  ;;  %v997_v52 = vld [vmem:[%s1215_s30 + $0xe4] sm:$0xf] }
  0x3e   : > { %v953_v49 = vor.u32 %v998_v47, %v952_v46  ;;  %670 = vmatpush.bf16.msra.mxu3 %v965_v44  ;;  %v893_v53 = vor.u32 %v981_v50, %v890_v51  ;;  %v954_v54 = vld [vmem:[%s1215_s30 + $0xe8] sm:$0xf0]  ;;  %v880_v55 = vld [vmem:[%s1215_s30 + $0x50] sm:$0xf]  ;;  %v980_v56 = vld [vmem:[%s1215_s30 + $0x54] sm:$0xf0] }
  0x3f   : > { %v957_v57 = vor.u32 %v997_v52, %v954_v54  ;;  %v944_v58 = vld [vmem:[%s1215_s30 + $0xd0] sm:$0xf]  ;;  %v996_v59 = vld [vmem:[%s1215_s30 + $0xd4] sm:$0xf0]  ;;  %v979_v60 = vld [vmem:[%s1215_s30 + $0x54] sm:$0xf]  ;;  %v881_v61 = vor.u32 %v980_v56, %v880_v55 }
  0x40   : > { %632 = vmatpush.bf16.msra.mxu0 %v889_v48  ;;  %v882_v62 = vld [vmem:[%s1215_s30 + $0x58] sm:$0xf0]  ;;  %v995_v63 = vld [vmem:[%s1215_s30 + $0xd4] sm:$0xf]  ;;  %v945_v1 = vor.u32 %v996_v59, %v944_v58  ;;  %v872_v3 = vld [vmem:[%s1215_s30 + $0x40] sm:$0xf] }
  0x41   : > { %v946_v0 = vld [vmem:[%s1215_s30 + $0xd8] sm:$0xf0]  ;;  %645 = vmatpush.bf16.msra.mxu1 %v953_v49  ;;  %658 = vmatpush.bf16.msra.mxu2 %v893_v53  ;;  %v885_v2 = vor.u32 %v979_v60, %v882_v62  ;;  %v978_v4 = vld [vmem:[%s1215_s30 + $0x44] sm:$0xf0]  ;;  %v936_v5 = vld [vmem:[%s1215_s30 + $0xc0] sm:$0xf] }
  0x42   : > { %671 = vmatpush.bf16.msra.mxu3 %v957_v57  ;;  %v949_v6 = vor.u32 %v995_v63, %v946_v0  ;;  %v994_v7 = vld [vmem:[%s1215_s30 + $0xc4] sm:$0xf0]  ;;  %v977_v8 = vld [vmem:[%s1215_s30 + $0x44] sm:$0xf]  ;;  %v874_v9 = vld [vmem:[%s1215_s30 + $0x48] sm:$0xf0]  ;;  %v873_v12 = vor.u32 %v978_v4, %v872_v3 }
  0x43   : > { %v993_v10 = vld [vmem:[%s1215_s30 + $0xc4] sm:$0xf]  ;;  %v938_v11 = vld [vmem:[%s1215_s30 + $0xc8] sm:$0xf0]  ;;  %v937_v13 = vor.u32 %v994_v7, %v936_v5  ;;  %v877_v14 = vor.u32 %v977_v8, %v874_v9  ;;  %v864_v15 = vld [vmem:[%s1215_s30 + $0x30] sm:$0xf] }
  0x44   : > { %633 = vmatpush.bf16.msra.mxu0 %v881_v61  ;;  %v976_v16 = vld [vmem:[%s1215_s30 + $0x34] sm:$0xf0]  ;;  %v928_v17 = vld [vmem:[%s1215_s30 + $0xb0] sm:$0xf]  ;;  %v941_v18 = vor.u32 %v993_v10, %v938_v11  ;;  %v975_v20 = vld [vmem:[%s1215_s30 + $0x34] sm:$0xf] }
  0x45   : > { %646 = vmatpush.bf16.msra.mxu1 %v945_v1  ;;  %659 = vmatpush.bf16.msra.mxu2 %v885_v2  ;;  %v992_v19 = vld [vmem:[%s1215_s30 + $0xb4] sm:$0xf0]  ;;  %v866_v21 = vld [vmem:[%s1215_s30 + $0x38] sm:$0xf0]  ;;  %v991_v22 = vld [vmem:[%s1215_s30 + $0xb4] sm:$0xf]  ;;  %v865_v24 = vor.u32 %v976_v16, %v864_v15 }
  0x46   : > { %672 = vmatpush.bf16.msra.mxu3 %v949_v6  ;;  %v930_v23 = vld [vmem:[%s1215_s30 + $0xb8] sm:$0xf0]  ;;  %v929_v25 = vor.u32 %v992_v19, %v928_v17  ;;  %v869_v26 = vor.u32 %v975_v20, %v866_v21  ;;  %v856_v27 = vld [vmem:[%s1215_s30 + $0x20] sm:$0xf]  ;;  %v974_v28 = vld [vmem:[%s1215_s30 + $0x24] sm:$0xf0] }
  0x47   : > { %v920_v29 = vld [vmem:[%s1215_s30 + $0xa0] sm:$0xf]  ;;  %v933_v30 = vor.u32 %v991_v22, %v930_v23  ;;  %v990_v31 = vld [vmem:[%s1215_s30 + $0xa4] sm:$0xf0]  ;;  %v973_v32 = vld [vmem:[%s1215_s30 + $0x24] sm:$0xf]  ;;  %v857_v36 = vor.u32 %v974_v28, %v856_v27 }
  0x48   : > { %634 = vmatpush.bf16.msra.mxu0 %v873_v12  ;;  %v858_v33 = vld [vmem:[%s1215_s30 + $0x28] sm:$0xf0]  ;;  %v989_v34 = vld [vmem:[%s1215_s30 + $0xa4] sm:$0xf]  ;;  %v921_v37 = vor.u32 %v990_v31, %v920_v29  ;;  %v848_v39 = vld [vmem:[%s1215_s30 + $0x10] sm:$0xf] }
  0x49   : > { %647 = vmatpush.bf16.msra.mxu1 %v937_v13  ;;  %660 = vmatpush.bf16.msra.mxu2 %v877_v14  ;;  %v922_v35 = vld [vmem:[%s1215_s30 + $0xa8] sm:$0xf0]  ;;  %v861_v38 = vor.u32 %v973_v32, %v858_v33  ;;  %v972_v40 = vld [vmem:[%s1215_s30 + $0x14] sm:$0xf0]  ;;  %v912_v41 = vld [vmem:[%s1215_s30 + $0x90] sm:$0xf] }
  0x4a   : > { %673 = vmatpush.bf16.msra.mxu3 %v941_v18  ;;  %v925_v42 = vor.u32 %v989_v34, %v922_v35  ;;  %v988_v43 = vld [vmem:[%s1215_s30 + $0x94] sm:$0xf0]  ;;  %v971_v44 = vld [vmem:[%s1215_s30 + $0x14] sm:$0xf]  ;;  %v850_v45 = vld [vmem:[%s1215_s30 + $0x18] sm:$0xf0]  ;;  %v849_v48 = vor.u32 %v972_v40, %v848_v39 }
  0x4b   : > { %v987_v46 = vld [vmem:[%s1215_s30 + $0x94] sm:$0xf]  ;;  %v914_v47 = vld [vmem:[%s1215_s30 + $0x98] sm:$0xf0]  ;;  %v431_v49 = vld [vmem:[%s1306_s0] sm:$0xff]  ;;  %v913_v50 = vor.u32 %v988_v43, %v912_v41  ;;  %v853_v51 = vor.u32 %v971_v44, %v850_v45  ;;  %s1317_s6 = smov (!%p409_p9, %s835_s6), 3 }
  0x4c   : > { %635 = vmatpush.bf16.msra.mxu0 %v865_v24  ;;  %v840_v52 = vld [vmem:[%s1215_s30] sm:$0xf]  ;;  %v970_v53 = vld [vmem:[%s1215_s30 + $0x4] sm:$0xf0]  ;;  %v917_v55 = vor.u32 %v987_v46, %v914_v47  ;;  %v969_v57 = vld [vmem:[%s1215_s30 + $0x4] sm:$0xf]  ;;  %v465_v61 = vunpack.c.l.b16 %v431_v49  ;;  %v466_v63 = vunpack.c.h.b16 %v431_v49  ;;  %s411_s9 = scalar_lea.vmem %s1308_s2, %s1317_s6 }
  0x4d   : > { %648 = vmatpush.bf16.msra.mxu1 %v929_v25  ;;  %661 = vmatpush.bf16.msra.mxu2 %v869_v26  ;;  %v904_v54 = vld [vmem:[%s1215_s30 + $0x80] sm:$0xf]  ;;  %v986_v56 = vld [vmem:[%s1215_s30 + $0x84] sm:$0xf0]  ;;  %v842_v58 = vld [vmem:[%s1215_s30 + $0x8] sm:$0xf0]  ;;  %v841_v62 = vor.u32 %v970_v53, %v840_v52 }
  0x4e   : > { %674 = vmatpush.bf16.msra.mxu3 %v933_v30  ;;  %v985_v59 = vld [vmem:[%s1215_s30 + $0x84] sm:$0xf]  ;;  %v906_v60 = vld [vmem:[%s1215_s30 + $0x88] sm:$0xf0]  ;;  %v905_v0 = vor.u32 %v986_v56, %v904_v54  ;;  %v845_v1 = vor.u32 %v969_v57, %v842_v58  ;;  %v467_v3 = vpack.c.b16 %v465_v61, %v465_v61  ;;  %v468_v4 = vpack.c.b16 %v466_v63, %v466_v63  ;;  %v692_v7 = vld [vmem:[%s411_s9] sm:$0x3] }
  0x4f   : > { %v909_v2 = vor.u32 %v985_v59, %v906_v60  ;;  %v694_v9 = vperm.slane %v692_v7, 0  ;;  %v695_v11 = vperm.slane %v692_v7, 1  ;;  %s837_s10 = sshll.u32 %s1317_s6, 2 }
  0x50   : > { %636 = vmatpush.bf16.msra.mxu0 %v857_v36  ;;  %s421_s14 = scalar_lea.vmem %s1309_s3, %s837_s10 }
  0x51   : > { %649 = vmatpush.bf16.msra.mxu1 %v921_v37  ;;  %662 = vmatpush.bf16.msra.mxu2 %v861_v38 }
  0x52   : > { %675 = vmatpush.bf16.msra.mxu3 %v925_v42 }
  0x54   : > { %637 = vmatpush.bf16.msra.mxu0 %v849_v48 }
  0x55   : > { %650 = vmatpush.bf16.msra.mxu1 %v913_v50  ;;  %663 = vmatpush.bf16.msra.mxu2 %v853_v51 }
  0x56   : > { %676 = vmatpush.bf16.msra.mxu3 %v917_v55 }
  0x58   : > { %638 = vmatpush.bf16.msra.mxu0 %v841_v62 }
  0x59   : > { %651 = vmatpush.bf16.msra.mxu1 %v905_v0  ;;  %664 = vmatpush.bf16.msra.mxu2 %v845_v1 }
  0x5a   : > { %677 = vmatpush.bf16.msra.mxu3 %v909_v2 }
  0x5b   : > { %639 = vmatmul.bf16.vlgmr.msra.gmra.mxu0 %v467_v3 }
  0x5c   : > { %652 = vmatmul.bf16.vlgmr.msra.gmra.mxu1 %v468_v4  ;;  %665 = vmatmul.bf16.vlgmr.msra.gmra.mxu2 %v467_v3 }
  0x5d   : > { %678 = vmatmul.bf16.vlgmr.msra.gmra.mxu3 %v468_v4 }
  0xd8   : > { %v640_v5 = vpop.f32.mrf.mxu0 }
  0xd9   : > { %v653_v6 = vpop.f32.mrf.mxu1 }
  0xda   : > { %v654_v8 = vadd.f32 %v653_v6, %v640_v5 }
  0xdc   : > { %v698_v14 = vadd.f32 %v694_v9, %v654_v8 }
  0xdf   : > { %v666_v10 = vpop.f32.mrf.mxu2 }
  0xe0   : > { %v679_v12 = vpop.f32.mrf.mxu3  ;;  %v642_v13 = vpop.f32.mrf.mxu0 }
  0xe1   : > { %v680_v15 = vadd.f32 %v679_v12, %v666_v10  ;;  %v655_v16 = vpop.f32.mrf.mxu1 }
  0xe3   : > { %v699_v17 = vadd.f32 %v695_v11, %v680_v15 }
  0xe5   : > { %v700_v18 = vpack.c.bf16 %v699_v17, %v698_v14 }
  0xe7   : > { %701 = vst [vmem:[%s421_s14] sm:$0xff] %v700_v18  ;;  %v668_v19 = vpop.f32.mrf.mxu2 }
  0xe8   : > { %v681_v20 = vpop.f32.mrf.mxu3 }
  0xe9 PF: > { %s13_s16 = sadd.s32 1, %s1079_s16   ;;  %s1310_s12 = smov %s1067_s13 }
  0xea   : > { %p10_p10 = scmp.ge.s32.totalorder %s13_s16, 4   ;;  %s1311_s13 = smov %s1136_s20 }
  0xeb   : > { %s1312_s14 = smov %s1075_s15  ;;  %s1313_s15 = smov %s1315_s17 }
  0xec   :  { %12 = sbr.rel (!%p10_p10) target bundleno = 3 (0x3), region = 119 }

// kernel: resnet_forward.40
= control target key start
LH: loop header
LB: loop body
LE: loop exit
PB: predicated region body
PF: predicated region fallthrough
CT: control target
= control target key end

     0   :  { %s1776_s15 = smov 0   ;;  %s1778_s16 = smov 0   ;;  %s2173_s0 = inlined_call_operand.vmem [shape: bf16[8,4608], index: 0, kind: input, shape index: {}]   ;;  %s2174_s1 = inlined_call_operand.vmem [shape: bf16[4608,512], index: 1, kind: input, shape index: {}]   ;;  %s2175_s2 = inlined_call_operand.vmem [shape: f32[1,512], index: 2, kind: input, shape index: {}]   ;;  %s2176_s3 = inlined_call_operand.vmem [shape: bf16[8,512], index: 3, kind: input, shape index: {}]   ;;  %s2177_s4 = inlined_call_operand.vmem [shape: bf16[8,512], index: 4, kind: output, shape index: {}]  }
   0x1   :  { %s1780_s17 = smov 0   ;;  %s1782_s18 = smov 0  }
   0x2   :  { %s1784_s19 = smov 0   ;;  %s1786_s20 = smov 0  }
   0x3   :  { %s1788_s21 = smov 0  }
   0x4 LB: > { %s26_s22 = sadd.s32 1, %s1740_s19  ;;  %s29_s23 = sadd.s32 1, %s1744_s20  ;;  %s1748_s21 = sphi %s1788_s21, %s14_s21   ;;  %s1744_s20 = sphi %s1786_s20, %s2183_s20   ;;  %s1740_s19 = sphi %s1784_s19, %s2182_s19   ;;  %s1736_s18 = sphi %s1782_s18, %s2181_s18   ;;  %s1732_s17 = sphi %s1780_s17, %s2180_s17   ;;  %s1728_s16 = sphi %s1778_s16, %s2179_s16   ;;  %s1724_s15 = sphi %s1776_s15, %s2178_s15  }
   0x5   : > { %p27_p0 = scmp.ge.s32.totalorder %s26_s22, 9  ;;  %p77_p1 = scmp.ne.s32.totalorder %s1728_s16, %s1724_s15 }
   0x6   : > { %p78_p2 = scmp.eq.s32.totalorder %s1748_s21, 0  ;;  %s70_s27 = sadd.s32 1, %s1728_s16 }
   0x7   : > { %s2185_s22 = smov (%p27_p0, %s26_s22), 0  ;;  %s2187_s23 = smov (!%p27_p0, %s29_s23), %s1744_s20 }
   0x8   : > { %p79_p3 = por %p78_p2, %p77_p1  ;;  %p31_p4 = scmp.ge.s32.totalorder %s2187_s23, 2 }
   0x9   : > { %s65_s24 = ssub.s32 %s1740_s19, %s2185_s22  ;;  %p1297_p6 = scmp.ge.s32.totalorder %s1748_s21, 18 }
   0xa   : > { %s2189_s23 = smov (%p31_p4, %s2187_s23), 0 }
   0xb   : > { %s66_s25 = ssub.s32 %s1744_s20, %s2189_s23  ;;  %185 = sbr.rel (%p1297_p6) target bundleno = 87 (0x57), region = 16 }
   0xc   : > { %s67_s26 = sor.u32 %s66_s25, %s65_s24 }
   0xd   : > { %p68_p5 = scmp.eq.s32.totalorder %s67_s26, 0 }
   0xf   : > { %s1827_s28 = scalar_select %p68_p5, %s1728_s16, %s70_s27  }
  0x10   : > { %201 = sbr.rel (!%p79_p3) target bundleno = 87 (0x57), region = 24  ;;  %s203_s29 = sand.u32 (%p79_p3), 1, %s1728_s16  }
  0x11   : > { %s1300_s30 = sshll.u32 (%p79_p3), %s1744_s20, 1  ;;  %s1298_s5 = sshll.u32 (%p79_p3), %s203_s29, 9 }
  0x12   : > { %s1572_s6 = sshll.u32 (%p79_p3), %s1740_s19, 8  ;;  %s1841_s12 = scalar_lea.vmem (%p79_p3), [#allocation3], %s1298_s5 }
  0x13   : > { %s209_s7 = sadd.s32 (%p79_p3), %s1572_s6, %s1300_s30 }
  0x14   : > { %s1302_s8 = sshll.u32 (%p79_p3), %s209_s7, 2 }
  0x15   : > { %s1836_s11 = scalar_lea.vmem %s2174_s1, %s1302_s8 }
  0x16   : > { %v366_v0 = vld [vmem:[%s1836_s11] sm:$0xff]  ;;  %v368_v1 = vld [vmem:[%s1836_s11 + $0x10] sm:$0xff] }
  0x17   : > { %v370_v2 = vld [vmem:[%s1836_s11 + $0x20] sm:$0xff]  ;;  %367 = vst [vmem:[%s1841_s12] sm:$0xff] %v366_v0  ;;  %v372_v3 = vld [vmem:[%s1836_s11 + $0x30] sm:$0xff] }
  0x18   : > { %369 = vst [vmem:[%s1841_s12 + $0x8] sm:$0xff] %v368_v1  ;;  %v374_v4 = vld [vmem:[%s1836_s11 + $0x40] sm:$0xff]  ;;  %v376_v5 = vld [vmem:[%s1836_s11 + $0x50] sm:$0xff] }
  0x19   : > { %371 = vst [vmem:[%s1841_s12 + $0x10] sm:$0xff] %v370_v2  ;;  %v378_v6 = vld [vmem:[%s1836_s11 + $0x60] sm:$0xff]  ;;  %v380_v7 = vld [vmem:[%s1836_s11 + $0x70] sm:$0xff] }
  0x1a   : > { %373 = vst [vmem:[%s1841_s12 + $0x18] sm:$0xff] %v372_v3  ;;  %v382_v8 = vld [vmem:[%s1836_s11 + $0x80] sm:$0xff]  ;;  %v384_v9 = vld [vmem:[%s1836_s11 + $0x90] sm:$0xff] }
  0x1b   : > { %375 = vst [vmem:[%s1841_s12 + $0x20] sm:$0xff] %v374_v4  ;;  %v386_v10 = vld [vmem:[%s1836_s11 + $0xa0] sm:$0xff]  ;;  %v388_v11 = vld [vmem:[%s1836_s11 + $0xb0] sm:$0xff] }
  0x1c   : > { %377 = vst [vmem:[%s1841_s12 + $0x28] sm:$0xff] %v376_v5  ;;  %v390_v12 = vld [vmem:[%s1836_s11 + $0xc0] sm:$0xff]  ;;  %v392_v13 = vld [vmem:[%s1836_s11 + $0xd0] sm:$0xff] }
  0x1d   : > { %379 = vst [vmem:[%s1841_s12 + $0x30] sm:$0xff] %v378_v6  ;;  %v394_v14 = vld [vmem:[%s1836_s11 + $0xe0] sm:$0xff]  ;;  %v396_v15 = vld [vmem:[%s1836_s11 + $0xf0] sm:$0xff] }
  0x1e   : > { %381 = vst [vmem:[%s1841_s12 + $0x38] sm:$0xff] %v380_v7  ;;  %v398_v16 = vld [vmem:[%s1836_s11 + $0x100] sm:$0xff]  ;;  %v400_v17 = vld [vmem:[%s1836_s11 + $0x110] sm:$0xff] }
  0x1f   : > { %383 = vst [vmem:[%s1841_s12 + $0x40] sm:$0xff] %v382_v8  ;;  %v402_v18 = vld [vmem:[%s1836_s11 + $0x120] sm:$0xff]  ;;  %v404_v19 = vld [vmem:[%s1836_s11 + $0x130] sm:$0xff] }
  0x20   : > { %385 = vst [vmem:[%s1841_s12 + $0x48] sm:$0xff] %v384_v9  ;;  %v406_v20 = vld [vmem:[%s1836_s11 + $0x140] sm:$0xff]  ;;  %v408_v21 = vld [vmem:[%s1836_s11 + $0x150] sm:$0xff] }
  0x21   : > { %387 = vst [vmem:[%s1841_s12 + $0x50] sm:$0xff] %v386_v10  ;;  %v410_v22 = vld [vmem:[%s1836_s11 + $0x160] sm:$0xff]  ;;  %v412_v23 = vld [vmem:[%s1836_s11 + $0x170] sm:$0xff] }
  0x22   : > { %389 = vst [vmem:[%s1841_s12 + $0x58] sm:$0xff] %v388_v11  ;;  %v414_v24 = vld [vmem:[%s1836_s11 + $0x180] sm:$0xff]  ;;  %v416_v25 = vld [vmem:[%s1836_s11 + $0x190] sm:$0xff] }
  0x23   : > { %391 = vst [vmem:[%s1841_s12 + $0x60] sm:$0xff] %v390_v12  ;;  %v418_v26 = vld [vmem:[%s1836_s11 + $0x1a0] sm:$0xff]  ;;  %v420_v27 = vld [vmem:[%s1836_s11 + $0x1b0] sm:$0xff] }
  0x24   : > { %393 = vst [vmem:[%s1841_s12 + $0x68] sm:$0xff] %v392_v13  ;;  %v422_v28 = vld [vmem:[%s1836_s11 + $0x1c0] sm:$0xff]  ;;  %v424_v29 = vld [vmem:[%s1836_s11 + $0x1d0] sm:$0xff] }
  0x25   : > { %395 = vst [vmem:[%s1841_s12 + $0x70] sm:$0xff] %v394_v14  ;;  %v426_v30 = vld [vmem:[%s1836_s11 + $0x1e0] sm:$0xff]  ;;  %v428_v31 = vld [vmem:[%s1836_s11 + $0x1f0] sm:$0xff] }
  0x26   : > { %397 = vst [vmem:[%s1841_s12 + $0x78] sm:$0xff] %v396_v15  ;;  %v430_v32 = vld [vmem:[%s1836_s11 + $0x200] sm:$0xff]  ;;  %v432_v33 = vld [vmem:[%s1836_s11 + $0x210] sm:$0xff] }
  0x27   : > { %399 = vst [vmem:[%s1841_s12 + $0x80] sm:$0xff] %v398_v16  ;;  %v434_v34 = vld [vmem:[%s1836_s11 + $0x220] sm:$0xff]  ;;  %v436_v35 = vld [vmem:[%s1836_s11 + $0x230] sm:$0xff] }
  0x28   : > { %401 = vst [vmem:[%s1841_s12 + $0x88] sm:$0xff] %v400_v17  ;;  %v438_v36 = vld [vmem:[%s1836_s11 + $0x240] sm:$0xff]  ;;  %v440_v37 = vld [vmem:[%s1836_s11 + $0x250] sm:$0xff] }
  0x29   : > { %403 = vst [vmem:[%s1841_s12 + $0x90] sm:$0xff] %v402_v18  ;;  %v442_v38 = vld [vmem:[%s1836_s11 + $0x260] sm:$0xff]  ;;  %v444_v39 = vld [vmem:[%s1836_s11 + $0x270] sm:$0xff] }
  0x2a   : > { %405 = vst [vmem:[%s1841_s12 + $0x98] sm:$0xff] %v404_v19  ;;  %v446_v40 = vld [vmem:[%s1836_s11 + $0x280] sm:$0xff]  ;;  %v448_v41 = vld [vmem:[%s1836_s11 + $0x290] sm:$0xff] }
  0x2b   : > { %407 = vst [vmem:[%s1841_s12 + $0xa0] sm:$0xff] %v406_v20  ;;  %v450_v42 = vld [vmem:[%s1836_s11 + $0x2a0] sm:$0xff]  ;;  %v452_v43 = vld [vmem:[%s1836_s11 + $0x2b0] sm:$0xff] }
  0x2c   : > { %409 = vst [vmem:[%s1841_s12 + $0xa8] sm:$0xff] %v408_v21  ;;  %v454_v44 = vld [vmem:[%s1836_s11 + $0x2c0] sm:$0xff]  ;;  %v456_v45 = vld [vmem:[%s1836_s11 + $0x2d0] sm:$0xff] }
  0x2d   : > { %411 = vst [vmem:[%s1841_s12 + $0xb0] sm:$0xff] %v410_v22  ;;  %v458_v46 = vld [vmem:[%s1836_s11 + $0x2e0] sm:$0xff]  ;;  %v460_v47 = vld [vmem:[%s1836_s11 + $0x2f0] sm:$0xff] }
  0x2e   : > { %413 = vst [vmem:[%s1841_s12 + $0xb8] sm:$0xff] %v412_v23  ;;  %v462_v48 = vld [vmem:[%s1836_s11 + $0x300] sm:$0xff]  ;;  %v464_v49 = vld [vmem:[%s1836_s11 + $0x310] sm:$0xff] }
  0x2f   : > { %415 = vst [vmem:[%s1841_s12 + $0xc0] sm:$0xff] %v414_v24  ;;  %v466_v50 = vld [vmem:[%s1836_s11 + $0x320] sm:$0xff]  ;;  %v468_v51 = vld [vmem:[%s1836_s11 + $0x330] sm:$0xff] }
  0x30   : > { %417 = vst [vmem:[%s1841_s12 + $0xc8] sm:$0xff] %v416_v25  ;;  %v470_v52 = vld [vmem:[%s1836_s11 + $0x340] sm:$0xff]  ;;  %v472_v53 = vld [vmem:[%s1836_s11 + $0x350] sm:$0xff] }
  0x31   : > { %419 = vst [vmem:[%s1841_s12 + $0xd0] sm:$0xff] %v418_v26  ;;  %v474_v54 = vld [vmem:[%s1836_s11 + $0x360] sm:$0xff]  ;;  %v476_v55 = vld [vmem:[%s1836_s11 + $0x370] sm:$0xff] }
  0x32   : > { %421 = vst [vmem:[%s1841_s12 + $0xd8] sm:$0xff] %v420_v27  ;;  %v478_v56 = vld [vmem:[%s1836_s11 + $0x380] sm:$0xff]  ;;  %v480_v57 = vld [vmem:[%s1836_s11 + $0x390] sm:$0xff] }
  0x33   : > { %423 = vst [vmem:[%s1841_s12 + $0xe0] sm:$0xff] %v422_v28  ;;  %v482_v58 = vld [vmem:[%s1836_s11 + $0x3a0] sm:$0xff]  ;;  %v484_v59 = vld [vmem:[%s1836_s11 + $0x3b0] sm:$0xff] }
  0x34   : > { %425 = vst [vmem:[%s1841_s12 + $0xe8] sm:$0xff] %v424_v29  ;;  %v486_v60 = vld [vmem:[%s1836_s11 + $0x3c0] sm:$0xff]  ;;  %v488_v61 = vld [vmem:[%s1836_s11 + $0x3d0] sm:$0xff] }
  0x35   : > { %427 = vst [vmem:[%s1841_s12 + $0xf0] sm:$0xff] %v426_v30  ;;  %v490_v62 = vld [vmem:[%s1836_s11 + $0x3e0] sm:$0xff]  ;;  %v492_v63 = vld [vmem:[%s1836_s11 + $0x3f0] sm:$0xff] }
  0x36   : > { %429 = vst [vmem:[%s1841_s12 + $0xf8] sm:$0xff] %v428_v31 }
  0x37   : > { %431 = vst [vmem:[%s1841_s12 + $0x100] sm:$0xff] %v430_v32 }
  0x38   : > { %433 = vst [vmem:[%s1841_s12 + $0x108] sm:$0xff] %v432_v33 }
  0x39   : > { %435 = vst [vmem:[%s1841_s12 + $0x110] sm:$0xff] %v434_v34 }
  0x3a   : > { %437 = vst [vmem:[%s1841_s12 + $0x118] sm:$0xff] %v436_v35 }
  0x3b   : > { %439 = vst [vmem:[%s1841_s12 + $0x120] sm:$0xff] %v438_v36 }
  0x3c   : > { %441 = vst [vmem:[%s1841_s12 + $0x128] sm:$0xff] %v440_v37 }
  0x3d   : > { %443 = vst [vmem:[%s1841_s12 + $0x130] sm:$0xff] %v442_v38 }
  0x3e   : > { %445 = vst [vmem:[%s1841_s12 + $0x138] sm:$0xff] %v444_v39 }
  0x3f   : > { %447 = vst [vmem:[%s1841_s12 + $0x140] sm:$0xff] %v446_v40 }
  0x40   : > { %449 = vst [vmem:[%s1841_s12 + $0x148] sm:$0xff] %v448_v41 }
  0x41   : > { %451 = vst [vmem:[%s1841_s12 + $0x150] sm:$0xff] %v450_v42 }
  0x42   : > { %453 = vst [vmem:[%s1841_s12 + $0x158] sm:$0xff] %v452_v43 }
  0x43   : > { %455 = vst [vmem:[%s1841_s12 + $0x160] sm:$0xff] %v454_v44 }
  0x44   : > { %457 = vst [vmem:[%s1841_s12 + $0x168] sm:$0xff] %v456_v45 }
  0x45   : > { %459 = vst [vmem:[%s1841_s12 + $0x170] sm:$0xff] %v458_v46 }
  0x46   : > { %461 = vst [vmem:[%s1841_s12 + $0x178] sm:$0xff] %v460_v47 }
  0x47   : > { %463 = vst [vmem:[%s1841_s12 + $0x180] sm:$0xff] %v462_v48 }
  0x48   : > { %465 = vst [vmem:[%s1841_s12 + $0x188] sm:$0xff] %v464_v49 }
  0x49   : > { %467 = vst [vmem:[%s1841_s12 + $0x190] sm:$0xff] %v466_v50 }
  0x4a   : > { %469 = vst [vmem:[%s1841_s12 + $0x198] sm:$0xff] %v468_v51 }
  0x4b   : > { %471 = vst [vmem:[%s1841_s12 + $0x1a0] sm:$0xff] %v470_v52 }
  0x4c   : > { %473 = vst [vmem:[%s1841_s12 + $0x1a8] sm:$0xff] %v472_v53 }
  0x4d   : > { %475 = vst [vmem:[%s1841_s12 + $0x1b0] sm:$0xff] %v474_v54 }
  0x4e   : > { %477 = vst [vmem:[%s1841_s12 + $0x1b8] sm:$0xff] %v476_v55 }
  0x4f   : > { %479 = vst [vmem:[%s1841_s12 + $0x1c0] sm:$0xff] %v478_v56 }
  0x50   : > { %481 = vst [vmem:[%s1841_s12 + $0x1c8] sm:$0xff] %v480_v57 }
  0x51   : > { %483 = vst [vmem:[%s1841_s12 + $0x1d0] sm:$0xff] %v482_v58 }
  0x52   : > { %485 = vst [vmem:[%s1841_s12 + $0x1d8] sm:$0xff] %v484_v59 }
  0x53   : > { %487 = vst [vmem:[%s1841_s12 + $0x1e0] sm:$0xff] %v486_v60 }
  0x54   : > { %489 = vst [vmem:[%s1841_s12 + $0x1e8] sm:$0xff] %v488_v61 }
  0x55   : > { %491 = vst [vmem:[%s1841_s12 + $0x1f0] sm:$0xff] %v490_v62 }
  0x56   : > { %493 = vst [vmem:[%s1841_s12 + $0x1f8] sm:$0xff] %v492_v63 }
  0x57 PF: > { %p1303_p7 = scmp.ge.s32.totalorder %s1748_s21, 1  ;;  %p519_p8 = scmp.lt.s32.totalorder %s1748_s21, 19 }
  0x59   : > { %p520_p9 = pnand %p1303_p7, %p519_p8 }
  0x5a   : > { %s526_s13 = sand.u32 (!%p520_p9), 1, %s1724_s15   ;;  %s1305_s14 = sshll.u32 (!%p520_p9), %s1732_s17, 2 }
  0x5b   : > { %523 = sbr.rel (%p520_p9) target bundleno = 331 (0x14b), region = 70  ;;  %s1304_s24 = sshll.u32 (!%p520_p9), %s526_s13, 9 }
  0x5c   : > { %p580_p10 = scmp.lt.s32.totalorder (!%p520_p9), %s1305_s14, 35  ;;  %s1307_s25 = sshll.u32 (!%p520_p9), %s1736_s18, 1 }
  0x5d   : > { %p590_p11 = scmp.lt.s32.totalorder (!%p520_p9), %s1307_s25, 3  ;;  %s1995_s13 = scalar_lea.vmem (!%p520_p9), [#allocation3], %s1304_s24 }
  0x5e   : > { %p1312_p12 = scmp.ne.s32.totalorder (!%p520_p9), %s1732_s17, 0 }
  0x60   : > { %s2191_s14 = smov (!%p580_p10, %s1305_s14), 35  ;;  %s2193_s25 = smov (!%p590_p11, %s1307_s25), 3 }
  0x61   : > { %s1306_s26 = sshll.u32 %s2191_s14, 2  ;;  %s592_s15 = scalar_lea.vmem %s2175_s2, %s2193_s25 }
  0x62   : > { %s1976_s30 = scalar_lea.vmem %s2173_s0, %s1306_s26  ;;  %s1309_s7 = sshll.u32 %s2193_s25, 2 }
  0x63   : > { %s1988_s18 = scalar_lea.vmem %s2176_s3, %s1309_s7  ;;  %s1993_s12 = scalar_lea.vmem %s2177_s4, %s1309_s7 }
  0x64   : > { %617 = sbr.rel (%p1312_p12) target bundleno = 108 (0x6c), region = 78 }
  0x69   : > { %v1750_v0 = vmov 0.0  }
  0x6a   : > { %618 = vst [vmem:[#allocation2] sm:$0xff] %v1750_v0 }
  0x6b   : > { %619 = vst [vmem:[#allocation2 + $0x8] sm:$0xff] %v1750_v0 }
  0x6c PF: > { %v1371_v1 = vld [vmem:[%s1995_s13 + $0x70] sm:$0xf]  ;;  %v1588_v2 = vld [vmem:[%s1995_s13 + $0x74] sm:$0xf0]  ;;  %v1363_v12 = vld [vmem:[%s1995_s13 + $0x60] sm:$0xf] }
  0x6d   : > { %v1435_v3 = vld [vmem:[%s1995_s13 + $0xf0] sm:$0xf]  ;;  %v1372_v4 = vor.u32 %v1588_v2, %v1371_v1  ;;  %v1604_v5 = vld [vmem:[%s1995_s13 + $0xf4] sm:$0xf0]  ;;  %v1586_v14 = vld [vmem:[%s1995_s13 + $0x64] sm:$0xf0] }
  0x6e   : > { %v1499_v6 = vld [vmem:[%s1995_s13 + $0x170] sm:$0xf]  ;;  %v1620_v7 = vld [vmem:[%s1995_s13 + $0x174] sm:$0xf0]  ;;  %v1436_v8 = vor.u32 %v1604_v5, %v1435_v3  ;;  %v1427_v15 = vld [vmem:[%s1995_s13 + $0xe0] sm:$0xf]  ;;  %v1364_v17 = vor.u32 %v1586_v14, %v1363_v12 }
  0x6f   : > { %v1500_v9 = vor.u32 %v1620_v7, %v1499_v6  ;;  %v1563_v10 = vld [vmem:[%s1995_s13 + $0x1f0] sm:$0xf]  ;;  %v1636_v11 = vld [vmem:[%s1995_s13 + $0x1f4] sm:$0xf0]  ;;  %1022 = vmatpush.bf16.msra.mxu0 %v1372_v4  ;;  %v1602_v16 = vld [vmem:[%s1995_s13 + $0xe4] sm:$0xf0] }
  0x70   : > { %v1564_v13 = vor.u32 %v1636_v11, %v1563_v10  ;;  %1035 = vmatpush.bf16.msra.mxu1 %v1436_v8  ;;  %v1428_v18 = vor.u32 %v1602_v16, %v1427_v15  ;;  %v1491_v19 = vld [vmem:[%s1995_s13 + $0x160] sm:$0xf]  ;;  %v1618_v20 = vld [vmem:[%s1995_s13 + $0x164] sm:$0xf0]  ;;  %v1355_v24 = vld [vmem:[%s1995_s13 + $0x50] sm:$0xf] }
  0x71   : > { %1048 = vmatpush.bf16.msra.mxu2 %v1500_v9  ;;  %v1555_v21 = vld [vmem:[%s1995_s13 + $0x1e0] sm:$0xf]  ;;  %v1492_v22 = vor.u32 %v1618_v20, %v1491_v19  ;;  %v1634_v23 = vld [vmem:[%s1995_s13 + $0x1e4] sm:$0xf0]  ;;  %v1584_v25 = vld [vmem:[%s1995_s13 + $0x54] sm:$0xf0] }
  0x72   : > { %1061 = vmatpush.bf16.msra.mxu3 %v1564_v13  ;;  %v1556_v26 = vor.u32 %v1634_v23, %v1555_v21  ;;  %v1419_v27 = vld [vmem:[%s1995_s13 + $0xd0] sm:$0xf]  ;;  %v1600_v28 = vld [vmem:[%s1995_s13 + $0xd4] sm:$0xf0]  ;;  %v1356_v30 = vor.u32 %v1584_v25, %v1355_v24  ;;  %v1347_v36 = vld [vmem:[%s1995_s13 + $0x40] sm:$0xf] }
  0x73   : > { %v1483_v29 = vld [vmem:[%s1995_s13 + $0x150] sm:$0xf]  ;;  %1023 = vmatpush.bf16.msra.mxu0 %v1364_v17  ;;  %v1616_v31 = vld [vmem:[%s1995_s13 + $0x154] sm:$0xf0]  ;;  %v1420_v34 = vor.u32 %v1600_v28, %v1419_v27  ;;  %v1582_v37 = vld [vmem:[%s1995_s13 + $0x44] sm:$0xf0] }
  0x74   : > { %v1547_v32 = vld [vmem:[%s1995_s13 + $0x1d0] sm:$0xf]  ;;  %v1632_v33 = vld [vmem:[%s1995_s13 + $0x1d4] sm:$0xf0]  ;;  %1036 = vmatpush.bf16.msra.mxu1 %v1428_v18  ;;  %v1484_v35 = vor.u32 %v1616_v31, %v1483_v29  ;;  %v1411_v38 = vld [vmem:[%s1995_s13 + $0xc0] sm:$0xf]  ;;  %v1348_v45 = vor.u32 %v1582_v37, %v1347_v36 }
  0x75   : > { %1049 = vmatpush.bf16.msra.mxu2 %v1492_v22  ;;  %v1548_v39 = vor.u32 %v1632_v33, %v1547_v32  ;;  %v1598_v40 = vld [vmem:[%s1995_s13 + $0xc4] sm:$0xf0]  ;;  %v1475_v41 = vld [vmem:[%s1995_s13 + $0x140] sm:$0xf]  ;;  %v1339_v48 = vld [vmem:[%s1995_s13 + $0x30] sm:$0xf] }
  0x76   : > { %1062 = vmatpush.bf16.msra.mxu3 %v1556_v26  ;;  %v1614_v42 = vld [vmem:[%s1995_s13 + $0x144] sm:$0xf0]  ;;  %v1539_v43 = vld [vmem:[%s1995_s13 + $0x1c0] sm:$0xf]  ;;  %v1412_v46 = vor.u32 %v1598_v40, %v1411_v38  ;;  %v1580_v49 = vld [vmem:[%s1995_s13 + $0x34] sm:$0xf0] }
  0x77   : > { %v1630_v44 = vld [vmem:[%s1995_s13 + $0x1c4] sm:$0xf0]  ;;  %1024 = vmatpush.bf16.msra.mxu0 %v1356_v30  ;;  %v1476_v47 = vor.u32 %v1614_v42, %v1475_v41  ;;  %v1403_v50 = vld [vmem:[%s1995_s13 + $0xb0] sm:$0xf]  ;;  %v1596_v52 = vld [vmem:[%s1995_s13 + $0xb4] sm:$0xf0]  ;;  %v1340_v57 = vor.u32 %v1580_v49, %v1339_v48 }
  0x78   : > { %1037 = vmatpush.bf16.msra.mxu1 %v1420_v34  ;;  %v1540_v51 = vor.u32 %v1630_v44, %v1539_v43  ;;  %v1467_v53 = vld [vmem:[%s1995_s13 + $0x130] sm:$0xf]  ;;  %v1612_v54 = vld [vmem:[%s1995_s13 + $0x134] sm:$0xf0]  ;;  %v1404_v58 = vor.u32 %v1596_v52, %v1403_v50  ;;  %v1331_v60 = vld [vmem:[%s1995_s13 + $0x20] sm:$0xf] }
  0x79   : > { %1050 = vmatpush.bf16.msra.mxu2 %v1484_v35  ;;  %v1531_v55 = vld [vmem:[%s1995_s13 + $0x1b0] sm:$0xf]  ;;  %v1628_v56 = vld [vmem:[%s1995_s13 + $0x1b4] sm:$0xf0]  ;;  %v1468_v59 = vor.u32 %v1612_v54, %v1467_v53  ;;  %v1578_v61 = vld [vmem:[%s1995_s13 + $0x24] sm:$0xf0] }
  0x7a   : > { %1063 = vmatpush.bf16.msra.mxu3 %v1548_v39  ;;  %v1395_v62 = vld [vmem:[%s1995_s13 + $0xa0] sm:$0xf]  ;;  %v1532_v63 = vor.u32 %v1628_v56, %v1531_v55  ;;  %v1594_v0 = vld [vmem:[%s1995_s13 + $0xa4] sm:$0xf0]  ;;  %v1332_v5 = vor.u32 %v1578_v61, %v1331_v60  ;;  %v1323_v8 = vld [vmem:[%s1995_s13 + $0x10] sm:$0xf] }
  0x7b   : > { %1025 = vmatpush.bf16.msra.mxu0 %v1348_v45  ;;  %v1459_v1 = vld [vmem:[%s1995_s13 + $0x120] sm:$0xf]  ;;  %v1610_v2 = vld [vmem:[%s1995_s13 + $0x124] sm:$0xf0]  ;;  %v1396_v6 = vor.u32 %v1594_v0, %v1395_v62  ;;  %v1576_v9 = vld [vmem:[%s1995_s13 + $0x14] sm:$0xf0] }
  0x7c   : > { %1038 = vmatpush.bf16.msra.mxu1 %v1412_v46  ;;  %v1523_v3 = vld [vmem:[%s1995_s13 + $0x1a0] sm:$0xf]  ;;  %v1626_v4 = vld [vmem:[%s1995_s13 + $0x1a4] sm:$0xf0]  ;;  %v1460_v7 = vor.u32 %v1610_v2, %v1459_v1  ;;  %v1387_v10 = vld [vmem:[%s1995_s13 + $0x90] sm:$0xf]  ;;  %v1324_v17 = vor.u32 %v1576_v9, %v1323_v8 }
  0x7d   : > { %1051 = vmatpush.bf16.msra.mxu2 %v1476_v47  ;;  %v1524_v11 = vor.u32 %v1626_v4, %v1523_v3  ;;  %v1592_v12 = vld [vmem:[%s1995_s13 + $0x94] sm:$0xf0]  ;;  %v1451_v13 = vld [vmem:[%s1995_s13 + $0x110] sm:$0xf]  ;;  %v1315_v18 = vld [vmem:[%s1995_s13] sm:$0xf] }
  0x7e   : > { %1064 = vmatpush.bf16.msra.mxu3 %v1540_v51  ;;  %v1608_v14 = vld [vmem:[%s1995_s13 + $0x114] sm:$0xf0]  ;;  %v1515_v15 = vld [vmem:[%s1995_s13 + $0x190] sm:$0xf]  ;;  %v1574_v19 = vld [vmem:[%s1995_s13 + $0x4] sm:$0xf0]  ;;  %v1388_v21 = vor.u32 %v1592_v12, %v1387_v10 }
  0x7f   : > { %1026 = vmatpush.bf16.msra.mxu0 %v1340_v57  ;;  %v1624_v16 = vld [vmem:[%s1995_s13 + $0x194] sm:$0xf0]  ;;  %v1379_v20 = vld [vmem:[%s1995_s13 + $0x80] sm:$0xf]  ;;  %v1452_v22 = vor.u32 %v1608_v14, %v1451_v13  ;;  %v1590_v23 = vld [vmem:[%s1995_s13 + $0x84] sm:$0xf0]  ;;  %v1316_v33 = vor.u32 %v1574_v19, %v1315_v18 }
  0x80   : > { %1039 = vmatpush.bf16.msra.mxu1 %v1404_v58  ;;  %v1443_v24 = vld [vmem:[%s1995_s13 + $0x100] sm:$0xf]  ;;  %v1606_v25 = vld [vmem:[%s1995_s13 + $0x104] sm:$0xf0]  ;;  %v1516_v26 = vor.u32 %v1624_v16, %v1515_v15  ;;  %v1587_v29 = vld [vmem:[%s1995_s13 + $0x74] sm:$0xf]  ;;  %v1380_v38 = vor.u32 %v1590_v23, %v1379_v20 }
  0x81   : > { %1052 = vmatpush.bf16.msra.mxu2 %v1468_v59  ;;  %v1507_v27 = vld [vmem:[%s1995_s13 + $0x180] sm:$0xf]  ;;  %v1622_v28 = vld [vmem:[%s1995_s13 + $0x184] sm:$0xf0]  ;;  %v1373_v30 = vld [vmem:[%s1995_s13 + $0x78] sm:$0xf0]  ;;  %v1444_v39 = vor.u32 %v1606_v25, %v1443_v24 }
  0x82   : > { %1065 = vmatpush.bf16.msra.mxu3 %v1532_v63  ;;  %v1603_v31 = vld [vmem:[%s1995_s13 + $0xf4] sm:$0xf]  ;;  %v623_v32 = vld [vmem:[%s1976_s30 + $0x8] sm:$0xff]  ;;  %v1508_v43 = vor.u32 %v1622_v28, %v1507_v27  ;;  %v1376_v44 = vor.u32 %v1587_v29, %v1373_v30  ;;  %v1585_v48 = vld [vmem:[%s1995_s13 + $0x64] sm:$0xf]  ;;  %p1569_p13 = scmp.ne.s32.totalorder %s1732_s17, 8 }
  0x83   : > { %1027 = vmatpush.bf16.msra.mxu0 %v1332_v5  ;;  %v1437_v34 = vld [vmem:[%s1995_s13 + $0xf8] sm:$0xf0]  ;;  %v1619_v35 = vld [vmem:[%s1995_s13 + $0x174] sm:$0xf]  ;;  %v692_v37 = vunpack.c.l.b16 %v623_v32  ;;  %v693_v42 = vunpack.c.h.b16 %v623_v32  ;;  %v1365_v49 = vld [vmem:[%s1995_s13 + $0x68] sm:$0xf0] }
  0x84   : > { %1040 = vmatpush.bf16.msra.mxu1 %v1396_v6  ;;  %v1501_v36 = vld [vmem:[%s1995_s13 + $0x178] sm:$0xf0]  ;;  %v1635_v40 = vld [vmem:[%s1995_s13 + $0x1f4] sm:$0xf]  ;;  %v1440_v46 = vor.u32 %v1603_v31, %v1437_v34  ;;  %v1601_v50 = vld [vmem:[%s1995_s13 + $0xe4] sm:$0xf]  ;;  %v1368_v62 = vor.u32 %v1585_v48, %v1365_v49 }
  0x85   : > { %1053 = vmatpush.bf16.msra.mxu2 %v1460_v7  ;;  %v1565_v41 = vld [vmem:[%s1995_s13 + $0x1f8] sm:$0xf0]  ;;  %v622_v45 = vld [vmem:[%s1976_s30] sm:$0xff]  ;;  %v1504_v47 = vor.u32 %v1619_v35, %v1501_v36  ;;  %v1429_v54 = vld [vmem:[%s1995_s13 + $0xe8] sm:$0xf0]  ;;  %v2078_v57 = vpack.c.b16 %v692_v37, %v692_v37  ;;  %v2082_v60 = vpack.c.b16 %v693_v42, %v693_v42 }
  0x86   : > { %1066 = vmatpush.bf16.msra.mxu3 %v1524_v11  ;;  %v690_v51 = vunpack.c.l.b16 %v622_v45  ;;  %v691_v52 = vunpack.c.h.b16 %v622_v45  ;;  %v1568_v53 = vor.u32 %v1635_v40, %v1565_v41  ;;  %v1617_v55 = vld [vmem:[%s1995_s13 + $0x164] sm:$0xf]  ;;  %v1493_v56 = vld [vmem:[%s1995_s13 + $0x168] sm:$0xf0]  ;;  %v1432_v0 = vor.u32 %v1601_v50, %v1429_v54  ;;  %v1583_v2 = vld [vmem:[%s1995_s13 + $0x54] sm:$0xf] }
  0x87   : > { %1028 = vmatpush.bf16.msra.mxu0 %v1324_v17  ;;  %v1633_v58 = vld [vmem:[%s1995_s13 + $0x1e4] sm:$0xf]  ;;  %v1557_v59 = vld [vmem:[%s1995_s13 + $0x1e8] sm:$0xf0]  ;;  %v1496_v1 = vor.u32 %v1617_v55, %v1493_v56  ;;  %v1357_v3 = vld [vmem:[%s1995_s13 + $0x58] sm:$0xf0] }
  0x88   : > { %1041 = vmatpush.bf16.msra.mxu1 %v1388_v21  ;;  %v2084_v61 = vpack.c.b16 %v690_v51, %v690_v51  ;;  %v2086_v63 = vpack.c.b16 %v691_v52, %v691_v52  ;;  %v1599_v4 = vld [vmem:[%s1995_s13 + $0xd4] sm:$0xf]  ;;  %v1560_v5 = vor.u32 %v1633_v58, %v1557_v59  ;;  %v1421_v6 = vld [vmem:[%s1995_s13 + $0xd8] sm:$0xf0]  ;;  %v1360_v11 = vor.u32 %v1583_v2, %v1357_v3  ;;  %v1581_v14 = vld [vmem:[%s1995_s13 + $0x44] sm:$0xf] }
  0x89   : > { %1054 = vmatpush.bf16.msra.mxu2 %v1452_v22  ;;  %v1615_v7 = vld [vmem:[%s1995_s13 + $0x154] sm:$0xf]  ;;  %v1485_v8 = vld [vmem:[%s1995_s13 + $0x158] sm:$0xf0]  ;;  %v1424_v12 = vor.u32 %v1599_v4, %v1421_v6  ;;  %v1349_v15 = vld [vmem:[%s1995_s13 + $0x48] sm:$0xf0] }
  0x8a   : > { %1067 = vmatpush.bf16.msra.mxu3 %v1516_v26  ;;  %v1631_v9 = vld [vmem:[%s1995_s13 + $0x1d4] sm:$0xf]  ;;  %v1549_v10 = vld [vmem:[%s1995_s13 + $0x1d8] sm:$0xf0]  ;;  %v1488_v13 = vor.u32 %v1615_v7, %v1485_v8  ;;  %v1597_v16 = vld [vmem:[%s1995_s13 + $0xc4] sm:$0xf]  ;;  %v1352_v23 = vor.u32 %v1581_v14, %v1349_v15 }
  0x8b   : > { %1029 = vmatpush.bf16.msra.mxu0 %v1316_v33  ;;  %v1552_v17 = vor.u32 %v1631_v9, %v1549_v10  ;;  %v1413_v18 = vld [vmem:[%s1995_s13 + $0xc8] sm:$0xf0]  ;;  %v1613_v19 = vld [vmem:[%s1995_s13 + $0x144] sm:$0xf]  ;;  %v1579_v26 = vld [vmem:[%s1995_s13 + $0x34] sm:$0xf] }
  0x8c   : > { %1042 = vmatpush.bf16.msra.mxu1 %v1380_v38  ;;  %v1477_v20 = vld [vmem:[%s1995_s13 + $0x148] sm:$0xf0]  ;;  %v1629_v21 = vld [vmem:[%s1995_s13 + $0x1c4] sm:$0xf]  ;;  %v1416_v24 = vor.u32 %v1597_v16, %v1413_v18  ;;  %v1341_v27 = vld [vmem:[%s1995_s13 + $0x38] sm:$0xf0] }
  0x8d   : > { %1055 = vmatpush.bf16.msra.mxu2 %v1444_v39  ;;  %v1541_v22 = vld [vmem:[%s1995_s13 + $0x1c8] sm:$0xf0]  ;;  %v1480_v25 = vor.u32 %v1613_v19, %v1477_v20  ;;  %v1595_v28 = vld [vmem:[%s1995_s13 + $0xb4] sm:$0xf]  ;;  %v1405_v30 = vld [vmem:[%s1995_s13 + $0xb8] sm:$0xf0]  ;;  %v1344_v35 = vor.u32 %v1579_v26, %v1341_v27 }
  0x8e   : > { %1068 = vmatpush.bf16.msra.mxu3 %v1508_v43  ;;  %1030 = vmatmul.bf16.vlgmr.msra.gmra.mxu0 %v2084_v61  ;;  %v1544_v29 = vor.u32 %v1629_v21, %v1541_v22  ;;  %v1611_v31 = vld [vmem:[%s1995_s13 + $0x134] sm:$0xf]  ;;  %v1469_v32 = vld [vmem:[%s1995_s13 + $0x138] sm:$0xf0]  ;;  %v1408_v36 = vor.u32 %v1595_v28, %v1405_v30  ;;  %v1577_v38 = vld [vmem:[%s1995_s13 + $0x24] sm:$0xf] }
  0x8f   : > { %1074 = vmatpush.bf16.msrb.mxu0 %v1376_v44  ;;  %1043 = vmatmul.bf16.vlgmr.msra.gmra.mxu1 %v2086_v63  ;;  %v1627_v33 = vld [vmem:[%s1995_s13 + $0x1b4] sm:$0xf]  ;;  %v1533_v34 = vld [vmem:[%s1995_s13 + $0x1b8] sm:$0xf0]  ;;  %v1472_v37 = vor.u32 %v1611_v31, %v1469_v32  ;;  %v1333_v39 = vld [vmem:[%s1995_s13 + $0x28] sm:$0xf0] }
  0x90   : > { %1087 = vmatpush.bf16.msrb.mxu1 %v1440_v46  ;;  %1056 = vmatmul.bf16.vlgmr.msra.gmra.mxu2 %v2078_v57  ;;  %v1593_v40 = vld [vmem:[%s1995_s13 + $0xa4] sm:$0xf]  ;;  %v1536_v41 = vor.u32 %v1627_v33, %v1533_v34  ;;  %v1397_v42 = vld [vmem:[%s1995_s13 + $0xa8] sm:$0xf0]  ;;  %v1575_v50 = vld [vmem:[%s1995_s13 + $0x14] sm:$0xf] }
  0x91   : > { %1100 = vmatpush.bf16.msrb.mxu2 %v1504_v47  ;;  %1069 = vmatmul.bf16.vlgmr.msra.gmra.mxu3 %v2082_v60  ;;  %v1609_v43 = vld [vmem:[%s1995_s13 + $0x124] sm:$0xf]  ;;  %v1461_v44 = vld [vmem:[%s1995_s13 + $0x128] sm:$0xf0]  ;;  %v1336_v47 = vor.u32 %v1577_v38, %v1333_v39  ;;  %v1400_v48 = vor.u32 %v1593_v40, %v1397_v42  ;;  %v1325_v51 = vld [vmem:[%s1995_s13 + $0x18] sm:$0xf0] }
  0x92   : > { %1113 = vmatpush.bf16.msrb.mxu3 %v1568_v53  ;;  %v1625_v45 = vld [vmem:[%s1995_s13 + $0x1a4] sm:$0xf]  ;;  %v1525_v46 = vld [vmem:[%s1995_s13 + $0x1a8] sm:$0xf0]  ;;  %v1464_v49 = vor.u32 %v1609_v43, %v1461_v44  ;;  %v1591_v52 = vld [vmem:[%s1995_s13 + $0x94] sm:$0xf] }
  0x93   : > { %1075 = vmatpush.bf16.msrb.mxu0 %v1368_v62  ;;  %v1528_v53 = vor.u32 %v1625_v45, %v1525_v46  ;;  %v1389_v54 = vld [vmem:[%s1995_s13 + $0x98] sm:$0xf0]  ;;  %v1607_v55 = vld [vmem:[%s1995_s13 + $0x114] sm:$0xf]  ;;  %v1328_v62 = vor.u32 %v1575_v50, %v1325_v51  ;;  %v1573_v2 = vld [vmem:[%s1995_s13 + $0x4] sm:$0xf] }
  0x94   : > { %1088 = vmatpush.bf16.msrb.mxu1 %v1432_v0  ;;  %v1453_v56 = vld [vmem:[%s1995_s13 + $0x118] sm:$0xf0]  ;;  %v1623_v58 = vld [vmem:[%s1995_s13 + $0x194] sm:$0xf]  ;;  %v1392_v0 = vor.u32 %v1591_v52, %v1389_v54  ;;  %v1317_v3 = vld [vmem:[%s1995_s13 + $0x8] sm:$0xf0] }
  0x95   : > { %1101 = vmatpush.bf16.msrb.mxu2 %v1496_v1  ;;  %v1517_v59 = vld [vmem:[%s1995_s13 + $0x198] sm:$0xf0]  ;;  %v1456_v1 = vor.u32 %v1607_v55, %v1453_v56  ;;  %v1589_v4 = vld [vmem:[%s1995_s13 + $0x84] sm:$0xf]  ;;  %v1381_v6 = vld [vmem:[%s1995_s13 + $0x88] sm:$0xf0] }
  0x96   : > { %1114 = vmatpush.bf16.msrb.mxu3 %v1560_v5  ;;  %v1520_v5 = vor.u32 %v1623_v58, %v1517_v59  ;;  %v1605_v7 = vld [vmem:[%s1995_s13 + $0x104] sm:$0xf]  ;;  %v1445_v8 = vld [vmem:[%s1995_s13 + $0x108] sm:$0xf0]  ;;  %v620_v21 = vld [vmem:[#allocation2] sm:$0xff] }
  0x97   : > { %1076 = vmatpush.bf16.msrb.mxu0 %v1360_v11  ;;  %v1621_v9 = vld [vmem:[%s1995_s13 + $0x184] sm:$0xf]  ;;  %v1509_v10 = vld [vmem:[%s1995_s13 + $0x188] sm:$0xf0]  ;;  %v1320_v11 = vor.u32 %v1573_v2, %v1317_v3  ;;  %v621_v31 = vld [vmem:[#allocation2 + $0x8] sm:$0xff] }
  0x98   : > { %1089 = vmatpush.bf16.msrb.mxu1 %v1424_v12  ;;  %v1384_v12 = vor.u32 %v1589_v4, %v1381_v6  ;;  %v1512_v14 = vor.u32 %v1621_v9, %v1509_v10 }
  0x99   : > { %1102 = vmatpush.bf16.msrb.mxu2 %v1488_v13  ;;  %v1448_v13 = vor.u32 %v1605_v7, %v1445_v8 }
  0x9a   : > { %1115 = vmatpush.bf16.msrb.mxu3 %v1552_v17 }
  0x9b   : > { %1077 = vmatpush.bf16.msrb.mxu0 %v1352_v23 }
  0x9c   : > { %1090 = vmatpush.bf16.msrb.mxu1 %v1416_v24 }
  0x9d   : > { %1103 = vmatpush.bf16.msrb.mxu2 %v1480_v25 }
  0x9e   : > { %1116 = vmatpush.bf16.msrb.mxu3 %v1544_v29 }
  0x9f   : > { %1078 = vmatpush.bf16.msrb.mxu0 %v1344_v35 }
  0xa0   : > { %1091 = vmatpush.bf16.msrb.mxu1 %v1408_v36 }
  0xa1   : > { %1104 = vmatpush.bf16.msrb.mxu2 %v1472_v37 }
  0xa2   : > { %1117 = vmatpush.bf16.msrb.mxu3 %v1536_v41 }
  0xa3   : > { %1079 = vmatpush.bf16.msrb.mxu0 %v1336_v47 }
  0xa4   : > { %1092 = vmatpush.bf16.msrb.mxu1 %v1400_v48 }
  0xa5   : > { %1105 = vmatpush.bf16.msrb.mxu2 %v1464_v49 }
  0xa6   : > { %1118 = vmatpush.bf16.msrb.mxu3 %v1528_v53 }
  0xa7   : > { %1080 = vmatpush.bf16.msrb.mxu0 %v1328_v62 }
  0xa8   : > { %1093 = vmatpush.bf16.msrb.mxu1 %v1392_v0 }
  0xa9   : > { %1106 = vmatpush.bf16.msrb.mxu2 %v1456_v1 }
  0xaa   : > { %1119 = vmatpush.bf16.msrb.mxu3 %v1520_v5 }
  0xab   : > { %1081 = vmatpush.bf16.msrb.mxu0 %v1320_v11 }
  0xac   : > { %1094 = vmatpush.bf16.msrb.mxu1 %v1384_v12 }
  0xad   : > { %1107 = vmatpush.bf16.msrb.mxu2 %v1448_v13 }
  0xae   : > { %1120 = vmatpush.bf16.msrb.mxu3 %v1512_v14  ;;  %1082 = vmatmul.bf16.vlgmr.msrb.gmra.mxu0 %v2084_v61 }
  0xaf   : > { %1095 = vmatmul.bf16.vlgmr.msrb.gmra.mxu1 %v2086_v63 }
  0xb0   : > { %1108 = vmatmul.bf16.vlgmr.msrb.gmra.mxu2 %v2078_v57 }
  0xb1   : > { %1121 = vmatmul.bf16.vlgmr.msrb.gmra.mxu3 %v2082_v60 }
 0x10b   : > { %v1031_v15 = vpop.f32.mrf.mxu0 }
 0x10c   : > { %v1044_v16 = vpop.f32.mrf.mxu1 }
 0x10d   : > { %v1045_v17 = vadd.f32 %v1044_v16, %v1031_v15 }
 0x113   : > { %v1057_v18 = vpop.f32.mrf.mxu2  ;;  %v1033_v23 = vpop.f32.mrf.mxu0 }
 0x114   : > { %v1058_v19 = vadd.f32 %v1057_v18, %v1045_v17  ;;  %v1070_v20 = vpop.f32.mrf.mxu3  ;;  %v1046_v24 = vpop.f32.mrf.mxu1 }
 0x116   : > { %v1071_v22 = vadd.f32 %v1070_v20, %v1058_v19 }
 0x118   : > { %v1126_v25 = vadd.f32 %v1071_v22, %v620_v21 }
 0x11a   : > { %1128 = vst [vmem:[#allocation2] sm:$0xff] %v1126_v25 }
 0x11b   : > { %v1059_v26 = vpop.f32.mrf.mxu2 }
 0x11c   : > { %v1072_v61 = vpop.f32.mrf.mxu3 }
 0x12b   : > { %v1083_v27 = vpop.f32.mrf.mxu0 }
 0x12c   : > { %v1096_v63 = vpop.f32.mrf.mxu1 }
 0x12d   : > { %v1097_v28 = vadd.f32 %v1096_v63, %v1083_v27 }
 0x133   : > { %v1109_v57 = vpop.f32.mrf.mxu2  ;;  %v1085_v30 = vpop.f32.mrf.mxu0 }
 0x134   : > { %v1110_v29 = vadd.f32 %v1109_v57, %v1097_v28  ;;  %v1122_v60 = vpop.f32.mrf.mxu3  ;;  %v1098_v32 = vpop.f32.mrf.mxu1 }
 0x136   : > { %v1123_v33 = vadd.f32 %v1122_v60, %v1110_v29 }
 0x138   : > { %v1127_v34 = vadd.f32 %v1123_v33, %v621_v31  ;;  %1133 = sbr.rel (%p1569_p13) target bundleno = 331 (0x14b), region = 82 }
 0x13a   : > { %1129 = vst [vmem:[#allocation2 + $0x8] sm:$0xff] %v1127_v34 }
 0x13b   : > { %v1111_v35 = vpop.f32.mrf.mxu2 }
 0x13c   : > { %v1124_v36 = vpop.f32.mrf.mxu3 }
 0x13d   : > { %v1134_v37 = vld [vmem:[#allocation2] sm:$0xff] }
 0x13e   : > { %v1136_v39 = vld [vmem:[%s592_s15] sm:$0x3] }
 0x13f   : > { %v1138_v40 = vperm.slane %v1136_v39, 0  ;;  %v1139_v41 = vperm.slane %v1136_v39, 1  ;;  %v1144_v42 = vld [vmem:[%s1988_s18] sm:$0xff] }
 0x140   : > { %v1145_v43 = vunpack.c.l.bf16 %v1144_v42  ;;  %v1146_v44 = vunpack.c.h.bf16 %v1144_v42 }
 0x141   : > { %v1135_v38 = vld [vmem:[#allocation2 + $0x8] sm:$0xff]  ;;  %v1142_v45 = vadd.f32 %v1138_v40, %v1134_v37 }
 0x142   : > { %v1143_v46 = vadd.f32 %v1139_v41, %v1135_v38 }
 0x143   : > { %v1147_v47 = vadd.f32 %v1145_v43, %v1142_v45 }
 0x144   : > { %v1148_v48 = vadd.f32 %v1146_v44, %v1143_v46 }
 0x145   : > { %v1149_v49 = vmax.f32 %v1147_v47, 0.0 }
 0x146   : > { %v1150_v50 = vmax.f32 %v1148_v48, 0.0 }
 0x148   : > { %v1151_v51 = vpack.c.bf16 %v1150_v50, %v1149_v49 }
 0x14a   : > { %1152 = vst [vmem:[%s1993_s12] sm:$0xff] %v1151_v51 }
 0x14b PF: > { %s14_s21 = sadd.s32 1, %s1748_s21   ;;  %s2178_s15 = smov %s1728_s16 }
 0x14c   : > { %p11_p0 = scmp.ge.s32.totalorder %s14_s21, 20   ;;  %s2179_s16 = smov %s1827_s28 }
 0x14d   : > { %s2180_s17 = smov %s1740_s19  ;;  %s2181_s18 = smov %s1744_s20 }
 0x14e   : > { %s2182_s19 = smov %s2185_s22  ;;  %s2183_s20 = smov %s2189_s23 }
 0x14f   :  { %13 = sbr.rel (!%p11_p0) target bundleno = 4 (0x4), region = 126 }

// kernel: resnet_forward.41
= control target key start
LH: loop header
LB: loop body
LE: loop exit
PB: predicated region body
PF: predicated region fallthrough
CT: control target
= control target key end

     0   :  { %s1683_s12 = smov 0   ;;  %s1685_s13 = smov 0   ;;  %s2074_s0 = inlined_call_operand.vmem [shape: bf16[8,4608], index: 0, kind: input, shape index: {}]   ;;  %s2075_s1 = inlined_call_operand.vmem [shape: bf16[4608,512], index: 1, kind: input, shape index: {}]   ;;  %s2076_s2 = inlined_call_operand.vmem [shape: f32[1,512], index: 2, kind: input, shape index: {}]   ;;  %s2077_s3 = inlined_call_operand.vmem [shape: bf16[8,512], index: 3, kind: output, shape index: {}]  }
   0x1   :  { %s1687_s14 = smov 0   ;;  %s1689_s15 = smov 0  }
   0x2   :  { %s1691_s16 = smov 0   ;;  %s1693_s17 = smov 0  }
   0x3   :  { %s1695_s18 = smov 0  }
   0x4 LB: > { %s25_s19 = sadd.s32 1, %s1652_s16  ;;  %s28_s20 = sadd.s32 1, %s1656_s17  ;;  %s1660_s18 = sphi %s1695_s18, %s13_s18   ;;  %s1656_s17 = sphi %s1693_s17, %s2083_s17   ;;  %s1652_s16 = sphi %s1691_s16, %s2082_s16   ;;  %s1648_s15 = sphi %s1689_s15, %s2081_s15   ;;  %s1644_s14 = sphi %s1687_s14, %s2080_s14   ;;  %s1640_s13 = sphi %s1685_s13, %s2079_s13   ;;  %s1636_s12 = sphi %s1683_s12, %s2078_s12  }
   0x5   : > { %p26_p0 = scmp.ge.s32.totalorder %s25_s19, 9  ;;  %p76_p1 = scmp.ne.s32.totalorder %s1640_s13, %s1636_s12 }
   0x6   : > { %p77_p2 = scmp.eq.s32.totalorder %s1660_s18, 0  ;;  %s69_s24 = sadd.s32 1, %s1640_s13 }
   0x7   : > { %s2085_s19 = smov (%p26_p0, %s25_s19), 0  ;;  %s2087_s20 = smov (!%p26_p0, %s28_s20), %s1656_s17 }
   0x8   : > { %p78_p3 = por %p77_p2, %p76_p1  ;;  %p30_p4 = scmp.ge.s32.totalorder %s2087_s20, 2 }
   0x9   : > { %s64_s21 = ssub.s32 %s1652_s16, %s2085_s19  ;;  %p1211_p6 = scmp.ge.s32.totalorder %s1660_s18, 18 }
   0xa   : > { %s2089_s20 = smov (%p30_p4, %s2087_s20), 0 }
   0xb   : > { %s65_s22 = ssub.s32 %s1656_s17, %s2089_s20  ;;  %156 = sbr.rel (%p1211_p6) target bundleno = 87 (0x57), region = 16 }
   0xc   : > { %s66_s23 = sor.u32 %s65_s22, %s64_s21 }
   0xd   : > { %p67_p5 = scmp.eq.s32.totalorder %s66_s23, 0 }
   0xf   : > { %s1734_s25 = scalar_select %p67_p5, %s1640_s13, %s69_s24  }
  0x10   : > { %172 = sbr.rel (!%p78_p3) target bundleno = 87 (0x57), region = 24  ;;  %s174_s26 = sand.u32 (%p78_p3), 1, %s1640_s13  }
  0x11   : > { %s1214_s27 = sshll.u32 (%p78_p3), %s1656_s17, 1  ;;  %s1212_s28 = sshll.u32 (%p78_p3), %s174_s26, 9 }
  0x12   : > { %s1484_s29 = sshll.u32 (%p78_p3), %s1652_s16, 8  ;;  %s1748_s8 = scalar_lea.vmem (%p78_p3), [#allocation3], %s1212_s28 }
  0x13   : > { %s180_s30 = sadd.s32 (%p78_p3), %s1484_s29, %s1214_s27 }
  0x14   : > { %s1216_s4 = sshll.u32 (%p78_p3), %s180_s30, 2 }
  0x15   : > { %s1743_s7 = scalar_lea.vmem %s2075_s1, %s1216_s4 }
  0x16   : > { %v337_v0 = vld [vmem:[%s1743_s7] sm:$0xff]  ;;  %v339_v1 = vld [vmem:[%s1743_s7 + $0x10] sm:$0xff] }
  0x17   : > { %v341_v2 = vld [vmem:[%s1743_s7 + $0x20] sm:$0xff]  ;;  %338 = vst [vmem:[%s1748_s8] sm:$0xff] %v337_v0  ;;  %v343_v3 = vld [vmem:[%s1743_s7 + $0x30] sm:$0xff] }
  0x18   : > { %340 = vst [vmem:[%s1748_s8 + $0x8] sm:$0xff] %v339_v1  ;;  %v345_v4 = vld [vmem:[%s1743_s7 + $0x40] sm:$0xff]  ;;  %v347_v5 = vld [vmem:[%s1743_s7 + $0x50] sm:$0xff] }
  0x19   : > { %342 = vst [vmem:[%s1748_s8 + $0x10] sm:$0xff] %v341_v2  ;;  %v349_v6 = vld [vmem:[%s1743_s7 + $0x60] sm:$0xff]  ;;  %v351_v7 = vld [vmem:[%s1743_s7 + $0x70] sm:$0xff] }
  0x1a   : > { %344 = vst [vmem:[%s1748_s8 + $0x18] sm:$0xff] %v343_v3  ;;  %v353_v8 = vld [vmem:[%s1743_s7 + $0x80] sm:$0xff]  ;;  %v355_v9 = vld [vmem:[%s1743_s7 + $0x90] sm:$0xff] }
  0x1b   : > { %346 = vst [vmem:[%s1748_s8 + $0x20] sm:$0xff] %v345_v4  ;;  %v357_v10 = vld [vmem:[%s1743_s7 + $0xa0] sm:$0xff]  ;;  %v359_v11 = vld [vmem:[%s1743_s7 + $0xb0] sm:$0xff] }
  0x1c   : > { %348 = vst [vmem:[%s1748_s8 + $0x28] sm:$0xff] %v347_v5  ;;  %v361_v12 = vld [vmem:[%s1743_s7 + $0xc0] sm:$0xff]  ;;  %v363_v13 = vld [vmem:[%s1743_s7 + $0xd0] sm:$0xff] }
  0x1d   : > { %350 = vst [vmem:[%s1748_s8 + $0x30] sm:$0xff] %v349_v6  ;;  %v365_v14 = vld [vmem:[%s1743_s7 + $0xe0] sm:$0xff]  ;;  %v367_v15 = vld [vmem:[%s1743_s7 + $0xf0] sm:$0xff] }
  0x1e   : > { %352 = vst [vmem:[%s1748_s8 + $0x38] sm:$0xff] %v351_v7  ;;  %v369_v16 = vld [vmem:[%s1743_s7 + $0x100] sm:$0xff]  ;;  %v371_v17 = vld [vmem:[%s1743_s7 + $0x110] sm:$0xff] }
  0x1f   : > { %354 = vst [vmem:[%s1748_s8 + $0x40] sm:$0xff] %v353_v8  ;;  %v373_v18 = vld [vmem:[%s1743_s7 + $0x120] sm:$0xff]  ;;  %v375_v19 = vld [vmem:[%s1743_s7 + $0x130] sm:$0xff] }
  0x20   : > { %356 = vst [vmem:[%s1748_s8 + $0x48] sm:$0xff] %v355_v9  ;;  %v377_v20 = vld [vmem:[%s1743_s7 + $0x140] sm:$0xff]  ;;  %v379_v21 = vld [vmem:[%s1743_s7 + $0x150] sm:$0xff] }
  0x21   : > { %358 = vst [vmem:[%s1748_s8 + $0x50] sm:$0xff] %v357_v10  ;;  %v381_v22 = vld [vmem:[%s1743_s7 + $0x160] sm:$0xff]  ;;  %v383_v23 = vld [vmem:[%s1743_s7 + $0x170] sm:$0xff] }
  0x22   : > { %360 = vst [vmem:[%s1748_s8 + $0x58] sm:$0xff] %v359_v11  ;;  %v385_v24 = vld [vmem:[%s1743_s7 + $0x180] sm:$0xff]  ;;  %v387_v25 = vld [vmem:[%s1743_s7 + $0x190] sm:$0xff] }
  0x23   : > { %362 = vst [vmem:[%s1748_s8 + $0x60] sm:$0xff] %v361_v12  ;;  %v389_v26 = vld [vmem:[%s1743_s7 + $0x1a0] sm:$0xff]  ;;  %v391_v27 = vld [vmem:[%s1743_s7 + $0x1b0] sm:$0xff] }
  0x24   : > { %364 = vst [vmem:[%s1748_s8 + $0x68] sm:$0xff] %v363_v13  ;;  %v393_v28 = vld [vmem:[%s1743_s7 + $0x1c0] sm:$0xff]  ;;  %v395_v29 = vld [vmem:[%s1743_s7 + $0x1d0] sm:$0xff] }
  0x25   : > { %366 = vst [vmem:[%s1748_s8 + $0x70] sm:$0xff] %v365_v14  ;;  %v397_v30 = vld [vmem:[%s1743_s7 + $0x1e0] sm:$0xff]  ;;  %v399_v31 = vld [vmem:[%s1743_s7 + $0x1f0] sm:$0xff] }
  0x26   : > { %368 = vst [vmem:[%s1748_s8 + $0x78] sm:$0xff] %v367_v15  ;;  %v401_v32 = vld [vmem:[%s1743_s7 + $0x200] sm:$0xff]  ;;  %v403_v33 = vld [vmem:[%s1743_s7 + $0x210] sm:$0xff] }
  0x27   : > { %370 = vst [vmem:[%s1748_s8 + $0x80] sm:$0xff] %v369_v16  ;;  %v405_v34 = vld [vmem:[%s1743_s7 + $0x220] sm:$0xff]  ;;  %v407_v35 = vld [vmem:[%s1743_s7 + $0x230] sm:$0xff] }
  0x28   : > { %372 = vst [vmem:[%s1748_s8 + $0x88] sm:$0xff] %v371_v17  ;;  %v409_v36 = vld [vmem:[%s1743_s7 + $0x240] sm:$0xff]  ;;  %v411_v37 = vld [vmem:[%s1743_s7 + $0x250] sm:$0xff] }
  0x29   : > { %374 = vst [vmem:[%s1748_s8 + $0x90] sm:$0xff] %v373_v18  ;;  %v413_v38 = vld [vmem:[%s1743_s7 + $0x260] sm:$0xff]  ;;  %v415_v39 = vld [vmem:[%s1743_s7 + $0x270] sm:$0xff] }
  0x2a   : > { %376 = vst [vmem:[%s1748_s8 + $0x98] sm:$0xff] %v375_v19  ;;  %v417_v40 = vld [vmem:[%s1743_s7 + $0x280] sm:$0xff]  ;;  %v419_v41 = vld [vmem:[%s1743_s7 + $0x290] sm:$0xff] }
  0x2b   : > { %378 = vst [vmem:[%s1748_s8 + $0xa0] sm:$0xff] %v377_v20  ;;  %v421_v42 = vld [vmem:[%s1743_s7 + $0x2a0] sm:$0xff]  ;;  %v423_v43 = vld [vmem:[%s1743_s7 + $0x2b0] sm:$0xff] }
  0x2c   : > { %380 = vst [vmem:[%s1748_s8 + $0xa8] sm:$0xff] %v379_v21  ;;  %v425_v44 = vld [vmem:[%s1743_s7 + $0x2c0] sm:$0xff]  ;;  %v427_v45 = vld [vmem:[%s1743_s7 + $0x2d0] sm:$0xff] }
  0x2d   : > { %382 = vst [vmem:[%s1748_s8 + $0xb0] sm:$0xff] %v381_v22  ;;  %v429_v46 = vld [vmem:[%s1743_s7 + $0x2e0] sm:$0xff]  ;;  %v431_v47 = vld [vmem:[%s1743_s7 + $0x2f0] sm:$0xff] }
  0x2e   : > { %384 = vst [vmem:[%s1748_s8 + $0xb8] sm:$0xff] %v383_v23  ;;  %v433_v48 = vld [vmem:[%s1743_s7 + $0x300] sm:$0xff]  ;;  %v435_v49 = vld [vmem:[%s1743_s7 + $0x310] sm:$0xff] }
  0x2f   : > { %386 = vst [vmem:[%s1748_s8 + $0xc0] sm:$0xff] %v385_v24  ;;  %v437_v50 = vld [vmem:[%s1743_s7 + $0x320] sm:$0xff]  ;;  %v439_v51 = vld [vmem:[%s1743_s7 + $0x330] sm:$0xff] }
  0x30   : > { %388 = vst [vmem:[%s1748_s8 + $0xc8] sm:$0xff] %v387_v25  ;;  %v441_v52 = vld [vmem:[%s1743_s7 + $0x340] sm:$0xff]  ;;  %v443_v53 = vld [vmem:[%s1743_s7 + $0x350] sm:$0xff] }
  0x31   : > { %390 = vst [vmem:[%s1748_s8 + $0xd0] sm:$0xff] %v389_v26  ;;  %v445_v54 = vld [vmem:[%s1743_s7 + $0x360] sm:$0xff]  ;;  %v447_v55 = vld [vmem:[%s1743_s7 + $0x370] sm:$0xff] }
  0x32   : > { %392 = vst [vmem:[%s1748_s8 + $0xd8] sm:$0xff] %v391_v27  ;;  %v449_v56 = vld [vmem:[%s1743_s7 + $0x380] sm:$0xff]  ;;  %v451_v57 = vld [vmem:[%s1743_s7 + $0x390] sm:$0xff] }
  0x33   : > { %394 = vst [vmem:[%s1748_s8 + $0xe0] sm:$0xff] %v393_v28  ;;  %v453_v58 = vld [vmem:[%s1743_s7 + $0x3a0] sm:$0xff]  ;;  %v455_v59 = vld [vmem:[%s1743_s7 + $0x3b0] sm:$0xff] }
  0x34   : > { %396 = vst [vmem:[%s1748_s8 + $0xe8] sm:$0xff] %v395_v29  ;;  %v457_v60 = vld [vmem:[%s1743_s7 + $0x3c0] sm:$0xff]  ;;  %v459_v61 = vld [vmem:[%s1743_s7 + $0x3d0] sm:$0xff] }
  0x35   : > { %398 = vst [vmem:[%s1748_s8 + $0xf0] sm:$0xff] %v397_v30  ;;  %v461_v62 = vld [vmem:[%s1743_s7 + $0x3e0] sm:$0xff]  ;;  %v463_v63 = vld [vmem:[%s1743_s7 + $0x3f0] sm:$0xff] }
  0x36   : > { %400 = vst [vmem:[%s1748_s8 + $0xf8] sm:$0xff] %v399_v31 }
  0x37   : > { %402 = vst [vmem:[%s1748_s8 + $0x100] sm:$0xff] %v401_v32 }
  0x38   : > { %404 = vst [vmem:[%s1748_s8 + $0x108] sm:$0xff] %v403_v33 }
  0x39   : > { %406 = vst [vmem:[%s1748_s8 + $0x110] sm:$0xff] %v405_v34 }
  0x3a   : > { %408 = vst [vmem:[%s1748_s8 + $0x118] sm:$0xff] %v407_v35 }
  0x3b   : > { %410 = vst [vmem:[%s1748_s8 + $0x120] sm:$0xff] %v409_v36 }
  0x3c   : > { %412 = vst [vmem:[%s1748_s8 + $0x128] sm:$0xff] %v411_v37 }
  0x3d   : > { %414 = vst [vmem:[%s1748_s8 + $0x130] sm:$0xff] %v413_v38 }
  0x3e   : > { %416 = vst [vmem:[%s1748_s8 + $0x138] sm:$0xff] %v415_v39 }
  0x3f   : > { %418 = vst [vmem:[%s1748_s8 + $0x140] sm:$0xff] %v417_v40 }
  0x40   : > { %420 = vst [vmem:[%s1748_s8 + $0x148] sm:$0xff] %v419_v41 }
  0x41   : > { %422 = vst [vmem:[%s1748_s8 + $0x150] sm:$0xff] %v421_v42 }
  0x42   : > { %424 = vst [vmem:[%s1748_s8 + $0x158] sm:$0xff] %v423_v43 }
  0x43   : > { %426 = vst [vmem:[%s1748_s8 + $0x160] sm:$0xff] %v425_v44 }
  0x44   : > { %428 = vst [vmem:[%s1748_s8 + $0x168] sm:$0xff] %v427_v45 }
  0x45   : > { %430 = vst [vmem:[%s1748_s8 + $0x170] sm:$0xff] %v429_v46 }
  0x46   : > { %432 = vst [vmem:[%s1748_s8 + $0x178] sm:$0xff] %v431_v47 }
  0x47   : > { %434 = vst [vmem:[%s1748_s8 + $0x180] sm:$0xff] %v433_v48 }
  0x48   : > { %436 = vst [vmem:[%s1748_s8 + $0x188] sm:$0xff] %v435_v49 }
  0x49   : > { %438 = vst [vmem:[%s1748_s8 + $0x190] sm:$0xff] %v437_v50 }
  0x4a   : > { %440 = vst [vmem:[%s1748_s8 + $0x198] sm:$0xff] %v439_v51 }
  0x4b   : > { %442 = vst [vmem:[%s1748_s8 + $0x1a0] sm:$0xff] %v441_v52 }
  0x4c   : > { %444 = vst [vmem:[%s1748_s8 + $0x1a8] sm:$0xff] %v443_v53 }
  0x4d   : > { %446 = vst [vmem:[%s1748_s8 + $0x1b0] sm:$0xff] %v445_v54 }
  0x4e   : > { %448 = vst [vmem:[%s1748_s8 + $0x1b8] sm:$0xff] %v447_v55 }
  0x4f   : > { %450 = vst [vmem:[%s1748_s8 + $0x1c0] sm:$0xff] %v449_v56 }
  0x50   : > { %452 = vst [vmem:[%s1748_s8 + $0x1c8] sm:$0xff] %v451_v57 }
  0x51   : > { %454 = vst [vmem:[%s1748_s8 + $0x1d0] sm:$0xff] %v453_v58 }
  0x52   : > { %456 = vst [vmem:[%s1748_s8 + $0x1d8] sm:$0xff] %v455_v59 }
  0x53   : > { %458 = vst [vmem:[%s1748_s8 + $0x1e0] sm:$0xff] %v457_v60 }
  0x54   : > { %460 = vst [vmem:[%s1748_s8 + $0x1e8] sm:$0xff] %v459_v61 }
  0x55   : > { %462 = vst [vmem:[%s1748_s8 + $0x1f0] sm:$0xff] %v461_v62 }
  0x56   : > { %464 = vst [vmem:[%s1748_s8 + $0x1f8] sm:$0xff] %v463_v63 }
  0x57 PF: > { %p1217_p7 = scmp.ge.s32.totalorder %s1660_s18, 1  ;;  %p477_p8 = scmp.lt.s32.totalorder %s1660_s18, 19 }
  0x59   : > { %p478_p9 = pnand %p1217_p7, %p477_p8 }
  0x5a   : > { %s484_s9 = sand.u32 (!%p478_p9), 1, %s1636_s12   ;;  %s1219_s10 = sshll.u32 (!%p478_p9), %s1644_s14, 2 }
  0x5b   : > { %481 = sbr.rel (%p478_p9) target bundleno = 328 (0x148), region = 66  ;;  %s1218_s11 = sshll.u32 (!%p478_p9), %s484_s9, 9 }
  0x5c   : > { %p527_p10 = scmp.lt.s32.totalorder (!%p478_p9), %s1219_s10, 35  ;;  %s1221_s21 = sshll.u32 (!%p478_p9), %s1648_s15, 1 }
  0x5d   : > { %p537_p11 = scmp.lt.s32.totalorder (!%p478_p9), %s1221_s21, 3  ;;  %s1897_s5 = scalar_lea.vmem (!%p478_p9), [#allocation3], %s1218_s11 }
  0x5e   : > { %p1224_p12 = scmp.ne.s32.totalorder (!%p478_p9), %s1644_s14, 0 }
  0x60   : > { %s2091_s10 = smov (!%p527_p10, %s1219_s10), 35  ;;  %s2093_s21 = smov (!%p537_p11, %s1221_s21), 3 }
  0x61   : > { %s1220_s22 = sshll.u32 %s2091_s10, 2  ;;  %s539_s12 = scalar_lea.vmem %s2076_s2, %s2093_s21 }
  0x62   : > { %s1883_s26 = scalar_lea.vmem %s2074_s0, %s1220_s22  ;;  %s1223_s29 = sshll.u32 %s2093_s21, 2 }
  0x63   : > { %s1895_s15 = scalar_lea.vmem %s2077_s3, %s1223_s29  ;;  %554 = sbr.rel (%p1224_p12) target bundleno = 107 (0x6b), region = 74 }
  0x68   : > { %v1662_v0 = vmov 0.0  }
  0x69   : > { %555 = vst [vmem:[#allocation2] sm:$0xff] %v1662_v0 }
  0x6a   : > { %556 = vst [vmem:[#allocation2 + $0x8] sm:$0xff] %v1662_v0 }
  0x6b PF: > { %v1283_v1 = vld [vmem:[%s1897_s5 + $0x70] sm:$0xf]  ;;  %v1500_v2 = vld [vmem:[%s1897_s5 + $0x74] sm:$0xf0]  ;;  %v1275_v12 = vld [vmem:[%s1897_s5 + $0x60] sm:$0xf] }
  0x6c   : > { %v1347_v3 = vld [vmem:[%s1897_s5 + $0xf0] sm:$0xf]  ;;  %v1284_v4 = vor.u32 %v1500_v2, %v1283_v1  ;;  %v1516_v5 = vld [vmem:[%s1897_s5 + $0xf4] sm:$0xf0]  ;;  %v1498_v14 = vld [vmem:[%s1897_s5 + $0x64] sm:$0xf0] }
  0x6d   : > { %v1411_v6 = vld [vmem:[%s1897_s5 + $0x170] sm:$0xf]  ;;  %v1532_v7 = vld [vmem:[%s1897_s5 + $0x174] sm:$0xf0]  ;;  %v1348_v8 = vor.u32 %v1516_v5, %v1347_v3  ;;  %v1339_v15 = vld [vmem:[%s1897_s5 + $0xe0] sm:$0xf]  ;;  %v1276_v17 = vor.u32 %v1498_v14, %v1275_v12 }
  0x6e   : > { %v1412_v9 = vor.u32 %v1532_v7, %v1411_v6  ;;  %v1475_v10 = vld [vmem:[%s1897_s5 + $0x1f0] sm:$0xf]  ;;  %v1548_v11 = vld [vmem:[%s1897_s5 + $0x1f4] sm:$0xf0]  ;;  %959 = vmatpush.bf16.msra.mxu0 %v1284_v4  ;;  %v1514_v16 = vld [vmem:[%s1897_s5 + $0xe4] sm:$0xf0] }
  0x6f   : > { %v1476_v13 = vor.u32 %v1548_v11, %v1475_v10  ;;  %972 = vmatpush.bf16.msra.mxu1 %v1348_v8  ;;  %v1340_v18 = vor.u32 %v1514_v16, %v1339_v15  ;;  %v1403_v19 = vld [vmem:[%s1897_s5 + $0x160] sm:$0xf]  ;;  %v1530_v20 = vld [vmem:[%s1897_s5 + $0x164] sm:$0xf0]  ;;  %v1267_v24 = vld [vmem:[%s1897_s5 + $0x50] sm:$0xf] }
  0x70   : > { %985 = vmatpush.bf16.msra.mxu2 %v1412_v9  ;;  %v1467_v21 = vld [vmem:[%s1897_s5 + $0x1e0] sm:$0xf]  ;;  %v1404_v22 = vor.u32 %v1530_v20, %v1403_v19  ;;  %v1546_v23 = vld [vmem:[%s1897_s5 + $0x1e4] sm:$0xf0]  ;;  %v1496_v25 = vld [vmem:[%s1897_s5 + $0x54] sm:$0xf0] }
  0x71   : > { %998 = vmatpush.bf16.msra.mxu3 %v1476_v13  ;;  %v1468_v26 = vor.u32 %v1546_v23, %v1467_v21  ;;  %v1331_v27 = vld [vmem:[%s1897_s5 + $0xd0] sm:$0xf]  ;;  %v1512_v28 = vld [vmem:[%s1897_s5 + $0xd4] sm:$0xf0]  ;;  %v1268_v30 = vor.u32 %v1496_v25, %v1267_v24  ;;  %v1259_v36 = vld [vmem:[%s1897_s5 + $0x40] sm:$0xf] }
  0x72   : > { %v1395_v29 = vld [vmem:[%s1897_s5 + $0x150] sm:$0xf]  ;;  %960 = vmatpush.bf16.msra.mxu0 %v1276_v17  ;;  %v1528_v31 = vld [vmem:[%s1897_s5 + $0x154] sm:$0xf0]  ;;  %v1332_v34 = vor.u32 %v1512_v28, %v1331_v27  ;;  %v1494_v37 = vld [vmem:[%s1897_s5 + $0x44] sm:$0xf0] }
  0x73   : > { %v1459_v32 = vld [vmem:[%s1897_s5 + $0x1d0] sm:$0xf]  ;;  %v1544_v33 = vld [vmem:[%s1897_s5 + $0x1d4] sm:$0xf0]  ;;  %973 = vmatpush.bf16.msra.mxu1 %v1340_v18  ;;  %v1396_v35 = vor.u32 %v1528_v31, %v1395_v29  ;;  %v1323_v38 = vld [vmem:[%s1897_s5 + $0xc0] sm:$0xf]  ;;  %v1260_v45 = vor.u32 %v1494_v37, %v1259_v36 }
  0x74   : > { %986 = vmatpush.bf16.msra.mxu2 %v1404_v22  ;;  %v1460_v39 = vor.u32 %v1544_v33, %v1459_v32  ;;  %v1510_v40 = vld [vmem:[%s1897_s5 + $0xc4] sm:$0xf0]  ;;  %v1387_v41 = vld [vmem:[%s1897_s5 + $0x140] sm:$0xf]  ;;  %v1251_v48 = vld [vmem:[%s1897_s5 + $0x30] sm:$0xf] }
  0x75   : > { %999 = vmatpush.bf16.msra.mxu3 %v1468_v26  ;;  %v1526_v42 = vld [vmem:[%s1897_s5 + $0x144] sm:$0xf0]  ;;  %v1451_v43 = vld [vmem:[%s1897_s5 + $0x1c0] sm:$0xf]  ;;  %v1324_v46 = vor.u32 %v1510_v40, %v1323_v38  ;;  %v1492_v49 = vld [vmem:[%s1897_s5 + $0x34] sm:$0xf0] }
  0x76   : > { %v1542_v44 = vld [vmem:[%s1897_s5 + $0x1c4] sm:$0xf0]  ;;  %961 = vmatpush.bf16.msra.mxu0 %v1268_v30  ;;  %v1388_v47 = vor.u32 %v1526_v42, %v1387_v41  ;;  %v1315_v50 = vld [vmem:[%s1897_s5 + $0xb0] sm:$0xf]  ;;  %v1508_v52 = vld [vmem:[%s1897_s5 + $0xb4] sm:$0xf0]  ;;  %v1252_v57 = vor.u32 %v1492_v49, %v1251_v48 }
  0x77   : > { %974 = vmatpush.bf16.msra.mxu1 %v1332_v34  ;;  %v1452_v51 = vor.u32 %v1542_v44, %v1451_v43  ;;  %v1379_v53 = vld [vmem:[%s1897_s5 + $0x130] sm:$0xf]  ;;  %v1524_v54 = vld [vmem:[%s1897_s5 + $0x134] sm:$0xf0]  ;;  %v1316_v58 = vor.u32 %v1508_v52, %v1315_v50  ;;  %v1243_v60 = vld [vmem:[%s1897_s5 + $0x20] sm:$0xf] }
  0x78   : > { %987 = vmatpush.bf16.msra.mxu2 %v1396_v35  ;;  %v1443_v55 = vld [vmem:[%s1897_s5 + $0x1b0] sm:$0xf]  ;;  %v1540_v56 = vld [vmem:[%s1897_s5 + $0x1b4] sm:$0xf0]  ;;  %v1380_v59 = vor.u32 %v1524_v54, %v1379_v53  ;;  %v1490_v61 = vld [vmem:[%s1897_s5 + $0x24] sm:$0xf0] }
  0x79   : > { %1000 = vmatpush.bf16.msra.mxu3 %v1460_v39  ;;  %v1307_v62 = vld [vmem:[%s1897_s5 + $0xa0] sm:$0xf]  ;;  %v1444_v63 = vor.u32 %v1540_v56, %v1443_v55  ;;  %v1506_v0 = vld [vmem:[%s1897_s5 + $0xa4] sm:$0xf0]  ;;  %v1244_v5 = vor.u32 %v1490_v61, %v1243_v60  ;;  %v1235_v8 = vld [vmem:[%s1897_s5 + $0x10] sm:$0xf] }
  0x7a   : > { %962 = vmatpush.bf16.msra.mxu0 %v1260_v45  ;;  %v1371_v1 = vld [vmem:[%s1897_s5 + $0x120] sm:$0xf]  ;;  %v1522_v2 = vld [vmem:[%s1897_s5 + $0x124] sm:$0xf0]  ;;  %v1308_v6 = vor.u32 %v1506_v0, %v1307_v62  ;;  %v1488_v9 = vld [vmem:[%s1897_s5 + $0x14] sm:$0xf0] }
  0x7b   : > { %975 = vmatpush.bf16.msra.mxu1 %v1324_v46  ;;  %v1435_v3 = vld [vmem:[%s1897_s5 + $0x1a0] sm:$0xf]  ;;  %v1538_v4 = vld [vmem:[%s1897_s5 + $0x1a4] sm:$0xf0]  ;;  %v1372_v7 = vor.u32 %v1522_v2, %v1371_v1  ;;  %v1299_v10 = vld [vmem:[%s1897_s5 + $0x90] sm:$0xf]  ;;  %v1236_v17 = vor.u32 %v1488_v9, %v1235_v8 }
  0x7c   : > { %988 = vmatpush.bf16.msra.mxu2 %v1388_v47  ;;  %v1436_v11 = vor.u32 %v1538_v4, %v1435_v3  ;;  %v1504_v12 = vld [vmem:[%s1897_s5 + $0x94] sm:$0xf0]  ;;  %v1363_v13 = vld [vmem:[%s1897_s5 + $0x110] sm:$0xf]  ;;  %v1227_v18 = vld [vmem:[%s1897_s5] sm:$0xf] }
  0x7d   : > { %1001 = vmatpush.bf16.msra.mxu3 %v1452_v51  ;;  %v1520_v14 = vld [vmem:[%s1897_s5 + $0x114] sm:$0xf0]  ;;  %v1427_v15 = vld [vmem:[%s1897_s5 + $0x190] sm:$0xf]  ;;  %v1486_v19 = vld [vmem:[%s1897_s5 + $0x4] sm:$0xf0]  ;;  %v1300_v21 = vor.u32 %v1504_v12, %v1299_v10 }
  0x7e   : > { %963 = vmatpush.bf16.msra.mxu0 %v1252_v57  ;;  %v1536_v16 = vld [vmem:[%s1897_s5 + $0x194] sm:$0xf0]  ;;  %v1291_v20 = vld [vmem:[%s1897_s5 + $0x80] sm:$0xf]  ;;  %v1364_v22 = vor.u32 %v1520_v14, %v1363_v13  ;;  %v1502_v23 = vld [vmem:[%s1897_s5 + $0x84] sm:$0xf0]  ;;  %v1228_v33 = vor.u32 %v1486_v19, %v1227_v18 }
  0x7f   : > { %976 = vmatpush.bf16.msra.mxu1 %v1316_v58  ;;  %v1355_v24 = vld [vmem:[%s1897_s5 + $0x100] sm:$0xf]  ;;  %v1518_v25 = vld [vmem:[%s1897_s5 + $0x104] sm:$0xf0]  ;;  %v1428_v26 = vor.u32 %v1536_v16, %v1427_v15  ;;  %v1499_v29 = vld [vmem:[%s1897_s5 + $0x74] sm:$0xf]  ;;  %v1292_v38 = vor.u32 %v1502_v23, %v1291_v20 }
  0x80   : > { %989 = vmatpush.bf16.msra.mxu2 %v1380_v59  ;;  %v1419_v27 = vld [vmem:[%s1897_s5 + $0x180] sm:$0xf]  ;;  %v1534_v28 = vld [vmem:[%s1897_s5 + $0x184] sm:$0xf0]  ;;  %v1285_v30 = vld [vmem:[%s1897_s5 + $0x78] sm:$0xf0]  ;;  %v1356_v39 = vor.u32 %v1518_v25, %v1355_v24 }
  0x81   : > { %1002 = vmatpush.bf16.msra.mxu3 %v1444_v63  ;;  %v1515_v31 = vld [vmem:[%s1897_s5 + $0xf4] sm:$0xf]  ;;  %v560_v32 = vld [vmem:[%s1883_s26 + $0x8] sm:$0xff]  ;;  %v1420_v43 = vor.u32 %v1534_v28, %v1419_v27  ;;  %v1288_v44 = vor.u32 %v1499_v29, %v1285_v30  ;;  %v1497_v48 = vld [vmem:[%s1897_s5 + $0x64] sm:$0xf]  ;;  %p1481_p13 = scmp.ne.s32.totalorder %s1644_s14, 8 }
  0x82   : > { %964 = vmatpush.bf16.msra.mxu0 %v1244_v5  ;;  %v1349_v34 = vld [vmem:[%s1897_s5 + $0xf8] sm:$0xf0]  ;;  %v1531_v35 = vld [vmem:[%s1897_s5 + $0x174] sm:$0xf]  ;;  %v629_v37 = vunpack.c.l.b16 %v560_v32  ;;  %v630_v42 = vunpack.c.h.b16 %v560_v32  ;;  %v1277_v49 = vld [vmem:[%s1897_s5 + $0x68] sm:$0xf0] }
  0x83   : > { %977 = vmatpush.bf16.msra.mxu1 %v1308_v6  ;;  %v1413_v36 = vld [vmem:[%s1897_s5 + $0x178] sm:$0xf0]  ;;  %v1547_v40 = vld [vmem:[%s1897_s5 + $0x1f4] sm:$0xf]  ;;  %v1352_v46 = vor.u32 %v1515_v31, %v1349_v34  ;;  %v1513_v50 = vld [vmem:[%s1897_s5 + $0xe4] sm:$0xf]  ;;  %v1280_v62 = vor.u32 %v1497_v48, %v1277_v49 }
  0x84   : > { %990 = vmatpush.bf16.msra.mxu2 %v1372_v7  ;;  %v1477_v41 = vld [vmem:[%s1897_s5 + $0x1f8] sm:$0xf0]  ;;  %v559_v45 = vld [vmem:[%s1883_s26] sm:$0xff]  ;;  %v1416_v47 = vor.u32 %v1531_v35, %v1413_v36  ;;  %v1341_v54 = vld [vmem:[%s1897_s5 + $0xe8] sm:$0xf0]  ;;  %v1980_v57 = vpack.c.b16 %v629_v37, %v629_v37  ;;  %v1984_v60 = vpack.c.b16 %v630_v42, %v630_v42 }
  0x85   : > { %1003 = vmatpush.bf16.msra.mxu3 %v1436_v11  ;;  %v627_v51 = vunpack.c.l.b16 %v559_v45  ;;  %v628_v52 = vunpack.c.h.b16 %v559_v45  ;;  %v1480_v53 = vor.u32 %v1547_v40, %v1477_v41  ;;  %v1529_v55 = vld [vmem:[%s1897_s5 + $0x164] sm:$0xf]  ;;  %v1405_v56 = vld [vmem:[%s1897_s5 + $0x168] sm:$0xf0]  ;;  %v1344_v0 = vor.u32 %v1513_v50, %v1341_v54  ;;  %v1495_v2 = vld [vmem:[%s1897_s5 + $0x54] sm:$0xf] }
  0x86   : > { %965 = vmatpush.bf16.msra.mxu0 %v1236_v17  ;;  %v1545_v58 = vld [vmem:[%s1897_s5 + $0x1e4] sm:$0xf]  ;;  %v1469_v59 = vld [vmem:[%s1897_s5 + $0x1e8] sm:$0xf0]  ;;  %v1408_v1 = vor.u32 %v1529_v55, %v1405_v56  ;;  %v1269_v3 = vld [vmem:[%s1897_s5 + $0x58] sm:$0xf0] }
  0x87   : > { %978 = vmatpush.bf16.msra.mxu1 %v1300_v21  ;;  %v1986_v61 = vpack.c.b16 %v627_v51, %v627_v51  ;;  %v1988_v63 = vpack.c.b16 %v628_v52, %v628_v52  ;;  %v1511_v4 = vld [vmem:[%s1897_s5 + $0xd4] sm:$0xf]  ;;  %v1472_v5 = vor.u32 %v1545_v58, %v1469_v59  ;;  %v1333_v6 = vld [vmem:[%s1897_s5 + $0xd8] sm:$0xf0]  ;;  %v1272_v11 = vor.u32 %v1495_v2, %v1269_v3  ;;  %v1493_v14 = vld [vmem:[%s1897_s5 + $0x44] sm:$0xf] }
  0x88   : > { %991 = vmatpush.bf16.msra.mxu2 %v1364_v22  ;;  %v1527_v7 = vld [vmem:[%s1897_s5 + $0x154] sm:$0xf]  ;;  %v1397_v8 = vld [vmem:[%s1897_s5 + $0x158] sm:$0xf0]  ;;  %v1336_v12 = vor.u32 %v1511_v4, %v1333_v6  ;;  %v1261_v15 = vld [vmem:[%s1897_s5 + $0x48] sm:$0xf0] }
  0x89   : > { %1004 = vmatpush.bf16.msra.mxu3 %v1428_v26  ;;  %v1543_v9 = vld [vmem:[%s1897_s5 + $0x1d4] sm:$0xf]  ;;  %v1461_v10 = vld [vmem:[%s1897_s5 + $0x1d8] sm:$0xf0]  ;;  %v1400_v13 = vor.u32 %v1527_v7, %v1397_v8  ;;  %v1509_v16 = vld [vmem:[%s1897_s5 + $0xc4] sm:$0xf]  ;;  %v1264_v23 = vor.u32 %v1493_v14, %v1261_v15 }
  0x8a   : > { %966 = vmatpush.bf16.msra.mxu0 %v1228_v33  ;;  %v1464_v17 = vor.u32 %v1543_v9, %v1461_v10  ;;  %v1325_v18 = vld [vmem:[%s1897_s5 + $0xc8] sm:$0xf0]  ;;  %v1525_v19 = vld [vmem:[%s1897_s5 + $0x144] sm:$0xf]  ;;  %v1491_v26 = vld [vmem:[%s1897_s5 + $0x34] sm:$0xf] }
  0x8b   : > { %979 = vmatpush.bf16.msra.mxu1 %v1292_v38  ;;  %v1389_v20 = vld [vmem:[%s1897_s5 + $0x148] sm:$0xf0]  ;;  %v1541_v21 = vld [vmem:[%s1897_s5 + $0x1c4] sm:$0xf]  ;;  %v1328_v24 = vor.u32 %v1509_v16, %v1325_v18  ;;  %v1253_v27 = vld [vmem:[%s1897_s5 + $0x38] sm:$0xf0] }
  0x8c   : > { %992 = vmatpush.bf16.msra.mxu2 %v1356_v39  ;;  %v1453_v22 = vld [vmem:[%s1897_s5 + $0x1c8] sm:$0xf0]  ;;  %v1392_v25 = vor.u32 %v1525_v19, %v1389_v20  ;;  %v1507_v28 = vld [vmem:[%s1897_s5 + $0xb4] sm:$0xf]  ;;  %v1317_v30 = vld [vmem:[%s1897_s5 + $0xb8] sm:$0xf0]  ;;  %v1256_v35 = vor.u32 %v1491_v26, %v1253_v27 }
  0x8d   : > { %1005 = vmatpush.bf16.msra.mxu3 %v1420_v43  ;;  %967 = vmatmul.bf16.vlgmr.msra.gmra.mxu0 %v1986_v61  ;;  %v1456_v29 = vor.u32 %v1541_v21, %v1453_v22  ;;  %v1523_v31 = vld [vmem:[%s1897_s5 + $0x134] sm:$0xf]  ;;  %v1381_v32 = vld [vmem:[%s1897_s5 + $0x138] sm:$0xf0]  ;;  %v1320_v36 = vor.u32 %v1507_v28, %v1317_v30  ;;  %v1489_v38 = vld [vmem:[%s1897_s5 + $0x24] sm:$0xf] }
  0x8e   : > { %1011 = vmatpush.bf16.msrb.mxu0 %v1288_v44  ;;  %980 = vmatmul.bf16.vlgmr.msra.gmra.mxu1 %v1988_v63  ;;  %v1539_v33 = vld [vmem:[%s1897_s5 + $0x1b4] sm:$0xf]  ;;  %v1445_v34 = vld [vmem:[%s1897_s5 + $0x1b8] sm:$0xf0]  ;;  %v1384_v37 = vor.u32 %v1523_v31, %v1381_v32  ;;  %v1245_v39 = vld [vmem:[%s1897_s5 + $0x28] sm:$0xf0] }
  0x8f   : > { %1024 = vmatpush.bf16.msrb.mxu1 %v1352_v46  ;;  %993 = vmatmul.bf16.vlgmr.msra.gmra.mxu2 %v1980_v57  ;;  %v1505_v40 = vld [vmem:[%s1897_s5 + $0xa4] sm:$0xf]  ;;  %v1448_v41 = vor.u32 %v1539_v33, %v1445_v34  ;;  %v1309_v42 = vld [vmem:[%s1897_s5 + $0xa8] sm:$0xf0]  ;;  %v1487_v50 = vld [vmem:[%s1897_s5 + $0x14] sm:$0xf] }
  0x90   : > { %1037 = vmatpush.bf16.msrb.mxu2 %v1416_v47  ;;  %1006 = vmatmul.bf16.vlgmr.msra.gmra.mxu3 %v1984_v60  ;;  %v1521_v43 = vld [vmem:[%s1897_s5 + $0x124] sm:$0xf]  ;;  %v1373_v44 = vld [vmem:[%s1897_s5 + $0x128] sm:$0xf0]  ;;  %v1248_v47 = vor.u32 %v1489_v38, %v1245_v39  ;;  %v1312_v48 = vor.u32 %v1505_v40, %v1309_v42  ;;  %v1237_v51 = vld [vmem:[%s1897_s5 + $0x18] sm:$0xf0] }
  0x91   : > { %1050 = vmatpush.bf16.msrb.mxu3 %v1480_v53  ;;  %v1537_v45 = vld [vmem:[%s1897_s5 + $0x1a4] sm:$0xf]  ;;  %v1437_v46 = vld [vmem:[%s1897_s5 + $0x1a8] sm:$0xf0]  ;;  %v1376_v49 = vor.u32 %v1521_v43, %v1373_v44  ;;  %v1503_v52 = vld [vmem:[%s1897_s5 + $0x94] sm:$0xf] }
  0x92   : > { %1012 = vmatpush.bf16.msrb.mxu0 %v1280_v62  ;;  %v1440_v53 = vor.u32 %v1537_v45, %v1437_v46  ;;  %v1301_v54 = vld [vmem:[%s1897_s5 + $0x98] sm:$0xf0]  ;;  %v1519_v55 = vld [vmem:[%s1897_s5 + $0x114] sm:$0xf]  ;;  %v1240_v62 = vor.u32 %v1487_v50, %v1237_v51  ;;  %v1485_v2 = vld [vmem:[%s1897_s5 + $0x4] sm:$0xf] }
  0x93   : > { %1025 = vmatpush.bf16.msrb.mxu1 %v1344_v0  ;;  %v1365_v56 = vld [vmem:[%s1897_s5 + $0x118] sm:$0xf0]  ;;  %v1535_v58 = vld [vmem:[%s1897_s5 + $0x194] sm:$0xf]  ;;  %v1304_v0 = vor.u32 %v1503_v52, %v1301_v54  ;;  %v1229_v3 = vld [vmem:[%s1897_s5 + $0x8] sm:$0xf0] }
  0x94   : > { %1038 = vmatpush.bf16.msrb.mxu2 %v1408_v1  ;;  %v1429_v59 = vld [vmem:[%s1897_s5 + $0x198] sm:$0xf0]  ;;  %v1368_v1 = vor.u32 %v1519_v55, %v1365_v56  ;;  %v1501_v4 = vld [vmem:[%s1897_s5 + $0x84] sm:$0xf]  ;;  %v1293_v6 = vld [vmem:[%s1897_s5 + $0x88] sm:$0xf0] }
  0x95   : > { %1051 = vmatpush.bf16.msrb.mxu3 %v1472_v5  ;;  %v1432_v5 = vor.u32 %v1535_v58, %v1429_v59  ;;  %v1517_v7 = vld [vmem:[%s1897_s5 + $0x104] sm:$0xf]  ;;  %v1357_v8 = vld [vmem:[%s1897_s5 + $0x108] sm:$0xf0]  ;;  %v557_v21 = vld [vmem:[#allocation2] sm:$0xff] }
  0x96   : > { %1013 = vmatpush.bf16.msrb.mxu0 %v1272_v11  ;;  %v1533_v9 = vld [vmem:[%s1897_s5 + $0x184] sm:$0xf]  ;;  %v1421_v10 = vld [vmem:[%s1897_s5 + $0x188] sm:$0xf0]  ;;  %v1232_v11 = vor.u32 %v1485_v2, %v1229_v3  ;;  %v558_v31 = vld [vmem:[#allocation2 + $0x8] sm:$0xff] }
  0x97   : > { %1026 = vmatpush.bf16.msrb.mxu1 %v1336_v12  ;;  %v1296_v12 = vor.u32 %v1501_v4, %v1293_v6  ;;  %v1424_v14 = vor.u32 %v1533_v9, %v1421_v10 }
  0x98   : > { %1039 = vmatpush.bf16.msrb.mxu2 %v1400_v13  ;;  %v1360_v13 = vor.u32 %v1517_v7, %v1357_v8 }
  0x99   : > { %1052 = vmatpush.bf16.msrb.mxu3 %v1464_v17 }
  0x9a   : > { %1014 = vmatpush.bf16.msrb.mxu0 %v1264_v23 }
  0x9b   : > { %1027 = vmatpush.bf16.msrb.mxu1 %v1328_v24 }
  0x9c   : > { %1040 = vmatpush.bf16.msrb.mxu2 %v1392_v25 }
  0x9d   : > { %1053 = vmatpush.bf16.msrb.mxu3 %v1456_v29 }
  0x9e   : > { %1015 = vmatpush.bf16.msrb.mxu0 %v1256_v35 }
  0x9f   : > { %1028 = vmatpush.bf16.msrb.mxu1 %v1320_v36 }
  0xa0   : > { %1041 = vmatpush.bf16.msrb.mxu2 %v1384_v37 }
  0xa1   : > { %1054 = vmatpush.bf16.msrb.mxu3 %v1448_v41 }
  0xa2   : > { %1016 = vmatpush.bf16.msrb.mxu0 %v1248_v47 }
  0xa3   : > { %1029 = vmatpush.bf16.msrb.mxu1 %v1312_v48 }
  0xa4   : > { %1042 = vmatpush.bf16.msrb.mxu2 %v1376_v49 }
  0xa5   : > { %1055 = vmatpush.bf16.msrb.mxu3 %v1440_v53 }
  0xa6   : > { %1017 = vmatpush.bf16.msrb.mxu0 %v1240_v62 }
  0xa7   : > { %1030 = vmatpush.bf16.msrb.mxu1 %v1304_v0 }
  0xa8   : > { %1043 = vmatpush.bf16.msrb.mxu2 %v1368_v1 }
  0xa9   : > { %1056 = vmatpush.bf16.msrb.mxu3 %v1432_v5 }
  0xaa   : > { %1018 = vmatpush.bf16.msrb.mxu0 %v1232_v11 }
  0xab   : > { %1031 = vmatpush.bf16.msrb.mxu1 %v1296_v12 }
  0xac   : > { %1044 = vmatpush.bf16.msrb.mxu2 %v1360_v13 }
  0xad   : > { %1057 = vmatpush.bf16.msrb.mxu3 %v1424_v14  ;;  %1019 = vmatmul.bf16.vlgmr.msrb.gmra.mxu0 %v1986_v61 }
  0xae   : > { %1032 = vmatmul.bf16.vlgmr.msrb.gmra.mxu1 %v1988_v63 }
  0xaf   : > { %1045 = vmatmul.bf16.vlgmr.msrb.gmra.mxu2 %v1980_v57 }
  0xb0   : > { %1058 = vmatmul.bf16.vlgmr.msrb.gmra.mxu3 %v1984_v60 }
 0x10a   : > { %v968_v15 = vpop.f32.mrf.mxu0 }
 0x10b   : > { %v981_v16 = vpop.f32.mrf.mxu1 }
 0x10c   : > { %v982_v17 = vadd.f32 %v981_v16, %v968_v15 }
 0x112   : > { %v994_v18 = vpop.f32.mrf.mxu2  ;;  %v970_v23 = vpop.f32.mrf.mxu0 }
 0x113   : > { %v995_v19 = vadd.f32 %v994_v18, %v982_v17  ;;  %v1007_v20 = vpop.f32.mrf.mxu3  ;;  %v983_v24 = vpop.f32.mrf.mxu1 }
 0x115   : > { %v1008_v22 = vadd.f32 %v1007_v20, %v995_v19 }
 0x117   : > { %v1063_v25 = vadd.f32 %v1008_v22, %v557_v21 }
 0x119   : > { %1065 = vst [vmem:[#allocation2] sm:$0xff] %v1063_v25 }
 0x11a   : > { %v996_v26 = vpop.f32.mrf.mxu2 }
 0x11b   : > { %v1009_v61 = vpop.f32.mrf.mxu3 }
 0x12a   : > { %v1020_v27 = vpop.f32.mrf.mxu0 }
 0x12b   : > { %v1033_v63 = vpop.f32.mrf.mxu1 }
 0x12c   : > { %v1034_v28 = vadd.f32 %v1033_v63, %v1020_v27 }
 0x132   : > { %v1046_v57 = vpop.f32.mrf.mxu2  ;;  %v1022_v30 = vpop.f32.mrf.mxu0 }
 0x133   : > { %v1047_v29 = vadd.f32 %v1046_v57, %v1034_v28  ;;  %v1059_v60 = vpop.f32.mrf.mxu3  ;;  %v1035_v32 = vpop.f32.mrf.mxu1 }
 0x135   : > { %v1060_v33 = vadd.f32 %v1059_v60, %v1047_v29 }
 0x137   : > { %v1064_v34 = vadd.f32 %v1060_v33, %v558_v31  ;;  %1070 = sbr.rel (%p1481_p13) target bundleno = 328 (0x148), region = 78 }
 0x139   : > { %1066 = vst [vmem:[#allocation2 + $0x8] sm:$0xff] %v1064_v34 }
 0x13a   : > { %v1048_v35 = vpop.f32.mrf.mxu2 }
 0x13b   : > { %v1061_v36 = vpop.f32.mrf.mxu3 }
 0x13c   : > { %v1071_v37 = vld [vmem:[#allocation2] sm:$0xff] }
 0x13d   : > { %v1073_v39 = vld [vmem:[%s539_s12] sm:$0x3] }
 0x13e   : > { %v1075_v40 = vperm.slane %v1073_v39, 0  ;;  %v1076_v41 = vperm.slane %v1073_v39, 1 }
 0x140   : > { %v1072_v38 = vld [vmem:[#allocation2 + $0x8] sm:$0xff]  ;;  %v1079_v42 = vadd.f32 %v1075_v40, %v1071_v37 }
 0x141   : > { %v1080_v43 = vadd.f32 %v1076_v41, %v1072_v38 }
 0x142   : > { %v1081_v44 = vmax.f32 %v1079_v42, 0.0 }
 0x143   : > { %v1082_v45 = vmax.f32 %v1080_v43, 0.0 }
 0x145   : > { %v1083_v46 = vpack.c.bf16 %v1082_v45, %v1081_v44 }
 0x147   : > { %1084 = vst [vmem:[%s1895_s15] sm:$0xff] %v1083_v46 }
 0x148 PF: > { %s13_s18 = sadd.s32 1, %s1660_s18   ;;  %s2078_s12 = smov %s1640_s13 }
 0x149   : > { %p10_p0 = scmp.ge.s32.totalorder %s13_s18, 20   ;;  %s2079_s13 = smov %s1734_s25 }
 0x14a   : > { %s2080_s14 = smov %s1652_s16  ;;  %s2081_s15 = smov %s1656_s17 }
 0x14b   : > { %s2082_s16 = smov %s2085_s19  ;;  %s2083_s17 = smov %s2089_s20 }
 0x14c   :  { %12 = sbr.rel (!%p10_p0) target bundleno = 4 (0x4), region = 119 }

// kernel: resnet_forward.43
= control target key start
LH: loop header
LB: loop body
LE: loop exit
PB: predicated region body
PF: predicated region fallthrough
CT: control target
= control target key end

     0   :  { %vm82_vm0 = vcmask 1041409   ;;  %vm84_vm1 = vcmask 1042434   ;;  %vm86_vm2 = vcmask 1043459   ;;  %vm88_vm3 = vcmask 1044484   ;;  %s626_s1 = inlined_call_operand.vmem [shape: f32[512,1], index: 1, kind: input, shape index: {}]   ;;  %s627_s2 = inlined_call_operand.<no memory space> [shape: f32[1,1], index: 2, kind: input, shape index: {}]   ;;  %s628_s0 = inlined_call_operand.vmem [shape: bf16[8,1,512], index: 0, kind: input, shape index: {}]   ;;  %s629_s3 = inlined_call_operand.vmem [shape: f32[8,512], index: 3, kind: output, shape index: {0}]   ;;  %s630_s4 = inlined_call_operand.vmem [shape: f32[8,1], index: 4, kind: output, shape index: {1}]  }
   0x1   :  { %v172_v0 = vld [vmem:[%s626_s1 + $0x178] sm:$0xff]  ;;  %v171_v2 = vld [vmem:[%s626_s1 + $0x170] sm:$0xff]  ;;  %v170_v6 = vld [vmem:[%s626_s1 + $0x168] sm:$0xff]  ;;  %v10_v26 = vstv %s627_s2  ;;  %vm90_vm4 = vcmask 1045509   ;;  %vm92_vm5 = vcmask 1046534   ;;  %vm94_vm6 = vcmask 1047559  }
   0x2   :  { %v140_v1 = vld [vmem:[%s626_s1 + $0x78] sm:$0xff]  ;;  %233 = vmatpush.msra.mxu2 %v172_v0  ;;  %v139_v4 = vld [vmem:[%s626_s1 + $0x70] sm:$0xff]  ;;  %v138_v8 = vld [vmem:[%s626_s1 + $0x68] sm:$0xff]  ;;  %11 = vst [vmem:[#allocation2] sm:$0x1] %v10_v26  ;;  %vm273_vm7 = vcmask 7168  }
   0x3   :  { %193 = vmatpush.msra.mxu0 %v140_v1  ;;  %v188_v3 = vld [vmem:[%s626_s1 + $0x1f8] sm:$0xff]  ;;  %v187_v7 = vld [vmem:[%s626_s1 + $0x1f0] sm:$0xff]  ;;  %v186_v10 = vld [vmem:[%s626_s1 + $0x1e8] sm:$0xff] }
   0x4   :  { %v156_v5 = vld [vmem:[%s626_s1 + $0xf8] sm:$0xff]  ;;  %253 = vmatpush.msra.mxu3 %v188_v3  ;;  %234 = vmatpush.msra.mxu2 %v171_v2  ;;  %v155_v9 = vld [vmem:[%s626_s1 + $0xf0] sm:$0xff]  ;;  %v169_v11 = vld [vmem:[%s626_s1 + $0x160] sm:$0xff] }
   0x5   :  { %213 = vmatpush.msra.mxu1 %v156_v5  ;;  %194 = vmatpush.msra.mxu0 %v139_v4  ;;  %v137_v12 = vld [vmem:[%s626_s1 + $0x60] sm:$0xff]  ;;  %v154_v13 = vld [vmem:[%s626_s1 + $0xe8] sm:$0xff]  ;;  %v168_v16 = vld [vmem:[%s626_s1 + $0x158] sm:$0xff] }
   0x6   :  { %254 = vmatpush.msra.mxu3 %v187_v7  ;;  %235 = vmatpush.msra.mxu2 %v170_v6  ;;  %v185_v14 = vld [vmem:[%s626_s1 + $0x1e0] sm:$0xff]  ;;  %v136_v17 = vld [vmem:[%s626_s1 + $0x58] sm:$0xff]  ;;  %v167_v20 = vld [vmem:[%s626_s1 + $0x150] sm:$0xff] }
   0x7   :  { %214 = vmatpush.msra.mxu1 %v155_v9  ;;  %195 = vmatpush.msra.mxu0 %v138_v8  ;;  %v153_v15 = vld [vmem:[%s626_s1 + $0xe0] sm:$0xff]  ;;  %v184_v18 = vld [vmem:[%s626_s1 + $0x1d8] sm:$0xff]  ;;  %v135_v21 = vld [vmem:[%s626_s1 + $0x50] sm:$0xff] }
   0x8   :  { %255 = vmatpush.msra.mxu3 %v186_v10  ;;  %236 = vmatpush.msra.mxu2 %v169_v11  ;;  %v152_v19 = vld [vmem:[%s626_s1 + $0xd8] sm:$0xff]  ;;  %v183_v22 = vld [vmem:[%s626_s1 + $0x1d0] sm:$0xff]  ;;  %v166_v24 = vld [vmem:[%s626_s1 + $0x148] sm:$0xff] }
   0x9   :  { %215 = vmatpush.msra.mxu1 %v154_v13  ;;  %196 = vmatpush.msra.mxu0 %v137_v12  ;;  %v151_v23 = vld [vmem:[%s626_s1 + $0xd0] sm:$0xff]  ;;  %v134_v25 = vld [vmem:[%s626_s1 + $0x48] sm:$0xff]  ;;  %v165_v29 = vld [vmem:[%s626_s1 + $0x140] sm:$0xff] }
   0xa   :  { %256 = vmatpush.msra.mxu3 %v185_v14  ;;  %237 = vmatpush.msra.mxu2 %v168_v16  ;;  %v182_v27 = vld [vmem:[%s626_s1 + $0x1c8] sm:$0xff]  ;;  %v133_v30 = vld [vmem:[%s626_s1 + $0x40] sm:$0xff]  ;;  %v164_v33 = vld [vmem:[%s626_s1 + $0x138] sm:$0xff] }
   0xb   :  { %216 = vmatpush.msra.mxu1 %v153_v15  ;;  %197 = vmatpush.msra.mxu0 %v136_v17  ;;  %v150_v28 = vld [vmem:[%s626_s1 + $0xc8] sm:$0xff]  ;;  %v181_v31 = vld [vmem:[%s626_s1 + $0x1c0] sm:$0xff]  ;;  %v132_v34 = vld [vmem:[%s626_s1 + $0x38] sm:$0xff] }
   0xc   :  { %257 = vmatpush.msra.mxu3 %v184_v18  ;;  %238 = vmatpush.msra.mxu2 %v167_v20  ;;  %v149_v32 = vld [vmem:[%s626_s1 + $0xc0] sm:$0xff]  ;;  %v180_v35 = vld [vmem:[%s626_s1 + $0x1b8] sm:$0xff]  ;;  %v163_v37 = vld [vmem:[%s626_s1 + $0x130] sm:$0xff] }
   0xd   :  { %217 = vmatpush.msra.mxu1 %v152_v19  ;;  %198 = vmatpush.msra.mxu0 %v135_v21  ;;  %v148_v36 = vld [vmem:[%s626_s1 + $0xb8] sm:$0xff]  ;;  %v131_v38 = vld [vmem:[%s626_s1 + $0x30] sm:$0xff]  ;;  %v162_v41 = vld [vmem:[%s626_s1 + $0x128] sm:$0xff] }
   0xe   :  { %258 = vmatpush.msra.mxu3 %v183_v22  ;;  %239 = vmatpush.msra.mxu2 %v166_v24  ;;  %v179_v39 = vld [vmem:[%s626_s1 + $0x1b0] sm:$0xff]  ;;  %v130_v42 = vld [vmem:[%s626_s1 + $0x28] sm:$0xff]  ;;  %v161_v43 = vld [vmem:[%s626_s1 + $0x120] sm:$0xff] }
   0xf   :  { %218 = vmatpush.msra.mxu1 %v151_v23  ;;  %199 = vmatpush.msra.mxu0 %v134_v25  ;;  %v147_v40 = vld [vmem:[%s626_s1 + $0xb0] sm:$0xff]  ;;  %v178_v44 = vld [vmem:[%s626_s1 + $0x1a8] sm:$0xff]  ;;  %v129_v45 = vld [vmem:[%s626_s1 + $0x20] sm:$0xff] }
  0x10   :  { %259 = vmatpush.msra.mxu3 %v182_v27  ;;  %240 = vmatpush.msra.mxu2 %v165_v29  ;;  %v146_v46 = vld [vmem:[%s626_s1 + $0xa8] sm:$0xff]  ;;  %v284_v47 = vld [vmem:[%s628_s0] sm:$0xff]   ;;  %v300_v49 = vld [vmem:[%s628_s0 + $0x10] sm:$0xff]  }
  0x11   :  { %219 = vmatpush.msra.mxu1 %v150_v28  ;;  %200 = vmatpush.msra.mxu0 %v133_v30  ;;  %v299_v48 = vld [vmem:[%s628_s0 + $0x8] sm:$0xff]   ;;  %v177_v50 = vld [vmem:[%s626_s1 + $0x1a0] sm:$0xff]  ;;  %v484_v52 = vunpack.c.l.bf16 %v284_v47  ;;  %v486_v53 = vunpack.c.h.bf16 %v284_v47  ;;  %v301_v56 = vld [vmem:[%s628_s0 + $0x18] sm:$0xff]   ;;  %v501_v59 = vunpack.c.l.bf16 %v300_v49  ;;  %v503_v60 = vunpack.c.h.bf16 %v300_v49 }
  0x12   :  { %260 = vmatpush.msra.mxu3 %v181_v31  ;;  %241 = vmatpush.msra.mxu2 %v164_v33  ;;  %v145_v51 = vld [vmem:[%s626_s1 + $0xa0] sm:$0xff]  ;;  %v488_v54 = vunpack.c.l.bf16 %v299_v48  ;;  %v490_v55 = vunpack.c.h.bf16 %v299_v48  ;;  %v160_v57 = vld [vmem:[%s626_s1 + $0x118] sm:$0xff]  ;;  %v505_v61 = vunpack.c.l.bf16 %v301_v56  ;;  %v507_v62 = vunpack.c.h.bf16 %v301_v56  ;;  %v159_v5 = vld [vmem:[%s626_s1 + $0x110] sm:$0xff] }
  0x13   :  { %220 = vmatpush.msra.mxu1 %v149_v32  ;;  %201 = vmatpush.msra.mxu0 %v132_v34  ;;  %v128_v58 = vld [vmem:[%s626_s1 + $0x18] sm:$0xff]  ;;  %v52_v1 = vperm.slane %v484_v52, 4  ;;  %v56_v2 = vperm.slane %v486_v53, 4  ;;  %v127_v6 = vld [vmem:[%s626_s1 + $0x10] sm:$0xff]  ;;  %v68_v7 = vperm.slane %v501_v59, 4  ;;  %v72_v8 = vperm.slane %v503_v60, 4 }
  0x14   :  { %261 = vmatpush.msra.mxu3 %v180_v35  ;;  %242 = vmatpush.msra.mxu2 %v163_v37  ;;  %v176_v63 = vld [vmem:[%s626_s1 + $0x198] sm:$0xff]  ;;  %v60_v3 = vperm.slane %v488_v54, 4  ;;  %v64_v4 = vperm.slane %v490_v55, 4  ;;  %v76_v9 = vperm.slane %v505_v61, 4  ;;  %v175_v10 = vld [vmem:[%s626_s1 + $0x190] sm:$0xff]  ;;  %v50_v13 = vperm.slane %v484_v52, 0 }
  0x15   :  { %221 = vmatpush.msra.mxu1 %v148_v36  ;;  %202 = vmatpush.msra.mxu0 %v131_v38  ;;  %v144_v0 = vld [vmem:[%s626_s1 + $0x98] sm:$0xff]  ;;  %v143_v11 = vld [vmem:[%s626_s1 + $0x90] sm:$0xff]  ;;  %v103_v12 = vsel %vm82_vm0, %v56_v2, %v52_v1  ;;  %v54_v14 = vperm.slane %v486_v53, 0  ;;  %v58_v15 = vperm.slane %v488_v54, 0  ;;  %v158_v16 = vld [vmem:[%s626_s1 + $0x108] sm:$0xff]  ;;  %v80_v18 = vperm.slane %v507_v62, 4 }
  0x16   :  { %262 = vmatpush.msra.mxu3 %v179_v39  ;;  %243 = vmatpush.msra.mxu2 %v162_v41  ;;  %v126_v17 = vld [vmem:[%s626_s1 + $0x8] sm:$0xff]  ;;  %v104_v19 = vsel %vm84_vm1, %v60_v3, %v103_v12  ;;  %v62_v20 = vperm.slane %v490_v55, 0  ;;  %v66_v21 = vperm.slane %v501_v59, 0  ;;  %v70_v25 = vperm.slane %v503_v60, 0  ;;  %v157_v28 = vld [vmem:[%s626_s1 + $0x100] sm:$0xff] }
  0x17   :  { %222 = vmatpush.msra.mxu1 %v147_v40  ;;  %203 = vmatpush.msra.mxu0 %v130_v42  ;;  %v174_v22 = vld [vmem:[%s626_s1 + $0x188] sm:$0xff]  ;;  %v105_v23 = vsel %vm86_vm2, %v64_v4, %v104_v19  ;;  %v74_v26 = vperm.slane %v505_v61, 0  ;;  %v83_v27 = vsel %vm82_vm0, %v54_v14, %v50_v13  ;;  %v125_v30 = vld [vmem:[%s626_s1] sm:$0xff]  ;;  %v53_v32 = vperm.slane %v484_v52, 6 }
  0x18   :  { %263 = vmatpush.msra.mxu3 %v178_v44  ;;  %244 = vmatpush.msra.mxu2 %v161_v43  ;;  %v142_v24 = vld [vmem:[%s626_s1 + $0x88] sm:$0xff]  ;;  %v106_v29 = vsel %vm88_vm3, %v68_v7, %v105_v23  ;;  %v85_v31 = vsel %vm84_vm1, %v58_v15, %v83_v27  ;;  %v57_v33 = vperm.slane %v486_v53, 6  ;;  %v173_v35 = vld [vmem:[%s626_s1 + $0x180] sm:$0xff]  ;;  %v78_v36 = vperm.slane %v507_v62, 0 }
  0x19   :  { %223 = vmatpush.msra.mxu1 %v146_v46  ;;  %204 = vmatpush.msra.mxu0 %v129_v45  ;;  %v107_v34 = vsel %vm90_vm4, %v72_v8, %v106_v29  ;;  %v87_v37 = vsel %vm86_vm2, %v62_v20, %v85_v31  ;;  %v61_v38 = vperm.slane %v488_v54, 6  ;;  %v65_v41 = vperm.slane %v490_v55, 6  ;;  %v141_v43 = vld [vmem:[%s626_s1 + $0x80] sm:$0xff] }
  0x1a   :  { %264 = vmatpush.msra.mxu3 %v177_v50  ;;  %245 = vmatpush.msra.mxu2 %v160_v57  ;;  %v108_v39 = vsel %vm92_vm5, %v76_v9, %v107_v34  ;;  %v89_v40 = vsel %vm88_vm3, %v66_v21, %v87_v37  ;;  %v69_v42 = vperm.slane %v501_v59, 6  ;;  %v73_v46 = vperm.slane %v503_v60, 6 }
  0x1b   :  { %224 = vmatpush.msra.mxu1 %v145_v51  ;;  %205 = vmatpush.msra.mxu0 %v128_v58  ;;  %v109_v44 = vsel %vm94_vm6, %v80_v18, %v108_v39  ;;  %v91_v45 = vsel %vm90_vm4, %v70_v25, %v89_v40  ;;  %v77_v47 = vperm.slane %v505_v61, 6  ;;  %v110_v49 = vsel %vm82_vm0, %v57_v33, %v53_v32 }
  0x1c   :  { %265 = vmatpush.msra.mxu3 %v176_v63  ;;  %246 = vmatpush.msra.mxu2 %v159_v5  ;;  %123 = vst [vmem:[%s629_s3 + $0x10] sm:$0xff] %v109_v44  ;;  %v93_v48 = vsel %vm92_vm5, %v74_v26, %v91_v45  ;;  %v51_v50 = vperm.slane %v484_v52, 2  ;;  %v55_v51 = vperm.slane %v486_v53, 2  ;;  %v111_v57 = vsel %vm84_vm1, %v61_v38, %v110_v49 }
  0x1d   :  { %225 = vmatpush.msra.mxu1 %v144_v0  ;;  %206 = vmatpush.msra.mxu0 %v127_v6  ;;  %v95_v56 = vsel %vm94_vm6, %v78_v36, %v93_v48  ;;  %v59_v58 = vperm.slane %v488_v54, 2  ;;  %v63_v63 = vperm.slane %v490_v55, 2  ;;  %v81_v0 = vperm.slane %v507_v62, 6 }
  0x1e   :  { %266 = vmatpush.msra.mxu3 %v175_v10  ;;  %247 = vmatpush.msra.mxu2 %v158_v16  ;;  %121 = vst [vmem:[%s629_s3] sm:$0xff] %v95_v56  ;;  %v112_v52 = vsel %vm86_vm2, %v65_v41, %v111_v57  ;;  %v67_v53 = vperm.slane %v501_v59, 2  ;;  %v71_v2 = vperm.slane %v503_v60, 2  ;;  %v96_v3 = vsel %vm82_vm0, %v55_v51, %v51_v50 }
  0x1f   :  { %226 = vmatpush.msra.mxu1 %v143_v11  ;;  %207 = vmatpush.msra.mxu0 %v126_v17  ;;  %v113_v1 = vsel %vm88_vm3, %v69_v42, %v112_v52  ;;  %v75_v55 = vperm.slane %v505_v61, 2  ;;  %v97_v4 = vsel %vm84_vm1, %v59_v58, %v96_v3  ;;  %v79_v6 = vperm.slane %v507_v62, 2  ;;  %v302_v62 = vld [vmem:[#allocation2] ss:$0 sm:$0xff] }
  0x20   :  { %267 = vmatpush.msra.mxu3 %v174_v22  ;;  %248 = vmatpush.msra.mxu2 %v157_v28  ;;  %v114_v54 = vsel %vm90_vm4, %v73_v46, %v113_v1  ;;  %v98_v7 = vsel %vm86_vm2, %v63_v63, %v97_v4 }
  0x21   :  { %227 = vmatpush.msra.mxu1 %v142_v24  ;;  %208 = vmatpush.msra.mxu0 %v125_v30  ;;  %v115_v5 = vsel %vm92_vm5, %v77_v47, %v114_v54  ;;  %v99_v8 = vsel %vm88_vm3, %v67_v53, %v98_v7 }
  0x22   :  { %249 = vmatmul.f32.vlgmr.msra.gmra.mxu2 %v109_v44  ;;  %268 = vmatpush.msra.mxu3 %v173_v35  ;;  %v116_v59 = vsel %vm94_vm6, %v81_v0, %v115_v5  ;;  %v100_v60 = vsel %vm90_vm4, %v71_v2, %v99_v8 }
  0x23   :  { %228 = vmatpush.msra.mxu1 %v141_v43  ;;  %209 = vmatmul.f32.vlgmr.msra.gmra.mxu0 %v95_v56  ;;  %124 = vst [vmem:[%s629_s3 + $0x18] sm:$0xff] %v116_v59  ;;  %v101_v61 = vsel %vm92_vm5, %v75_v55, %v100_v60 }
  0x24   :  { %269 = vmatmul.f32.vlgmr.msra.gmra.mxu3 %v116_v59  ;;  %v102_v9 = vsel %vm94_vm6, %v79_v6, %v101_v61 }
  0x25   :  { %122 = vst [vmem:[%s629_s3 + $0x8] sm:$0xff] %v102_v9  ;;  %229 = vmatmul.f32.vlgmr.msra.gmra.mxu1 %v102_v9 }
  0xa0   :  { %v210_v10 = vpop.f32.mrf.mxu0 }
  0xa1   :  { %v211_v11 = vadd.f32 %v302_v62, %v210_v10 }
  0xa2   :  { %v230_v12 = vpop.f32.mrf.mxu1 }
  0xa3   :  { %v231_v14 = vadd.f32 %v230_v12, %v211_v11 }
  0xa5   :  { %v250_v13 = vpop.f32.mrf.mxu2 }
  0xa6   :  { %v251_v15 = vadd.f32 %v250_v13, %v231_v14 }
  0xa7   :  { %v270_v16 = vpop.f32.mrf.mxu3 }
  0xa8   :  { %v271_v17 = vadd.f32 %v270_v16, %v251_v15 }
  0xaa   :  { %274 = vst.msk [vmem:[%s630_s4] sm:$0xff] %vm273_vm7, %v271_v17 }

</bundles_post_ra>
